<compile_context>
chip_gen: v7x
topology: tpu7x:2x2x1
jax: 0.10.0
libtpu: 0.0.40
codegen_flags: <defaults>
</compile_context>

<pallas_src>
import functools

import jax
import jax.numpy as jnp
import numpy as np
from jax.experimental import pallas as pl
from jax.experimental.pallas import tpu as pltpu


def _round_up(x, m):
    return ((x + m - 1) // m) * m


# ----------------------------------------------------------------------------
# Kernel
# ----------------------------------------------------------------------------
def _nerf_kernel(
    x_ref,      # (TN, IN_PAD)          f32 (cast to compute dtype in-kernel)
    w0_ref,     # (IN_PAD, W)           compute dtype   block-1 first linear
    b0_ref,     # (1, W)                f32
    wt_ref,     # (max(D-1,1), W, W)    compute dtype   folded w_b[i] @ w_a[i]
    bt_ref,     # (max(D-1,1), 1, W)    f32             folded biases
    wh1_ref,    # (W, 2W)               compute dtype   folded w_b[D-1] @ [sig_w1 | sh_w1]
    bh1_ref,    # (1, 2W)               f32
    wh2_ref,    # (2W, OUT_W)           compute dtype   block-diag [sig_w2 ; sh_w2]
    bh2_ref,    # (1, OUT_W)            f32
    out_ref,    # (TN, OUT_W)           col 0 = sigma, cols 1..32 = sh
    *,
    depth: int,
):
    cd = w0_ref.dtype  # compute dtype (bf16 by default); accumulation is f32.

    def dense(h, w, b):
        return jnp.dot(h.astype(cd), w, preferred_element_type=jnp.float32) + b

    # Block 1 first linear + ReLU (its second linear is folded into the next
    # trunk step / the head matmul below).
    h = jnp.maximum(dense(x_ref[...], w0_ref[...], b0_ref[...]), 0.0)

    # Folded trunk: step j = (block j+1 second linear) ∘ (block j+2 first linear) + ReLU.
    for j in range(depth - 1):
        h = jnp.maximum(dense(h, wt_ref[j], bt_ref[j]), 0.0)

    # Folded (last block second linear) ∘ (both heads' first linear) + ReLU,
    # then both heads' second linears as one block-diagonal lane-dense matmul.
    t = jnp.maximum(dense(h, wh1_ref[...], bh1_ref[...]), 0.0)
    out = dense(t, wh2_ref[...], bh2_ref[...])
    out_ref[...] = out.astype(out_ref.dtype)


# ----------------------------------------------------------------------------
# Parameter folding / packing (all folding done in f32, cast once at the end)
# ----------------------------------------------------------------------------
def _fold_params(params, compute_dtype=jnp.bfloat16):
    """Fold activation-free adjacent linears and fuse/pad the heads.

    Returns (weights, dims):
      weights = (w0, b0, w_trunk, b_trunk, w_h1, b_h1, w_h2, b_h2)
      dims    = dict(D, W, in_dim, in_pad, sh_dim, out_w)
    """
    f32 = jnp.float32
    cd = compute_dtype

    D, _, W = params["w_b"].shape
    in_dim = params["w_a0"].shape[0]
    sh_dim = params["sh_w2"].shape[-1]
    in_pad = _round_up(in_dim, 8)          # sublane-aligned K for the first matmul
    out_w = _round_up(1 + sh_dim, 128)     # lane-dense packed output width

    # Block-1 first linear (input columns zero-padded to in_pad).
    w0 = jnp.zeros((in_pad, W), f32).at[:in_dim, :].set(params["w_a0"]).astype(cd)
    b0 = params["b_a0"].astype(f32)

    # Folded trunk: w_trunk[j] = w_b[j] @ w_a[j]; b_trunk[j] = b_b[j] @ w_a[j] + b_a[j].
    if D > 1:
        w_a = params["w_a"].astype(f32)            # (D-1, W, W)
        b_a = params["b_a"].astype(f32)            # (D-1, 1, W)
        w_bf = params["w_b"][: D - 1].astype(f32)  # (D-1, W, W)
        b_bf = params["b_b"][: D - 1].astype(f32)  # (D-1, 1, W)
        w_trunk = jnp.einsum("jik,jkl->jil", w_bf, w_a)
        b_trunk = jnp.einsum("jik,jkl->jil", b_bf, w_a) + b_a
    else:  # D == 1: dummy slot (never read by the kernel).
        w_trunk = jnp.zeros((1, W, W), f32)
        b_trunk = jnp.zeros((1, 1, W), f32)
    w_trunk = w_trunk.astype(cd)
    b_trunk = b_trunk.astype(f32)

    # Fused head first layers, folded with the last block's second linear.
    head_w1 = jnp.concatenate([params["sig_w1"], params["sh_w1"]], axis=1).astype(f32)  # (W, 2W)
    head_b1 = jnp.concatenate([params["sig_b1"], params["sh_b1"]], axis=1).astype(f32)  # (1, 2W)
    wbL = params["w_b"][D - 1].astype(f32)   # (W, W)
    bbL = params["b_b"][D - 1].astype(f32)   # (1, W)
    w_h1 = (wbL @ head_w1).astype(cd)                 # (W, 2W)
    b_h1 = (bbL @ head_w1 + head_b1).astype(f32)      # (1, 2W)

    # Fused head second layers: block-diagonal, lane-padded to out_w.
    w_h2 = jnp.zeros((2 * W, out_w), f32)
    w_h2 = w_h2.at[:W, 0:1].set(params["sig_w2"])
    w_h2 = w_h2.at[W:, 1:1 + sh_dim].set(params["sh_w2"])
    w_h2 = w_h2.astype(cd)
    b_h2 = jnp.zeros((1, out_w), f32)
    b_h2 = b_h2.at[:, 0:1].set(params["sig_b2"])
    b_h2 = b_h2.at[:, 1:1 + sh_dim].set(params["sh_b2"])

    weights = (w0, b0, w_trunk, b_trunk, w_h1, b_h1, w_h2, b_h2)
    dims = dict(D=int(D), W=int(W), in_dim=int(in_dim), in_pad=int(in_pad),
                sh_dim=int(sh_dim), out_w=int(out_w))
    return weights, dims


# ----------------------------------------------------------------------------
# Wrapper
# ----------------------------------------------------------------------------
def nerf_forward_pallas(xyz, params, *, tile_n=1024, compute_dtype=jnp.bfloat16,
                        packed_out_dtype=jnp.float32, single_buffer_weights=True):
    """Run the NeRF forward pass via a Pallas TPU kernel.

    xyz: (N, in_channels_xyz) float32.
    Returns (sigma (N, 1), sh (N, 32)) in packed_out_dtype (f32 by default,
    matching the torch module; pass bf16 to halve output HBM traffic if the
    consumer can accept it).
    """
    N, in_dim = xyz.shape
    weights, dims = _fold_params(params, compute_dtype)
    D, W = dims["D"], dims["W"]
    in_pad, out_w, sh_dim = dims["in_pad"], dims["out_w"], dims["sh_dim"]
    assert in_dim == dims["in_dim"]

    out_itemsize = int(np.dtype(packed_out_dtype).itemsize)
    weight_bytes = sum(int(np.prod(a.shape)) * a.dtype.itemsize for a in weights)

    # ---- per-generation VMEM budget (v5e/v6e: 128 MiB, v7x: 64 MiB per TC) ----
    try:
        vmem_cap = int(pltpu.get_tpu_info().vmem_capacity_bytes)
    except Exception:
        vmem_cap = 64 * 1024 * 1024          # conservative fallback (v7x per-TC)
    vmem_budget = int(0.75 * vmem_cap)

    # ---- tile_n selection: large M (the only free MXU dim at small W), capped
    #      by the VMEM budget, then shaped so the grid is >= 2 and even. ----
    tile_n = max(8, _round_up(int(tile_n), 8))
    w_bufs = 1 if single_buffer_weights else 2

    def est_vmem(tn):
        x_tile = tn * in_pad * xyz.dtype.itemsize      # double buffered
        out_tile = tn * out_w * out_itemsize           # double buffered
        act = tn * (3 * W + out_w) * 4                 # f32 h/t/out intermediates
        return w_bufs * weight_bytes + 2 * (x_tile + out_tile) + act

    while tile_n > 8 and est_vmem(tile_n) > vmem_budget:
        tile_n = max(8, ((tile_n // 2) // 8) * 8)

    if pl.cdiv(N, tile_n) < 2:                   # keep >= 2 grid steps
        tile_n = max(8, _round_up(pl.cdiv(N, 2), 8))
    steps = pl.cdiv(N, tile_n)
    steps += steps % 2                           # even grid -> v7x TCs balanced
    n_rows = steps * tile_n

    # Input stays f32 (cast to bf16 inside the kernel); a single cheap pad to
    # the aligned shape — no materialized bf16 copy of x in HBM.
    x_in = jnp.pad(xyz, ((0, n_rows - N), (0, in_pad - in_dim)))

    # ---- cost estimate (folded trunk: D + 2 matmuls total) ----
    flops = 2 * n_rows * (in_pad * W + (D - 1) * W * W + W * (2 * W) + (2 * W) * out_w)
    bytes_accessed = (n_rows * in_pad * xyz.dtype.itemsize + weight_bytes
                      + n_rows * out_w * out_itemsize)

    def make_in_specs(weight_buffers):
        def weight_spec(a):
            nd = a.ndim
            idx = lambda i, _nd=nd: (0,) * _nd   # constant index map -> VMEM resident
            if weight_buffers == 1:
                # Weights are fetched once; a single buffer halves their VMEM cost.
                return pl.BlockSpec(a.shape, idx, pipeline_mode=pl.Buffered(1))
            return pl.BlockSpec(a.shape, idx)
        return ([pl.BlockSpec((tile_n, in_pad), lambda i: (i, 0))]
                + [weight_spec(a) for a in weights])

    def call(in_specs):
        return pl.pallas_call(
            functools.partial(_nerf_kernel, depth=D),
            out_shape=jax.ShapeDtypeStruct((n_rows, out_w), packed_out_dtype),
            grid_spec=pltpu.PrefetchScalarGridSpec(
                num_scalar_prefetch=0,
                grid=(steps,),
                in_specs=in_specs,
                out_specs=pl.BlockSpec((tile_n, out_w), lambda i: (i, 0)),
            ),
            compiler_params=pltpu.CompilerParams(
                dimension_semantics=("parallel",),
                vmem_limit_bytes=vmem_budget,
            ),
            cost_estimate=pl.CostEstimate(
                flops=int(flops), transcendentals=0, bytes_accessed=int(bytes_accessed)),
        )(x_in, *weights)

    if single_buffer_weights:
        try:
            packed = call(make_in_specs(1))
        except Exception:
            # pipeline_mode=pl.Buffered(1) not supported on this jax version:
            # fall back to default double-buffered resident weights (correctness
            # identical; only VMEM headroom differs).
            packed = call(make_in_specs(2))
    else:
        packed = call(make_in_specs(2))

    sigma = packed[:N, 0:1]
    sh = packed[:N, 1:1 + sh_dim]
    return sigma, sh


# ----------------------------------------------------------------------------
# Parameters & references
# ----------------------------------------------------------------------------
def init_nerf_params(key, D, W, in_channels_xyz):
    """Deterministic synthetic parameter init (shapes match the torch module), f32."""
    ks = jax.random.split(key, 24)

    def init_w(k, shape):
        fan_in = shape[-2] if len(shape) > 2 else shape[0]
        return (jax.random.normal(k, shape, jnp.float32) / jnp.sqrt(fan_in)).astype(jnp.float32)

    params = {
        "w_a0": init_w(ks[0], (in_channels_xyz, W)),
        "b_a0": 0.01 * jax.random.normal(ks[1], (1, W), jnp.float32),
        "w_a": init_w(ks[2], (D - 1, W, W)) if D > 1 else jnp.zeros((0, W, W), jnp.float32),
        "b_a": 0.01 * jax.random.normal(ks[3], (max(D - 1, 0), 1, W), jnp.float32),
        "w_b": init_w(ks[4], (D, W, W)),
        "b_b": 0.01 * jax.random.normal(ks[5], (D, 1, W), jnp.float32),
        "sig_w1": init_w(ks[6], (W, W)),
        "sig_b1": 0.01 * jax.random.normal(ks[7], (1, W), jnp.float32),
        "sig_w2": init_w(ks[8], (W, 1)),
        "sig_b2": 0.01 * jax.random.normal(ks[9], (1, 1), jnp.float32),
        "sh_w1": init_w(ks[10], (W, W)),
        "sh_b1": 0.01 * jax.random.normal(ks[11], (1, W), jnp.float32),
        "sh_w2": init_w(ks[12], (W, 32)),
        "sh_b2": 0.01 * jax.random.normal(ks[13], (1, 32), jnp.float32),
    }
    return params


def nerf_forward_ref(xyz, params, D):
    """Pure-JAX f32 reference matching the torch forward semantics exactly."""
    hp = jax.lax.Precision.HIGHEST

    def dense(h, w, b):
        return jnp.dot(h, w, precision=hp) + b

    h = xyz
    h = jnp.maximum(dense(h, params["w_a0"], params["b_a0"]), 0.0)
    h = dense(h, params["w_b"][0], params["b_b"][0])
    for i in range(1, D):
        h = jnp.maximum(dense(h, params["w_a"][i - 1], params["b_a"][i - 1]), 0.0)
        h = dense(h, params["w_b"][i], params["b_b"][i])
    t = jnp.maximum(dense(h, params["sig_w1"], params["sig_b1"]), 0.0)
    sigma = dense(t, params["sig_w2"], params["sig_b2"])
    t = jnp.maximum(dense(h, params["sh_w1"], params["sh_b1"]), 0.0)
    sh = dense(t, params["sh_w2"], params["sh_b2"])
    return sigma, sh


def nerf_forward_folded_ref(xyz, weights, dims):
    """Pure-JAX reference using the SAME folded/packed weights and the same
    bf16-operand / f32-accumulate math as the Pallas kernel (tight check)."""
    w0, b0, w_t, b_t, w_h1, b_h1, w_h2, b_h2 = weights
    cd = w0.dtype

    def dense(h, w, b):
        return jnp.dot(h.astype(cd), w, preferred_element_type=jnp.float32) + b

    x = jnp.pad(xyz, ((0, 0), (0, dims["in_pad"] - dims["in_dim"])))
    h = jnp.maximum(dense(x, w0, b0), 0.0)
    for j in range(dims["D"] - 1):
        h = jnp.maximum(dense(h, w_t[j], b_t[j]), 0.0)
    t = jnp.maximum(dense(h, w_h1, b_h1), 0.0)
    out = dense(t, w_h2, b_h2)
    return out[:, 0:1], out[:, 1:1 + dims["sh_dim"]]


if __name__ == "__main__":
    # Small shapes consistent with the module: keep D=8 blocks and the
    # in_channels_xyz=63 input width, shrink the hidden width to 64.
    D = 8
    W = 64
    IN_XYZ = 63
    N = 1024   # tile_n auto-shrinks 1024 -> 512 so the grid is 2 even "parallel" steps

    key = jax.random.PRNGKey(0)
    k_x, k_p = jax.random.split(key)

    xyz = jax.random.normal(k_x, (N, IN_XYZ), jnp.float32)
    params = init_nerf_params(k_p, D, W, IN_XYZ)

    sigma, sh = nerf_forward_pallas(xyz, params, compute_dtype=jnp.bfloat16)
    sigma = jax.block_until_ready(sigma)
    sh = jax.block_until_ready(sh)
    assert sigma.shape == (N, 1) and sh.shape == (N, 32)
    assert sigma.dtype == jnp.float32 and sh.dtype == jnp.float32

    # Tight check vs a reference with the exact folded-bf16 / f32-accumulate math.
    folded_weights, folded_dims = _fold_params(params, jnp.bfloat16)
    sig_bf, sh_bf = nerf_forward_folded_ref(xyz, folded_weights, folded_dims)
    assert jnp.allclose(sigma, sig_bf, atol=2e-3, rtol=2e-3)
    assert jnp.allclose(sh, sh_bf, atol=2e-3, rtol=2e-3)

    # Loose check vs the plain f32 (torch-semantics) reference: the folding is
    # exact in f32, the remaining error is bf16 operand rounding.
    sig_f32, sh_f32 = nerf_forward_ref(xyz, params, D)
    assert jnp.allclose(sigma, sig_f32, atol=2e-1, rtol=2e-1)
    assert jnp.allclose(sh, sh_f32, atol=2e-1, rtol=2e-1)

    print("KERNEL_OK")
</pallas_src>

<mosaic_0001>
module attributes {stable_mosaic.version = 11 : i64} {
  func.func @_nerf_kernel(%arg0: i32, %arg1: memref<512x64xf32, #tpu.memory_space<vmem>>, %arg2: memref<64x64xbf16, #tpu.memory_space<vmem>>, %arg3: memref<1x64xf32, #tpu.memory_space<vmem>>, %arg4: memref<7x64x64xbf16, #tpu.memory_space<vmem>>, %arg5: memref<7x1x64xf32, #tpu.memory_space<vmem>>, %arg6: memref<64x128xbf16, #tpu.memory_space<vmem>>, %arg7: memref<1x128xf32, #tpu.memory_space<vmem>>, %arg8: memref<128x128xbf16, #tpu.memory_space<vmem>>, %arg9: memref<1x128xf32, #tpu.memory_space<vmem>>, %arg10: memref<512x128xf32, #tpu.memory_space<vmem>>) attributes {dimension_semantics = [#tpu.dimension_semantics<parallel>], iteration_bounds = array<i64: 2>, scalar_prefetch = 0 : i64, scratch_operands = 0 : i64, tpu.core_type = #tpu.core_type<tc>, window_params = [{transform_indices = @transform_0, window_bounds = array<i64: 512, 64>}, {pipeline_mode = #tpu.pipeline_mode<synchronous>, transform_indices = @transform_1, window_bounds = array<i64: 64, 64>}, {pipeline_mode = #tpu.pipeline_mode<synchronous>, transform_indices = @transform_2, window_bounds = array<i64: 1, 64>}, {pipeline_mode = #tpu.pipeline_mode<synchronous>, transform_indices = @transform_3, window_bounds = array<i64: 7, 64, 64>}, {pipeline_mode = #tpu.pipeline_mode<synchronous>, transform_indices = @transform_4, window_bounds = array<i64: 7, 1, 64>}, {pipeline_mode = #tpu.pipeline_mode<synchronous>, transform_indices = @transform_5, window_bounds = array<i64: 64, 128>}, {pipeline_mode = #tpu.pipeline_mode<synchronous>, transform_indices = @transform_6, window_bounds = array<i64: 1, 128>}, {pipeline_mode = #tpu.pipeline_mode<synchronous>, transform_indices = @transform_7, window_bounds = array<i64: 128, 128>}, {pipeline_mode = #tpu.pipeline_mode<synchronous>, transform_indices = @transform_8, window_bounds = array<i64: 1, 128>}, {transform_indices = @transform_9, window_bounds = array<i64: 512, 128>}]} {
    %c0 = arith.constant 0 : index
    %c0_0 = arith.constant 0 : index
    %0 = vector.load %arg1[%c0, %c0_0] : memref<512x64xf32, #tpu.memory_space<vmem>>, vector<512x64xf32>
    %c0_1 = arith.constant 0 : index
    %c0_2 = arith.constant 0 : index
    %1 = vector.load %arg2[%c0_1, %c0_2] : memref<64x64xbf16, #tpu.memory_space<vmem>>, vector<64x64xbf16>
    %c0_3 = arith.constant 0 : index
    %c0_4 = arith.constant 0 : index
    %2 = vector.load %arg3[%c0_3, %c0_4] : memref<1x64xf32, #tpu.memory_space<vmem>>, vector<1x64xf32>
    %3 = arith.truncf %0 : vector<512x64xf32> to vector<512x64xbf16>
    %cst = arith.constant dense<0.000000e+00> : vector<512x64xf32>
    %4 = tpu.matmul %3, %1, %cst {dimension_numbers = #tpu.dot_dimension_numbers<[1], [0], [0], [1], [0, 0, 1, 1], [], []>} : vector<512x64xbf16>, vector<64x64xbf16>, vector<512x64xf32> -> vector<512x64xf32>
    %5 = vector.broadcast %2 : vector<1x64xf32> to vector<512x64xf32>
    %6 = arith.addf %4, %5 : vector<512x64xf32>
    %cst_5 = arith.constant 0.000000e+00 : f32
    %7 = vector.broadcast %cst_5 : f32 to vector<512x64xf32>
    %8 = arith.maximumf %6, %7 : vector<512x64xf32>
    %c0_6 = arith.constant 0 : index
    %c0_7 = arith.constant 0 : index
    %c0_8 = arith.constant 0 : index
    %9 = vector.load %arg4[%c0_6, %c0_7, %c0_8] : memref<7x64x64xbf16, #tpu.memory_space<vmem>>, vector<1x64x64xbf16>
    %10 = vector.shape_cast %9 : vector<1x64x64xbf16> to vector<64x64xbf16>
    %c0_9 = arith.constant 0 : index
    %c0_10 = arith.constant 0 : index
    %c0_11 = arith.constant 0 : index
    %11 = vector.load %arg5[%c0_9, %c0_10, %c0_11] : memref<7x1x64xf32, #tpu.memory_space<vmem>>, vector<1x1x64xf32>
    %12 = vector.shape_cast %11 : vector<1x1x64xf32> to vector<1x64xf32>
    %13 = arith.truncf %8 : vector<512x64xf32> to vector<512x64xbf16>
    %cst_12 = arith.constant dense<0.000000e+00> : vector<512x64xf32>
    %14 = tpu.matmul %13, %10, %cst_12 {dimension_numbers = #tpu.dot_dimension_numbers<[1], [0], [0], [1], [0, 0, 1, 1], [], []>} : vector<512x64xbf16>, vector<64x64xbf16>, vector<512x64xf32> -> vector<512x64xf32>
    %15 = vector.broadcast %12 : vector<1x64xf32> to vector<512x64xf32>
    %16 = arith.addf %14, %15 : vector<512x64xf32>
    %cst_13 = arith.constant 0.000000e+00 : f32
    %17 = vector.broadcast %cst_13 : f32 to vector<512x64xf32>
    %18 = arith.maximumf %16, %17 : vector<512x64xf32>
    %c1 = arith.constant 1 : index
    %c0_14 = arith.constant 0 : index
    %c0_15 = arith.constant 0 : index
    %19 = vector.load %arg4[%c1, %c0_14, %c0_15] : memref<7x64x64xbf16, #tpu.memory_space<vmem>>, vector<1x64x64xbf16>
    %20 = vector.shape_cast %19 : vector<1x64x64xbf16> to vector<64x64xbf16>
    %c1_16 = arith.constant 1 : index
    %c0_17 = arith.constant 0 : index
    %c0_18 = arith.constant 0 : index
    %21 = vector.load %arg5[%c1_16, %c0_17, %c0_18] : memref<7x1x64xf32, #tpu.memory_space<vmem>>, vector<1x1x64xf32>
    %22 = vector.shape_cast %21 : vector<1x1x64xf32> to vector<1x64xf32>
    %23 = arith.truncf %18 : vector<512x64xf32> to vector<512x64xbf16>
    %cst_19 = arith.constant dense<0.000000e+00> : vector<512x64xf32>
    %24 = tpu.matmul %23, %20, %cst_19 {dimension_numbers = #tpu.dot_dimension_numbers<[1], [0], [0], [1], [0, 0, 1, 1], [], []>} : vector<512x64xbf16>, vector<64x64xbf16>, vector<512x64xf32> -> vector<512x64xf32>
    %25 = vector.broadcast %22 : vector<1x64xf32> to vector<512x64xf32>
    %26 = arith.addf %24, %25 : vector<512x64xf32>
    %cst_20 = arith.constant 0.000000e+00 : f32
    %27 = vector.broadcast %cst_20 : f32 to vector<512x64xf32>
    %28 = arith.maximumf %26, %27 : vector<512x64xf32>
    %c2 = arith.constant 2 : index
    %c0_21 = arith.constant 0 : index
    %c0_22 = arith.constant 0 : index
    %29 = vector.load %arg4[%c2, %c0_21, %c0_22] : memref<7x64x64xbf16, #tpu.memory_space<vmem>>, vector<1x64x64xbf16>
    %30 = vector.shape_cast %29 : vector<1x64x64xbf16> to vector<64x64xbf16>
    %c2_23 = arith.constant 2 : index
    %c0_24 = arith.constant 0 : index
    %c0_25 = arith.constant 0 : index
    %31 = vector.load %arg5[%c2_23, %c0_24, %c0_25] : memref<7x1x64xf32, #tpu.memory_space<vmem>>, vector<1x1x64xf32>
    %32 = vector.shape_cast %31 : vector<1x1x64xf32> to vector<1x64xf32>
    %33 = arith.truncf %28 : vector<512x64xf32> to vector<512x64xbf16>
    %cst_26 = arith.constant dense<0.000000e+00> : vector<512x64xf32>
    %34 = tpu.matmul %33, %30, %cst_26 {dimension_numbers = #tpu.dot_dimension_numbers<[1], [0], [0], [1], [0, 0, 1, 1], [], []>} : vector<512x64xbf16>, vector<64x64xbf16>, vector<512x64xf32> -> vector<512x64xf32>
    %35 = vector.broadcast %32 : vector<1x64xf32> to vector<512x64xf32>
    %36 = arith.addf %34, %35 : vector<512x64xf32>
    %cst_27 = arith.constant 0.000000e+00 : f32
    %37 = vector.broadcast %cst_27 : f32 to vector<512x64xf32>
    %38 = arith.maximumf %36, %37 : vector<512x64xf32>
    %c3 = arith.constant 3 : index
    %c0_28 = arith.constant 0 : index
    %c0_29 = arith.constant 0 : index
    %39 = vector.load %arg4[%c3, %c0_28, %c0_29] : memref<7x64x64xbf16, #tpu.memory_space<vmem>>, vector<1x64x64xbf16>
    %40 = vector.shape_cast %39 : vector<1x64x64xbf16> to vector<64x64xbf16>
    %c3_30 = arith.constant 3 : index
    %c0_31 = arith.constant 0 : index
    %c0_32 = arith.constant 0 : index
    %41 = vector.load %arg5[%c3_30, %c0_31, %c0_32] : memref<7x1x64xf32, #tpu.memory_space<vmem>>, vector<1x1x64xf32>
    %42 = vector.shape_cast %41 : vector<1x1x64xf32> to vector<1x64xf32>
    %43 = arith.truncf %38 : vector<512x64xf32> to vector<512x64xbf16>
    %cst_33 = arith.constant dense<0.000000e+00> : vector<512x64xf32>
    %44 = tpu.matmul %43, %40, %cst_33 {dimension_numbers = #tpu.dot_dimension_numbers<[1], [0], [0], [1], [0, 0, 1, 1], [], []>} : vector<512x64xbf16>, vector<64x64xbf16>, vector<512x64xf32> -> vector<512x64xf32>
    %45 = vector.broadcast %42 : vector<1x64xf32> to vector<512x64xf32>
    %46 = arith.addf %44, %45 : vector<512x64xf32>
    %cst_34 = arith.constant 0.000000e+00 : f32
    %47 = vector.broadcast %cst_34 : f32 to vector<512x64xf32>
    %48 = arith.maximumf %46, %47 : vector<512x64xf32>
    %c4 = arith.constant 4 : index
    %c0_35 = arith.constant 0 : index
    %c0_36 = arith.constant 0 : index
    %49 = vector.load %arg4[%c4, %c0_35, %c0_36] : memref<7x64x64xbf16, #tpu.memory_space<vmem>>, vector<1x64x64xbf16>
    %50 = vector.shape_cast %49 : vector<1x64x64xbf16> to vector<64x64xbf16>
    %c4_37 = arith.constant 4 : index
    %c0_38 = arith.constant 0 : index
    %c0_39 = arith.constant 0 : index
    %51 = vector.load %arg5[%c4_37, %c0_38, %c0_39] : memref<7x1x64xf32, #tpu.memory_space<vmem>>, vector<1x1x64xf32>
    %52 = vector.shape_cast %51 : vector<1x1x64xf32> to vector<1x64xf32>
    %53 = arith.truncf %48 : vector<512x64xf32> to vector<512x64xbf16>
    %cst_40 = arith.constant dense<0.000000e+00> : vector<512x64xf32>
    %54 = tpu.matmul %53, %50, %cst_40 {dimension_numbers = #tpu.dot_dimension_numbers<[1], [0], [0], [1], [0, 0, 1, 1], [], []>} : vector<512x64xbf16>, vector<64x64xbf16>, vector<512x64xf32> -> vector<512x64xf32>
    %55 = vector.broadcast %52 : vector<1x64xf32> to vector<512x64xf32>
    %56 = arith.addf %54, %55 : vector<512x64xf32>
    %cst_41 = arith.constant 0.000000e+00 : f32
    %57 = vector.broadcast %cst_41 : f32 to vector<512x64xf32>
    %58 = arith.maximumf %56, %57 : vector<512x64xf32>
    %c5 = arith.constant 5 : index
    %c0_42 = arith.constant 0 : index
    %c0_43 = arith.constant 0 : index
    %59 = vector.load %arg4[%c5, %c0_42, %c0_43] : memref<7x64x64xbf16, #tpu.memory_space<vmem>>, vector<1x64x64xbf16>
    %60 = vector.shape_cast %59 : vector<1x64x64xbf16> to vector<64x64xbf16>
    %c5_44 = arith.constant 5 : index
    %c0_45 = arith.constant 0 : index
    %c0_46 = arith.constant 0 : index
    %61 = vector.load %arg5[%c5_44, %c0_45, %c0_46] : memref<7x1x64xf32, #tpu.memory_space<vmem>>, vector<1x1x64xf32>
    %62 = vector.shape_cast %61 : vector<1x1x64xf32> to vector<1x64xf32>
    %63 = arith.truncf %58 : vector<512x64xf32> to vector<512x64xbf16>
    %cst_47 = arith.constant dense<0.000000e+00> : vector<512x64xf32>
    %64 = tpu.matmul %63, %60, %cst_47 {dimension_numbers = #tpu.dot_dimension_numbers<[1], [0], [0], [1], [0, 0, 1, 1], [], []>} : vector<512x64xbf16>, vector<64x64xbf16>, vector<512x64xf32> -> vector<512x64xf32>
    %65 = vector.broadcast %62 : vector<1x64xf32> to vector<512x64xf32>
    %66 = arith.addf %64, %65 : vector<512x64xf32>
    %cst_48 = arith.constant 0.000000e+00 : f32
    %67 = vector.broadcast %cst_48 : f32 to vector<512x64xf32>
    %68 = arith.maximumf %66, %67 : vector<512x64xf32>
    %c6 = arith.constant 6 : index
    %c0_49 = arith.constant 0 : index
    %c0_50 = arith.constant 0 : index
    %69 = vector.load %arg4[%c6, %c0_49, %c0_50] : memref<7x64x64xbf16, #tpu.memory_space<vmem>>, vector<1x64x64xbf16>
    %70 = vector.shape_cast %69 : vector<1x64x64xbf16> to vector<64x64xbf16>
    %c6_51 = arith.constant 6 : index
    %c0_52 = arith.constant 0 : index
    %c0_53 = arith.constant 0 : index
    %71 = vector.load %arg5[%c6_51, %c0_52, %c0_53] : memref<7x1x64xf32, #tpu.memory_space<vmem>>, vector<1x1x64xf32>
    %72 = vector.shape_cast %71 : vector<1x1x64xf32> to vector<1x64xf32>
    %73 = arith.truncf %68 : vector<512x64xf32> to vector<512x64xbf16>
    %cst_54 = arith.constant dense<0.000000e+00> : vector<512x64xf32>
    %74 = tpu.matmul %73, %70, %cst_54 {dimension_numbers = #tpu.dot_dimension_numbers<[1], [0], [0], [1], [0, 0, 1, 1], [], []>} : vector<512x64xbf16>, vector<64x64xbf16>, vector<512x64xf32> -> vector<512x64xf32>
    %75 = vector.broadcast %72 : vector<1x64xf32> to vector<512x64xf32>
    %76 = arith.addf %74, %75 : vector<512x64xf32>
    %cst_55 = arith.constant 0.000000e+00 : f32
    %77 = vector.broadcast %cst_55 : f32 to vector<512x64xf32>
    %78 = arith.maximumf %76, %77 : vector<512x64xf32>
    %c0_56 = arith.constant 0 : index
    %c0_57 = arith.constant 0 : index
    %79 = vector.load %arg6[%c0_56, %c0_57] : memref<64x128xbf16, #tpu.memory_space<vmem>>, vector<64x128xbf16>
    %c0_58 = arith.constant 0 : index
    %c0_59 = arith.constant 0 : index
    %80 = vector.load %arg7[%c0_58, %c0_59] : memref<1x128xf32, #tpu.memory_space<vmem>>, vector<1x128xf32>
    %81 = arith.truncf %78 : vector<512x64xf32> to vector<512x64xbf16>
    %cst_60 = arith.constant dense<0.000000e+00> : vector<512x128xf32>
    %82 = tpu.matmul %81, %79, %cst_60 {dimension_numbers = #tpu.dot_dimension_numbers<[1], [0], [0], [1], [0, 0, 1, 1], [], []>} : vector<512x64xbf16>, vector<64x128xbf16>, vector<512x128xf32> -> vector<512x128xf32>
    %83 = vector.broadcast %80 : vector<1x128xf32> to vector<512x128xf32>
    %84 = arith.addf %82, %83 : vector<512x128xf32>
    %cst_61 = arith.constant 0.000000e+00 : f32
    %85 = vector.broadcast %cst_61 : f32 to vector<512x128xf32>
    %86 = arith.maximumf %84, %85 : vector<512x128xf32>
    %c0_62 = arith.constant 0 : index
    %c0_63 = arith.constant 0 : index
    %87 = vector.load %arg8[%c0_62, %c0_63] : memref<128x128xbf16, #tpu.memory_space<vmem>>, vector<128x128xbf16>
    %c0_64 = arith.constant 0 : index
    %c0_65 = arith.constant 0 : index
    %88 = vector.load %arg9[%c0_64, %c0_65] : memref<1x128xf32, #tpu.memory_space<vmem>>, vector<1x128xf32>
    %89 = arith.truncf %86 : vector<512x128xf32> to vector<512x128xbf16>
    %cst_66 = arith.constant dense<0.000000e+00> : vector<512x128xf32>
    %90 = tpu.matmul %89, %87, %cst_66 {dimension_numbers = #tpu.dot_dimension_numbers<[1], [0], [0], [1], [0, 0, 1, 1], [], []>} : vector<512x128xbf16>, vector<128x128xbf16>, vector<512x128xf32> -> vector<512x128xf32>
    %91 = vector.broadcast %88 : vector<1x128xf32> to vector<512x128xf32>
    %92 = arith.addf %90, %91 : vector<512x128xf32>
    %c0_67 = arith.constant 0 : index
    %c0_68 = arith.constant 0 : index
    %93 = vector.load %arg10[%c0_67, %c0_68] : memref<512x128xf32, #tpu.memory_space<vmem>>, vector<512x128xf32>
    tpu.vector_store %arg10[%c0_67, %c0_68], %92 {strides = array<i32>} : memref<512x128xf32, #tpu.memory_space<vmem>>, vector<512x128xf32>,
    return
  }
  func.func @transform_0(%arg0: i32) -> (i32, i32) {
    %c0_i32 = arith.constant 0 : i32
    %c0_i32_0 = arith.constant 0 : i32
    return %arg0, %c0_i32 : i32, i32
  }
  func.func @transform_1(%arg0: i32) -> (i32, i32) {
    %c0_i32 = arith.constant 0 : i32
    %c0_i32_0 = arith.constant 0 : i32
    %c0_i32_1 = arith.constant 0 : i32
    return %c0_i32, %c0_i32_0 : i32, i32
  }
  func.func @transform_2(%arg0: i32) -> (i32, i32) {
    %c0_i32 = arith.constant 0 : i32
    %c0_i32_0 = arith.constant 0 : i32
    %c0_i32_1 = arith.constant 0 : i32
    return %c0_i32, %c0_i32_0 : i32, i32
  }
  func.func @transform_3(%arg0: i32) -> (i32, i32, i32) {
    %c0_i32 = arith.constant 0 : i32
    %c0_i32_0 = arith.constant 0 : i32
    %c0_i32_1 = arith.constant 0 : i32
    %c0_i32_2 = arith.constant 0 : i32
    return %c0_i32, %c0_i32_0, %c0_i32_1 : i32, i32, i32
  }
  func.func @transform_4(%arg0: i32) -> (i32, i32, i32) {
    %c0_i32 = arith.constant 0 : i32
    %c0_i32_0 = arith.constant 0 : i32
    %c0_i32_1 = arith.constant 0 : i32
    %c0_i32_2 = arith.constant 0 : i32
    return %c0_i32, %c0_i32_0, %c0_i32_1 : i32, i32, i32
  }
  func.func @transform_5(%arg0: i32) -> (i32, i32) {
    %c0_i32 = arith.constant 0 : i32
    %c0_i32_0 = arith.constant 0 : i32
    %c0_i32_1 = arith.constant 0 : i32
    return %c0_i32, %c0_i32_0 : i32, i32
  }
  func.func @transform_6(%arg0: i32) -> (i32, i32) {
    %c0_i32 = arith.constant 0 : i32
    %c0_i32_0 = arith.constant 0 : i32
    %c0_i32_1 = arith.constant 0 : i32
    return %c0_i32, %c0_i32_0 : i32, i32
  }
  func.func @transform_7(%arg0: i32) -> (i32, i32) {
    %c0_i32 = arith.constant 0 : i32
    %c0_i32_0 = arith.constant 0 : i32
    %c0_i32_1 = arith.constant 0 : i32
    return %c0_i32, %c0_i32_0 : i32, i32
  }
  func.func @transform_8(%arg0: i32) -> (i32, i32) {
    %c0_i32 = arith.constant 0 : i32
    %c0_i32_0 = arith.constant 0 : i32
    %c0_i32_1 = arith.constant 0 : i32
    return %c0_i32, %c0_i32_0 : i32, i32
  }
  func.func @transform_9(%arg0: i32) -> (i32, i32) {
    %c0_i32 = arith.constant 0 : i32
    %c0_i32_0 = arith.constant 0 : i32
    return %arg0, %c0_i32 : i32, i32
  }
}

module attributes {stable_mosaic.version = 11 : i64} {
  func.func @_nerf_kernel(%arg0: i32, %arg1: memref<512x64xf32, #tpu.memory_space<vmem>>, %arg2: memref<64x64xbf16, #tpu.memory_space<vmem>>, %arg3: memref<1x64xf32, #tpu.memory_space<vmem>>, %arg4: memref<7x64x64xbf16, #tpu.memory_space<vmem>>, %arg5: memref<7x1x64xf32, #tpu.memory_space<vmem>>, %arg6: memref<64x128xbf16, #tpu.memory_space<vmem>>, %arg7: memref<1x128xf32, #tpu.memory_space<vmem>>, %arg8: memref<128x128xbf16, #tpu.memory_space<vmem>>, %arg9: memref<1x128xf32, #tpu.memory_space<vmem>>, %arg10: memref<512x128xf32, #tpu.memory_space<vmem>>) attributes {dimension_semantics = [#tpu.dimension_semantics<parallel>], iteration_bounds = array<i64: 2>, scalar_prefetch = 0 : i64, scratch_operands = 0 : i64, tpu.core_type = #tpu.core_type<tc>, window_params = [{transform_indices = @transform_0, window_bounds = array<i64: 512, 64>}, {pipeline_mode = #tpu.pipeline_mode<synchronous>, transform_indices = @transform_1, window_bounds = array<i64: 64, 64>}, {pipeline_mode = #tpu.pipeline_mode<synchronous>, transform_indices = @transform_2, window_bounds = array<i64: 1, 64>}, {pipeline_mode = #tpu.pipeline_mode<synchronous>, transform_indices = @transform_3, window_bounds = array<i64: 7, 64, 64>}, {pipeline_mode = #tpu.pipeline_mode<synchronous>, transform_indices = @transform_4, window_bounds = array<i64: 7, 1, 64>}, {pipeline_mode = #tpu.pipeline_mode<synchronous>, transform_indices = @transform_5, window_bounds = array<i64: 64, 128>}, {pipeline_mode = #tpu.pipeline_mode<synchronous>, transform_indices = @transform_6, window_bounds = array<i64: 1, 128>}, {pipeline_mode = #tpu.pipeline_mode<synchronous>, transform_indices = @transform_7, window_bounds = array<i64: 128, 128>}, {pipeline_mode = #tpu.pipeline_mode<synchronous>, transform_indices = @transform_8, window_bounds = array<i64: 1, 128>}, {transform_indices = @transform_9, window_bounds = array<i64: 512, 128>}]} {
    %c0 = arith.constant 0 : index
    %c0_0 = arith.constant 0 : index
    %0 = vector.load %arg1[%c0, %c0_0] : memref<512x64xf32, #tpu.memory_space<vmem>>, vector<512x64xf32>
    %c0_1 = arith.constant 0 : index
    %c0_2 = arith.constant 0 : index
    %1 = vector.load %arg2[%c0_1, %c0_2] : memref<64x64xbf16, #tpu.memory_space<vmem>>, vector<64x64xbf16>
    %c0_3 = arith.constant 0 : index
    %c0_4 = arith.constant 0 : index
    %2 = vector.load %arg3[%c0_3, %c0_4] : memref<1x64xf32, #tpu.memory_space<vmem>>, vector<1x64xf32>
    %3 = arith.truncf %0 : vector<512x64xf32> to vector<512x64xbf16>
    %cst = arith.constant dense<0.000000e+00> : vector<512x64xf32>
    %4 = tpu.matmul %3, %1, %cst {dimension_numbers = #tpu.dot_dimension_numbers<[1], [0], [0], [1], [0, 0, 1, 1], [], []>} : vector<512x64xbf16>, vector<64x64xbf16>, vector<512x64xf32> -> vector<512x64xf32>
    %5 = vector.broadcast %2 : vector<1x64xf32> to vector<512x64xf32>
    %6 = arith.addf %4, %5 : vector<512x64xf32>
    %cst_5 = arith.constant 0.000000e+00 : f32
    %7 = vector.broadcast %cst_5 : f32 to vector<512x64xf32>
    %8 = arith.maximumf %6, %7 : vector<512x64xf32>
    %c0_6 = arith.constant 0 : index
    %c0_7 = arith.constant 0 : index
    %c0_8 = arith.constant 0 : index
    %9 = vector.load %arg4[%c0_6, %c0_7, %c0_8] : memref<7x64x64xbf16, #tpu.memory_space<vmem>>, vector<1x64x64xbf16>
    %10 = vector.shape_cast %9 : vector<1x64x64xbf16> to vector<64x64xbf16>
    %c0_9 = arith.constant 0 : index
    %c0_10 = arith.constant 0 : index
    %c0_11 = arith.constant 0 : index
    %11 = vector.load %arg5[%c0_9, %c0_10, %c0_11] : memref<7x1x64xf32, #tpu.memory_space<vmem>>, vector<1x1x64xf32>
    %12 = vector.shape_cast %11 : vector<1x1x64xf32> to vector<1x64xf32>
    %13 = arith.truncf %8 : vector<512x64xf32> to vector<512x64xbf16>
    %cst_12 = arith.constant dense<0.000000e+00> : vector<512x64xf32>
    %14 = tpu.matmul %13, %10, %cst_12 {dimension_numbers = #tpu.dot_dimension_numbers<[1], [0], [0], [1], [0, 0, 1, 1], [], []>} : vector<512x64xbf16>, vector<64x64xbf16>, vector<512x64xf32> -> vector<512x64xf32>
    %15 = vector.broadcast %12 : vector<1x64xf32> to vector<512x64xf32>
    %16 = arith.addf %14, %15 : vector<512x64xf32>
    %cst_13 = arith.constant 0.000000e+00 : f32
    %17 = vector.broadcast %cst_13 : f32 to vector<512x64xf32>
    %18 = arith.maximumf %16, %17 : vector<512x64xf32>
    %c1 = arith.constant 1 : index
    %c0_14 = arith.constant 0 : index
    %c0_15 = arith.constant 0 : index
    %19 = vector.load %arg4[%c1, %c0_14, %c0_15] : memref<7x64x64xbf16, #tpu.memory_space<vmem>>, vector<1x64x64xbf16>
    %20 = vector.shape_cast %19 : vector<1x64x64xbf16> to vector<64x64xbf16>
    %c1_16 = arith.constant 1 : index
    %c0_17 = arith.constant 0 : index
    %c0_18 = arith.constant 0 : index
    %21 = vector.load %arg5[%c1_16, %c0_17, %c0_18] : memref<7x1x64xf32, #tpu.memory_space<vmem>>, vector<1x1x64xf32>
    %22 = vector.shape_cast %21 : vector<1x1x64xf32> to vector<1x64xf32>
    %23 = arith.truncf %18 : vector<512x64xf32> to vector<512x64xbf16>
    %cst_19 = arith.constant dense<0.000000e+00> : vector<512x64xf32>
    %24 = tpu.matmul %23, %20, %cst_19 {dimension_numbers = #tpu.dot_dimension_numbers<[1], [0], [0], [1], [0, 0, 1, 1], [], []>} : vector<512x64xbf16>, vector<64x64xbf16>, vector<512x64xf32> -> vector<512x64xf32>
    %25 = vector.broadcast %22 : vector<1x64xf32> to vector<512x64xf32>
    %26 = arith.addf %24, %25 : vector<512x64xf32>
    %cst_20 = arith.constant 0.000000e+00 : f32
    %27 = vector.broadcast %cst_20 : f32 to vector<512x64xf32>
    %28 = arith.maximumf %26, %27 : vector<512x64xf32>
    %c2 = arith.constant 2 : index
    %c0_21 = arith.constant 0 : index
    %c0_22 = arith.constant 0 : index
    %29 = vector.load %arg4[%c2, %c0_21, %c0_22] : memref<7x64x64xbf16, #tpu.memory_space<vmem>>, vector<1x64x64xbf16>
    %30 = vector.shape_cast %29 : vector<1x64x64xbf16> to vector<64x64xbf16>
    %c2_23 = arith.constant 2 : index
    %c0_24 = arith.constant 0 : index
    %c0_25 = arith.constant 0 : index
    %31 = vector.load %arg5[%c2_23, %c0_24, %c0_25] : memref<7x1x64xf32, #tpu.memory_space<vmem>>, vector<1x1x64xf32>
    %32 = vector.shape_cast %31 : vector<1x1x64xf32> to vector<1x64xf32>
    %33 = arith.truncf %28 : vector<512x64xf32> to vector<512x64xbf16>
    %cst_26 = arith.constant dense<0.000000e+00> : vector<512x64xf32>
    %34 = tpu.matmul %33, %30, %cst_26 {dimension_numbers = #tpu.dot_dimension_numbers<[1], [0], [0], [1], [0, 0, 1, 1], [], []>} : vector<512x64xbf16>, vector<64x64xbf16>, vector<512x64xf32> -> vector<512x64xf32>
    %35 = vector.broadcast %32 : vector<1x64xf32> to vector<512x64xf32>
    %36 = arith.addf %34, %35 : vector<512x64xf32>
    %cst_27 = arith.constant 0.000000e+00 : f32
    %37 = vector.broadcast %cst_27 : f32 to vector<512x64xf32>
    %38 = arith.maximumf %36, %37 : vector<512x64xf32>
    %c3 = arith.constant 3 : index
    %c0_28 = arith.constant 0 : index
    %c0_29 = arith.constant 0 : index
    %39 = vector.load %arg4[%c3, %c0_28, %c0_29] : memref<7x64x64xbf16, #tpu.memory_space<vmem>>, vector<1x64x64xbf16>
    %40 = vector.shape_cast %39 : vector<1x64x64xbf16> to vector<64x64xbf16>
    %c3_30 = arith.constant 3 : index
    %c0_31 = arith.constant 0 : index
    %c0_32 = arith.constant 0 : index
    %41 = vector.load %arg5[%c3_30, %c0_31, %c0_32] : memref<7x1x64xf32, #tpu.memory_space<vmem>>, vector<1x1x64xf32>
    %42 = vector.shape_cast %41 : vector<1x1x64xf32> to vector<1x64xf32>
    %43 = arith.truncf %38 : vector<512x64xf32> to vector<512x64xbf16>
    %cst_33 = arith.constant dense<0.000000e+00> : vector<512x64xf32>
    %44 = tpu.matmul %43, %40, %cst_33 {dimension_numbers = #tpu.dot_dimension_numbers<[1], [0], [0], [1], [0, 0, 1, 1], [], []>} : vector<512x64xbf16>, vector<64x64xbf16>, vector<512x64xf32> -> vector<512x64xf32>
    %45 = vector.broadcast %42 : vector<1x64xf32> to vector<512x64xf32>
    %46 = arith.addf %44, %45 : vector<512x64xf32>
    %cst_34 = arith.constant 0.000000e+00 : f32
    %47 = vector.broadcast %cst_34 : f32 to vector<512x64xf32>
    %48 = arith.maximumf %46, %47 : vector<512x64xf32>
    %c4 = arith.constant 4 : index
    %c0_35 = arith.constant 0 : index
    %c0_36 = arith.constant 0 : index
    %49 = vector.load %arg4[%c4, %c0_35, %c0_36] : memref<7x64x64xbf16, #tpu.memory_space<vmem>>, vector<1x64x64xbf16>
    %50 = vector.shape_cast %49 : vector<1x64x64xbf16> to vector<64x64xbf16>
    %c4_37 = arith.constant 4 : index
    %c0_38 = arith.constant 0 : index
    %c0_39 = arith.constant 0 : index
    %51 = vector.load %arg5[%c4_37, %c0_38, %c0_39] : memref<7x1x64xf32, #tpu.memory_space<vmem>>, vector<1x1x64xf32>
    %52 = vector.shape_cast %51 : vector<1x1x64xf32> to vector<1x64xf32>
    %53 = arith.truncf %48 : vector<512x64xf32> to vector<512x64xbf16>
    %cst_40 = arith.constant dense<0.000000e+00> : vector<512x64xf32>
    %54 = tpu.matmul %53, %50, %cst_40 {dimension_numbers = #tpu.dot_dimension_numbers<[1], [0], [0], [1], [0, 0, 1, 1], [], []>} : vector<512x64xbf16>, vector<64x64xbf16>, vector<512x64xf32> -> vector<512x64xf32>
    %55 = vector.broadcast %52 : vector<1x64xf32> to vector<512x64xf32>
    %56 = arith.addf %54, %55 : vector<512x64xf32>
    %cst_41 = arith.constant 0.000000e+00 : f32
    %57 = vector.broadcast %cst_41 : f32 to vector<512x64xf32>
    %58 = arith.maximumf %56, %57 : vector<512x64xf32>
    %c5 = arith.constant 5 : index
    %c0_42 = arith.constant 0 : index
    %c0_43 = arith.constant 0 : index
    %59 = vector.load %arg4[%c5, %c0_42, %c0_43] : memref<7x64x64xbf16, #tpu.memory_space<vmem>>, vector<1x64x64xbf16>
    %60 = vector.shape_cast %59 : vector<1x64x64xbf16> to vector<64x64xbf16>
    %c5_44 = arith.constant 5 : index
    %c0_45 = arith.constant 0 : index
    %c0_46 = arith.constant 0 : index
    %61 = vector.load %arg5[%c5_44, %c0_45, %c0_46] : memref<7x1x64xf32, #tpu.memory_space<vmem>>, vector<1x1x64xf32>
    %62 = vector.shape_cast %61 : vector<1x1x64xf32> to vector<1x64xf32>
    %63 = arith.truncf %58 : vector<512x64xf32> to vector<512x64xbf16>
    %cst_47 = arith.constant dense<0.000000e+00> : vector<512x64xf32>
    %64 = tpu.matmul %63, %60, %cst_47 {dimension_numbers = #tpu.dot_dimension_numbers<[1], [0], [0], [1], [0, 0, 1, 1], [], []>} : vector<512x64xbf16>, vector<64x64xbf16>, vector<512x64xf32> -> vector<512x64xf32>
    %65 = vector.broadcast %62 : vector<1x64xf32> to vector<512x64xf32>
    %66 = arith.addf %64, %65 : vector<512x64xf32>
    %cst_48 = arith.constant 0.000000e+00 : f32
    %67 = vector.broadcast %cst_48 : f32 to vector<512x64xf32>
    %68 = arith.maximumf %66, %67 : vector<512x64xf32>
    %c6 = arith.constant 6 : index
    %c0_49 = arith.constant 0 : index
    %c0_50 = arith.constant 0 : index
    %69 = vector.load %arg4[%c6, %c0_49, %c0_50] : memref<7x64x64xbf16, #tpu.memory_space<vmem>>, vector<1x64x64xbf16>
    %70 = vector.shape_cast %69 : vector<1x64x64xbf16> to vector<64x64xbf16>
    %c6_51 = arith.constant 6 : index
    %c0_52 = arith.constant 0 : index
    %c0_53 = arith.constant 0 : index
    %71 = vector.load %arg5[%c6_51, %c0_52, %c0_53] : memref<7x1x64xf32, #tpu.memory_space<vmem>>, vector<1x1x64xf32>
    %72 = vector.shape_cast %71 : vector<1x1x64xf32> to vector<1x64xf32>
    %73 = arith.truncf %68 : vector<512x64xf32> to vector<512x64xbf16>
    %cst_54 = arith.constant dense<0.000000e+00> : vector<512x64xf32>
    %74 = tpu.matmul %73, %70, %cst_54 {dimension_numbers = #tpu.dot_dimension_numbers<[1], [0], [0], [1], [0, 0, 1, 1], [], []>} : vector<512x64xbf16>, vector<64x64xbf16>, vector<512x64xf32> -> vector<512x64xf32>
    %75 = vector.broadcast %72 : vector<1x64xf32> to vector<512x64xf32>
    %76 = arith.addf %74, %75 : vector<512x64xf32>
    %cst_55 = arith.constant 0.000000e+00 : f32
    %77 = vector.broadcast %cst_55 : f32 to vector<512x64xf32>
    %78 = arith.maximumf %76, %77 : vector<512x64xf32>
    %c0_56 = arith.constant 0 : index
    %c0_57 = arith.constant 0 : index
    %79 = vector.load %arg6[%c0_56, %c0_57] : memref<64x128xbf16, #tpu.memory_space<vmem>>, vector<64x128xbf16>
    %c0_58 = arith.constant 0 : index
    %c0_59 = arith.constant 0 : index
    %80 = vector.load %arg7[%c0_58, %c0_59] : memref<1x128xf32, #tpu.memory_space<vmem>>, vector<1x128xf32>
    %81 = arith.truncf %78 : vector<512x64xf32> to vector<512x64xbf16>
    %cst_60 = arith.constant dense<0.000000e+00> : vector<512x128xf32>
    %82 = tpu.matmul %81, %79, %cst_60 {dimension_numbers = #tpu.dot_dimension_numbers<[1], [0], [0], [1], [0, 0, 1, 1], [], []>} : vector<512x64xbf16>, vector<64x128xbf16>, vector<512x128xf32> -> vector<512x128xf32>
    %83 = vector.broadcast %80 : vector<1x128xf32> to vector<512x128xf32>
    %84 = arith.addf %82, %83 : vector<512x128xf32>
    %cst_61 = arith.constant 0.000000e+00 : f32
    %85 = vector.broadcast %cst_61 : f32 to vector<512x128xf32>
    %86 = arith.maximumf %84, %85 : vector<512x128xf32>
    %c0_62 = arith.constant 0 : index
    %c0_63 = arith.constant 0 : index
    %87 = vector.load %arg8[%c0_62, %c0_63] : memref<128x128xbf16, #tpu.memory_space<vmem>>, vector<128x128xbf16>
    %c0_64 = arith.constant 0 : index
    %c0_65 = arith.constant 0 : index
    %88 = vector.load %arg9[%c0_64, %c0_65] : memref<1x128xf32, #tpu.memory_space<vmem>>, vector<1x128xf32>
    %89 = arith.truncf %86 : vector<512x128xf32> to vector<512x128xbf16>
    %cst_66 = arith.constant dense<0.000000e+00> : vector<512x128xf32>
    %90 = tpu.matmul %89, %87, %cst_66 {dimension_numbers = #tpu.dot_dimension_numbers<[1], [0], [0], [1], [0, 0, 1, 1], [], []>} : vector<512x128xbf16>, vector<128x128xbf16>, vector<512x128xf32> -> vector<512x128xf32>
    %91 = vector.broadcast %88 : vector<1x128xf32> to vector<512x128xf32>
    %92 = arith.addf %90, %91 : vector<512x128xf32>
    %c0_67 = arith.constant 0 : index
    %c0_68 = arith.constant 0 : index
    %93 = vector.load %arg10[%c0_67, %c0_68] : memref<512x128xf32, #tpu.memory_space<vmem>>, vector<512x128xf32>
    tpu.vector_store %arg10[%c0_67, %c0_68], %92 {strides = array<i32>} : memref<512x128xf32, #tpu.memory_space<vmem>>, vector<512x128xf32>,
    return
  }
  func.func @transform_0(%arg0: i32) -> (i32, i32) {
    %c0_i32 = arith.constant 0 : i32
    %c0_i32_0 = arith.constant 0 : i32
    return %arg0, %c0_i32 : i32, i32
  }
  func.func @transform_1(%arg0: i32) -> (i32, i32) {
    %c0_i32 = arith.constant 0 : i32
    %c0_i32_0 = arith.constant 0 : i32
    %c0_i32_1 = arith.constant 0 : i32
    return %c0_i32, %c0_i32_0 : i32, i32
  }
  func.func @transform_2(%arg0: i32) -> (i32, i32) {
    %c0_i32 = arith.constant 0 : i32
    %c0_i32_0 = arith.constant 0 : i32
    %c0_i32_1 = arith.constant 0 : i32
    return %c0_i32, %c0_i32_0 : i32, i32
  }
  func.func @transform_3(%arg0: i32) -> (i32, i32, i32) {
    %c0_i32 = arith.constant 0 : i32
    %c0_i32_0 = arith.constant 0 : i32
    %c0_i32_1 = arith.constant 0 : i32
    %c0_i32_2 = arith.constant 0 : i32
    return %c0_i32, %c0_i32_0, %c0_i32_1 : i32, i32, i32
  }
  func.func @transform_4(%arg0: i32) -> (i32, i32, i32) {
    %c0_i32 = arith.constant 0 : i32
    %c0_i32_0 = arith.constant 0 : i32
    %c0_i32_1 = arith.constant 0 : i32
    %c0_i32_2 = arith.constant 0 : i32
    return %c0_i32, %c0_i32_0, %c0_i32_1 : i32, i32, i32
  }
  func.func @transform_5(%arg0: i32) -> (i32, i32) {
    %c0_i32 = arith.constant 0 : i32
    %c0_i32_0 = arith.constant 0 : i32
    %c0_i32_1 = arith.constant 0 : i32
    return %c0_i32, %c0_i32_0 : i32, i32
  }
  func.func @transform_6(%arg0: i32) -> (i32, i32) {
    %c0_i32 = arith.constant 0 : i32
    %c0_i32_0 = arith.constant 0 : i32
    %c0_i32_1 = arith.constant 0 : i32
    return %c0_i32, %c0_i32_0 : i32, i32
  }
  func.func @transform_7(%arg0: i32) -> (i32, i32) {
    %c0_i32 = arith.constant 0 : i32
    %c0_i32_0 = arith.constant 0 : i32
    %c0_i32_1 = arith.constant 0 : i32
    return %c0_i32, %c0_i32_0 : i32, i32
  }
  func.func @transform_8(%arg0: i32) -> (i32, i32) {
    %c0_i32 = arith.constant 0 : i32
    %c0_i32_0 = arith.constant 0 : i32
    %c0_i32_1 = arith.constant 0 : i32
    return %c0_i32, %c0_i32_0 : i32, i32
  }
  func.func @transform_9(%arg0: i32) -> (i32, i32) {
    %c0_i32 = arith.constant 0 : i32
    %c0_i32_0 = arith.constant 0 : i32
    return %arg0, %c0_i32 : i32, i32
  }
}

</mosaic_0001>

<bundles_post_ra>
// kernel: tpu_custom_call.1
= control target key start
LH: loop header
LB: loop body
LE: loop exit
PB: predicated region body
PF: predicated region fallthrough
CT: control target
= control target key end

     0   :  { %14 = vsyncpa [#allocation3], 0  ;;  %s8676_s0 = inlined_call_operand.vmem [shape: f32[1024,64], index: 0, kind: input, shape index: {}]   ;;  %s8677_s1 = inlined_call_operand.vmem [shape: bf16[64,64], index: 1, kind: input, shape index: {}]   ;;  %s8678_s2 = inlined_call_operand.vmem [shape: f32[1,64], index: 2, kind: input, shape index: {}]   ;;  %s8679_s3 = inlined_call_operand.vmem [shape: bf16[7,64,64], index: 3, kind: input, shape index: {}]   ;;  %s8680_s4 = inlined_call_operand.vmem [shape: f32[7,1,64], index: 4, kind: input, shape index: {}]   ;;  %s8681_s5 = inlined_call_operand.vmem [shape: bf16[64,128], index: 5, kind: input, shape index: {}]   ;;  %s8682_s6 = inlined_call_operand.vmem [shape: f32[1,128], index: 6, kind: input, shape index: {}]   ;;  %s8683_s7 = inlined_call_operand.vmem [shape: bf16[128,128], index: 7, kind: input, shape index: {}]   ;;  %s8684_s8 = inlined_call_operand.vmem [shape: f32[1,128], index: 8, kind: input, shape index: {}]   ;;  %s8685_s9 = inlined_call_operand.hbm [shape: f32[1024,128], index: 9, kind: output, shape index: {}]  }
   0x1   :  { %16 = vsyncpa [#allocation3 + $0x1], 0  ;;  %s7327_s30 = smov 0   ;;  %s7329_s10 = smov 0  }
   0x2   :  { %s7331_s11 = smov 0   ;;  %s7333_s12 = smov 0  }
   0x3 LB: > { %s7348_s13 = sadd.s32 4294967295, %s7272_s12   ;;  %s5624_s14 = sadd.s32 4294967294, %s7272_s12   ;;  %s7272_s12 = sphi %s7333_s12, %s8691_s12   ;;  %s7268_s11 = sphi %s7331_s11, %s8690_s11   ;;  %s7264_s10 = sphi %s7329_s10, %s8689_s10   ;;  %s7260_s30 = sphi %s7327_s30, %s8688_s30  }
   0x4   : > { %s7352_s15 = sadd.s32 1, %s7272_s12   ;;  %s223_s16 = sadd.s32 1, %s7268_s11 }
   0x5   : > { %s220_s17 = ssub.s32 %s7272_s12, %s7352_s15  ;;  %p233_p0 = scmp.ne.s32.totalorder %s7268_s11, %s7264_s10 }
   0x6   : > { %p221_p1 = scmp.eq.s32.totalorder %s220_s17, 0  ;;  %p234_p2 = scmp.eq.s32.totalorder %s7348_s13, 1 }
   0x7   : > { %p239_p3 = scmp.ne.s32.totalorder %s7264_s10, %s7260_s30  ;;  %p240_p4 = scmp.eq.s32.totalorder %s5624_s14, 1 }
   0x8   : > { %s7363_s18 = scalar_select %p221_p1, %s7268_s11, %s223_s16  }
   0x9   : > { %p7365_p5 = por %p234_p2, %p233_p0  ;;  %p7369_p6 = por %p240_p4, %p239_p3 }
   0xa   : > { %p5627_p7 = scmp.ge.s32.totalorder %s7272_s12, 1  ;;  %p291_p8 = scmp.lt.s32.totalorder %s7272_s12, 3 }
   0xc   : > { %p292_p9 = pnand %p5627_p7, %p291_p8 }
   0xd   : > { %v7166_v0 = vld [vmem:[%s8677_s1] sm:$0xff] (!%p292_p9)   ;;  %s5629_s23 = sshll.u32 (!%p292_p9), %s7348_s13, 6  ;;  %v7167_v1 = vld [vmem:[%s8677_s1 + $0x8] sm:$0xff] (!%p292_p9)   ;;  %v7168_v2 = vld [vmem:[%s8677_s1 + $0x10] sm:$0xff] (!%p292_p9)   ;;  %vm470_vm0 = vcmask (!%p292_p9), 523264   ;;  %s324_s24 = sand.u32 (!%p292_p9), 1, %s7264_s10  }
   0xe   : > { %295 = sbr.rel (%p292_p9) target bundleno = 2380 (0x94c), region = 56  ;;  %p328_p10 = scmp.lt.s32.totalorder (!%p292_p9), %s5629_s23, 127  ;;  %6397 = vmatprep.subr.bf16.mxu0 (!%p292_p9), %v7166_v0  ;;  %v7169_v5 = vld [vmem:[%s8677_s1 + $0x18] sm:$0xff] (!%p292_p9)   ;;  %v7170_v23 = vld [vmem:[%s8679_s3] sm:$0xff] (!%p292_p9)   ;;  %v7171_v24 = vld [vmem:[%s8679_s3 + $0x8] sm:$0xff] (!%p292_p9)  }
   0xf   : > { %6398 = vmatpush3.bf16.msra.mxu0 (!%p292_p9), %v7166_v0  ;;  %6469 = vmatprep.subr.bf16.mxu1 (!%p292_p9), %v7170_v23  ;;  %s5628_s25 = sshll.u32 (!%p292_p9), %s324_s24, 9  ;;  %s6032_s29 = sshll.u32 (!%p292_p9), %s7348_s13, 13 }
  0x10   : > { %6399 = vmatprep.subr.bf16.mxu0 (!%p292_p9), %v7167_v1  ;;  %6470 = vmatpush3.bf16.msra.mxu1 (!%p292_p9), %v7170_v23  ;;  %s8625_s22 = scalar_lea.hbm (!%p292_p9), %s8685_s9, %s6032_s29  ;;  %s8635_s13 = scalar_lea.sflag (!%p292_p9), [#allocation3], %s324_s24 }
  0x11   : > { %6471 = vmatprep.subr.bf16.mxu1 (!%p292_p9), %v7171_v24 }
  0x13   : > { %6400 = vmatpush3.bf16.msra.mxu0 (!%p292_p9), %v7167_v1 }
  0x14   : > { %6401 = vmatprep.subr.bf16.mxu0 (!%p292_p9), %v7168_v2  ;;  %6472 = vmatpush3.bf16.msra.mxu1 (!%p292_p9), %v7171_v24 }
  0x15   : > { %s8693_s23 = smov (!%p328_p10, %s5629_s23), 127 }
  0x16   : > { %s5630_s28 = sshll.u32 %s8693_s23, 3  ;;  %s7274_s23 = smov [#allocation2]  }
  0x17   : > { %s7388_s16 = scalar_lea.vmem %s8676_s0, %s5630_s28  ;;  %6402 = vmatpush3.bf16.msra.mxu0 %v7168_v2  ;;  %s8496_s28 = scalar_lea.vmem [#allocation2], %s5628_s25 }
  0x18   : > { %v335_v3 = vld [vmem:[%s7388_s16] sm:$0xff]  ;;  %v336_v4 = vld [vmem:[%s7388_s16 + $0x8] sm:$0xff]  ;;  %v337_v7 = vld [vmem:[%s7388_s16 + $0x10] sm:$0xff]  ;;  %6403 = vmatprep.subr.bf16.mxu0 %v7169_v5  ;;  %s5562_s14 = sshll.u32 %s8496_s28, 4  ;;  %s7214_s25 = sshll.u32 %s7274_s23, 4  ;;  %s8627_s14 = int_to_ptr.vmem [resolvable:$true] %s5562_s14  ;;  %s7215_s25 = int_to_ptr.vmem [resolvable:$false] %s7214_s25 }
  0x19   : > { %v408_v6 = vpack.c.bf16 %v336_v4, %v335_v3  ;;  %v338_v8 = vld [vmem:[%s7388_s16 + $0x18] sm:$0xff]  ;;  %v339_v9 = vld [vmem:[%s7388_s16 + $0x20] sm:$0xff]  ;;  %v340_v10 = vld [vmem:[%s7388_s16 + $0x28] sm:$0xff]  ;;  %s7216_s26 = scalar_lea.vmem %s7215_s25, 16384  ;;  %p7217_p0 = scmp.lt.s32.totalorder %s8627_s14, %s7215_s25 }
  0x1a   : > { %v409_v11 = vpack.c.bf16 %v338_v8, %v337_v7  ;;  %v410_v12 = vpack.c.bf16 %v340_v10, %v339_v9  ;;  %v341_v13 = vld [vmem:[%s7388_s16 + $0x30] sm:$0xff]  ;;  %v342_v14 = vld [vmem:[%s7388_s16 + $0x38] sm:$0xff]  ;;  %v343_v15 = vld [vmem:[%s7388_s16 + $0x40] sm:$0xff] }
  0x1b   : > { %6405 = vmatprep.mubr.msk.bf16.mxu0 %vm470_vm0, %v408_v6  ;;  %6404 = vmatpush3.bf16.msra.mxu0 %v7169_v5  ;;  %v344_v16 = vld [vmem:[%s7388_s16 + $0x48] sm:$0xff]  ;;  %v411_v17 = vpack.c.bf16 %v342_v14, %v341_v13  ;;  %v345_v19 = vld [vmem:[%s7388_s16 + $0x50] sm:$0xff]  ;;  %v346_v20 = vld [vmem:[%s7388_s16 + $0x58] sm:$0xff] }
  0x1c   : > { %v412_v18 = vpack.c.bf16 %v344_v16, %v343_v15  ;;  %v347_v21 = vld [vmem:[%s7388_s16 + $0x60] sm:$0xff]  ;;  %v348_v22 = vld [vmem:[%s7388_s16 + $0x68] sm:$0xff]  ;;  %v413_v25 = vpack.c.bf16 %v346_v20, %v345_v19  ;;  %v349_v27 = vld [vmem:[%s7388_s16 + $0x70] sm:$0xff] }
  0x1d   : > { %v414_v26 = vpack.c.bf16 %v348_v22, %v347_v21  ;;  %v350_v28 = vld [vmem:[%s7388_s16 + $0x78] sm:$0xff]  ;;  %v351_v29 = vld [vmem:[%s7388_s16 + $0x80] sm:$0xff]  ;;  %v352_v30 = vld [vmem:[%s7388_s16 + $0x88] sm:$0xff] }
  0x1e   : > { %6406 = vmatmul.mubr.msk.bf16.vlgmr.msra.gmra.mrb[0].mxu0 %vm470_vm0, %v409_v11  ;;  %v415_v31 = vpack.c.bf16 %v350_v28, %v349_v27  ;;  %v416_v32 = vpack.c.bf16 %v352_v30, %v351_v29  ;;  %v353_v33 = vld [vmem:[%s7388_s16 + $0x90] sm:$0xff]  ;;  %v354_v34 = vld [vmem:[%s7388_s16 + $0x98] sm:$0xff]  ;;  %v355_v35 = vld [vmem:[%s7388_s16 + $0xa0] sm:$0xff] }
  0x1f   : > { %6409 = vmatprep.mubr.msk.bf16.mxu0 %vm470_vm0, %v410_v12  ;;  %v356_v36 = vld [vmem:[%s7388_s16 + $0xa8] sm:$0xff]  ;;  %v417_v37 = vpack.c.bf16 %v354_v34, %v353_v33  ;;  %v357_v39 = vld [vmem:[%s7388_s16 + $0xb0] sm:$0xff]  ;;  %v358_v40 = vld [vmem:[%s7388_s16 + $0xb8] sm:$0xff] }
  0x20   : > { %v418_v38 = vpack.c.bf16 %v356_v36, %v355_v35  ;;  %v359_v41 = vld [vmem:[%s7388_s16 + $0xc0] sm:$0xff]  ;;  %v360_v42 = vld [vmem:[%s7388_s16 + $0xc8] sm:$0xff]  ;;  %v419_v43 = vpack.c.bf16 %v358_v40, %v357_v39  ;;  %v361_v45 = vld [vmem:[%s7388_s16 + $0xd0] sm:$0xff] }
  0x21   : > { %v420_v44 = vpack.c.bf16 %v360_v42, %v359_v41  ;;  %v362_v46 = vld [vmem:[%s7388_s16 + $0xd8] sm:$0xff]  ;;  %v363_v47 = vld [vmem:[%s7388_s16 + $0xe0] sm:$0xff]  ;;  %v364_v48 = vld [vmem:[%s7388_s16 + $0xe8] sm:$0xff] }
  0x22   : > { %v421_v49 = vpack.c.bf16 %v362_v46, %v361_v45  ;;  %v422_v50 = vpack.c.bf16 %v364_v48, %v363_v47  ;;  %v365_v51 = vld [vmem:[%s7388_s16 + $0xf0] sm:$0xff]  ;;  %v366_v52 = vld [vmem:[%s7388_s16 + $0xf8] sm:$0xff]  ;;  %v367_v53 = vld [vmem:[%s7388_s16 + $0x100] sm:$0xff] }
  0x23   : > { %v368_v54 = vld [vmem:[%s7388_s16 + $0x108] sm:$0xff]  ;;  %v423_v55 = vpack.c.bf16 %v366_v52, %v365_v51  ;;  %v369_v57 = vld [vmem:[%s7388_s16 + $0x110] sm:$0xff]  ;;  %v370_v58 = vld [vmem:[%s7388_s16 + $0x118] sm:$0xff] }
  0x24   : > { %v424_v56 = vpack.c.bf16 %v368_v54, %v367_v53  ;;  %v371_v59 = vld [vmem:[%s7388_s16 + $0x120] sm:$0xff]  ;;  %v372_v60 = vld [vmem:[%s7388_s16 + $0x128] sm:$0xff]  ;;  %v425_v61 = vpack.c.bf16 %v370_v58, %v369_v57  ;;  %v373_v63 = vld [vmem:[%s7388_s16 + $0x130] sm:$0xff] }
  0x25   : > { %v426_v62 = vpack.c.bf16 %v372_v60, %v371_v59  ;;  %v374_v0 = vld [vmem:[%s7388_s16 + $0x138] sm:$0xff]  ;;  %v375_v1 = vld [vmem:[%s7388_s16 + $0x140] sm:$0xff]  ;;  %v376_v2 = vld [vmem:[%s7388_s16 + $0x148] sm:$0xff] }
  0x26   : > { %6410 = vmatmul.mubr.msk.bf16.gmra.mrb[4].mxu0 %vm470_vm0, %v411_v17  ;;  %v427_v3 = vpack.c.bf16 %v374_v0, %v373_v63  ;;  %v428_v4 = vpack.c.bf16 %v376_v2, %v375_v1  ;;  %v377_v5 = vld [vmem:[%s7388_s16 + $0x150] sm:$0xff]  ;;  %v378_v6 = vld [vmem:[%s7388_s16 + $0x158] sm:$0xff]  ;;  %v379_v7 = vld [vmem:[%s7388_s16 + $0x160] sm:$0xff] }
  0x27   : > { %6413 = vmatprep.mubr.msk.bf16.mxu0 %vm470_vm0, %v412_v18  ;;  %v380_v8 = vld [vmem:[%s7388_s16 + $0x168] sm:$0xff]  ;;  %v429_v9 = vpack.c.bf16 %v378_v6, %v377_v5  ;;  %v381_v11 = vld [vmem:[%s7388_s16 + $0x170] sm:$0xff]  ;;  %v382_v12 = vld [vmem:[%s7388_s16 + $0x178] sm:$0xff] }
  0x28   : > { %v430_v10 = vpack.c.bf16 %v380_v8, %v379_v7  ;;  %v383_v13 = vld [vmem:[%s7388_s16 + $0x180] sm:$0xff]  ;;  %v384_v14 = vld [vmem:[%s7388_s16 + $0x188] sm:$0xff]  ;;  %v431_v15 = vpack.c.bf16 %v382_v12, %v381_v11  ;;  %v7172_v16 = vld [vmem:[%s8679_s3 + $0x10] sm:$0xff]  }
  0x29   : > { %v432_v17 = vpack.c.bf16 %v384_v14, %v383_v13  ;;  %6473 = vmatprep.subr.bf16.mxu1 %v7172_v16  ;;  %v7173_v18 = vld [vmem:[%s8679_s3 + $0x18] sm:$0xff]   ;;  %v385_v19 = vld [vmem:[%s7388_s16 + $0x190] sm:$0xff]  ;;  %v387_v21 = vld [vmem:[%s7388_s16 + $0x1a0] sm:$0xff] }
  0x2a   : > { %6474 = vmatpush3.bf16.msra.mxu1 %v7172_v16  ;;  %v386_v20 = vld [vmem:[%s7388_s16 + $0x198] sm:$0xff]  ;;  %v388_v22 = vld [vmem:[%s7388_s16 + $0x1a8] sm:$0xff]  ;;  %v391_v27 = vld [vmem:[%s7388_s16 + $0x1c0] sm:$0xff] }
  0x2b   : > { %6475 = vmatprep.subr.bf16.mxu1 %v7173_v18  ;;  %v433_v23 = vpack.c.bf16 %v386_v20, %v385_v19  ;;  %v434_v24 = vpack.c.bf16 %v388_v22, %v387_v21  ;;  %v392_v28 = vld [vmem:[%s7388_s16 + $0x1c8] sm:$0xff]  ;;  %v395_v33 = vld [vmem:[%s7388_s16 + $0x1e0] sm:$0xff]  ;;  %v7177_v57 = vld [vmem:[%s8679_s3 + $0x38] sm:$0xff]  }
  0x2c   : > { %v436_v30 = vpack.c.bf16 %v392_v28, %v391_v27  ;;  %v396_v34 = vld [vmem:[%s7388_s16 + $0x1e8] sm:$0xff]  ;;  %v7174_v40 = vld [vmem:[%s8679_s3 + $0x20] sm:$0xff]  }
  0x2d   : > { %v438_v36 = vpack.c.bf16 %v396_v34, %v395_v33  ;;  %6541 = vmatprep.subr.bf16.mxu0 %v7174_v40  ;;  %v7507_v41 = vld [vmem:[%s8678_s2] ss:$0 sm:$0xff] }
  0x2e   : > { %6414 = vmatmul.mubr.msk.bf16.gmra.mrb[8].mxu0 %vm470_vm0, %v413_v25  ;;  %6476 = vmatpush3.bf16.msra.mxu1 %v7173_v18  ;;  %v389_v25 = vld [vmem:[%s7388_s16 + $0x1b0] sm:$0xff] }
  0x2f   : > { %6417 = vmatprep.mubr.msk.bf16.mxu0 %vm470_vm0, %v414_v26  ;;  %v390_v26 = vld [vmem:[%s7388_s16 + $0x1b8] sm:$0xff]  ;;  %6542 = vmatpush3.bf16.msra.mxu0 %v7174_v40 }
  0x30   : > { %v435_v29 = vpack.c.bf16 %v390_v26, %v389_v25 }
  0x36   : > { %6418 = vmatmul.mubr.msk.bf16.gmra.mrb[12].mxu0 %vm470_vm0, %v415_v31  ;;  %v393_v31 = vld [vmem:[%s7388_s16 + $0x1d0] sm:$0xff] }
  0x37   : > { %6421 = vmatprep.mubr.msk.bf16.mxu0 %vm470_vm0, %v416_v32  ;;  %v394_v32 = vld [vmem:[%s7388_s16 + $0x1d8] sm:$0xff] }
  0x38   : > { %v437_v35 = vpack.c.bf16 %v394_v32, %v393_v31 }
  0x3e   : > { %6422 = vmatmul.mubr.msk.bf16.gmra.mrb[16].mxu0 %vm470_vm0, %v417_v37  ;;  %v397_v37 = vld [vmem:[%s7388_s16 + $0x1f0] sm:$0xff] }
  0x3f   : > { %6425 = vmatprep.mubr.msk.bf16.mxu0 %vm470_vm0, %v418_v38  ;;  %v398_v38 = vld [vmem:[%s7388_s16 + $0x1f8] sm:$0xff]  ;;  %s7210_s16 = scalar_lea.vmem %s8627_s14, 8192 }
  0x40   : > { %v439_v39 = vpack.c.bf16 %v398_v38, %v397_v37  ;;  %p7211_p11 = scmp.ne.s32.totalorder %s8627_s14, %s7210_s16  ;;  %p7218_p1 = scmp.lt.s32.totalorder %s7216_s26, %s7210_s16 }
  0x42   : > { %p7212_p12 = pnand %p7211_p11, %p7365_p5  ;;  %p7219_p2 = por %p7218_p1, %p7217_p0 }
  0x44   : > { %p7213_p13 = pneg %p7212_p12 }
  0x46   : > { %6426 = vmatmul.mubr.msk.bf16.gmra.mrb[20].mxu0 %vm470_vm0, %v419_v43  ;;  %p7220_p3 = pnand %p7219_p2, %p7213_p13 }
  0x47   : > { %6429 = vmatprep.mubr.msk.bf16.mxu0 %vm470_vm0, %v420_v44 }
  0x4e   : > { %6430 = vmatmul.mubr.msk.bf16.gmra.mrb[24].mxu0 %vm470_vm0, %v421_v49  ;;  %v7175_v49 = vld [vmem:[%s8679_s3 + $0x28] sm:$0xff]  }
  0x4f   : > { %6433 = vmatprep.mubr.msk.bf16.mxu0 %vm470_vm0, %v422_v50  ;;  %v7176_v50 = vld [vmem:[%s8679_s3 + $0x30] sm:$0xff]   ;;  %6543 = vmatprep.subr.bf16.mxu0 %v7175_v49 }
  0x50   : > { %6544 = vmatpush3.bf16.msra.mxu0 %v7175_v49 }
  0x51   : > { %6545 = vmatprep.subr.bf16.mxu0 %v7176_v50 }
  0x54   : > { %6546 = vmatpush3.bf16.msra.mxu0 %v7176_v50 }
  0x55   : > { %6547 = vmatprep.subr.bf16.mxu0 %v7177_v57 }
  0x56   : > { %6434 = vmatmul.mubr.msk.bf16.gmra.mrb[28].mxu0 %vm470_vm0, %v423_v55 }
  0x57   : > { %6437 = vmatprep.mubr.msk.bf16.mxu0 %vm470_vm0, %v424_v56 }
  0x58   : > { %6548 = vmatpush3.bf16.msra.mxu0 %v7177_v57 }
  0x5e   : > { %6438 = vmatmul.mubr.msk.bf16.gmra.mrb[32].mxu0 %vm470_vm0, %v425_v61 }
  0x5f   : > { %6441 = vmatprep.mubr.msk.bf16.mxu0 %vm470_vm0, %v426_v62 }
  0x66   : > { %6442 = vmatmul.mubr.msk.bf16.gmra.mrb[36].mxu0 %vm470_vm0, %v427_v3 }
  0x67   : > { %6445 = vmatprep.mubr.msk.bf16.mxu0 %vm470_vm0, %v428_v4 }
  0x6e   : > { %6446 = vmatmul.mubr.msk.bf16.gmra.mrb[40].mxu0 %vm470_vm0, %v429_v9 }
  0x6f   : > { %6449 = vmatprep.mubr.msk.bf16.mxu0 %vm470_vm0, %v430_v10 }
  0x76   : > { %6450 = vmatmul.mubr.msk.bf16.gmra.mrb[44].mxu0 %vm470_vm0, %v431_v15 }
  0x77   : > { %6453 = vmatprep.mubr.msk.bf16.mxu0 %vm470_vm0, %v432_v17 }
  0x7e   : > { %6454 = vmatmul.mubr.msk.bf16.gmra.mrb[48].mxu0 %vm470_vm0, %v433_v23 }
  0x7f   : > { %6457 = vmatprep.mubr.msk.bf16.mxu0 %vm470_vm0, %v434_v24 }
  0x86   : > { %6458 = vmatmul.mubr.msk.bf16.gmra.mrb[52].mxu0 %vm470_vm0, %v435_v29 }
  0x87   : > { %6461 = vmatprep.mubr.msk.bf16.mxu0 %vm470_vm0, %v436_v30 }
  0x8e   : > { %6462 = vmatmul.mubr.msk.bf16.gmra.mrb[56].mxu0 %vm470_vm0, %v437_v35 }
  0x8f   : > { %6465 = vmatprep.mubr.msk.bf16.mxu0 %vm470_vm0, %v438_v36 }
  0x96   : > { %6466 = vmatmul.mubr.msk.bf16.gmra.mrb[60].mxu0 %vm470_vm0, %v439_v39 }
  0xf1   : > { %v6407_v42 = vpop.f32.mrb[0].mxu0 }
  0xf2   : > { %v610_v43 = vadd.f32 %v6407_v42, %v7507_v41  ;;  %v601_v44 = vpop.f32.mrb[1].mxu0 }
  0xf3   : > { %v602_v45 = vadd.f32 %v7507_v41, %v601_v44  ;;  %v6408_v46 = vpop.f32.mrb[2].mxu0 }
  0xf4   : > { %v613_v47 = vadd.f32 %v6408_v46, %v7507_v41  ;;  %v604_v48 = vpop.f32.mrb[3].mxu0  ;;  %v858_v52 = vmax.f32 %v610_v43, 0.0 }
  0xf5   : > { %v605_v51 = vadd.f32 %v7507_v41, %v604_v48  ;;  %v856_v54 = vmax.f32 %v602_v45, 0.0 }
  0xf6   : > { %v859_v53 = vmax.f32 %v613_v47, 0.0 }
  0xf7   : > { %v857_v55 = vmax.f32 %v605_v51, 0.0 }
  0xf8   : > { %v930_v56 = vpack.c.bf16 %v859_v53, %v858_v52 }
  0xf9   : > { %v6411_v58 = vpop.f32.mrb[4].mxu0  ;;  %v929_v59 = vpack.c.bf16 %v857_v55, %v856_v54 }
  0xfa   : > { %v626_v60 = vadd.f32 %v6411_v58, %v7507_v41  ;;  %v617_v61 = vpop.f32.mrb[5].mxu0 }
  0xfb   : > { %v618_v62 = vadd.f32 %v7507_v41, %v617_v61  ;;  %v6412_v63 = vpop.f32.mrb[6].mxu0  ;;  %6477 = vmatprep.mubr.msk.bf16.mxu1 %vm470_vm0, %v929_v59 }
  0xfc   : > { %v629_v0 = vadd.f32 %v6412_v63, %v7507_v41  ;;  %v620_v1 = vpop.f32.mrb[7].mxu0  ;;  %6478 = vmatmul.mubr.msk.bf16.vlgmr.msra.gmra.mrb[0].mxu1 %vm470_vm0, %v930_v56  ;;  %v862_v3 = vmax.f32 %v626_v60, 0.0 }
  0xfd   : > { %v621_v2 = vadd.f32 %v7507_v41, %v620_v1  ;;  %v860_v5 = vmax.f32 %v618_v62, 0.0 }
  0xfe   : > { %v863_v4 = vmax.f32 %v629_v0, 0.0 }
  0xff   : > { %v861_v6 = vmax.f32 %v621_v2, 0.0 }
 0x100   : > { %v932_v7 = vpack.c.bf16 %v863_v4, %v862_v3 }
 0x101   : > { %v931_v8 = vpack.c.bf16 %v861_v6, %v860_v5  ;;  %v6415_v9 = vpop.f32.mrb[8].mxu0 }
 0x102   : > { %v642_v10 = vadd.f32 %v6415_v9, %v7507_v41  ;;  %v633_v11 = vpop.f32.mrb[9].mxu0 }
 0x103   : > { %v634_v12 = vadd.f32 %v7507_v41, %v633_v11  ;;  %v6416_v13 = vpop.f32.mrb[10].mxu0  ;;  %6481 = vmatprep.mubr.msk.bf16.mxu1 %vm470_vm0, %v931_v8 }
 0x104   : > { %v645_v14 = vadd.f32 %v6416_v13, %v7507_v41  ;;  %v636_v15 = vpop.f32.mrb[11].mxu0  ;;  %6482 = vmatmul.mubr.msk.bf16.gmra.mrb[4].mxu1 %vm470_vm0, %v932_v7  ;;  %v866_v17 = vmax.f32 %v642_v10, 0.0 }
 0x105   : > { %v637_v16 = vadd.f32 %v7507_v41, %v636_v15  ;;  %v864_v19 = vmax.f32 %v634_v12, 0.0 }
 0x106   : > { %v867_v18 = vmax.f32 %v645_v14, 0.0 }
 0x107   : > { %v865_v20 = vmax.f32 %v637_v16, 0.0 }
 0x108   : > { %v934_v21 = vpack.c.bf16 %v867_v18, %v866_v17 }
 0x109   : > { %v933_v22 = vpack.c.bf16 %v865_v20, %v864_v19  ;;  %v6419_v23 = vpop.f32.mrb[12].mxu0 }
 0x10a   : > { %v658_v24 = vadd.f32 %v6419_v23, %v7507_v41  ;;  %v649_v25 = vpop.f32.mrb[13].mxu0 }
 0x10b   : > { %v650_v26 = vadd.f32 %v7507_v41, %v649_v25  ;;  %v6420_v27 = vpop.f32.mrb[14].mxu0  ;;  %6485 = vmatprep.mubr.msk.bf16.mxu1 %vm470_vm0, %v933_v22 }
 0x10c   : > { %v661_v28 = vadd.f32 %v6420_v27, %v7507_v41  ;;  %v652_v29 = vpop.f32.mrb[15].mxu0  ;;  %6486 = vmatmul.mubr.msk.bf16.gmra.mrb[8].mxu1 %vm470_vm0, %v934_v21  ;;  %v870_v31 = vmax.f32 %v658_v24, 0.0 }
 0x10d   : > { %v653_v30 = vadd.f32 %v7507_v41, %v652_v29  ;;  %v868_v33 = vmax.f32 %v650_v26, 0.0 }
 0x10e   : > { %v871_v32 = vmax.f32 %v661_v28, 0.0 }
 0x10f   : > { %v869_v34 = vmax.f32 %v653_v30, 0.0 }
 0x110   : > { %v936_v35 = vpack.c.bf16 %v871_v32, %v870_v31 }
 0x111   : > { %v935_v36 = vpack.c.bf16 %v869_v34, %v868_v33  ;;  %v6423_v37 = vpop.f32.mrb[16].mxu0 }
 0x112   : > { %v674_v38 = vadd.f32 %v6423_v37, %v7507_v41  ;;  %v665_v39 = vpop.f32.mrb[17].mxu0 }
 0x113   : > { %v666_v40 = vadd.f32 %v7507_v41, %v665_v39  ;;  %v6424_v42 = vpop.f32.mrb[18].mxu0  ;;  %6489 = vmatprep.mubr.msk.bf16.mxu1 %vm470_vm0, %v935_v36 }
 0x114   : > { %v677_v43 = vadd.f32 %v6424_v42, %v7507_v41  ;;  %v668_v44 = vpop.f32.mrb[19].mxu0  ;;  %6490 = vmatmul.mubr.msk.bf16.gmra.mrb[12].mxu1 %vm470_vm0, %v936_v35  ;;  %v874_v46 = vmax.f32 %v674_v38, 0.0 }
 0x115   : > { %v669_v45 = vadd.f32 %v7507_v41, %v668_v44  ;;  %v872_v48 = vmax.f32 %v666_v40, 0.0 }
 0x116   : > { %v875_v47 = vmax.f32 %v677_v43, 0.0 }
 0x117   : > { %v873_v49 = vmax.f32 %v669_v45, 0.0 }
 0x118   : > { %v938_v50 = vpack.c.bf16 %v875_v47, %v874_v46 }
 0x119   : > { %v937_v51 = vpack.c.bf16 %v873_v49, %v872_v48  ;;  %v6427_v52 = vpop.f32.mrb[20].mxu0 }
 0x11a   : > { %v690_v53 = vadd.f32 %v6427_v52, %v7507_v41  ;;  %v681_v54 = vpop.f32.mrb[21].mxu0 }
 0x11b   : > { %v682_v55 = vadd.f32 %v7507_v41, %v681_v54  ;;  %v6428_v56 = vpop.f32.mrb[22].mxu0  ;;  %6493 = vmatprep.mubr.msk.bf16.mxu1 %vm470_vm0, %v937_v51 }
 0x11c   : > { %v693_v57 = vadd.f32 %v6428_v56, %v7507_v41  ;;  %v684_v58 = vpop.f32.mrb[23].mxu0  ;;  %6494 = vmatmul.mubr.msk.bf16.gmra.mrb[16].mxu1 %vm470_vm0, %v938_v50  ;;  %v878_v60 = vmax.f32 %v690_v53, 0.0 }
 0x11d   : > { %v685_v59 = vadd.f32 %v7507_v41, %v684_v58  ;;  %v876_v62 = vmax.f32 %v682_v55, 0.0 }
 0x11e   : > { %v879_v61 = vmax.f32 %v693_v57, 0.0 }
 0x11f   : > { %v877_v63 = vmax.f32 %v685_v59, 0.0 }
 0x120   : > { %v940_v0 = vpack.c.bf16 %v879_v61, %v878_v60 }
 0x121   : > { %v939_v1 = vpack.c.bf16 %v877_v63, %v876_v62  ;;  %v6431_v2 = vpop.f32.mrb[24].mxu0 }
 0x122   : > { %v706_v3 = vadd.f32 %v6431_v2, %v7507_v41  ;;  %v697_v4 = vpop.f32.mrb[25].mxu0 }
 0x123   : > { %v698_v5 = vadd.f32 %v7507_v41, %v697_v4  ;;  %v6432_v6 = vpop.f32.mrb[26].mxu0  ;;  %6497 = vmatprep.mubr.msk.bf16.mxu1 %vm470_vm0, %v939_v1 }
 0x124   : > { %v709_v7 = vadd.f32 %v6432_v6, %v7507_v41  ;;  %v700_v8 = vpop.f32.mrb[27].mxu0  ;;  %6498 = vmatmul.mubr.msk.bf16.gmra.mrb[20].mxu1 %vm470_vm0, %v940_v0  ;;  %v882_v10 = vmax.f32 %v706_v3, 0.0 }
 0x125   : > { %v701_v9 = vadd.f32 %v7507_v41, %v700_v8  ;;  %v880_v12 = vmax.f32 %v698_v5, 0.0 }
 0x126   : > { %v883_v11 = vmax.f32 %v709_v7, 0.0 }
 0x127   : > { %v881_v13 = vmax.f32 %v701_v9, 0.0 }
 0x128   : > { %v942_v14 = vpack.c.bf16 %v883_v11, %v882_v10 }
 0x129   : > { %v941_v15 = vpack.c.bf16 %v881_v13, %v880_v12  ;;  %v6435_v16 = vpop.f32.mrb[28].mxu0 }
 0x12a   : > { %v722_v17 = vadd.f32 %v6435_v16, %v7507_v41  ;;  %v713_v18 = vpop.f32.mrb[29].mxu0 }
 0x12b   : > { %v714_v19 = vadd.f32 %v7507_v41, %v713_v18  ;;  %v6436_v20 = vpop.f32.mrb[30].mxu0  ;;  %6501 = vmatprep.mubr.msk.bf16.mxu1 %vm470_vm0, %v941_v15 }
 0x12c   : > { %v725_v21 = vadd.f32 %v6436_v20, %v7507_v41  ;;  %v716_v22 = vpop.f32.mrb[31].mxu0  ;;  %6502 = vmatmul.mubr.msk.bf16.gmra.mrb[24].mxu1 %vm470_vm0, %v942_v14  ;;  %v886_v24 = vmax.f32 %v722_v17, 0.0 }
 0x12d   : > { %v717_v23 = vadd.f32 %v7507_v41, %v716_v22  ;;  %v884_v26 = vmax.f32 %v714_v19, 0.0 }
 0x12e   : > { %v887_v25 = vmax.f32 %v725_v21, 0.0 }
 0x12f   : > { %v885_v27 = vmax.f32 %v717_v23, 0.0 }
 0x130   : > { %v944_v28 = vpack.c.bf16 %v887_v25, %v886_v24 }
 0x131   : > { %v943_v29 = vpack.c.bf16 %v885_v27, %v884_v26  ;;  %v6439_v30 = vpop.f32.mrb[32].mxu0 }
 0x132   : > { %v738_v31 = vadd.f32 %v6439_v30, %v7507_v41  ;;  %v729_v32 = vpop.f32.mrb[33].mxu0 }
 0x133   : > { %v730_v33 = vadd.f32 %v7507_v41, %v729_v32  ;;  %v6440_v34 = vpop.f32.mrb[34].mxu0  ;;  %6505 = vmatprep.mubr.msk.bf16.mxu1 %vm470_vm0, %v943_v29 }
 0x134   : > { %v741_v35 = vadd.f32 %v6440_v34, %v7507_v41  ;;  %v732_v36 = vpop.f32.mrb[35].mxu0  ;;  %6506 = vmatmul.mubr.msk.bf16.gmra.mrb[28].mxu1 %vm470_vm0, %v944_v28  ;;  %v890_v38 = vmax.f32 %v738_v31, 0.0 }
 0x135   : > { %v733_v37 = vadd.f32 %v7507_v41, %v732_v36  ;;  %v888_v40 = vmax.f32 %v730_v33, 0.0 }
 0x136   : > { %v891_v39 = vmax.f32 %v741_v35, 0.0 }
 0x137   : > { %v889_v42 = vmax.f32 %v733_v37, 0.0 }
 0x138   : > { %v946_v43 = vpack.c.bf16 %v891_v39, %v890_v38 }
 0x139   : > { %v945_v44 = vpack.c.bf16 %v889_v42, %v888_v40  ;;  %v6443_v45 = vpop.f32.mrb[36].mxu0 }
 0x13a   : > { %v754_v46 = vadd.f32 %v6443_v45, %v7507_v41  ;;  %v745_v47 = vpop.f32.mrb[37].mxu0 }
 0x13b   : > { %v746_v48 = vadd.f32 %v7507_v41, %v745_v47  ;;  %v6444_v49 = vpop.f32.mrb[38].mxu0  ;;  %6509 = vmatprep.mubr.msk.bf16.mxu1 %vm470_vm0, %v945_v44 }
 0x13c   : > { %v757_v50 = vadd.f32 %v6444_v49, %v7507_v41  ;;  %v748_v51 = vpop.f32.mrb[39].mxu0  ;;  %6510 = vmatmul.mubr.msk.bf16.gmra.mrb[32].mxu1 %vm470_vm0, %v946_v43  ;;  %v894_v53 = vmax.f32 %v754_v46, 0.0 }
 0x13d   : > { %v749_v52 = vadd.f32 %v7507_v41, %v748_v51  ;;  %v892_v55 = vmax.f32 %v746_v48, 0.0 }
 0x13e   : > { %v895_v54 = vmax.f32 %v757_v50, 0.0 }
 0x13f   : > { %v893_v56 = vmax.f32 %v749_v52, 0.0 }
 0x140   : > { %v948_v57 = vpack.c.bf16 %v895_v54, %v894_v53 }
 0x141   : > { %v947_v58 = vpack.c.bf16 %v893_v56, %v892_v55  ;;  %v6447_v59 = vpop.f32.mrb[40].mxu0 }
 0x142   : > { %v770_v60 = vadd.f32 %v6447_v59, %v7507_v41  ;;  %v761_v61 = vpop.f32.mrb[41].mxu0 }
 0x143   : > { %v762_v62 = vadd.f32 %v7507_v41, %v761_v61  ;;  %v6448_v63 = vpop.f32.mrb[42].mxu0  ;;  %6513 = vmatprep.mubr.msk.bf16.mxu1 %vm470_vm0, %v947_v58 }
 0x144   : > { %v773_v0 = vadd.f32 %v6448_v63, %v7507_v41  ;;  %v764_v1 = vpop.f32.mrb[43].mxu0  ;;  %6514 = vmatmul.mubr.msk.bf16.gmra.mrb[36].mxu1 %vm470_vm0, %v948_v57  ;;  %v898_v3 = vmax.f32 %v770_v60, 0.0 }
 0x145   : > { %v765_v2 = vadd.f32 %v7507_v41, %v764_v1  ;;  %v896_v5 = vmax.f32 %v762_v62, 0.0 }
 0x146   : > { %v899_v4 = vmax.f32 %v773_v0, 0.0 }
 0x147   : > { %v897_v6 = vmax.f32 %v765_v2, 0.0 }
 0x148   : > { %v950_v7 = vpack.c.bf16 %v899_v4, %v898_v3 }
 0x149   : > { %v949_v8 = vpack.c.bf16 %v897_v6, %v896_v5  ;;  %v6451_v9 = vpop.f32.mrb[44].mxu0 }
 0x14a   : > { %v786_v10 = vadd.f32 %v6451_v9, %v7507_v41  ;;  %v777_v11 = vpop.f32.mrb[45].mxu0 }
 0x14b   : > { %v778_v12 = vadd.f32 %v7507_v41, %v777_v11  ;;  %v6452_v13 = vpop.f32.mrb[46].mxu0  ;;  %6517 = vmatprep.mubr.msk.bf16.mxu1 %vm470_vm0, %v949_v8 }
 0x14c   : > { %v789_v14 = vadd.f32 %v6452_v13, %v7507_v41  ;;  %v780_v15 = vpop.f32.mrb[47].mxu0  ;;  %6518 = vmatmul.mubr.msk.bf16.gmra.mrb[40].mxu1 %vm470_vm0, %v950_v7  ;;  %v902_v17 = vmax.f32 %v786_v10, 0.0 }
 0x14d   : > { %v781_v16 = vadd.f32 %v7507_v41, %v780_v15  ;;  %v900_v19 = vmax.f32 %v778_v12, 0.0 }
 0x14e   : > { %v903_v18 = vmax.f32 %v789_v14, 0.0 }
 0x14f   : > { %v901_v20 = vmax.f32 %v781_v16, 0.0  ;;  %v7178_v16 = vld [vmem:[%s8679_s3 + $0x40] sm:$0xff]  }
 0x150   : > { %v952_v21 = vpack.c.bf16 %v903_v18, %v902_v17  ;;  %6613 = vmatprep.subr.bf16.mxu1 %v7178_v16 }
 0x151   : > { %v951_v22 = vpack.c.bf16 %v901_v20, %v900_v19  ;;  %v6455_v23 = vpop.f32.mrb[48].mxu0  ;;  %6614 = vmatpush3.bf16.msra.mxu1 %v7178_v16 }
 0x152   : > { %v802_v24 = vadd.f32 %v6455_v23, %v7507_v41  ;;  %v793_v25 = vpop.f32.mrb[49].mxu0 }
 0x153   : > { %v794_v26 = vadd.f32 %v7507_v41, %v793_v25  ;;  %v6456_v27 = vpop.f32.mrb[50].mxu0  ;;  %6521 = vmatprep.mubr.msk.bf16.mxu1 %vm470_vm0, %v951_v22  ;;  %v7180_v25 = vld [vmem:[%s8679_s3 + $0x50] sm:$0xff]  }
 0x154   : > { %v805_v28 = vadd.f32 %v6456_v27, %v7507_v41  ;;  %v796_v29 = vpop.f32.mrb[51].mxu0  ;;  %6522 = vmatmul.mubr.msk.bf16.gmra.mrb[44].mxu1 %vm470_vm0, %v952_v21  ;;  %v906_v31 = vmax.f32 %v802_v24, 0.0  ;;  %v7179_v24 = vld [vmem:[%s8679_s3 + $0x48] sm:$0xff]  }
 0x155   : > { %v797_v30 = vadd.f32 %v7507_v41, %v796_v29  ;;  %v904_v33 = vmax.f32 %v794_v26, 0.0  ;;  %6615 = vmatprep.subr.bf16.mxu1 %v7179_v24 }
 0x156   : > { %v907_v32 = vmax.f32 %v805_v28, 0.0  ;;  %6616 = vmatpush3.bf16.msra.mxu1 %v7179_v24 }
 0x157   : > { %v905_v34 = vmax.f32 %v797_v30, 0.0  ;;  %6617 = vmatprep.subr.bf16.mxu1 %v7180_v25 }
 0x158   : > { %v954_v35 = vpack.c.bf16 %v907_v32, %v906_v31  ;;  %v7181_v32 = vld [vmem:[%s8679_s3 + $0x58] sm:$0xff]  }
 0x159   : > { %v953_v36 = vpack.c.bf16 %v905_v34, %v904_v33  ;;  %v6459_v37 = vpop.f32.mrb[52].mxu0 }
 0x15a   : > { %v818_v38 = vadd.f32 %v6459_v37, %v7507_v41  ;;  %v809_v39 = vpop.f32.mrb[53].mxu0  ;;  %6618 = vmatpush3.bf16.msra.mxu1 %v7180_v25 }
 0x15b   : > { %v810_v40 = vadd.f32 %v7507_v41, %v809_v39  ;;  %v6460_v42 = vpop.f32.mrb[54].mxu0  ;;  %6525 = vmatprep.mubr.msk.bf16.mxu1 %vm470_vm0, %v953_v36  ;;  %6619 = vmatprep.subr.bf16.mxu1 %v7181_v32 }
 0x15c   : > { %v821_v43 = vadd.f32 %v6460_v42, %v7507_v41  ;;  %v812_v44 = vpop.f32.mrb[55].mxu0  ;;  %6526 = vmatmul.mubr.msk.bf16.gmra.mrb[48].mxu1 %vm470_vm0, %v954_v35  ;;  %v910_v46 = vmax.f32 %v818_v38, 0.0 }
 0x15d   : > { %v813_v45 = vadd.f32 %v7507_v41, %v812_v44  ;;  %v908_v48 = vmax.f32 %v810_v40, 0.0 }
 0x15e   : > { %v911_v47 = vmax.f32 %v821_v43, 0.0  ;;  %6620 = vmatpush3.bf16.msra.mxu1 %v7181_v32 }
 0x15f   : > { %v909_v49 = vmax.f32 %v813_v45, 0.0 }
 0x160   : > { %v956_v50 = vpack.c.bf16 %v911_v47, %v910_v46 }
 0x161   : > { %v955_v51 = vpack.c.bf16 %v909_v49, %v908_v48  ;;  %v6463_v52 = vpop.f32.mrb[56].mxu0 }
 0x162   : > { %v834_v53 = vadd.f32 %v6463_v52, %v7507_v41  ;;  %v825_v54 = vpop.f32.mrb[57].mxu0 }
 0x163   : > { %v826_v55 = vadd.f32 %v7507_v41, %v825_v54  ;;  %v6464_v56 = vpop.f32.mrb[58].mxu0  ;;  %6529 = vmatprep.mubr.msk.bf16.mxu1 %vm470_vm0, %v955_v51 }
 0x164   : > { %v837_v57 = vadd.f32 %v6464_v56, %v7507_v41  ;;  %v828_v58 = vpop.f32.mrb[59].mxu0  ;;  %6530 = vmatmul.mubr.msk.bf16.gmra.mrb[52].mxu1 %vm470_vm0, %v956_v50  ;;  %v914_v60 = vmax.f32 %v834_v53, 0.0 }
 0x165   : > { %v829_v59 = vadd.f32 %v7507_v41, %v828_v58  ;;  %v912_v62 = vmax.f32 %v826_v55, 0.0 }
 0x166   : > { %v915_v61 = vmax.f32 %v837_v57, 0.0 }
 0x167   : > { %v913_v63 = vmax.f32 %v829_v59, 0.0 }
 0x168   : > { %v958_v0 = vpack.c.bf16 %v915_v61, %v914_v60 }
 0x169   : > { %v957_v1 = vpack.c.bf16 %v913_v63, %v912_v62  ;;  %v6467_v2 = vpop.f32.mrb[60].mxu0 }
 0x16a   : > { %v850_v3 = vadd.f32 %v6467_v2, %v7507_v41  ;;  %v841_v4 = vpop.f32.mrb[61].mxu0 }
 0x16b   : > { %v842_v5 = vadd.f32 %v7507_v41, %v841_v4  ;;  %v6468_v6 = vpop.f32.mrb[62].mxu0  ;;  %6533 = vmatprep.mubr.msk.bf16.mxu1 %vm470_vm0, %v957_v1 }
 0x16c   : > { %v853_v7 = vadd.f32 %v6468_v6, %v7507_v41  ;;  %v844_v8 = vpop.f32.mrb[63].mxu0  ;;  %6534 = vmatmul.mubr.msk.bf16.gmra.mrb[56].mxu1 %vm470_vm0, %v958_v0  ;;  %v918_v10 = vmax.f32 %v850_v3, 0.0 }
 0x16d   : > { %v845_v9 = vadd.f32 %v7507_v41, %v844_v8  ;;  %v916_v12 = vmax.f32 %v842_v5, 0.0  ;;  %v7620_v41 = vld [vmem:[%s8680_s4] ss:$0 sm:$0xff] }
 0x16e   : > { %v919_v11 = vmax.f32 %v853_v7, 0.0 }
 0x16f   : > { %v917_v13 = vmax.f32 %v845_v9, 0.0 }
 0x170   : > { %v960_v14 = vpack.c.bf16 %v919_v11, %v918_v10 }
 0x171   : > { %v959_v15 = vpack.c.bf16 %v917_v13, %v916_v12 }
 0x173   : > { %6537 = vmatprep.mubr.msk.bf16.mxu1 %vm470_vm0, %v959_v15 }
 0x174   : > { %6538 = vmatmul.mubr.msk.bf16.gmra.mrb[60].mxu1 %vm470_vm0, %v960_v14 }
 0x1cf   : > { %v6479_v17 = vpop.f32.mrb[0].mxu1 }
 0x1d0   : > { %v1130_v18 = vadd.f32 %v6479_v17, %v7620_v41  ;;  %v1121_v19 = vpop.f32.mrb[1].mxu1 }
 0x1d1   : > { %v1122_v20 = vadd.f32 %v7620_v41, %v1121_v19  ;;  %v6480_v21 = vpop.f32.mrb[2].mxu1 }
 0x1d2   : > { %v1133_v22 = vadd.f32 %v6480_v21, %v7620_v41  ;;  %v1124_v23 = vpop.f32.mrb[3].mxu1  ;;  %v1378_v27 = vmax.f32 %v1130_v18, 0.0 }
 0x1d3   : > { %v1125_v26 = vadd.f32 %v7620_v41, %v1124_v23  ;;  %v1376_v29 = vmax.f32 %v1122_v20, 0.0 }
 0x1d4   : > { %v1379_v28 = vmax.f32 %v1133_v22, 0.0 }
 0x1d5   : > { %v1377_v30 = vmax.f32 %v1125_v26, 0.0 }
 0x1d6   : > { %v1452_v31 = vpack.c.bf16 %v1379_v28, %v1378_v27 }
 0x1d7   : > { %v1451_v33 = vpack.c.bf16 %v1377_v30, %v1376_v29  ;;  %v6483_v34 = vpop.f32.mrb[4].mxu1 }
 0x1d8   : > { %v1146_v35 = vadd.f32 %v6483_v34, %v7620_v41  ;;  %v1137_v36 = vpop.f32.mrb[5].mxu1 }
 0x1d9   : > { %v1138_v37 = vadd.f32 %v7620_v41, %v1137_v36  ;;  %v6484_v38 = vpop.f32.mrb[6].mxu1  ;;  %6549 = vmatprep.mubr.msk.bf16.mxu0 %vm470_vm0, %v1451_v33 }
 0x1da   : > { %v1149_v39 = vadd.f32 %v6484_v38, %v7620_v41  ;;  %v1140_v40 = vpop.f32.mrb[7].mxu1  ;;  %6550 = vmatmul.mubr.msk.bf16.vlgmr.msra.gmra.mrb[64].mxu0 %vm470_vm0, %v1452_v31  ;;  %v1382_v43 = vmax.f32 %v1146_v35, 0.0 }
 0x1db   : > { %v1141_v42 = vadd.f32 %v7620_v41, %v1140_v40  ;;  %v1380_v45 = vmax.f32 %v1138_v37, 0.0 }
 0x1dc   : > { %v1383_v44 = vmax.f32 %v1149_v39, 0.0 }
 0x1dd   : > { %v1381_v46 = vmax.f32 %v1141_v42, 0.0 }
 0x1de   : > { %v1454_v47 = vpack.c.bf16 %v1383_v44, %v1382_v43 }
 0x1df   : > { %v1453_v48 = vpack.c.bf16 %v1381_v46, %v1380_v45  ;;  %v6487_v49 = vpop.f32.mrb[8].mxu1 }
 0x1e0   : > { %v1162_v50 = vadd.f32 %v6487_v49, %v7620_v41  ;;  %v1153_v51 = vpop.f32.mrb[9].mxu1 }
 0x1e1   : > { %v1154_v52 = vadd.f32 %v7620_v41, %v1153_v51  ;;  %v6488_v53 = vpop.f32.mrb[10].mxu1  ;;  %6553 = vmatprep.mubr.msk.bf16.mxu0 %vm470_vm0, %v1453_v48 }
 0x1e2   : > { %v1165_v54 = vadd.f32 %v6488_v53, %v7620_v41  ;;  %v1156_v55 = vpop.f32.mrb[11].mxu1  ;;  %6554 = vmatmul.mubr.msk.bf16.gmra.mrb[68].mxu0 %vm470_vm0, %v1454_v47  ;;  %v1386_v57 = vmax.f32 %v1162_v50, 0.0 }
 0x1e3   : > { %v1157_v56 = vadd.f32 %v7620_v41, %v1156_v55  ;;  %v1384_v59 = vmax.f32 %v1154_v52, 0.0 }
 0x1e4   : > { %v1387_v58 = vmax.f32 %v1165_v54, 0.0 }
 0x1e5   : > { %v1385_v60 = vmax.f32 %v1157_v56, 0.0 }
 0x1e6   : > { %v1456_v61 = vpack.c.bf16 %v1387_v58, %v1386_v57 }
 0x1e7   : > { %v1455_v62 = vpack.c.bf16 %v1385_v60, %v1384_v59  ;;  %v6491_v63 = vpop.f32.mrb[12].mxu1 }
 0x1e8   : > { %v1178_v0 = vadd.f32 %v6491_v63, %v7620_v41  ;;  %v1169_v1 = vpop.f32.mrb[13].mxu1 }
 0x1e9   : > { %v1170_v2 = vadd.f32 %v7620_v41, %v1169_v1  ;;  %v6492_v3 = vpop.f32.mrb[14].mxu1  ;;  %6557 = vmatprep.mubr.msk.bf16.mxu0 %vm470_vm0, %v1455_v62 }
 0x1ea   : > { %v1181_v4 = vadd.f32 %v6492_v3, %v7620_v41  ;;  %v1172_v5 = vpop.f32.mrb[15].mxu1  ;;  %6558 = vmatmul.mubr.msk.bf16.gmra.mrb[72].mxu0 %vm470_vm0, %v1456_v61  ;;  %v1390_v7 = vmax.f32 %v1178_v0, 0.0 }
 0x1eb   : > { %v1173_v6 = vadd.f32 %v7620_v41, %v1172_v5  ;;  %v1388_v9 = vmax.f32 %v1170_v2, 0.0 }
 0x1ec   : > { %v1391_v8 = vmax.f32 %v1181_v4, 0.0 }
 0x1ed   : > { %v1389_v10 = vmax.f32 %v1173_v6, 0.0 }
 0x1ee   : > { %v1458_v11 = vpack.c.bf16 %v1391_v8, %v1390_v7 }
 0x1ef   : > { %v1457_v12 = vpack.c.bf16 %v1389_v10, %v1388_v9  ;;  %v6495_v13 = vpop.f32.mrb[16].mxu1 }
 0x1f0   : > { %v1194_v14 = vadd.f32 %v6495_v13, %v7620_v41  ;;  %v1185_v15 = vpop.f32.mrb[17].mxu1 }
 0x1f1   : > { %v1186_v16 = vadd.f32 %v7620_v41, %v1185_v15  ;;  %v6496_v17 = vpop.f32.mrb[18].mxu1  ;;  %6561 = vmatprep.mubr.msk.bf16.mxu0 %vm470_vm0, %v1457_v12 }
 0x1f2   : > { %v1197_v18 = vadd.f32 %v6496_v17, %v7620_v41  ;;  %v1188_v19 = vpop.f32.mrb[19].mxu1  ;;  %6562 = vmatmul.mubr.msk.bf16.gmra.mrb[76].mxu0 %vm470_vm0, %v1458_v11  ;;  %v1394_v21 = vmax.f32 %v1194_v14, 0.0 }
 0x1f3   : > { %v1189_v20 = vadd.f32 %v7620_v41, %v1188_v19  ;;  %v1392_v23 = vmax.f32 %v1186_v16, 0.0 }
 0x1f4   : > { %v1395_v22 = vmax.f32 %v1197_v18, 0.0 }
 0x1f5   : > { %v1393_v24 = vmax.f32 %v1189_v20, 0.0 }
 0x1f6   : > { %v1460_v25 = vpack.c.bf16 %v1395_v22, %v1394_v21 }
 0x1f7   : > { %v1459_v26 = vpack.c.bf16 %v1393_v24, %v1392_v23  ;;  %v6499_v27 = vpop.f32.mrb[20].mxu1 }
 0x1f8   : > { %v1210_v28 = vadd.f32 %v6499_v27, %v7620_v41  ;;  %v1201_v29 = vpop.f32.mrb[21].mxu1 }
 0x1f9   : > { %v1202_v30 = vadd.f32 %v7620_v41, %v1201_v29  ;;  %v6500_v31 = vpop.f32.mrb[22].mxu1  ;;  %6565 = vmatprep.mubr.msk.bf16.mxu0 %vm470_vm0, %v1459_v26 }
 0x1fa   : > { %v1213_v32 = vadd.f32 %v6500_v31, %v7620_v41  ;;  %v1204_v33 = vpop.f32.mrb[23].mxu1  ;;  %6566 = vmatmul.mubr.msk.bf16.gmra.mrb[80].mxu0 %vm470_vm0, %v1460_v25  ;;  %v1398_v35 = vmax.f32 %v1210_v28, 0.0 }
 0x1fb   : > { %v1205_v34 = vadd.f32 %v7620_v41, %v1204_v33  ;;  %v1396_v37 = vmax.f32 %v1202_v30, 0.0 }
 0x1fc   : > { %v1399_v36 = vmax.f32 %v1213_v32, 0.0 }
 0x1fd   : > { %v1397_v38 = vmax.f32 %v1205_v34, 0.0 }
 0x1fe   : > { %v1462_v39 = vpack.c.bf16 %v1399_v36, %v1398_v35 }
 0x1ff   : > { %v1461_v40 = vpack.c.bf16 %v1397_v38, %v1396_v37  ;;  %v6503_v42 = vpop.f32.mrb[24].mxu1 }
 0x200   : > { %v1226_v43 = vadd.f32 %v6503_v42, %v7620_v41  ;;  %v1217_v44 = vpop.f32.mrb[25].mxu1 }
 0x201   : > { %v1218_v45 = vadd.f32 %v7620_v41, %v1217_v44  ;;  %v6504_v46 = vpop.f32.mrb[26].mxu1  ;;  %6569 = vmatprep.mubr.msk.bf16.mxu0 %vm470_vm0, %v1461_v40 }
 0x202   : > { %v1229_v47 = vadd.f32 %v6504_v46, %v7620_v41  ;;  %v1220_v48 = vpop.f32.mrb[27].mxu1  ;;  %6570 = vmatmul.mubr.msk.bf16.gmra.mrb[84].mxu0 %vm470_vm0, %v1462_v39  ;;  %v1402_v50 = vmax.f32 %v1226_v43, 0.0 }
 0x203   : > { %v1221_v49 = vadd.f32 %v7620_v41, %v1220_v48  ;;  %v1400_v52 = vmax.f32 %v1218_v45, 0.0 }
 0x204   : > { %v1403_v51 = vmax.f32 %v1229_v47, 0.0 }
 0x205   : > { %v1401_v53 = vmax.f32 %v1221_v49, 0.0 }
 0x206   : > { %v1464_v54 = vpack.c.bf16 %v1403_v51, %v1402_v50 }
 0x207   : > { %v1463_v55 = vpack.c.bf16 %v1401_v53, %v1400_v52  ;;  %v6507_v56 = vpop.f32.mrb[28].mxu1 }
 0x208   : > { %v1242_v57 = vadd.f32 %v6507_v56, %v7620_v41  ;;  %v1233_v58 = vpop.f32.mrb[29].mxu1 }
 0x209   : > { %v1234_v59 = vadd.f32 %v7620_v41, %v1233_v58  ;;  %v6508_v60 = vpop.f32.mrb[30].mxu1  ;;  %6573 = vmatprep.mubr.msk.bf16.mxu0 %vm470_vm0, %v1463_v55 }
 0x20a   : > { %v1245_v61 = vadd.f32 %v6508_v60, %v7620_v41  ;;  %v1236_v62 = vpop.f32.mrb[31].mxu1  ;;  %6574 = vmatmul.mubr.msk.bf16.gmra.mrb[88].mxu0 %vm470_vm0, %v1464_v54  ;;  %v1406_v0 = vmax.f32 %v1242_v57, 0.0 }
 0x20b   : > { %v1237_v63 = vadd.f32 %v7620_v41, %v1236_v62  ;;  %v1404_v2 = vmax.f32 %v1234_v59, 0.0 }
 0x20c   : > { %v1407_v1 = vmax.f32 %v1245_v61, 0.0 }
 0x20d   : > { %v1405_v3 = vmax.f32 %v1237_v63, 0.0 }
 0x20e   : > { %v1466_v4 = vpack.c.bf16 %v1407_v1, %v1406_v0 }
 0x20f   : > { %v1465_v5 = vpack.c.bf16 %v1405_v3, %v1404_v2  ;;  %v6511_v6 = vpop.f32.mrb[32].mxu1 }
 0x210   : > { %v1258_v7 = vadd.f32 %v6511_v6, %v7620_v41  ;;  %v1249_v8 = vpop.f32.mrb[33].mxu1 }
 0x211   : > { %v1250_v9 = vadd.f32 %v7620_v41, %v1249_v8  ;;  %v6512_v10 = vpop.f32.mrb[34].mxu1  ;;  %6577 = vmatprep.mubr.msk.bf16.mxu0 %vm470_vm0, %v1465_v5 }
 0x212   : > { %v1261_v11 = vadd.f32 %v6512_v10, %v7620_v41  ;;  %v1252_v12 = vpop.f32.mrb[35].mxu1  ;;  %6578 = vmatmul.mubr.msk.bf16.gmra.mrb[92].mxu0 %vm470_vm0, %v1466_v4  ;;  %v1410_v14 = vmax.f32 %v1258_v7, 0.0 }
 0x213   : > { %v1253_v13 = vadd.f32 %v7620_v41, %v1252_v12  ;;  %v1408_v16 = vmax.f32 %v1250_v9, 0.0 }
 0x214   : > { %v1411_v15 = vmax.f32 %v1261_v11, 0.0 }
 0x215   : > { %v1409_v17 = vmax.f32 %v1253_v13, 0.0 }
 0x216   : > { %v1468_v18 = vpack.c.bf16 %v1411_v15, %v1410_v14 }
 0x217   : > { %v1467_v19 = vpack.c.bf16 %v1409_v17, %v1408_v16  ;;  %v6515_v20 = vpop.f32.mrb[36].mxu1 }
 0x218   : > { %v1274_v21 = vadd.f32 %v6515_v20, %v7620_v41  ;;  %v1265_v22 = vpop.f32.mrb[37].mxu1 }
 0x219   : > { %v1266_v23 = vadd.f32 %v7620_v41, %v1265_v22  ;;  %v6516_v24 = vpop.f32.mrb[38].mxu1  ;;  %6581 = vmatprep.mubr.msk.bf16.mxu0 %vm470_vm0, %v1467_v19 }
 0x21a   : > { %v1277_v25 = vadd.f32 %v6516_v24, %v7620_v41  ;;  %v1268_v26 = vpop.f32.mrb[39].mxu1  ;;  %6582 = vmatmul.mubr.msk.bf16.gmra.mrb[96].mxu0 %vm470_vm0, %v1468_v18  ;;  %v1414_v28 = vmax.f32 %v1274_v21, 0.0 }
 0x21b   : > { %v1269_v27 = vadd.f32 %v7620_v41, %v1268_v26  ;;  %v1412_v30 = vmax.f32 %v1266_v23, 0.0 }
 0x21c   : > { %v1415_v29 = vmax.f32 %v1277_v25, 0.0 }
 0x21d   : > { %v1413_v31 = vmax.f32 %v1269_v27, 0.0 }
 0x21e   : > { %v1470_v32 = vpack.c.bf16 %v1415_v29, %v1414_v28 }
 0x21f   : > { %v1469_v33 = vpack.c.bf16 %v1413_v31, %v1412_v30  ;;  %v6519_v34 = vpop.f32.mrb[40].mxu1 }
 0x220   : > { %v1290_v35 = vadd.f32 %v6519_v34, %v7620_v41  ;;  %v1281_v36 = vpop.f32.mrb[41].mxu1 }
 0x221   : > { %v1282_v37 = vadd.f32 %v7620_v41, %v1281_v36  ;;  %v6520_v38 = vpop.f32.mrb[42].mxu1  ;;  %6585 = vmatprep.mubr.msk.bf16.mxu0 %vm470_vm0, %v1469_v33 }
 0x222   : > { %v1293_v39 = vadd.f32 %v6520_v38, %v7620_v41  ;;  %v1284_v40 = vpop.f32.mrb[43].mxu1  ;;  %6586 = vmatmul.mubr.msk.bf16.gmra.mrb[100].mxu0 %vm470_vm0, %v1470_v32  ;;  %v1418_v43 = vmax.f32 %v1290_v35, 0.0 }
 0x223   : > { %v1285_v42 = vadd.f32 %v7620_v41, %v1284_v40  ;;  %v1416_v45 = vmax.f32 %v1282_v37, 0.0 }
 0x224   : > { %v1419_v44 = vmax.f32 %v1293_v39, 0.0 }
 0x225   : > { %v1417_v46 = vmax.f32 %v1285_v42, 0.0 }
 0x226   : > { %v1472_v47 = vpack.c.bf16 %v1419_v44, %v1418_v43 }
 0x227   : > { %v1471_v48 = vpack.c.bf16 %v1417_v46, %v1416_v45  ;;  %v6523_v49 = vpop.f32.mrb[44].mxu1 }
 0x228   : > { %v1306_v50 = vadd.f32 %v6523_v49, %v7620_v41  ;;  %v1297_v51 = vpop.f32.mrb[45].mxu1 }
 0x229   : > { %v1298_v52 = vadd.f32 %v7620_v41, %v1297_v51  ;;  %v6524_v53 = vpop.f32.mrb[46].mxu1  ;;  %6589 = vmatprep.mubr.msk.bf16.mxu0 %vm470_vm0, %v1471_v48 }
 0x22a   : > { %v1309_v54 = vadd.f32 %v6524_v53, %v7620_v41  ;;  %v1300_v55 = vpop.f32.mrb[47].mxu1  ;;  %6590 = vmatmul.mubr.msk.bf16.gmra.mrb[104].mxu0 %vm470_vm0, %v1472_v47  ;;  %v1422_v57 = vmax.f32 %v1306_v50, 0.0 }
 0x22b   : > { %v1301_v56 = vadd.f32 %v7620_v41, %v1300_v55  ;;  %v1420_v59 = vmax.f32 %v1298_v52, 0.0 }
 0x22c   : > { %v1423_v58 = vmax.f32 %v1309_v54, 0.0 }
 0x22d   : > { %v1421_v60 = vmax.f32 %v1301_v56, 0.0  ;;  %v7182_v56 = vld [vmem:[%s8679_s3 + $0x60] sm:$0xff]  }
 0x22e   : > { %v1474_v61 = vpack.c.bf16 %v1423_v58, %v1422_v57  ;;  %6685 = vmatprep.subr.bf16.mxu0 %v7182_v56 }
 0x22f   : > { %v1473_v62 = vpack.c.bf16 %v1421_v60, %v1420_v59  ;;  %v6527_v63 = vpop.f32.mrb[48].mxu1  ;;  %6686 = vmatpush3.bf16.msra.mxu0 %v7182_v56 }
 0x230   : > { %v1322_v0 = vadd.f32 %v6527_v63, %v7620_v41  ;;  %v1313_v1 = vpop.f32.mrb[49].mxu1 }
 0x231   : > { %v1314_v2 = vadd.f32 %v7620_v41, %v1313_v1  ;;  %v6528_v3 = vpop.f32.mrb[50].mxu1  ;;  %6593 = vmatprep.mubr.msk.bf16.mxu0 %vm470_vm0, %v1473_v62  ;;  %v7184_v1 = vld [vmem:[%s8679_s3 + $0x70] sm:$0xff]  }
 0x232   : > { %v1325_v4 = vadd.f32 %v6528_v3, %v7620_v41  ;;  %v1316_v5 = vpop.f32.mrb[51].mxu1  ;;  %6594 = vmatmul.mubr.msk.bf16.gmra.mrb[108].mxu0 %vm470_vm0, %v1474_v61  ;;  %v1426_v7 = vmax.f32 %v1322_v0, 0.0  ;;  %v7183_v0 = vld [vmem:[%s8679_s3 + $0x68] sm:$0xff]  }
 0x233   : > { %v1317_v6 = vadd.f32 %v7620_v41, %v1316_v5  ;;  %v1424_v9 = vmax.f32 %v1314_v2, 0.0  ;;  %6687 = vmatprep.subr.bf16.mxu0 %v7183_v0 }
 0x234   : > { %v1427_v8 = vmax.f32 %v1325_v4, 0.0  ;;  %6688 = vmatpush3.bf16.msra.mxu0 %v7183_v0 }
 0x235   : > { %v1425_v10 = vmax.f32 %v1317_v6, 0.0  ;;  %6689 = vmatprep.subr.bf16.mxu0 %v7184_v1 }
 0x236   : > { %v1476_v11 = vpack.c.bf16 %v1427_v8, %v1426_v7  ;;  %v7185_v8 = vld [vmem:[%s8679_s3 + $0x78] sm:$0xff]  }
 0x237   : > { %v1475_v12 = vpack.c.bf16 %v1425_v10, %v1424_v9  ;;  %v6531_v13 = vpop.f32.mrb[52].mxu1 }
 0x238   : > { %v1338_v14 = vadd.f32 %v6531_v13, %v7620_v41  ;;  %v1329_v15 = vpop.f32.mrb[53].mxu1  ;;  %6690 = vmatpush3.bf16.msra.mxu0 %v7184_v1 }
 0x239   : > { %v1330_v16 = vadd.f32 %v7620_v41, %v1329_v15  ;;  %v6532_v17 = vpop.f32.mrb[54].mxu1  ;;  %6597 = vmatprep.mubr.msk.bf16.mxu0 %vm470_vm0, %v1475_v12  ;;  %6691 = vmatprep.subr.bf16.mxu0 %v7185_v8 }
 0x23a   : > { %v1341_v18 = vadd.f32 %v6532_v17, %v7620_v41  ;;  %v1332_v19 = vpop.f32.mrb[55].mxu1  ;;  %6598 = vmatmul.mubr.msk.bf16.gmra.mrb[112].mxu0 %vm470_vm0, %v1476_v11  ;;  %v1430_v21 = vmax.f32 %v1338_v14, 0.0 }
 0x23b   : > { %v1333_v20 = vadd.f32 %v7620_v41, %v1332_v19  ;;  %v1428_v23 = vmax.f32 %v1330_v16, 0.0 }
 0x23c   : > { %v1431_v22 = vmax.f32 %v1341_v18, 0.0  ;;  %6692 = vmatpush3.bf16.msra.mxu0 %v7185_v8 }
 0x23d   : > { %v1429_v24 = vmax.f32 %v1333_v20, 0.0 }
 0x23e   : > { %v1478_v25 = vpack.c.bf16 %v1431_v22, %v1430_v21 }
 0x23f   : > { %v1477_v26 = vpack.c.bf16 %v1429_v24, %v1428_v23  ;;  %v6535_v27 = vpop.f32.mrb[56].mxu1 }
 0x240   : > { %v1354_v28 = vadd.f32 %v6535_v27, %v7620_v41  ;;  %v1345_v29 = vpop.f32.mrb[57].mxu1 }
 0x241   : > { %v1346_v30 = vadd.f32 %v7620_v41, %v1345_v29  ;;  %v6536_v31 = vpop.f32.mrb[58].mxu1  ;;  %6601 = vmatprep.mubr.msk.bf16.mxu0 %vm470_vm0, %v1477_v26 }
 0x242   : > { %v1357_v32 = vadd.f32 %v6536_v31, %v7620_v41  ;;  %v1348_v33 = vpop.f32.mrb[59].mxu1  ;;  %6602 = vmatmul.mubr.msk.bf16.gmra.mrb[116].mxu0 %vm470_vm0, %v1478_v25  ;;  %v1434_v35 = vmax.f32 %v1354_v28, 0.0 }
 0x243   : > { %v1349_v34 = vadd.f32 %v7620_v41, %v1348_v33  ;;  %v1432_v37 = vmax.f32 %v1346_v30, 0.0 }
 0x244   : > { %v1435_v36 = vmax.f32 %v1357_v32, 0.0 }
 0x245   : > { %v1433_v38 = vmax.f32 %v1349_v34, 0.0 }
 0x246   : > { %v1480_v39 = vpack.c.bf16 %v1435_v36, %v1434_v35 }
 0x247   : > { %v1479_v40 = vpack.c.bf16 %v1433_v38, %v1432_v37  ;;  %v6539_v42 = vpop.f32.mrb[60].mxu1 }
 0x248   : > { %v1370_v43 = vadd.f32 %v6539_v42, %v7620_v41  ;;  %v1361_v44 = vpop.f32.mrb[61].mxu1 }
 0x249   : > { %v1362_v45 = vadd.f32 %v7620_v41, %v1361_v44  ;;  %v6540_v46 = vpop.f32.mrb[62].mxu1  ;;  %6605 = vmatprep.mubr.msk.bf16.mxu0 %vm470_vm0, %v1479_v40 }
 0x24a   : > { %v1373_v47 = vadd.f32 %v6540_v46, %v7620_v41  ;;  %v1364_v48 = vpop.f32.mrb[63].mxu1  ;;  %6606 = vmatmul.mubr.msk.bf16.gmra.mrb[120].mxu0 %vm470_vm0, %v1480_v39  ;;  %v1438_v50 = vmax.f32 %v1370_v43, 0.0 }
 0x24b   : > { %v1365_v49 = vadd.f32 %v7620_v41, %v1364_v48  ;;  %v1436_v52 = vmax.f32 %v1362_v45, 0.0  ;;  %v7733_v41 = vld [vmem:[%s8680_s4 + $0x1] ss:$0 sm:$0xff] }
 0x24c   : > { %v1439_v51 = vmax.f32 %v1373_v47, 0.0 }
 0x24d   : > { %v1437_v53 = vmax.f32 %v1365_v49, 0.0 }
 0x24e   : > { %v1482_v54 = vpack.c.bf16 %v1439_v51, %v1438_v50 }
 0x24f   : > { %v1481_v55 = vpack.c.bf16 %v1437_v53, %v1436_v52 }
 0x251   : > { %6609 = vmatprep.mubr.msk.bf16.mxu0 %vm470_vm0, %v1481_v55 }
 0x252   : > { %6610 = vmatmul.mubr.msk.bf16.gmra.mrb[124].mxu0 %vm470_vm0, %v1482_v54 }
 0x2ad   : > { %v6551_v57 = vpop.f32.mrb[64].mxu0 }
 0x2ae   : > { %v1652_v58 = vadd.f32 %v6551_v57, %v7733_v41  ;;  %v1643_v59 = vpop.f32.mrb[65].mxu0 }
 0x2af   : > { %v1644_v60 = vadd.f32 %v7733_v41, %v1643_v59  ;;  %v6552_v61 = vpop.f32.mrb[66].mxu0 }
 0x2b0   : > { %v1655_v62 = vadd.f32 %v6552_v61, %v7733_v41  ;;  %v1646_v63 = vpop.f32.mrb[67].mxu0  ;;  %v1900_v3 = vmax.f32 %v1652_v58, 0.0 }
 0x2b1   : > { %v1647_v2 = vadd.f32 %v7733_v41, %v1646_v63  ;;  %v1898_v5 = vmax.f32 %v1644_v60, 0.0 }
 0x2b2   : > { %v1901_v4 = vmax.f32 %v1655_v62, 0.0 }
 0x2b3   : > { %v1899_v6 = vmax.f32 %v1647_v2, 0.0 }
 0x2b4   : > { %v1974_v7 = vpack.c.bf16 %v1901_v4, %v1900_v3 }
 0x2b5   : > { %v1973_v9 = vpack.c.bf16 %v1899_v6, %v1898_v5  ;;  %v6555_v10 = vpop.f32.mrb[68].mxu0 }
 0x2b6   : > { %v1668_v11 = vadd.f32 %v6555_v10, %v7733_v41  ;;  %v1659_v12 = vpop.f32.mrb[69].mxu0 }
 0x2b7   : > { %v1660_v13 = vadd.f32 %v7733_v41, %v1659_v12  ;;  %v6556_v14 = vpop.f32.mrb[70].mxu0  ;;  %6621 = vmatprep.mubr.msk.bf16.mxu1 %vm470_vm0, %v1973_v9 }
 0x2b8   : > { %v1671_v15 = vadd.f32 %v6556_v14, %v7733_v41  ;;  %v1662_v16 = vpop.f32.mrb[71].mxu0  ;;  %6622 = vmatmul.mubr.msk.bf16.vlgmr.msra.gmra.mrb[64].mxu1 %vm470_vm0, %v1974_v7  ;;  %v1904_v18 = vmax.f32 %v1668_v11, 0.0 }
 0x2b9   : > { %v1663_v17 = vadd.f32 %v7733_v41, %v1662_v16  ;;  %v1902_v20 = vmax.f32 %v1660_v13, 0.0 }
 0x2ba   : > { %v1905_v19 = vmax.f32 %v1671_v15, 0.0 }
 0x2bb   : > { %v1903_v21 = vmax.f32 %v1663_v17, 0.0 }
 0x2bc   : > { %v1976_v22 = vpack.c.bf16 %v1905_v19, %v1904_v18 }
 0x2bd   : > { %v1975_v23 = vpack.c.bf16 %v1903_v21, %v1902_v20  ;;  %v6559_v24 = vpop.f32.mrb[72].mxu0 }
 0x2be   : > { %v1684_v25 = vadd.f32 %v6559_v24, %v7733_v41  ;;  %v1675_v26 = vpop.f32.mrb[73].mxu0 }
 0x2bf   : > { %v1676_v27 = vadd.f32 %v7733_v41, %v1675_v26  ;;  %v6560_v28 = vpop.f32.mrb[74].mxu0  ;;  %6625 = vmatprep.mubr.msk.bf16.mxu1 %vm470_vm0, %v1975_v23 }
 0x2c0   : > { %v1687_v29 = vadd.f32 %v6560_v28, %v7733_v41  ;;  %v1678_v30 = vpop.f32.mrb[75].mxu0  ;;  %6626 = vmatmul.mubr.msk.bf16.gmra.mrb[68].mxu1 %vm470_vm0, %v1976_v22  ;;  %v1908_v32 = vmax.f32 %v1684_v25, 0.0 }
 0x2c1   : > { %v1679_v31 = vadd.f32 %v7733_v41, %v1678_v30  ;;  %v1906_v34 = vmax.f32 %v1676_v27, 0.0 }
 0x2c2   : > { %v1909_v33 = vmax.f32 %v1687_v29, 0.0 }
 0x2c3   : > { %v1907_v35 = vmax.f32 %v1679_v31, 0.0 }
 0x2c4   : > { %v1978_v36 = vpack.c.bf16 %v1909_v33, %v1908_v32 }
 0x2c5   : > { %v1977_v37 = vpack.c.bf16 %v1907_v35, %v1906_v34  ;;  %v6563_v38 = vpop.f32.mrb[76].mxu0 }
 0x2c6   : > { %v1700_v39 = vadd.f32 %v6563_v38, %v7733_v41  ;;  %v1691_v40 = vpop.f32.mrb[77].mxu0 }
 0x2c7   : > { %v1692_v42 = vadd.f32 %v7733_v41, %v1691_v40  ;;  %v6564_v43 = vpop.f32.mrb[78].mxu0  ;;  %6629 = vmatprep.mubr.msk.bf16.mxu1 %vm470_vm0, %v1977_v37 }
 0x2c8   : > { %v1703_v44 = vadd.f32 %v6564_v43, %v7733_v41  ;;  %v1694_v45 = vpop.f32.mrb[79].mxu0  ;;  %6630 = vmatmul.mubr.msk.bf16.gmra.mrb[72].mxu1 %vm470_vm0, %v1978_v36  ;;  %v1912_v47 = vmax.f32 %v1700_v39, 0.0 }
 0x2c9   : > { %v1695_v46 = vadd.f32 %v7733_v41, %v1694_v45  ;;  %v1910_v49 = vmax.f32 %v1692_v42, 0.0 }
 0x2ca   : > { %v1913_v48 = vmax.f32 %v1703_v44, 0.0 }
 0x2cb   : > { %v1911_v50 = vmax.f32 %v1695_v46, 0.0 }
 0x2cc   : > { %v1980_v51 = vpack.c.bf16 %v1913_v48, %v1912_v47 }
 0x2cd   : > { %v1979_v52 = vpack.c.bf16 %v1911_v50, %v1910_v49  ;;  %v6567_v53 = vpop.f32.mrb[80].mxu0 }
 0x2ce   : > { %v1716_v54 = vadd.f32 %v6567_v53, %v7733_v41  ;;  %v1707_v55 = vpop.f32.mrb[81].mxu0 }
 0x2cf   : > { %v1708_v56 = vadd.f32 %v7733_v41, %v1707_v55  ;;  %v6568_v57 = vpop.f32.mrb[82].mxu0  ;;  %6633 = vmatprep.mubr.msk.bf16.mxu1 %vm470_vm0, %v1979_v52 }
 0x2d0   : > { %v1719_v58 = vadd.f32 %v6568_v57, %v7733_v41  ;;  %v1710_v59 = vpop.f32.mrb[83].mxu0  ;;  %6634 = vmatmul.mubr.msk.bf16.gmra.mrb[76].mxu1 %vm470_vm0, %v1980_v51  ;;  %v1916_v61 = vmax.f32 %v1716_v54, 0.0 }
 0x2d1   : > { %v1711_v60 = vadd.f32 %v7733_v41, %v1710_v59  ;;  %v1914_v63 = vmax.f32 %v1708_v56, 0.0 }
 0x2d2   : > { %v1917_v62 = vmax.f32 %v1719_v58, 0.0 }
 0x2d3   : > { %v1915_v0 = vmax.f32 %v1711_v60, 0.0 }
 0x2d4   : > { %v1982_v1 = vpack.c.bf16 %v1917_v62, %v1916_v61 }
 0x2d5   : > { %v1981_v2 = vpack.c.bf16 %v1915_v0, %v1914_v63  ;;  %v6571_v3 = vpop.f32.mrb[84].mxu0 }
 0x2d6   : > { %v1732_v4 = vadd.f32 %v6571_v3, %v7733_v41  ;;  %v1723_v5 = vpop.f32.mrb[85].mxu0 }
 0x2d7   : > { %v1724_v6 = vadd.f32 %v7733_v41, %v1723_v5  ;;  %v6572_v7 = vpop.f32.mrb[86].mxu0  ;;  %6637 = vmatprep.mubr.msk.bf16.mxu1 %vm470_vm0, %v1981_v2 }
 0x2d8   : > { %v1735_v8 = vadd.f32 %v6572_v7, %v7733_v41  ;;  %v1726_v9 = vpop.f32.mrb[87].mxu0  ;;  %6638 = vmatmul.mubr.msk.bf16.gmra.mrb[80].mxu1 %vm470_vm0, %v1982_v1  ;;  %v1920_v11 = vmax.f32 %v1732_v4, 0.0 }
 0x2d9   : > { %v1727_v10 = vadd.f32 %v7733_v41, %v1726_v9  ;;  %v1918_v13 = vmax.f32 %v1724_v6, 0.0 }
 0x2da   : > { %v1921_v12 = vmax.f32 %v1735_v8, 0.0 }
 0x2db   : > { %v1919_v14 = vmax.f32 %v1727_v10, 0.0 }
 0x2dc   : > { %v1984_v15 = vpack.c.bf16 %v1921_v12, %v1920_v11 }
 0x2dd   : > { %v1983_v16 = vpack.c.bf16 %v1919_v14, %v1918_v13  ;;  %v6575_v17 = vpop.f32.mrb[88].mxu0 }
 0x2de   : > { %v1748_v18 = vadd.f32 %v6575_v17, %v7733_v41  ;;  %v1739_v19 = vpop.f32.mrb[89].mxu0 }
 0x2df   : > { %v1740_v20 = vadd.f32 %v7733_v41, %v1739_v19  ;;  %v6576_v21 = vpop.f32.mrb[90].mxu0  ;;  %6641 = vmatprep.mubr.msk.bf16.mxu1 %vm470_vm0, %v1983_v16 }
 0x2e0   : > { %v1751_v22 = vadd.f32 %v6576_v21, %v7733_v41  ;;  %v1742_v23 = vpop.f32.mrb[91].mxu0  ;;  %6642 = vmatmul.mubr.msk.bf16.gmra.mrb[84].mxu1 %vm470_vm0, %v1984_v15  ;;  %v1924_v25 = vmax.f32 %v1748_v18, 0.0 }
 0x2e1   : > { %v1743_v24 = vadd.f32 %v7733_v41, %v1742_v23  ;;  %v1922_v27 = vmax.f32 %v1740_v20, 0.0 }
 0x2e2   : > { %v1925_v26 = vmax.f32 %v1751_v22, 0.0 }
 0x2e3   : > { %v1923_v28 = vmax.f32 %v1743_v24, 0.0 }
 0x2e4   : > { %v1986_v29 = vpack.c.bf16 %v1925_v26, %v1924_v25 }
 0x2e5   : > { %v1985_v30 = vpack.c.bf16 %v1923_v28, %v1922_v27  ;;  %v6579_v31 = vpop.f32.mrb[92].mxu0 }
 0x2e6   : > { %v1764_v32 = vadd.f32 %v6579_v31, %v7733_v41  ;;  %v1755_v33 = vpop.f32.mrb[93].mxu0 }
 0x2e7   : > { %v1756_v34 = vadd.f32 %v7733_v41, %v1755_v33  ;;  %v6580_v35 = vpop.f32.mrb[94].mxu0  ;;  %6645 = vmatprep.mubr.msk.bf16.mxu1 %vm470_vm0, %v1985_v30 }
 0x2e8   : > { %v1767_v36 = vadd.f32 %v6580_v35, %v7733_v41  ;;  %v1758_v37 = vpop.f32.mrb[95].mxu0  ;;  %6646 = vmatmul.mubr.msk.bf16.gmra.mrb[88].mxu1 %vm470_vm0, %v1986_v29  ;;  %v1928_v39 = vmax.f32 %v1764_v32, 0.0 }
 0x2e9   : > { %v1759_v38 = vadd.f32 %v7733_v41, %v1758_v37  ;;  %v1926_v42 = vmax.f32 %v1756_v34, 0.0 }
 0x2ea   : > { %v1929_v40 = vmax.f32 %v1767_v36, 0.0 }
 0x2eb   : > { %v1927_v43 = vmax.f32 %v1759_v38, 0.0 }
 0x2ec   : > { %v1988_v44 = vpack.c.bf16 %v1929_v40, %v1928_v39 }
 0x2ed   : > { %v1987_v45 = vpack.c.bf16 %v1927_v43, %v1926_v42  ;;  %v6583_v46 = vpop.f32.mrb[96].mxu0 }
 0x2ee   : > { %v1780_v47 = vadd.f32 %v6583_v46, %v7733_v41  ;;  %v1771_v48 = vpop.f32.mrb[97].mxu0 }
 0x2ef   : > { %v1772_v49 = vadd.f32 %v7733_v41, %v1771_v48  ;;  %v6584_v50 = vpop.f32.mrb[98].mxu0  ;;  %6649 = vmatprep.mubr.msk.bf16.mxu1 %vm470_vm0, %v1987_v45 }
 0x2f0   : > { %v1783_v51 = vadd.f32 %v6584_v50, %v7733_v41  ;;  %v1774_v52 = vpop.f32.mrb[99].mxu0  ;;  %6650 = vmatmul.mubr.msk.bf16.gmra.mrb[92].mxu1 %vm470_vm0, %v1988_v44  ;;  %v1932_v54 = vmax.f32 %v1780_v47, 0.0 }
 0x2f1   : > { %v1775_v53 = vadd.f32 %v7733_v41, %v1774_v52  ;;  %v1930_v56 = vmax.f32 %v1772_v49, 0.0 }
 0x2f2   : > { %v1933_v55 = vmax.f32 %v1783_v51, 0.0 }
 0x2f3   : > { %v1931_v57 = vmax.f32 %v1775_v53, 0.0 }
 0x2f4   : > { %v1990_v58 = vpack.c.bf16 %v1933_v55, %v1932_v54 }
 0x2f5   : > { %v1989_v59 = vpack.c.bf16 %v1931_v57, %v1930_v56  ;;  %v6587_v60 = vpop.f32.mrb[100].mxu0 }
 0x2f6   : > { %v1796_v61 = vadd.f32 %v6587_v60, %v7733_v41  ;;  %v1787_v62 = vpop.f32.mrb[101].mxu0 }
 0x2f7   : > { %v1788_v63 = vadd.f32 %v7733_v41, %v1787_v62  ;;  %v6588_v0 = vpop.f32.mrb[102].mxu0  ;;  %6653 = vmatprep.mubr.msk.bf16.mxu1 %vm470_vm0, %v1989_v59 }
 0x2f8   : > { %v1799_v1 = vadd.f32 %v6588_v0, %v7733_v41  ;;  %v1790_v2 = vpop.f32.mrb[103].mxu0  ;;  %6654 = vmatmul.mubr.msk.bf16.gmra.mrb[96].mxu1 %vm470_vm0, %v1990_v58  ;;  %v1936_v4 = vmax.f32 %v1796_v61, 0.0 }
 0x2f9   : > { %v1791_v3 = vadd.f32 %v7733_v41, %v1790_v2  ;;  %v1934_v6 = vmax.f32 %v1788_v63, 0.0 }
 0x2fa   : > { %v1937_v5 = vmax.f32 %v1799_v1, 0.0 }
 0x2fb   : > { %v1935_v7 = vmax.f32 %v1791_v3, 0.0 }
 0x2fc   : > { %v1992_v8 = vpack.c.bf16 %v1937_v5, %v1936_v4 }
 0x2fd   : > { %v1991_v9 = vpack.c.bf16 %v1935_v7, %v1934_v6  ;;  %v6591_v10 = vpop.f32.mrb[104].mxu0 }
 0x2fe   : > { %v1812_v11 = vadd.f32 %v6591_v10, %v7733_v41  ;;  %v1803_v12 = vpop.f32.mrb[105].mxu0 }
 0x2ff   : > { %v1804_v13 = vadd.f32 %v7733_v41, %v1803_v12  ;;  %v6592_v14 = vpop.f32.mrb[106].mxu0  ;;  %6657 = vmatprep.mubr.msk.bf16.mxu1 %vm470_vm0, %v1991_v9 }
 0x300   : > { %v1815_v15 = vadd.f32 %v6592_v14, %v7733_v41  ;;  %v1806_v16 = vpop.f32.mrb[107].mxu0  ;;  %6658 = vmatmul.mubr.msk.bf16.gmra.mrb[100].mxu1 %vm470_vm0, %v1992_v8  ;;  %v1940_v18 = vmax.f32 %v1812_v11, 0.0 }
 0x301   : > { %v1807_v17 = vadd.f32 %v7733_v41, %v1806_v16  ;;  %v1938_v20 = vmax.f32 %v1804_v13, 0.0 }
 0x302   : > { %v1941_v19 = vmax.f32 %v1815_v15, 0.0 }
 0x303   : > { %v1939_v21 = vmax.f32 %v1807_v17, 0.0 }
 0x304   : > { %v1994_v22 = vpack.c.bf16 %v1941_v19, %v1940_v18 }
 0x305   : > { %v1993_v23 = vpack.c.bf16 %v1939_v21, %v1938_v20  ;;  %v6595_v24 = vpop.f32.mrb[108].mxu0 }
 0x306   : > { %v1828_v25 = vadd.f32 %v6595_v24, %v7733_v41  ;;  %v1819_v26 = vpop.f32.mrb[109].mxu0 }
 0x307   : > { %v1820_v27 = vadd.f32 %v7733_v41, %v1819_v26  ;;  %v6596_v28 = vpop.f32.mrb[110].mxu0  ;;  %6661 = vmatprep.mubr.msk.bf16.mxu1 %vm470_vm0, %v1993_v23 }
 0x308   : > { %v1831_v29 = vadd.f32 %v6596_v28, %v7733_v41  ;;  %v1822_v30 = vpop.f32.mrb[111].mxu0  ;;  %6662 = vmatmul.mubr.msk.bf16.gmra.mrb[104].mxu1 %vm470_vm0, %v1994_v22  ;;  %v1944_v32 = vmax.f32 %v1828_v25, 0.0 }
 0x309   : > { %v1823_v31 = vadd.f32 %v7733_v41, %v1822_v30  ;;  %v1942_v34 = vmax.f32 %v1820_v27, 0.0 }
 0x30a   : > { %v1945_v33 = vmax.f32 %v1831_v29, 0.0 }
 0x30b   : > { %v1943_v35 = vmax.f32 %v1823_v31, 0.0  ;;  %v7186_v31 = vld [vmem:[%s8679_s3 + $0x80] sm:$0xff]  }
 0x30c   : > { %v1996_v36 = vpack.c.bf16 %v1945_v33, %v1944_v32  ;;  %6757 = vmatprep.subr.bf16.mxu1 %v7186_v31 }
 0x30d   : > { %v1995_v37 = vpack.c.bf16 %v1943_v35, %v1942_v34  ;;  %v6599_v38 = vpop.f32.mrb[112].mxu0  ;;  %6758 = vmatpush3.bf16.msra.mxu1 %v7186_v31 }
 0x30e   : > { %v1844_v39 = vadd.f32 %v6599_v38, %v7733_v41  ;;  %v1835_v40 = vpop.f32.mrb[113].mxu0 }
 0x30f   : > { %v1836_v42 = vadd.f32 %v7733_v41, %v1835_v40  ;;  %v6600_v43 = vpop.f32.mrb[114].mxu0  ;;  %6665 = vmatprep.mubr.msk.bf16.mxu1 %vm470_vm0, %v1995_v37  ;;  %v7188_v40 = vld [vmem:[%s8679_s3 + $0x90] sm:$0xff]  }
 0x310   : > { %v1847_v44 = vadd.f32 %v6600_v43, %v7733_v41  ;;  %v1838_v45 = vpop.f32.mrb[115].mxu0  ;;  %6666 = vmatmul.mubr.msk.bf16.gmra.mrb[108].mxu1 %vm470_vm0, %v1996_v36  ;;  %v1948_v47 = vmax.f32 %v1844_v39, 0.0  ;;  %v7187_v39 = vld [vmem:[%s8679_s3 + $0x88] sm:$0xff]  }
 0x311   : > { %v1839_v46 = vadd.f32 %v7733_v41, %v1838_v45  ;;  %v1946_v49 = vmax.f32 %v1836_v42, 0.0  ;;  %6759 = vmatprep.subr.bf16.mxu1 %v7187_v39 }
 0x312   : > { %v1949_v48 = vmax.f32 %v1847_v44, 0.0  ;;  %6760 = vmatpush3.bf16.msra.mxu1 %v7187_v39 }
 0x313   : > { %v1947_v50 = vmax.f32 %v1839_v46, 0.0  ;;  %6761 = vmatprep.subr.bf16.mxu1 %v7188_v40 }
 0x314   : > { %v1998_v51 = vpack.c.bf16 %v1949_v48, %v1948_v47  ;;  %v7189_v48 = vld [vmem:[%s8679_s3 + $0x98] sm:$0xff]  }
 0x315   : > { %v1997_v52 = vpack.c.bf16 %v1947_v50, %v1946_v49  ;;  %v6603_v53 = vpop.f32.mrb[116].mxu0 }
 0x316   : > { %v1860_v54 = vadd.f32 %v6603_v53, %v7733_v41  ;;  %v1851_v55 = vpop.f32.mrb[117].mxu0  ;;  %6762 = vmatpush3.bf16.msra.mxu1 %v7188_v40 }
 0x317   : > { %v1852_v56 = vadd.f32 %v7733_v41, %v1851_v55  ;;  %v6604_v57 = vpop.f32.mrb[118].mxu0  ;;  %6669 = vmatprep.mubr.msk.bf16.mxu1 %vm470_vm0, %v1997_v52  ;;  %6763 = vmatprep.subr.bf16.mxu1 %v7189_v48 }
 0x318   : > { %v1863_v58 = vadd.f32 %v6604_v57, %v7733_v41  ;;  %v1854_v59 = vpop.f32.mrb[119].mxu0  ;;  %6670 = vmatmul.mubr.msk.bf16.gmra.mrb[112].mxu1 %vm470_vm0, %v1998_v51  ;;  %v1952_v61 = vmax.f32 %v1860_v54, 0.0 }
 0x319   : > { %v1855_v60 = vadd.f32 %v7733_v41, %v1854_v59  ;;  %v1950_v63 = vmax.f32 %v1852_v56, 0.0 }
 0x31a   : > { %v1953_v62 = vmax.f32 %v1863_v58, 0.0  ;;  %6764 = vmatpush3.bf16.msra.mxu1 %v7189_v48 }
 0x31b   : > { %v1951_v0 = vmax.f32 %v1855_v60, 0.0 }
 0x31c   : > { %v2000_v1 = vpack.c.bf16 %v1953_v62, %v1952_v61 }
 0x31d   : > { %v1999_v2 = vpack.c.bf16 %v1951_v0, %v1950_v63  ;;  %v6607_v3 = vpop.f32.mrb[120].mxu0 }
 0x31e   : > { %v1876_v4 = vadd.f32 %v6607_v3, %v7733_v41  ;;  %v1867_v5 = vpop.f32.mrb[121].mxu0 }
 0x31f   : > { %v1868_v6 = vadd.f32 %v7733_v41, %v1867_v5  ;;  %v6608_v7 = vpop.f32.mrb[122].mxu0  ;;  %6673 = vmatprep.mubr.msk.bf16.mxu1 %vm470_vm0, %v1999_v2 }
 0x320   : > { %v1879_v8 = vadd.f32 %v6608_v7, %v7733_v41  ;;  %v1870_v9 = vpop.f32.mrb[123].mxu0  ;;  %6674 = vmatmul.mubr.msk.bf16.gmra.mrb[116].mxu1 %vm470_vm0, %v2000_v1  ;;  %v1956_v11 = vmax.f32 %v1876_v4, 0.0 }
 0x321   : > { %v1871_v10 = vadd.f32 %v7733_v41, %v1870_v9  ;;  %v1954_v13 = vmax.f32 %v1868_v6, 0.0 }
 0x322   : > { %v1957_v12 = vmax.f32 %v1879_v8, 0.0 }
 0x323   : > { %v1955_v14 = vmax.f32 %v1871_v10, 0.0 }
 0x324   : > { %v2002_v15 = vpack.c.bf16 %v1957_v12, %v1956_v11 }
 0x325   : > { %v2001_v16 = vpack.c.bf16 %v1955_v14, %v1954_v13  ;;  %v6611_v17 = vpop.f32.mrb[124].mxu0 }
 0x326   : > { %v1892_v18 = vadd.f32 %v6611_v17, %v7733_v41  ;;  %v1883_v19 = vpop.f32.mrb[125].mxu0 }
 0x327   : > { %v1884_v20 = vadd.f32 %v7733_v41, %v1883_v19  ;;  %v6612_v21 = vpop.f32.mrb[126].mxu0  ;;  %6677 = vmatprep.mubr.msk.bf16.mxu1 %vm470_vm0, %v2001_v16 }
 0x328   : > { %v1895_v22 = vadd.f32 %v6612_v21, %v7733_v41  ;;  %v1886_v23 = vpop.f32.mrb[127].mxu0  ;;  %6678 = vmatmul.mubr.msk.bf16.gmra.mrb[120].mxu1 %vm470_vm0, %v2002_v15  ;;  %v1960_v25 = vmax.f32 %v1892_v18, 0.0 }
 0x329   : > { %v1887_v24 = vadd.f32 %v7733_v41, %v1886_v23  ;;  %v1958_v27 = vmax.f32 %v1884_v20, 0.0  ;;  %v7846_v41 = vld [vmem:[%s8680_s4 + $0x2] ss:$0 sm:$0xff] }
 0x32a   : > { %v1961_v26 = vmax.f32 %v1895_v22, 0.0 }
 0x32b   : > { %v1959_v28 = vmax.f32 %v1887_v24, 0.0 }
 0x32c   : > { %v2004_v29 = vpack.c.bf16 %v1961_v26, %v1960_v25 }
 0x32d   : > { %v2003_v30 = vpack.c.bf16 %v1959_v28, %v1958_v27 }
 0x32f   : > { %6681 = vmatprep.mubr.msk.bf16.mxu1 %vm470_vm0, %v2003_v30 }
 0x330   : > { %6682 = vmatmul.mubr.msk.bf16.gmra.mrb[124].mxu1 %vm470_vm0, %v2004_v29 }
 0x38b   : > { %v6623_v32 = vpop.f32.mrb[64].mxu1 }
 0x38c   : > { %v2174_v33 = vadd.f32 %v6623_v32, %v7846_v41  ;;  %v2165_v34 = vpop.f32.mrb[65].mxu1 }
 0x38d   : > { %v2166_v35 = vadd.f32 %v7846_v41, %v2165_v34  ;;  %v6624_v36 = vpop.f32.mrb[66].mxu1 }
 0x38e   : > { %v2177_v37 = vadd.f32 %v6624_v36, %v7846_v41  ;;  %v2168_v38 = vpop.f32.mrb[67].mxu1  ;;  %v2422_v43 = vmax.f32 %v2174_v33, 0.0 }
 0x38f   : > { %v2169_v42 = vadd.f32 %v7846_v41, %v2168_v38  ;;  %v2420_v45 = vmax.f32 %v2166_v35, 0.0 }
 0x390   : > { %v2423_v44 = vmax.f32 %v2177_v37, 0.0 }
 0x391   : > { %v2421_v46 = vmax.f32 %v2169_v42, 0.0 }
 0x392   : > { %v2496_v47 = vpack.c.bf16 %v2423_v44, %v2422_v43 }
 0x393   : > { %v2495_v49 = vpack.c.bf16 %v2421_v46, %v2420_v45  ;;  %v6627_v50 = vpop.f32.mrb[68].mxu1 }
 0x394   : > { %v2190_v51 = vadd.f32 %v6627_v50, %v7846_v41  ;;  %v2181_v52 = vpop.f32.mrb[69].mxu1 }
 0x395   : > { %v2182_v53 = vadd.f32 %v7846_v41, %v2181_v52  ;;  %v6628_v54 = vpop.f32.mrb[70].mxu1  ;;  %6693 = vmatprep.mubr.msk.bf16.mxu0 %vm470_vm0, %v2495_v49 }
 0x396   : > { %v2193_v55 = vadd.f32 %v6628_v54, %v7846_v41  ;;  %v2184_v56 = vpop.f32.mrb[71].mxu1  ;;  %6694 = vmatmul.mubr.msk.bf16.vlgmr.msra.gmra.mrb[128].mxu0 %vm470_vm0, %v2496_v47  ;;  %v2426_v58 = vmax.f32 %v2190_v51, 0.0 }
 0x397   : > { %v2185_v57 = vadd.f32 %v7846_v41, %v2184_v56  ;;  %v2424_v60 = vmax.f32 %v2182_v53, 0.0 }
 0x398   : > { %v2427_v59 = vmax.f32 %v2193_v55, 0.0 }
 0x399   : > { %v2425_v61 = vmax.f32 %v2185_v57, 0.0 }
 0x39a   : > { %v2498_v62 = vpack.c.bf16 %v2427_v59, %v2426_v58 }
 0x39b   : > { %v2497_v63 = vpack.c.bf16 %v2425_v61, %v2424_v60  ;;  %v6631_v0 = vpop.f32.mrb[72].mxu1 }
 0x39c   : > { %v2206_v1 = vadd.f32 %v6631_v0, %v7846_v41  ;;  %v2197_v2 = vpop.f32.mrb[73].mxu1 }
 0x39d   : > { %v2198_v3 = vadd.f32 %v7846_v41, %v2197_v2  ;;  %v6632_v4 = vpop.f32.mrb[74].mxu1  ;;  %6697 = vmatprep.mubr.msk.bf16.mxu0 %vm470_vm0, %v2497_v63 }
 0x39e   : > { %v2209_v5 = vadd.f32 %v6632_v4, %v7846_v41  ;;  %v2200_v6 = vpop.f32.mrb[75].mxu1  ;;  %6698 = vmatmul.mubr.msk.bf16.gmra.mrb[132].mxu0 %vm470_vm0, %v2498_v62  ;;  %v2430_v8 = vmax.f32 %v2206_v1, 0.0 }
 0x39f   : > { %v2201_v7 = vadd.f32 %v7846_v41, %v2200_v6  ;;  %v2428_v10 = vmax.f32 %v2198_v3, 0.0 }
 0x3a0   : > { %v2431_v9 = vmax.f32 %v2209_v5, 0.0 }
 0x3a1   : > { %v2429_v11 = vmax.f32 %v2201_v7, 0.0 }
 0x3a2   : > { %v2500_v12 = vpack.c.bf16 %v2431_v9, %v2430_v8 }
 0x3a3   : > { %v2499_v13 = vpack.c.bf16 %v2429_v11, %v2428_v10  ;;  %v6635_v14 = vpop.f32.mrb[76].mxu1 }
 0x3a4   : > { %v2222_v15 = vadd.f32 %v6635_v14, %v7846_v41  ;;  %v2213_v16 = vpop.f32.mrb[77].mxu1 }
 0x3a5   : > { %v2214_v17 = vadd.f32 %v7846_v41, %v2213_v16  ;;  %v6636_v18 = vpop.f32.mrb[78].mxu1  ;;  %6701 = vmatprep.mubr.msk.bf16.mxu0 %vm470_vm0, %v2499_v13 }
 0x3a6   : > { %v2225_v19 = vadd.f32 %v6636_v18, %v7846_v41  ;;  %v2216_v20 = vpop.f32.mrb[79].mxu1  ;;  %6702 = vmatmul.mubr.msk.bf16.gmra.mrb[136].mxu0 %vm470_vm0, %v2500_v12  ;;  %v2434_v22 = vmax.f32 %v2222_v15, 0.0 }
 0x3a7   : > { %v2217_v21 = vadd.f32 %v7846_v41, %v2216_v20  ;;  %v2432_v24 = vmax.f32 %v2214_v17, 0.0 }
 0x3a8   : > { %v2435_v23 = vmax.f32 %v2225_v19, 0.0 }
 0x3a9   : > { %v2433_v25 = vmax.f32 %v2217_v21, 0.0 }
 0x3aa   : > { %v2502_v26 = vpack.c.bf16 %v2435_v23, %v2434_v22 }
 0x3ab   : > { %v2501_v27 = vpack.c.bf16 %v2433_v25, %v2432_v24  ;;  %v6639_v28 = vpop.f32.mrb[80].mxu1 }
 0x3ac   : > { %v2238_v29 = vadd.f32 %v6639_v28, %v7846_v41  ;;  %v2229_v30 = vpop.f32.mrb[81].mxu1 }
 0x3ad   : > { %v2230_v31 = vadd.f32 %v7846_v41, %v2229_v30  ;;  %v6640_v32 = vpop.f32.mrb[82].mxu1  ;;  %6705 = vmatprep.mubr.msk.bf16.mxu0 %vm470_vm0, %v2501_v27 }
 0x3ae   : > { %v2241_v33 = vadd.f32 %v6640_v32, %v7846_v41  ;;  %v2232_v34 = vpop.f32.mrb[83].mxu1  ;;  %6706 = vmatmul.mubr.msk.bf16.gmra.mrb[140].mxu0 %vm470_vm0, %v2502_v26  ;;  %v2438_v36 = vmax.f32 %v2238_v29, 0.0 }
 0x3af   : > { %v2233_v35 = vadd.f32 %v7846_v41, %v2232_v34  ;;  %v2436_v38 = vmax.f32 %v2230_v31, 0.0 }
 0x3b0   : > { %v2439_v37 = vmax.f32 %v2241_v33, 0.0 }
 0x3b1   : > { %v2437_v39 = vmax.f32 %v2233_v35, 0.0 }
 0x3b2   : > { %v2504_v40 = vpack.c.bf16 %v2439_v37, %v2438_v36 }
 0x3b3   : > { %v2503_v42 = vpack.c.bf16 %v2437_v39, %v2436_v38  ;;  %v6643_v43 = vpop.f32.mrb[84].mxu1 }
 0x3b4   : > { %v2254_v44 = vadd.f32 %v6643_v43, %v7846_v41  ;;  %v2245_v45 = vpop.f32.mrb[85].mxu1 }
 0x3b5   : > { %v2246_v46 = vadd.f32 %v7846_v41, %v2245_v45  ;;  %v6644_v47 = vpop.f32.mrb[86].mxu1  ;;  %6709 = vmatprep.mubr.msk.bf16.mxu0 %vm470_vm0, %v2503_v42 }
 0x3b6   : > { %v2257_v48 = vadd.f32 %v6644_v47, %v7846_v41  ;;  %v2248_v49 = vpop.f32.mrb[87].mxu1  ;;  %6710 = vmatmul.mubr.msk.bf16.gmra.mrb[144].mxu0 %vm470_vm0, %v2504_v40  ;;  %v2442_v51 = vmax.f32 %v2254_v44, 0.0 }
 0x3b7   : > { %v2249_v50 = vadd.f32 %v7846_v41, %v2248_v49  ;;  %v2440_v53 = vmax.f32 %v2246_v46, 0.0 }
 0x3b8   : > { %v2443_v52 = vmax.f32 %v2257_v48, 0.0 }
 0x3b9   : > { %v2441_v54 = vmax.f32 %v2249_v50, 0.0 }
 0x3ba   : > { %v2506_v55 = vpack.c.bf16 %v2443_v52, %v2442_v51 }
 0x3bb   : > { %v2505_v56 = vpack.c.bf16 %v2441_v54, %v2440_v53  ;;  %v6647_v57 = vpop.f32.mrb[88].mxu1 }
 0x3bc   : > { %v2270_v58 = vadd.f32 %v6647_v57, %v7846_v41  ;;  %v2261_v59 = vpop.f32.mrb[89].mxu1 }
 0x3bd   : > { %v2262_v60 = vadd.f32 %v7846_v41, %v2261_v59  ;;  %v6648_v61 = vpop.f32.mrb[90].mxu1  ;;  %6713 = vmatprep.mubr.msk.bf16.mxu0 %vm470_vm0, %v2505_v56 }
 0x3be   : > { %v2273_v62 = vadd.f32 %v6648_v61, %v7846_v41  ;;  %v2264_v63 = vpop.f32.mrb[91].mxu1  ;;  %6714 = vmatmul.mubr.msk.bf16.gmra.mrb[148].mxu0 %vm470_vm0, %v2506_v55  ;;  %v2446_v1 = vmax.f32 %v2270_v58, 0.0 }
 0x3bf   : > { %v2265_v0 = vadd.f32 %v7846_v41, %v2264_v63  ;;  %v2444_v3 = vmax.f32 %v2262_v60, 0.0 }
 0x3c0   : > { %v2447_v2 = vmax.f32 %v2273_v62, 0.0 }
 0x3c1   : > { %v2445_v4 = vmax.f32 %v2265_v0, 0.0 }
 0x3c2   : > { %v2508_v5 = vpack.c.bf16 %v2447_v2, %v2446_v1 }
 0x3c3   : > { %v2507_v6 = vpack.c.bf16 %v2445_v4, %v2444_v3  ;;  %v6651_v7 = vpop.f32.mrb[92].mxu1 }
 0x3c4   : > { %v2286_v8 = vadd.f32 %v6651_v7, %v7846_v41  ;;  %v2277_v9 = vpop.f32.mrb[93].mxu1 }
 0x3c5   : > { %v2278_v10 = vadd.f32 %v7846_v41, %v2277_v9  ;;  %v6652_v11 = vpop.f32.mrb[94].mxu1  ;;  %6717 = vmatprep.mubr.msk.bf16.mxu0 %vm470_vm0, %v2507_v6 }
 0x3c6   : > { %v2289_v12 = vadd.f32 %v6652_v11, %v7846_v41  ;;  %v2280_v13 = vpop.f32.mrb[95].mxu1  ;;  %6718 = vmatmul.mubr.msk.bf16.gmra.mrb[152].mxu0 %vm470_vm0, %v2508_v5  ;;  %v2450_v15 = vmax.f32 %v2286_v8, 0.0 }
 0x3c7   : > { %v2281_v14 = vadd.f32 %v7846_v41, %v2280_v13  ;;  %v2448_v17 = vmax.f32 %v2278_v10, 0.0 }
 0x3c8   : > { %v2451_v16 = vmax.f32 %v2289_v12, 0.0 }
 0x3c9   : > { %v2449_v18 = vmax.f32 %v2281_v14, 0.0 }
 0x3ca   : > { %v2510_v19 = vpack.c.bf16 %v2451_v16, %v2450_v15 }
 0x3cb   : > { %v2509_v20 = vpack.c.bf16 %v2449_v18, %v2448_v17  ;;  %v6655_v21 = vpop.f32.mrb[96].mxu1 }
 0x3cc   : > { %v2302_v22 = vadd.f32 %v6655_v21, %v7846_v41  ;;  %v2293_v23 = vpop.f32.mrb[97].mxu1 }
 0x3cd   : > { %v2294_v24 = vadd.f32 %v7846_v41, %v2293_v23  ;;  %v6656_v25 = vpop.f32.mrb[98].mxu1  ;;  %6721 = vmatprep.mubr.msk.bf16.mxu0 %vm470_vm0, %v2509_v20 }
 0x3ce   : > { %v2305_v26 = vadd.f32 %v6656_v25, %v7846_v41  ;;  %v2296_v27 = vpop.f32.mrb[99].mxu1  ;;  %6722 = vmatmul.mubr.msk.bf16.gmra.mrb[156].mxu0 %vm470_vm0, %v2510_v19  ;;  %v2454_v29 = vmax.f32 %v2302_v22, 0.0 }
 0x3cf   : > { %v2297_v28 = vadd.f32 %v7846_v41, %v2296_v27  ;;  %v2452_v31 = vmax.f32 %v2294_v24, 0.0 }
 0x3d0   : > { %v2455_v30 = vmax.f32 %v2305_v26, 0.0 }
 0x3d1   : > { %v2453_v32 = vmax.f32 %v2297_v28, 0.0 }
 0x3d2   : > { %v2512_v33 = vpack.c.bf16 %v2455_v30, %v2454_v29 }
 0x3d3   : > { %v2511_v34 = vpack.c.bf16 %v2453_v32, %v2452_v31  ;;  %v6659_v35 = vpop.f32.mrb[100].mxu1 }
 0x3d4   : > { %v2318_v36 = vadd.f32 %v6659_v35, %v7846_v41  ;;  %v2309_v37 = vpop.f32.mrb[101].mxu1 }
 0x3d5   : > { %v2310_v38 = vadd.f32 %v7846_v41, %v2309_v37  ;;  %v6660_v39 = vpop.f32.mrb[102].mxu1  ;;  %6725 = vmatprep.mubr.msk.bf16.mxu0 %vm470_vm0, %v2511_v34 }
 0x3d6   : > { %v2321_v40 = vadd.f32 %v6660_v39, %v7846_v41  ;;  %v2312_v42 = vpop.f32.mrb[103].mxu1  ;;  %6726 = vmatmul.mubr.msk.bf16.gmra.mrb[160].mxu0 %vm470_vm0, %v2512_v33  ;;  %v2458_v44 = vmax.f32 %v2318_v36, 0.0 }
 0x3d7   : > { %v2313_v43 = vadd.f32 %v7846_v41, %v2312_v42  ;;  %v2456_v46 = vmax.f32 %v2310_v38, 0.0 }
 0x3d8   : > { %v2459_v45 = vmax.f32 %v2321_v40, 0.0 }
 0x3d9   : > { %v2457_v47 = vmax.f32 %v2313_v43, 0.0 }
 0x3da   : > { %v2514_v48 = vpack.c.bf16 %v2459_v45, %v2458_v44 }
 0x3db   : > { %v2513_v49 = vpack.c.bf16 %v2457_v47, %v2456_v46  ;;  %v6663_v50 = vpop.f32.mrb[104].mxu1 }
 0x3dc   : > { %v2334_v51 = vadd.f32 %v6663_v50, %v7846_v41  ;;  %v2325_v52 = vpop.f32.mrb[105].mxu1 }
 0x3dd   : > { %v2326_v53 = vadd.f32 %v7846_v41, %v2325_v52  ;;  %v6664_v54 = vpop.f32.mrb[106].mxu1  ;;  %6729 = vmatprep.mubr.msk.bf16.mxu0 %vm470_vm0, %v2513_v49 }
 0x3de   : > { %v2337_v55 = vadd.f32 %v6664_v54, %v7846_v41  ;;  %v2328_v56 = vpop.f32.mrb[107].mxu1  ;;  %6730 = vmatmul.mubr.msk.bf16.gmra.mrb[164].mxu0 %vm470_vm0, %v2514_v48  ;;  %v2462_v58 = vmax.f32 %v2334_v51, 0.0 }
 0x3df   : > { %v2329_v57 = vadd.f32 %v7846_v41, %v2328_v56  ;;  %v2460_v60 = vmax.f32 %v2326_v53, 0.0 }
 0x3e0   : > { %v2463_v59 = vmax.f32 %v2337_v55, 0.0 }
 0x3e1   : > { %v2461_v61 = vmax.f32 %v2329_v57, 0.0 }
 0x3e2   : > { %v2516_v62 = vpack.c.bf16 %v2463_v59, %v2462_v58 }
 0x3e3   : > { %v2515_v63 = vpack.c.bf16 %v2461_v61, %v2460_v60  ;;  %v6667_v0 = vpop.f32.mrb[108].mxu1 }
 0x3e4   : > { %v2350_v1 = vadd.f32 %v6667_v0, %v7846_v41  ;;  %v2341_v2 = vpop.f32.mrb[109].mxu1 }
 0x3e5   : > { %v2342_v3 = vadd.f32 %v7846_v41, %v2341_v2  ;;  %v6668_v4 = vpop.f32.mrb[110].mxu1  ;;  %6733 = vmatprep.mubr.msk.bf16.mxu0 %vm470_vm0, %v2515_v63 }
 0x3e6   : > { %v2353_v5 = vadd.f32 %v6668_v4, %v7846_v41  ;;  %v2344_v6 = vpop.f32.mrb[111].mxu1  ;;  %6734 = vmatmul.mubr.msk.bf16.gmra.mrb[168].mxu0 %vm470_vm0, %v2516_v62  ;;  %v2466_v8 = vmax.f32 %v2350_v1, 0.0 }
 0x3e7   : > { %v2345_v7 = vadd.f32 %v7846_v41, %v2344_v6  ;;  %v2464_v10 = vmax.f32 %v2342_v3, 0.0 }
 0x3e8   : > { %v2467_v9 = vmax.f32 %v2353_v5, 0.0 }
 0x3e9   : > { %v2465_v11 = vmax.f32 %v2345_v7, 0.0  ;;  %v7190_v7 = vld [vmem:[%s8679_s3 + $0xa0] sm:$0xff]  }
 0x3ea   : > { %v2518_v12 = vpack.c.bf16 %v2467_v9, %v2466_v8  ;;  %6829 = vmatprep.subr.bf16.mxu0 %v7190_v7 }
 0x3eb   : > { %v2517_v13 = vpack.c.bf16 %v2465_v11, %v2464_v10  ;;  %v6671_v14 = vpop.f32.mrb[112].mxu1  ;;  %6830 = vmatpush3.bf16.msra.mxu0 %v7190_v7 }
 0x3ec   : > { %v2366_v15 = vadd.f32 %v6671_v14, %v7846_v41  ;;  %v2357_v16 = vpop.f32.mrb[113].mxu1 }
 0x3ed   : > { %v2358_v17 = vadd.f32 %v7846_v41, %v2357_v16  ;;  %v6672_v18 = vpop.f32.mrb[114].mxu1  ;;  %6737 = vmatprep.mubr.msk.bf16.mxu0 %vm470_vm0, %v2517_v13  ;;  %v7192_v16 = vld [vmem:[%s8679_s3 + $0xb0] sm:$0xff]  }
 0x3ee   : > { %v2369_v19 = vadd.f32 %v6672_v18, %v7846_v41  ;;  %v2360_v20 = vpop.f32.mrb[115].mxu1  ;;  %6738 = vmatmul.mubr.msk.bf16.gmra.mrb[172].mxu0 %vm470_vm0, %v2518_v12  ;;  %v2470_v22 = vmax.f32 %v2366_v15, 0.0  ;;  %v7191_v15 = vld [vmem:[%s8679_s3 + $0xa8] sm:$0xff]  }
 0x3ef   : > { %v2361_v21 = vadd.f32 %v7846_v41, %v2360_v20  ;;  %v2468_v24 = vmax.f32 %v2358_v17, 0.0  ;;  %6831 = vmatprep.subr.bf16.mxu0 %v7191_v15 }
 0x3f0   : > { %v2471_v23 = vmax.f32 %v2369_v19, 0.0  ;;  %6832 = vmatpush3.bf16.msra.mxu0 %v7191_v15 }
 0x3f1   : > { %v2469_v25 = vmax.f32 %v2361_v21, 0.0  ;;  %6833 = vmatprep.subr.bf16.mxu0 %v7192_v16 }
 0x3f2   : > { %v2520_v26 = vpack.c.bf16 %v2471_v23, %v2470_v22  ;;  %v7193_v23 = vld [vmem:[%s8679_s3 + $0xb8] sm:$0xff]  }
 0x3f3   : > { %v2519_v27 = vpack.c.bf16 %v2469_v25, %v2468_v24  ;;  %v6675_v28 = vpop.f32.mrb[116].mxu1 }
 0x3f4   : > { %v2382_v29 = vadd.f32 %v6675_v28, %v7846_v41  ;;  %v2373_v30 = vpop.f32.mrb[117].mxu1  ;;  %6834 = vmatpush3.bf16.msra.mxu0 %v7192_v16 }
 0x3f5   : > { %v2374_v31 = vadd.f32 %v7846_v41, %v2373_v30  ;;  %v6676_v32 = vpop.f32.mrb[118].mxu1  ;;  %6741 = vmatprep.mubr.msk.bf16.mxu0 %vm470_vm0, %v2519_v27  ;;  %6835 = vmatprep.subr.bf16.mxu0 %v7193_v23 }
 0x3f6   : > { %v2385_v33 = vadd.f32 %v6676_v32, %v7846_v41  ;;  %v2376_v34 = vpop.f32.mrb[119].mxu1  ;;  %6742 = vmatmul.mubr.msk.bf16.gmra.mrb[176].mxu0 %vm470_vm0, %v2520_v26  ;;  %v2474_v36 = vmax.f32 %v2382_v29, 0.0 }
 0x3f7   : > { %v2377_v35 = vadd.f32 %v7846_v41, %v2376_v34  ;;  %v2472_v38 = vmax.f32 %v2374_v31, 0.0 }
 0x3f8   : > { %v2475_v37 = vmax.f32 %v2385_v33, 0.0  ;;  %6836 = vmatpush3.bf16.msra.mxu0 %v7193_v23 }
 0x3f9   : > { %v2473_v39 = vmax.f32 %v2377_v35, 0.0 }
 0x3fa   : > { %v2522_v40 = vpack.c.bf16 %v2475_v37, %v2474_v36 }
 0x3fb   : > { %v2521_v42 = vpack.c.bf16 %v2473_v39, %v2472_v38  ;;  %v6679_v43 = vpop.f32.mrb[120].mxu1 }
 0x3fc   : > { %v2398_v44 = vadd.f32 %v6679_v43, %v7846_v41  ;;  %v2389_v45 = vpop.f32.mrb[121].mxu1 }
 0x3fd   : > { %v2390_v46 = vadd.f32 %v7846_v41, %v2389_v45  ;;  %v6680_v47 = vpop.f32.mrb[122].mxu1  ;;  %6745 = vmatprep.mubr.msk.bf16.mxu0 %vm470_vm0, %v2521_v42 }
 0x3fe   : > { %v2401_v48 = vadd.f32 %v6680_v47, %v7846_v41  ;;  %v2392_v49 = vpop.f32.mrb[123].mxu1  ;;  %6746 = vmatmul.mubr.msk.bf16.gmra.mrb[180].mxu0 %vm470_vm0, %v2522_v40  ;;  %v2478_v51 = vmax.f32 %v2398_v44, 0.0 }
 0x3ff   : > { %v2393_v50 = vadd.f32 %v7846_v41, %v2392_v49  ;;  %v2476_v53 = vmax.f32 %v2390_v46, 0.0 }
 0x400   : > { %v2479_v52 = vmax.f32 %v2401_v48, 0.0 }
 0x401   : > { %v2477_v54 = vmax.f32 %v2393_v50, 0.0 }
 0x402   : > { %v2524_v55 = vpack.c.bf16 %v2479_v52, %v2478_v51 }
 0x403   : > { %v2523_v56 = vpack.c.bf16 %v2477_v54, %v2476_v53  ;;  %v6683_v57 = vpop.f32.mrb[124].mxu1 }
 0x404   : > { %v2414_v58 = vadd.f32 %v6683_v57, %v7846_v41  ;;  %v2405_v59 = vpop.f32.mrb[125].mxu1 }
 0x405   : > { %v2406_v60 = vadd.f32 %v7846_v41, %v2405_v59  ;;  %v6684_v61 = vpop.f32.mrb[126].mxu1  ;;  %6749 = vmatprep.mubr.msk.bf16.mxu0 %vm470_vm0, %v2523_v56 }
 0x406   : > { %v2417_v62 = vadd.f32 %v6684_v61, %v7846_v41  ;;  %v2408_v63 = vpop.f32.mrb[127].mxu1  ;;  %6750 = vmatmul.mubr.msk.bf16.gmra.mrb[184].mxu0 %vm470_vm0, %v2524_v55  ;;  %v2482_v1 = vmax.f32 %v2414_v58, 0.0 }
 0x407   : > { %v2409_v0 = vadd.f32 %v7846_v41, %v2408_v63  ;;  %v2480_v3 = vmax.f32 %v2406_v60, 0.0  ;;  %v7959_v41 = vld [vmem:[%s8680_s4 + $0x3] ss:$0 sm:$0xff] }
 0x408   : > { %v2483_v2 = vmax.f32 %v2417_v62, 0.0 }
 0x409   : > { %v2481_v4 = vmax.f32 %v2409_v0, 0.0 }
 0x40a   : > { %v2526_v5 = vpack.c.bf16 %v2483_v2, %v2482_v1 }
 0x40b   : > { %v2525_v6 = vpack.c.bf16 %v2481_v4, %v2480_v3 }
 0x40d   : > { %6753 = vmatprep.mubr.msk.bf16.mxu0 %vm470_vm0, %v2525_v6 }
 0x40e   : > { %6754 = vmatmul.mubr.msk.bf16.gmra.mrb[188].mxu0 %vm470_vm0, %v2526_v5 }
 0x469   : > { %v6695_v8 = vpop.f32.mrb[128].mxu0 }
 0x46a   : > { %v2696_v9 = vadd.f32 %v6695_v8, %v7959_v41  ;;  %v2687_v10 = vpop.f32.mrb[129].mxu0 }
 0x46b   : > { %v2688_v11 = vadd.f32 %v7959_v41, %v2687_v10  ;;  %v6696_v12 = vpop.f32.mrb[130].mxu0 }
 0x46c   : > { %v2699_v13 = vadd.f32 %v6696_v12, %v7959_v41  ;;  %v2690_v14 = vpop.f32.mrb[131].mxu0  ;;  %v2944_v18 = vmax.f32 %v2696_v9, 0.0 }
 0x46d   : > { %v2691_v17 = vadd.f32 %v7959_v41, %v2690_v14  ;;  %v2942_v20 = vmax.f32 %v2688_v11, 0.0 }
 0x46e   : > { %v2945_v19 = vmax.f32 %v2699_v13, 0.0 }
 0x46f   : > { %v2943_v21 = vmax.f32 %v2691_v17, 0.0 }
 0x470   : > { %v3018_v22 = vpack.c.bf16 %v2945_v19, %v2944_v18 }
 0x471   : > { %v3017_v24 = vpack.c.bf16 %v2943_v21, %v2942_v20  ;;  %v6699_v25 = vpop.f32.mrb[132].mxu0 }
 0x472   : > { %v2712_v26 = vadd.f32 %v6699_v25, %v7959_v41  ;;  %v2703_v27 = vpop.f32.mrb[133].mxu0 }
 0x473   : > { %v2704_v28 = vadd.f32 %v7959_v41, %v2703_v27  ;;  %v6700_v29 = vpop.f32.mrb[134].mxu0  ;;  %6765 = vmatprep.mubr.msk.bf16.mxu1 %vm470_vm0, %v3017_v24 }
 0x474   : > { %v2715_v30 = vadd.f32 %v6700_v29, %v7959_v41  ;;  %v2706_v31 = vpop.f32.mrb[135].mxu0  ;;  %6766 = vmatmul.mubr.msk.bf16.vlgmr.msra.gmra.mrb[128].mxu1 %vm470_vm0, %v3018_v22  ;;  %v2948_v33 = vmax.f32 %v2712_v26, 0.0 }
 0x475   : > { %v2707_v32 = vadd.f32 %v7959_v41, %v2706_v31  ;;  %v2946_v35 = vmax.f32 %v2704_v28, 0.0 }
 0x476   : > { %v2949_v34 = vmax.f32 %v2715_v30, 0.0 }
 0x477   : > { %v2947_v36 = vmax.f32 %v2707_v32, 0.0 }
 0x478   : > { %v3020_v37 = vpack.c.bf16 %v2949_v34, %v2948_v33 }
 0x479   : > { %v3019_v38 = vpack.c.bf16 %v2947_v36, %v2946_v35  ;;  %v6703_v39 = vpop.f32.mrb[136].mxu0 }
 0x47a   : > { %v2728_v40 = vadd.f32 %v6703_v39, %v7959_v41  ;;  %v2719_v42 = vpop.f32.mrb[137].mxu0 }
 0x47b   : > { %v2720_v43 = vadd.f32 %v7959_v41, %v2719_v42  ;;  %v6704_v44 = vpop.f32.mrb[138].mxu0  ;;  %6769 = vmatprep.mubr.msk.bf16.mxu1 %vm470_vm0, %v3019_v38 }
 0x47c   : > { %v2731_v45 = vadd.f32 %v6704_v44, %v7959_v41  ;;  %v2722_v46 = vpop.f32.mrb[139].mxu0  ;;  %6770 = vmatmul.mubr.msk.bf16.gmra.mrb[132].mxu1 %vm470_vm0, %v3020_v37  ;;  %v2952_v48 = vmax.f32 %v2728_v40, 0.0 }
 0x47d   : > { %v2723_v47 = vadd.f32 %v7959_v41, %v2722_v46  ;;  %v2950_v50 = vmax.f32 %v2720_v43, 0.0 }
 0x47e   : > { %v2953_v49 = vmax.f32 %v2731_v45, 0.0 }
 0x47f   : > { %v2951_v51 = vmax.f32 %v2723_v47, 0.0 }
 0x480   : > { %v3022_v52 = vpack.c.bf16 %v2953_v49, %v2952_v48 }
 0x481   : > { %v3021_v53 = vpack.c.bf16 %v2951_v51, %v2950_v50  ;;  %v6707_v54 = vpop.f32.mrb[140].mxu0 }
 0x482   : > { %v2744_v55 = vadd.f32 %v6707_v54, %v7959_v41  ;;  %v2735_v56 = vpop.f32.mrb[141].mxu0 }
 0x483   : > { %v2736_v57 = vadd.f32 %v7959_v41, %v2735_v56  ;;  %v6708_v58 = vpop.f32.mrb[142].mxu0  ;;  %6773 = vmatprep.mubr.msk.bf16.mxu1 %vm470_vm0, %v3021_v53 }
 0x484   : > { %v2747_v59 = vadd.f32 %v6708_v58, %v7959_v41  ;;  %v2738_v60 = vpop.f32.mrb[143].mxu0  ;;  %6774 = vmatmul.mubr.msk.bf16.gmra.mrb[136].mxu1 %vm470_vm0, %v3022_v52  ;;  %v2956_v62 = vmax.f32 %v2744_v55, 0.0 }
 0x485   : > { %v2739_v61 = vadd.f32 %v7959_v41, %v2738_v60  ;;  %v2954_v0 = vmax.f32 %v2736_v57, 0.0 }
 0x486   : > { %v2957_v63 = vmax.f32 %v2747_v59, 0.0 }
 0x487   : > { %v2955_v1 = vmax.f32 %v2739_v61, 0.0 }
 0x488   : > { %v3024_v2 = vpack.c.bf16 %v2957_v63, %v2956_v62 }
 0x489   : > { %v3023_v3 = vpack.c.bf16 %v2955_v1, %v2954_v0  ;;  %v6711_v4 = vpop.f32.mrb[144].mxu0 }
 0x48a   : > { %v2760_v5 = vadd.f32 %v6711_v4, %v7959_v41  ;;  %v2751_v6 = vpop.f32.mrb[145].mxu0 }
 0x48b   : > { %v2752_v7 = vadd.f32 %v7959_v41, %v2751_v6  ;;  %v6712_v8 = vpop.f32.mrb[146].mxu0  ;;  %6777 = vmatprep.mubr.msk.bf16.mxu1 %vm470_vm0, %v3023_v3 }
 0x48c   : > { %v2763_v9 = vadd.f32 %v6712_v8, %v7959_v41  ;;  %v2754_v10 = vpop.f32.mrb[147].mxu0  ;;  %6778 = vmatmul.mubr.msk.bf16.gmra.mrb[140].mxu1 %vm470_vm0, %v3024_v2  ;;  %v2960_v12 = vmax.f32 %v2760_v5, 0.0 }
 0x48d   : > { %v2755_v11 = vadd.f32 %v7959_v41, %v2754_v10  ;;  %v2958_v14 = vmax.f32 %v2752_v7, 0.0 }
 0x48e   : > { %v2961_v13 = vmax.f32 %v2763_v9, 0.0 }
 0x48f   : > { %v2959_v15 = vmax.f32 %v2755_v11, 0.0 }
 0x490   : > { %v3026_v16 = vpack.c.bf16 %v2961_v13, %v2960_v12 }
 0x491   : > { %v3025_v17 = vpack.c.bf16 %v2959_v15, %v2958_v14  ;;  %v6715_v18 = vpop.f32.mrb[148].mxu0 }
 0x492   : > { %v2776_v19 = vadd.f32 %v6715_v18, %v7959_v41  ;;  %v2767_v20 = vpop.f32.mrb[149].mxu0 }
 0x493   : > { %v2768_v21 = vadd.f32 %v7959_v41, %v2767_v20  ;;  %v6716_v22 = vpop.f32.mrb[150].mxu0  ;;  %6781 = vmatprep.mubr.msk.bf16.mxu1 %vm470_vm0, %v3025_v17 }
 0x494   : > { %v2779_v23 = vadd.f32 %v6716_v22, %v7959_v41  ;;  %v2770_v24 = vpop.f32.mrb[151].mxu0  ;;  %6782 = vmatmul.mubr.msk.bf16.gmra.mrb[144].mxu1 %vm470_vm0, %v3026_v16  ;;  %v2964_v26 = vmax.f32 %v2776_v19, 0.0 }
 0x495   : > { %v2771_v25 = vadd.f32 %v7959_v41, %v2770_v24  ;;  %v2962_v28 = vmax.f32 %v2768_v21, 0.0 }
 0x496   : > { %v2965_v27 = vmax.f32 %v2779_v23, 0.0 }
 0x497   : > { %v2963_v29 = vmax.f32 %v2771_v25, 0.0 }
 0x498   : > { %v3028_v30 = vpack.c.bf16 %v2965_v27, %v2964_v26 }
 0x499   : > { %v3027_v31 = vpack.c.bf16 %v2963_v29, %v2962_v28  ;;  %v6719_v32 = vpop.f32.mrb[152].mxu0 }
 0x49a   : > { %v2792_v33 = vadd.f32 %v6719_v32, %v7959_v41  ;;  %v2783_v34 = vpop.f32.mrb[153].mxu0 }
 0x49b   : > { %v2784_v35 = vadd.f32 %v7959_v41, %v2783_v34  ;;  %v6720_v36 = vpop.f32.mrb[154].mxu0  ;;  %6785 = vmatprep.mubr.msk.bf16.mxu1 %vm470_vm0, %v3027_v31 }
 0x49c   : > { %v2795_v37 = vadd.f32 %v6720_v36, %v7959_v41  ;;  %v2786_v38 = vpop.f32.mrb[155].mxu0  ;;  %6786 = vmatmul.mubr.msk.bf16.gmra.mrb[148].mxu1 %vm470_vm0, %v3028_v30  ;;  %v2968_v40 = vmax.f32 %v2792_v33, 0.0 }
 0x49d   : > { %v2787_v39 = vadd.f32 %v7959_v41, %v2786_v38  ;;  %v2966_v43 = vmax.f32 %v2784_v35, 0.0 }
 0x49e   : > { %v2969_v42 = vmax.f32 %v2795_v37, 0.0 }
 0x49f   : > { %v2967_v44 = vmax.f32 %v2787_v39, 0.0 }
 0x4a0   : > { %v3030_v45 = vpack.c.bf16 %v2969_v42, %v2968_v40 }
 0x4a1   : > { %v3029_v46 = vpack.c.bf16 %v2967_v44, %v2966_v43  ;;  %v6723_v47 = vpop.f32.mrb[156].mxu0 }
 0x4a2   : > { %v2808_v48 = vadd.f32 %v6723_v47, %v7959_v41  ;;  %v2799_v49 = vpop.f32.mrb[157].mxu0 }
 0x4a3   : > { %v2800_v50 = vadd.f32 %v7959_v41, %v2799_v49  ;;  %v6724_v51 = vpop.f32.mrb[158].mxu0  ;;  %6789 = vmatprep.mubr.msk.bf16.mxu1 %vm470_vm0, %v3029_v46 }
 0x4a4   : > { %v2811_v52 = vadd.f32 %v6724_v51, %v7959_v41  ;;  %v2802_v53 = vpop.f32.mrb[159].mxu0  ;;  %6790 = vmatmul.mubr.msk.bf16.gmra.mrb[152].mxu1 %vm470_vm0, %v3030_v45  ;;  %v2972_v55 = vmax.f32 %v2808_v48, 0.0 }
 0x4a5   : > { %v2803_v54 = vadd.f32 %v7959_v41, %v2802_v53  ;;  %v2970_v57 = vmax.f32 %v2800_v50, 0.0 }
 0x4a6   : > { %v2973_v56 = vmax.f32 %v2811_v52, 0.0 }
 0x4a7   : > { %v2971_v58 = vmax.f32 %v2803_v54, 0.0 }
 0x4a8   : > { %v3032_v59 = vpack.c.bf16 %v2973_v56, %v2972_v55 }
 0x4a9   : > { %v3031_v60 = vpack.c.bf16 %v2971_v58, %v2970_v57  ;;  %v6727_v61 = vpop.f32.mrb[160].mxu0 }
 0x4aa   : > { %v2824_v62 = vadd.f32 %v6727_v61, %v7959_v41  ;;  %v2815_v63 = vpop.f32.mrb[161].mxu0 }
 0x4ab   : > { %v2816_v0 = vadd.f32 %v7959_v41, %v2815_v63  ;;  %v6728_v1 = vpop.f32.mrb[162].mxu0  ;;  %6793 = vmatprep.mubr.msk.bf16.mxu1 %vm470_vm0, %v3031_v60 }
 0x4ac   : > { %v2827_v2 = vadd.f32 %v6728_v1, %v7959_v41  ;;  %v2818_v3 = vpop.f32.mrb[163].mxu0  ;;  %6794 = vmatmul.mubr.msk.bf16.gmra.mrb[156].mxu1 %vm470_vm0, %v3032_v59  ;;  %v2976_v5 = vmax.f32 %v2824_v62, 0.0 }
 0x4ad   : > { %v2819_v4 = vadd.f32 %v7959_v41, %v2818_v3  ;;  %v2974_v7 = vmax.f32 %v2816_v0, 0.0 }
 0x4ae   : > { %v2977_v6 = vmax.f32 %v2827_v2, 0.0 }
 0x4af   : > { %v2975_v8 = vmax.f32 %v2819_v4, 0.0 }
 0x4b0   : > { %v3034_v9 = vpack.c.bf16 %v2977_v6, %v2976_v5 }
 0x4b1   : > { %v3033_v10 = vpack.c.bf16 %v2975_v8, %v2974_v7  ;;  %v6731_v11 = vpop.f32.mrb[164].mxu0 }
 0x4b2   : > { %v2840_v12 = vadd.f32 %v6731_v11, %v7959_v41  ;;  %v2831_v13 = vpop.f32.mrb[165].mxu0 }
 0x4b3   : > { %v2832_v14 = vadd.f32 %v7959_v41, %v2831_v13  ;;  %v6732_v15 = vpop.f32.mrb[166].mxu0  ;;  %6797 = vmatprep.mubr.msk.bf16.mxu1 %vm470_vm0, %v3033_v10 }
 0x4b4   : > { %v2843_v16 = vadd.f32 %v6732_v15, %v7959_v41  ;;  %v2834_v17 = vpop.f32.mrb[167].mxu0  ;;  %6798 = vmatmul.mubr.msk.bf16.gmra.mrb[160].mxu1 %vm470_vm0, %v3034_v9  ;;  %v2980_v19 = vmax.f32 %v2840_v12, 0.0 }
 0x4b5   : > { %v2835_v18 = vadd.f32 %v7959_v41, %v2834_v17  ;;  %v2978_v21 = vmax.f32 %v2832_v14, 0.0 }
 0x4b6   : > { %v2981_v20 = vmax.f32 %v2843_v16, 0.0 }
 0x4b7   : > { %v2979_v22 = vmax.f32 %v2835_v18, 0.0 }
 0x4b8   : > { %v3036_v23 = vpack.c.bf16 %v2981_v20, %v2980_v19 }
 0x4b9   : > { %v3035_v24 = vpack.c.bf16 %v2979_v22, %v2978_v21  ;;  %v6735_v25 = vpop.f32.mrb[168].mxu0 }
 0x4ba   : > { %v2856_v26 = vadd.f32 %v6735_v25, %v7959_v41  ;;  %v2847_v27 = vpop.f32.mrb[169].mxu0 }
 0x4bb   : > { %v2848_v28 = vadd.f32 %v7959_v41, %v2847_v27  ;;  %v6736_v29 = vpop.f32.mrb[170].mxu0  ;;  %6801 = vmatprep.mubr.msk.bf16.mxu1 %vm470_vm0, %v3035_v24 }
 0x4bc   : > { %v2859_v30 = vadd.f32 %v6736_v29, %v7959_v41  ;;  %v2850_v31 = vpop.f32.mrb[171].mxu0  ;;  %6802 = vmatmul.mubr.msk.bf16.gmra.mrb[164].mxu1 %vm470_vm0, %v3036_v23  ;;  %v2984_v33 = vmax.f32 %v2856_v26, 0.0 }
 0x4bd   : > { %v2851_v32 = vadd.f32 %v7959_v41, %v2850_v31  ;;  %v2982_v35 = vmax.f32 %v2848_v28, 0.0 }
 0x4be   : > { %v2985_v34 = vmax.f32 %v2859_v30, 0.0 }
 0x4bf   : > { %v2983_v36 = vmax.f32 %v2851_v32, 0.0 }
 0x4c0   : > { %v3038_v37 = vpack.c.bf16 %v2985_v34, %v2984_v33 }
 0x4c1   : > { %v3037_v38 = vpack.c.bf16 %v2983_v36, %v2982_v35  ;;  %v6739_v39 = vpop.f32.mrb[172].mxu0 }
 0x4c2   : > { %v2872_v40 = vadd.f32 %v6739_v39, %v7959_v41  ;;  %v2863_v42 = vpop.f32.mrb[173].mxu0 }
 0x4c3   : > { %v2864_v43 = vadd.f32 %v7959_v41, %v2863_v42  ;;  %v6740_v44 = vpop.f32.mrb[174].mxu0  ;;  %6805 = vmatprep.mubr.msk.bf16.mxu1 %vm470_vm0, %v3037_v38 }
 0x4c4   : > { %v2875_v45 = vadd.f32 %v6740_v44, %v7959_v41  ;;  %v2866_v46 = vpop.f32.mrb[175].mxu0  ;;  %6806 = vmatmul.mubr.msk.bf16.gmra.mrb[168].mxu1 %vm470_vm0, %v3038_v37  ;;  %v2988_v48 = vmax.f32 %v2872_v40, 0.0 }
 0x4c5   : > { %v2867_v47 = vadd.f32 %v7959_v41, %v2866_v46  ;;  %v2986_v50 = vmax.f32 %v2864_v43, 0.0 }
 0x4c6   : > { %v2989_v49 = vmax.f32 %v2875_v45, 0.0 }
 0x4c7   : > { %v2987_v51 = vmax.f32 %v2867_v47, 0.0  ;;  %v7194_v47 = vld [vmem:[%s8679_s3 + $0xc0] sm:$0xff]  }
 0x4c8   : > { %v3040_v52 = vpack.c.bf16 %v2989_v49, %v2988_v48  ;;  %6901 = vmatprep.subr.bf16.mxu1 %v7194_v47 }
 0x4c9   : > { %v3039_v53 = vpack.c.bf16 %v2987_v51, %v2986_v50  ;;  %v6743_v54 = vpop.f32.mrb[176].mxu0  ;;  %6902 = vmatpush3.bf16.msra.mxu1 %v7194_v47 }
 0x4ca   : > { %v2888_v55 = vadd.f32 %v6743_v54, %v7959_v41  ;;  %v2879_v56 = vpop.f32.mrb[177].mxu0 }
 0x4cb   : > { %v2880_v57 = vadd.f32 %v7959_v41, %v2879_v56  ;;  %v6744_v58 = vpop.f32.mrb[178].mxu0  ;;  %6809 = vmatprep.mubr.msk.bf16.mxu1 %vm470_vm0, %v3039_v53  ;;  %v7196_v56 = vld [vmem:[%s8679_s3 + $0xd0] sm:$0xff]  }
 0x4cc   : > { %v2891_v59 = vadd.f32 %v6744_v58, %v7959_v41  ;;  %v2882_v60 = vpop.f32.mrb[179].mxu0  ;;  %6810 = vmatmul.mubr.msk.bf16.gmra.mrb[172].mxu1 %vm470_vm0, %v3040_v52  ;;  %v2992_v62 = vmax.f32 %v2888_v55, 0.0  ;;  %v7195_v55 = vld [vmem:[%s8679_s3 + $0xc8] sm:$0xff]  }
 0x4cd   : > { %v2883_v61 = vadd.f32 %v7959_v41, %v2882_v60  ;;  %v2990_v0 = vmax.f32 %v2880_v57, 0.0  ;;  %6903 = vmatprep.subr.bf16.mxu1 %v7195_v55 }
 0x4ce   : > { %v2993_v63 = vmax.f32 %v2891_v59, 0.0  ;;  %6904 = vmatpush3.bf16.msra.mxu1 %v7195_v55 }
 0x4cf   : > { %v2991_v1 = vmax.f32 %v2883_v61, 0.0  ;;  %6905 = vmatprep.subr.bf16.mxu1 %v7196_v56 }
 0x4d0   : > { %v3042_v2 = vpack.c.bf16 %v2993_v63, %v2992_v62  ;;  %v7197_v63 = vld [vmem:[%s8679_s3 + $0xd8] sm:$0xff]  }
 0x4d1   : > { %v3041_v3 = vpack.c.bf16 %v2991_v1, %v2990_v0  ;;  %v6747_v4 = vpop.f32.mrb[180].mxu0 }
 0x4d2   : > { %v2904_v5 = vadd.f32 %v6747_v4, %v7959_v41  ;;  %v2895_v6 = vpop.f32.mrb[181].mxu0  ;;  %6906 = vmatpush3.bf16.msra.mxu1 %v7196_v56 }
 0x4d3   : > { %v2896_v7 = vadd.f32 %v7959_v41, %v2895_v6  ;;  %v6748_v8 = vpop.f32.mrb[182].mxu0  ;;  %6813 = vmatprep.mubr.msk.bf16.mxu1 %vm470_vm0, %v3041_v3  ;;  %6907 = vmatprep.subr.bf16.mxu1 %v7197_v63 }
 0x4d4   : > { %v2907_v9 = vadd.f32 %v6748_v8, %v7959_v41  ;;  %v2898_v10 = vpop.f32.mrb[183].mxu0  ;;  %6814 = vmatmul.mubr.msk.bf16.gmra.mrb[176].mxu1 %vm470_vm0, %v3042_v2  ;;  %v2996_v12 = vmax.f32 %v2904_v5, 0.0 }
 0x4d5   : > { %v2899_v11 = vadd.f32 %v7959_v41, %v2898_v10  ;;  %v2994_v14 = vmax.f32 %v2896_v7, 0.0 }
 0x4d6   : > { %v2997_v13 = vmax.f32 %v2907_v9, 0.0  ;;  %6908 = vmatpush3.bf16.msra.mxu1 %v7197_v63 }
 0x4d7   : > { %v2995_v15 = vmax.f32 %v2899_v11, 0.0 }
 0x4d8   : > { %v3044_v16 = vpack.c.bf16 %v2997_v13, %v2996_v12 }
 0x4d9   : > { %v3043_v17 = vpack.c.bf16 %v2995_v15, %v2994_v14  ;;  %v6751_v18 = vpop.f32.mrb[184].mxu0 }
 0x4da   : > { %v2920_v19 = vadd.f32 %v6751_v18, %v7959_v41  ;;  %v2911_v20 = vpop.f32.mrb[185].mxu0 }
 0x4db   : > { %v2912_v21 = vadd.f32 %v7959_v41, %v2911_v20  ;;  %v6752_v22 = vpop.f32.mrb[186].mxu0  ;;  %6817 = vmatprep.mubr.msk.bf16.mxu1 %vm470_vm0, %v3043_v17 }
 0x4dc   : > { %v2923_v23 = vadd.f32 %v6752_v22, %v7959_v41  ;;  %v2914_v24 = vpop.f32.mrb[187].mxu0  ;;  %6818 = vmatmul.mubr.msk.bf16.gmra.mrb[180].mxu1 %vm470_vm0, %v3044_v16  ;;  %v3000_v26 = vmax.f32 %v2920_v19, 0.0 }
 0x4dd   : > { %v2915_v25 = vadd.f32 %v7959_v41, %v2914_v24  ;;  %v2998_v28 = vmax.f32 %v2912_v21, 0.0 }
 0x4de   : > { %v3001_v27 = vmax.f32 %v2923_v23, 0.0 }
 0x4df   : > { %v2999_v29 = vmax.f32 %v2915_v25, 0.0 }
 0x4e0   : > { %v3046_v30 = vpack.c.bf16 %v3001_v27, %v3000_v26 }
 0x4e1   : > { %v3045_v31 = vpack.c.bf16 %v2999_v29, %v2998_v28  ;;  %v6755_v32 = vpop.f32.mrb[188].mxu0 }
 0x4e2   : > { %v2936_v33 = vadd.f32 %v6755_v32, %v7959_v41  ;;  %v2927_v34 = vpop.f32.mrb[189].mxu0 }
 0x4e3   : > { %v2928_v35 = vadd.f32 %v7959_v41, %v2927_v34  ;;  %v6756_v36 = vpop.f32.mrb[190].mxu0  ;;  %6821 = vmatprep.mubr.msk.bf16.mxu1 %vm470_vm0, %v3045_v31 }
 0x4e4   : > { %v2939_v37 = vadd.f32 %v6756_v36, %v7959_v41  ;;  %v2930_v38 = vpop.f32.mrb[191].mxu0  ;;  %6822 = vmatmul.mubr.msk.bf16.gmra.mrb[184].mxu1 %vm470_vm0, %v3046_v30  ;;  %v3004_v40 = vmax.f32 %v2936_v33, 0.0 }
 0x4e5   : > { %v2931_v39 = vadd.f32 %v7959_v41, %v2930_v38  ;;  %v3002_v43 = vmax.f32 %v2928_v35, 0.0  ;;  %v8072_v41 = vld [vmem:[%s8680_s4 + $0x4] ss:$0 sm:$0xff] }
 0x4e6   : > { %v3005_v42 = vmax.f32 %v2939_v37, 0.0 }
 0x4e7   : > { %v3003_v44 = vmax.f32 %v2931_v39, 0.0 }
 0x4e8   : > { %v3048_v45 = vpack.c.bf16 %v3005_v42, %v3004_v40 }
 0x4e9   : > { %v3047_v46 = vpack.c.bf16 %v3003_v44, %v3002_v43 }
 0x4eb   : > { %6825 = vmatprep.mubr.msk.bf16.mxu1 %vm470_vm0, %v3047_v46 }
 0x4ec   : > { %6826 = vmatmul.mubr.msk.bf16.gmra.mrb[188].mxu1 %vm470_vm0, %v3048_v45 }
 0x547   : > { %v6767_v48 = vpop.f32.mrb[128].mxu1 }
 0x548   : > { %v3218_v49 = vadd.f32 %v6767_v48, %v8072_v41  ;;  %v3209_v50 = vpop.f32.mrb[129].mxu1 }
 0x549   : > { %v3210_v51 = vadd.f32 %v8072_v41, %v3209_v50  ;;  %v6768_v52 = vpop.f32.mrb[130].mxu1 }
 0x54a   : > { %v3221_v53 = vadd.f32 %v6768_v52, %v8072_v41  ;;  %v3212_v54 = vpop.f32.mrb[131].mxu1  ;;  %v3466_v58 = vmax.f32 %v3218_v49, 0.0 }
 0x54b   : > { %v3213_v57 = vadd.f32 %v8072_v41, %v3212_v54  ;;  %v3464_v60 = vmax.f32 %v3210_v51, 0.0 }
 0x54c   : > { %v3467_v59 = vmax.f32 %v3221_v53, 0.0 }
 0x54d   : > { %v3465_v61 = vmax.f32 %v3213_v57, 0.0 }
 0x54e   : > { %v3540_v62 = vpack.c.bf16 %v3467_v59, %v3466_v58 }
 0x54f   : > { %v3539_v0 = vpack.c.bf16 %v3465_v61, %v3464_v60  ;;  %v6771_v1 = vpop.f32.mrb[132].mxu1 }
 0x550   : > { %v3234_v2 = vadd.f32 %v6771_v1, %v8072_v41  ;;  %v3225_v3 = vpop.f32.mrb[133].mxu1 }
 0x551   : > { %v3226_v4 = vadd.f32 %v8072_v41, %v3225_v3  ;;  %v6772_v5 = vpop.f32.mrb[134].mxu1  ;;  %6837 = vmatprep.mubr.msk.bf16.mxu0 %vm470_vm0, %v3539_v0 }
 0x552   : > { %v3237_v6 = vadd.f32 %v6772_v5, %v8072_v41  ;;  %v3228_v7 = vpop.f32.mrb[135].mxu1  ;;  %6838 = vmatmul.mubr.msk.bf16.vlgmr.msra.gmra.mrb[192].mxu0 %vm470_vm0, %v3540_v62  ;;  %v3470_v9 = vmax.f32 %v3234_v2, 0.0 }
 0x553   : > { %v3229_v8 = vadd.f32 %v8072_v41, %v3228_v7  ;;  %v3468_v11 = vmax.f32 %v3226_v4, 0.0 }
 0x554   : > { %v3471_v10 = vmax.f32 %v3237_v6, 0.0 }
 0x555   : > { %v3469_v12 = vmax.f32 %v3229_v8, 0.0 }
 0x556   : > { %v3542_v13 = vpack.c.bf16 %v3471_v10, %v3470_v9 }
 0x557   : > { %v3541_v14 = vpack.c.bf16 %v3469_v12, %v3468_v11  ;;  %v6775_v15 = vpop.f32.mrb[136].mxu1 }
 0x558   : > { %v3250_v16 = vadd.f32 %v6775_v15, %v8072_v41  ;;  %v3241_v17 = vpop.f32.mrb[137].mxu1 }
 0x559   : > { %v3242_v18 = vadd.f32 %v8072_v41, %v3241_v17  ;;  %v6776_v19 = vpop.f32.mrb[138].mxu1  ;;  %6841 = vmatprep.mubr.msk.bf16.mxu0 %vm470_vm0, %v3541_v14 }
 0x55a   : > { %v3253_v20 = vadd.f32 %v6776_v19, %v8072_v41  ;;  %v3244_v21 = vpop.f32.mrb[139].mxu1  ;;  %6842 = vmatmul.mubr.msk.bf16.gmra.mrb[196].mxu0 %vm470_vm0, %v3542_v13  ;;  %v3474_v23 = vmax.f32 %v3250_v16, 0.0 }
 0x55b   : > { %v3245_v22 = vadd.f32 %v8072_v41, %v3244_v21  ;;  %v3472_v25 = vmax.f32 %v3242_v18, 0.0 }
 0x55c   : > { %v3475_v24 = vmax.f32 %v3253_v20, 0.0 }
 0x55d   : > { %v3473_v26 = vmax.f32 %v3245_v22, 0.0 }
 0x55e   : > { %v3544_v27 = vpack.c.bf16 %v3475_v24, %v3474_v23 }
 0x55f   : > { %v3543_v28 = vpack.c.bf16 %v3473_v26, %v3472_v25  ;;  %v6779_v29 = vpop.f32.mrb[140].mxu1 }
 0x560   : > { %v3266_v30 = vadd.f32 %v6779_v29, %v8072_v41  ;;  %v3257_v31 = vpop.f32.mrb[141].mxu1 }
 0x561   : > { %v3258_v32 = vadd.f32 %v8072_v41, %v3257_v31  ;;  %v6780_v33 = vpop.f32.mrb[142].mxu1  ;;  %6845 = vmatprep.mubr.msk.bf16.mxu0 %vm470_vm0, %v3543_v28 }
 0x562   : > { %v3269_v34 = vadd.f32 %v6780_v33, %v8072_v41  ;;  %v3260_v35 = vpop.f32.mrb[143].mxu1  ;;  %6846 = vmatmul.mubr.msk.bf16.gmra.mrb[200].mxu0 %vm470_vm0, %v3544_v27  ;;  %v3478_v37 = vmax.f32 %v3266_v30, 0.0 }
 0x563   : > { %v3261_v36 = vadd.f32 %v8072_v41, %v3260_v35  ;;  %v3476_v39 = vmax.f32 %v3258_v32, 0.0 }
 0x564   : > { %v3479_v38 = vmax.f32 %v3269_v34, 0.0 }
 0x565   : > { %v3477_v40 = vmax.f32 %v3261_v36, 0.0 }
 0x566   : > { %v3546_v42 = vpack.c.bf16 %v3479_v38, %v3478_v37 }
 0x567   : > { %v3545_v43 = vpack.c.bf16 %v3477_v40, %v3476_v39  ;;  %v6783_v44 = vpop.f32.mrb[144].mxu1 }
 0x568   : > { %v3282_v45 = vadd.f32 %v6783_v44, %v8072_v41  ;;  %v3273_v46 = vpop.f32.mrb[145].mxu1 }
 0x569   : > { %v3274_v47 = vadd.f32 %v8072_v41, %v3273_v46  ;;  %v6784_v48 = vpop.f32.mrb[146].mxu1  ;;  %6849 = vmatprep.mubr.msk.bf16.mxu0 %vm470_vm0, %v3545_v43 }
 0x56a   : > { %v3285_v49 = vadd.f32 %v6784_v48, %v8072_v41  ;;  %v3276_v50 = vpop.f32.mrb[147].mxu1  ;;  %6850 = vmatmul.mubr.msk.bf16.gmra.mrb[204].mxu0 %vm470_vm0, %v3546_v42  ;;  %v3482_v52 = vmax.f32 %v3282_v45, 0.0 }
 0x56b   : > { %v3277_v51 = vadd.f32 %v8072_v41, %v3276_v50  ;;  %v3480_v54 = vmax.f32 %v3274_v47, 0.0 }
 0x56c   : > { %v3483_v53 = vmax.f32 %v3285_v49, 0.0 }
 0x56d   : > { %v3481_v55 = vmax.f32 %v3277_v51, 0.0 }
 0x56e   : > { %v3548_v56 = vpack.c.bf16 %v3483_v53, %v3482_v52 }
 0x56f   : > { %v3547_v57 = vpack.c.bf16 %v3481_v55, %v3480_v54  ;;  %v6787_v58 = vpop.f32.mrb[148].mxu1 }
 0x570   : > { %v3298_v59 = vadd.f32 %v6787_v58, %v8072_v41  ;;  %v3289_v60 = vpop.f32.mrb[149].mxu1 }
 0x571   : > { %v3290_v61 = vadd.f32 %v8072_v41, %v3289_v60  ;;  %v6788_v62 = vpop.f32.mrb[150].mxu1  ;;  %6853 = vmatprep.mubr.msk.bf16.mxu0 %vm470_vm0, %v3547_v57 }
 0x572   : > { %v3301_v63 = vadd.f32 %v6788_v62, %v8072_v41  ;;  %v3292_v0 = vpop.f32.mrb[151].mxu1  ;;  %6854 = vmatmul.mubr.msk.bf16.gmra.mrb[208].mxu0 %vm470_vm0, %v3548_v56  ;;  %v3486_v2 = vmax.f32 %v3298_v59, 0.0 }
 0x573   : > { %v3293_v1 = vadd.f32 %v8072_v41, %v3292_v0  ;;  %v3484_v4 = vmax.f32 %v3290_v61, 0.0 }
 0x574   : > { %v3487_v3 = vmax.f32 %v3301_v63, 0.0 }
 0x575   : > { %v3485_v5 = vmax.f32 %v3293_v1, 0.0 }
 0x576   : > { %v3550_v6 = vpack.c.bf16 %v3487_v3, %v3486_v2 }
 0x577   : > { %v3549_v7 = vpack.c.bf16 %v3485_v5, %v3484_v4  ;;  %v6791_v8 = vpop.f32.mrb[152].mxu1 }
 0x578   : > { %v3314_v9 = vadd.f32 %v6791_v8, %v8072_v41  ;;  %v3305_v10 = vpop.f32.mrb[153].mxu1 }
 0x579   : > { %v3306_v11 = vadd.f32 %v8072_v41, %v3305_v10  ;;  %v6792_v12 = vpop.f32.mrb[154].mxu1  ;;  %6857 = vmatprep.mubr.msk.bf16.mxu0 %vm470_vm0, %v3549_v7 }
 0x57a   : > { %v3317_v13 = vadd.f32 %v6792_v12, %v8072_v41  ;;  %v3308_v14 = vpop.f32.mrb[155].mxu1  ;;  %6858 = vmatmul.mubr.msk.bf16.gmra.mrb[212].mxu0 %vm470_vm0, %v3550_v6  ;;  %v3490_v16 = vmax.f32 %v3314_v9, 0.0 }
 0x57b   : > { %v3309_v15 = vadd.f32 %v8072_v41, %v3308_v14  ;;  %v3488_v18 = vmax.f32 %v3306_v11, 0.0 }
 0x57c   : > { %v3491_v17 = vmax.f32 %v3317_v13, 0.0 }
 0x57d   : > { %v3489_v19 = vmax.f32 %v3309_v15, 0.0 }
 0x57e   : > { %v3552_v20 = vpack.c.bf16 %v3491_v17, %v3490_v16 }
 0x57f   : > { %v3551_v21 = vpack.c.bf16 %v3489_v19, %v3488_v18  ;;  %v6795_v22 = vpop.f32.mrb[156].mxu1 }
 0x580   : > { %v3330_v23 = vadd.f32 %v6795_v22, %v8072_v41  ;;  %v3321_v24 = vpop.f32.mrb[157].mxu1 }
 0x581   : > { %v3322_v25 = vadd.f32 %v8072_v41, %v3321_v24  ;;  %v6796_v26 = vpop.f32.mrb[158].mxu1  ;;  %6861 = vmatprep.mubr.msk.bf16.mxu0 %vm470_vm0, %v3551_v21 }
 0x582   : > { %v3333_v27 = vadd.f32 %v6796_v26, %v8072_v41  ;;  %v3324_v28 = vpop.f32.mrb[159].mxu1  ;;  %6862 = vmatmul.mubr.msk.bf16.gmra.mrb[216].mxu0 %vm470_vm0, %v3552_v20  ;;  %v3494_v30 = vmax.f32 %v3330_v23, 0.0 }
 0x583   : > { %v3325_v29 = vadd.f32 %v8072_v41, %v3324_v28  ;;  %v3492_v32 = vmax.f32 %v3322_v25, 0.0 }
 0x584   : > { %v3495_v31 = vmax.f32 %v3333_v27, 0.0 }
 0x585   : > { %v3493_v33 = vmax.f32 %v3325_v29, 0.0 }
 0x586   : > { %v3554_v34 = vpack.c.bf16 %v3495_v31, %v3494_v30 }
 0x587   : > { %v3553_v35 = vpack.c.bf16 %v3493_v33, %v3492_v32  ;;  %v6799_v36 = vpop.f32.mrb[160].mxu1 }
 0x588   : > { %v3346_v37 = vadd.f32 %v6799_v36, %v8072_v41  ;;  %v3337_v38 = vpop.f32.mrb[161].mxu1 }
 0x589   : > { %v3338_v39 = vadd.f32 %v8072_v41, %v3337_v38  ;;  %v6800_v40 = vpop.f32.mrb[162].mxu1  ;;  %6865 = vmatprep.mubr.msk.bf16.mxu0 %vm470_vm0, %v3553_v35 }
 0x58a   : > { %v3349_v42 = vadd.f32 %v6800_v40, %v8072_v41  ;;  %v3340_v43 = vpop.f32.mrb[163].mxu1  ;;  %6866 = vmatmul.mubr.msk.bf16.gmra.mrb[220].mxu0 %vm470_vm0, %v3554_v34  ;;  %v3498_v45 = vmax.f32 %v3346_v37, 0.0 }
 0x58b   : > { %v3341_v44 = vadd.f32 %v8072_v41, %v3340_v43  ;;  %v3496_v47 = vmax.f32 %v3338_v39, 0.0 }
 0x58c   : > { %v3499_v46 = vmax.f32 %v3349_v42, 0.0 }
 0x58d   : > { %v3497_v48 = vmax.f32 %v3341_v44, 0.0 }
 0x58e   : > { %v3556_v49 = vpack.c.bf16 %v3499_v46, %v3498_v45 }
 0x58f   : > { %v3555_v50 = vpack.c.bf16 %v3497_v48, %v3496_v47  ;;  %v6803_v51 = vpop.f32.mrb[164].mxu1 }
 0x590   : > { %v3362_v52 = vadd.f32 %v6803_v51, %v8072_v41  ;;  %v3353_v53 = vpop.f32.mrb[165].mxu1 }
 0x591   : > { %v3354_v54 = vadd.f32 %v8072_v41, %v3353_v53  ;;  %v6804_v55 = vpop.f32.mrb[166].mxu1  ;;  %6869 = vmatprep.mubr.msk.bf16.mxu0 %vm470_vm0, %v3555_v50 }
 0x592   : > { %v3365_v56 = vadd.f32 %v6804_v55, %v8072_v41  ;;  %v3356_v57 = vpop.f32.mrb[167].mxu1  ;;  %6870 = vmatmul.mubr.msk.bf16.gmra.mrb[224].mxu0 %vm470_vm0, %v3556_v49  ;;  %v3502_v59 = vmax.f32 %v3362_v52, 0.0 }
 0x593   : > { %v3357_v58 = vadd.f32 %v8072_v41, %v3356_v57  ;;  %v3500_v61 = vmax.f32 %v3354_v54, 0.0 }
 0x594   : > { %v3503_v60 = vmax.f32 %v3365_v56, 0.0 }
 0x595   : > { %v3501_v62 = vmax.f32 %v3357_v58, 0.0 }
 0x596   : > { %v3558_v63 = vpack.c.bf16 %v3503_v60, %v3502_v59 }
 0x597   : > { %v3557_v0 = vpack.c.bf16 %v3501_v62, %v3500_v61  ;;  %v6807_v1 = vpop.f32.mrb[168].mxu1 }
 0x598   : > { %v3378_v2 = vadd.f32 %v6807_v1, %v8072_v41  ;;  %v3369_v3 = vpop.f32.mrb[169].mxu1 }
 0x599   : > { %v3370_v4 = vadd.f32 %v8072_v41, %v3369_v3  ;;  %v6808_v5 = vpop.f32.mrb[170].mxu1  ;;  %6873 = vmatprep.mubr.msk.bf16.mxu0 %vm470_vm0, %v3557_v0 }
 0x59a   : > { %v3381_v6 = vadd.f32 %v6808_v5, %v8072_v41  ;;  %v3372_v7 = vpop.f32.mrb[171].mxu1  ;;  %6874 = vmatmul.mubr.msk.bf16.gmra.mrb[228].mxu0 %vm470_vm0, %v3558_v63  ;;  %v3506_v9 = vmax.f32 %v3378_v2, 0.0 }
 0x59b   : > { %v3373_v8 = vadd.f32 %v8072_v41, %v3372_v7  ;;  %v3504_v11 = vmax.f32 %v3370_v4, 0.0 }
 0x59c   : > { %v3507_v10 = vmax.f32 %v3381_v6, 0.0 }
 0x59d   : > { %v3505_v12 = vmax.f32 %v3373_v8, 0.0 }
 0x59e   : > { %v3560_v13 = vpack.c.bf16 %v3507_v10, %v3506_v9 }
 0x59f   : > { %v3559_v14 = vpack.c.bf16 %v3505_v12, %v3504_v11  ;;  %v6811_v15 = vpop.f32.mrb[172].mxu1 }
 0x5a0   : > { %v3394_v16 = vadd.f32 %v6811_v15, %v8072_v41  ;;  %v3385_v17 = vpop.f32.mrb[173].mxu1 }
 0x5a1   : > { %v3386_v18 = vadd.f32 %v8072_v41, %v3385_v17  ;;  %v6812_v19 = vpop.f32.mrb[174].mxu1  ;;  %6877 = vmatprep.mubr.msk.bf16.mxu0 %vm470_vm0, %v3559_v14 }
 0x5a2   : > { %v3397_v20 = vadd.f32 %v6812_v19, %v8072_v41  ;;  %v3388_v21 = vpop.f32.mrb[175].mxu1  ;;  %6878 = vmatmul.mubr.msk.bf16.gmra.mrb[232].mxu0 %vm470_vm0, %v3560_v13  ;;  %v3510_v23 = vmax.f32 %v3394_v16, 0.0 }
 0x5a3   : > { %v3389_v22 = vadd.f32 %v8072_v41, %v3388_v21  ;;  %v3508_v25 = vmax.f32 %v3386_v18, 0.0 }
 0x5a4   : > { %v3511_v24 = vmax.f32 %v3397_v20, 0.0 }
 0x5a5   : > { %v3509_v26 = vmax.f32 %v3389_v22, 0.0  ;;  %v7198_v22 = vld [vmem:[%s8681_s5] sm:$0xff]  }
 0x5a6   : > { %v3562_v27 = vpack.c.bf16 %v3511_v24, %v3510_v23  ;;  %6973 = vmatprep.subr.bf16.mxu0 %v7198_v22 }
 0x5a7   : > { %v3561_v28 = vpack.c.bf16 %v3509_v26, %v3508_v25  ;;  %v6815_v29 = vpop.f32.mrb[176].mxu1  ;;  %6974 = vmatpush3.bf16.msra.mxu0 %v7198_v22 }
 0x5a8   : > { %v3410_v30 = vadd.f32 %v6815_v29, %v8072_v41  ;;  %v3401_v31 = vpop.f32.mrb[177].mxu1 }
 0x5a9   : > { %v3402_v32 = vadd.f32 %v8072_v41, %v3401_v31  ;;  %v6816_v33 = vpop.f32.mrb[178].mxu1  ;;  %6881 = vmatprep.mubr.msk.bf16.mxu0 %vm470_vm0, %v3561_v28  ;;  %v7200_v31 = vld [vmem:[%s8681_s5 + $0x10] sm:$0xff]  }
 0x5aa   : > { %v3413_v34 = vadd.f32 %v6816_v33, %v8072_v41  ;;  %v3404_v35 = vpop.f32.mrb[179].mxu1  ;;  %6882 = vmatmul.mubr.msk.bf16.gmra.mrb[236].mxu0 %vm470_vm0, %v3562_v27  ;;  %v3514_v37 = vmax.f32 %v3410_v30, 0.0  ;;  %v7199_v30 = vld [vmem:[%s8681_s5 + $0x8] sm:$0xff]  }
 0x5ab   : > { %v3405_v36 = vadd.f32 %v8072_v41, %v3404_v35  ;;  %v3512_v39 = vmax.f32 %v3402_v32, 0.0  ;;  %6975 = vmatprep.subr.bf16.mxu0 %v7199_v30 }
 0x5ac   : > { %v3515_v38 = vmax.f32 %v3413_v34, 0.0  ;;  %6976 = vmatpush3.bf16.msra.mxu0 %v7199_v30 }
 0x5ad   : > { %v3513_v40 = vmax.f32 %v3405_v36, 0.0  ;;  %6977 = vmatprep.subr.bf16.mxu0 %v7200_v31 }
 0x5ae   : > { %v3564_v42 = vpack.c.bf16 %v3515_v38, %v3514_v37  ;;  %v7201_v38 = vld [vmem:[%s8681_s5 + $0x18] sm:$0xff]  }
 0x5af   : > { %v3563_v43 = vpack.c.bf16 %v3513_v40, %v3512_v39  ;;  %v6819_v44 = vpop.f32.mrb[180].mxu1 }
 0x5b0   : > { %v3426_v45 = vadd.f32 %v6819_v44, %v8072_v41  ;;  %v3417_v46 = vpop.f32.mrb[181].mxu1  ;;  %6978 = vmatpush3.bf16.msra.mxu0 %v7200_v31 }
 0x5b1   : > { %v3418_v47 = vadd.f32 %v8072_v41, %v3417_v46  ;;  %v6820_v48 = vpop.f32.mrb[182].mxu1  ;;  %6885 = vmatprep.mubr.msk.bf16.mxu0 %vm470_vm0, %v3563_v43  ;;  %6979 = vmatprep.subr.bf16.mxu0 %v7201_v38 }
 0x5b2   : > { %v3429_v49 = vadd.f32 %v6820_v48, %v8072_v41  ;;  %v3420_v50 = vpop.f32.mrb[183].mxu1  ;;  %6886 = vmatmul.mubr.msk.bf16.gmra.mrb[240].mxu0 %vm470_vm0, %v3564_v42  ;;  %v3518_v52 = vmax.f32 %v3426_v45, 0.0 }
 0x5b3   : > { %v3421_v51 = vadd.f32 %v8072_v41, %v3420_v50  ;;  %v3516_v54 = vmax.f32 %v3418_v47, 0.0 }
 0x5b4   : > { %v3519_v53 = vmax.f32 %v3429_v49, 0.0  ;;  %6980 = vmatpush3.bf16.msra.mxu0 %v7201_v38 }
 0x5b5   : > { %v3517_v55 = vmax.f32 %v3421_v51, 0.0 }
 0x5b6   : > { %v3566_v56 = vpack.c.bf16 %v3519_v53, %v3518_v52 }
 0x5b7   : > { %v3565_v57 = vpack.c.bf16 %v3517_v55, %v3516_v54  ;;  %v6823_v58 = vpop.f32.mrb[184].mxu1 }
 0x5b8   : > { %v3442_v59 = vadd.f32 %v6823_v58, %v8072_v41  ;;  %v3433_v60 = vpop.f32.mrb[185].mxu1 }
 0x5b9   : > { %v3434_v61 = vadd.f32 %v8072_v41, %v3433_v60  ;;  %v6824_v62 = vpop.f32.mrb[186].mxu1  ;;  %6889 = vmatprep.mubr.msk.bf16.mxu0 %vm470_vm0, %v3565_v57 }
 0x5ba   : > { %v3445_v63 = vadd.f32 %v6824_v62, %v8072_v41  ;;  %v3436_v0 = vpop.f32.mrb[187].mxu1  ;;  %6890 = vmatmul.mubr.msk.bf16.gmra.mrb[244].mxu0 %vm470_vm0, %v3566_v56  ;;  %v3522_v2 = vmax.f32 %v3442_v59, 0.0 }
 0x5bb   : > { %v3437_v1 = vadd.f32 %v8072_v41, %v3436_v0  ;;  %v3520_v4 = vmax.f32 %v3434_v61, 0.0 }
 0x5bc   : > { %v3523_v3 = vmax.f32 %v3445_v63, 0.0 }
 0x5bd   : > { %v3521_v5 = vmax.f32 %v3437_v1, 0.0 }
 0x5be   : > { %v3568_v6 = vpack.c.bf16 %v3523_v3, %v3522_v2 }
 0x5bf   : > { %v3567_v7 = vpack.c.bf16 %v3521_v5, %v3520_v4  ;;  %v6827_v8 = vpop.f32.mrb[188].mxu1 }
 0x5c0   : > { %v3458_v9 = vadd.f32 %v6827_v8, %v8072_v41  ;;  %v3449_v10 = vpop.f32.mrb[189].mxu1 }
 0x5c1   : > { %v3450_v11 = vadd.f32 %v8072_v41, %v3449_v10  ;;  %v6828_v12 = vpop.f32.mrb[190].mxu1  ;;  %6893 = vmatprep.mubr.msk.bf16.mxu0 %vm470_vm0, %v3567_v7 }
 0x5c2   : > { %v3461_v13 = vadd.f32 %v6828_v12, %v8072_v41  ;;  %v3452_v14 = vpop.f32.mrb[191].mxu1  ;;  %6894 = vmatmul.mubr.msk.bf16.gmra.mrb[248].mxu0 %vm470_vm0, %v3568_v6  ;;  %v3526_v16 = vmax.f32 %v3458_v9, 0.0 }
 0x5c3   : > { %v3453_v15 = vadd.f32 %v8072_v41, %v3452_v14  ;;  %v3524_v18 = vmax.f32 %v3450_v11, 0.0  ;;  %v8185_v41 = vld [vmem:[%s8680_s4 + $0x5] ss:$0 sm:$0xff] }
 0x5c4   : > { %v3527_v17 = vmax.f32 %v3461_v13, 0.0 }
 0x5c5   : > { %v3525_v19 = vmax.f32 %v3453_v15, 0.0 }
 0x5c6   : > { %v3570_v20 = vpack.c.bf16 %v3527_v17, %v3526_v16 }
 0x5c7   : > { %v3569_v21 = vpack.c.bf16 %v3525_v19, %v3524_v18 }
 0x5c9   : > { %6897 = vmatprep.mubr.msk.bf16.mxu0 %vm470_vm0, %v3569_v21 }
 0x5ca   : > { %6898 = vmatmul.mubr.msk.bf16.gmra.mrb[252].mxu0 %vm470_vm0, %v3570_v20 }
 0x625   : > { %v6839_v23 = vpop.f32.mrb[192].mxu0 }
 0x626   : > { %v3740_v24 = vadd.f32 %v6839_v23, %v8185_v41  ;;  %v3731_v25 = vpop.f32.mrb[193].mxu0 }
 0x627   : > { %v3732_v26 = vadd.f32 %v8185_v41, %v3731_v25  ;;  %v6840_v27 = vpop.f32.mrb[194].mxu0 }
 0x628   : > { %v3743_v28 = vadd.f32 %v6840_v27, %v8185_v41  ;;  %v3734_v29 = vpop.f32.mrb[195].mxu0  ;;  %v3988_v33 = vmax.f32 %v3740_v24, 0.0 }
 0x629   : > { %v3735_v32 = vadd.f32 %v8185_v41, %v3734_v29  ;;  %v3986_v35 = vmax.f32 %v3732_v26, 0.0 }
 0x62a   : > { %v3989_v34 = vmax.f32 %v3743_v28, 0.0 }
 0x62b   : > { %v3987_v36 = vmax.f32 %v3735_v32, 0.0 }
 0x62c   : > { %v4062_v37 = vpack.c.bf16 %v3989_v34, %v3988_v33 }
 0x62d   : > { %v4061_v39 = vpack.c.bf16 %v3987_v36, %v3986_v35  ;;  %v6843_v40 = vpop.f32.mrb[196].mxu0 }
 0x62e   : > { %v3756_v42 = vadd.f32 %v6843_v40, %v8185_v41  ;;  %v3747_v43 = vpop.f32.mrb[197].mxu0 }
 0x62f   : > { %v3748_v44 = vadd.f32 %v8185_v41, %v3747_v43  ;;  %v6844_v45 = vpop.f32.mrb[198].mxu0  ;;  %6909 = vmatprep.mubr.msk.bf16.mxu1 %vm470_vm0, %v4061_v39 }
 0x630   : > { %v3759_v46 = vadd.f32 %v6844_v45, %v8185_v41  ;;  %v3750_v47 = vpop.f32.mrb[199].mxu0  ;;  %6910 = vmatmul.mubr.msk.bf16.vlgmr.msra.gmra.mrb[192].mxu1 %vm470_vm0, %v4062_v37  ;;  %v3992_v49 = vmax.f32 %v3756_v42, 0.0 }
 0x631   : > { %v3751_v48 = vadd.f32 %v8185_v41, %v3750_v47  ;;  %v3990_v51 = vmax.f32 %v3748_v44, 0.0 }
 0x632   : > { %v3993_v50 = vmax.f32 %v3759_v46, 0.0 }
 0x633   : > { %v3991_v52 = vmax.f32 %v3751_v48, 0.0 }
 0x634   : > { %v4064_v53 = vpack.c.bf16 %v3993_v50, %v3992_v49 }
 0x635   : > { %v4063_v54 = vpack.c.bf16 %v3991_v52, %v3990_v51  ;;  %v6847_v55 = vpop.f32.mrb[200].mxu0 }
 0x636   : > { %v3772_v56 = vadd.f32 %v6847_v55, %v8185_v41  ;;  %v3763_v57 = vpop.f32.mrb[201].mxu0 }
 0x637   : > { %v3764_v58 = vadd.f32 %v8185_v41, %v3763_v57  ;;  %v6848_v59 = vpop.f32.mrb[202].mxu0  ;;  %6913 = vmatprep.mubr.msk.bf16.mxu1 %vm470_vm0, %v4063_v54 }
 0x638   : > { %v3775_v60 = vadd.f32 %v6848_v59, %v8185_v41  ;;  %v3766_v61 = vpop.f32.mrb[203].mxu0  ;;  %6914 = vmatmul.mubr.msk.bf16.gmra.mrb[196].mxu1 %vm470_vm0, %v4064_v53  ;;  %v3996_v63 = vmax.f32 %v3772_v56, 0.0 }
 0x639   : > { %v3767_v62 = vadd.f32 %v8185_v41, %v3766_v61  ;;  %v3994_v1 = vmax.f32 %v3764_v58, 0.0 }
 0x63a   : > { %v3997_v0 = vmax.f32 %v3775_v60, 0.0 }
 0x63b   : > { %v3995_v2 = vmax.f32 %v3767_v62, 0.0 }
 0x63c   : > { %v4066_v3 = vpack.c.bf16 %v3997_v0, %v3996_v63 }
 0x63d   : > { %v4065_v4 = vpack.c.bf16 %v3995_v2, %v3994_v1  ;;  %v6851_v5 = vpop.f32.mrb[204].mxu0 }
 0x63e   : > { %v3788_v6 = vadd.f32 %v6851_v5, %v8185_v41  ;;  %v3779_v7 = vpop.f32.mrb[205].mxu0 }
 0x63f   : > { %v3780_v8 = vadd.f32 %v8185_v41, %v3779_v7  ;;  %v6852_v9 = vpop.f32.mrb[206].mxu0  ;;  %6917 = vmatprep.mubr.msk.bf16.mxu1 %vm470_vm0, %v4065_v4 }
 0x640   : > { %v3791_v10 = vadd.f32 %v6852_v9, %v8185_v41  ;;  %v3782_v11 = vpop.f32.mrb[207].mxu0  ;;  %6918 = vmatmul.mubr.msk.bf16.gmra.mrb[200].mxu1 %vm470_vm0, %v4066_v3  ;;  %v4000_v13 = vmax.f32 %v3788_v6, 0.0 }
 0x641   : > { %v3783_v12 = vadd.f32 %v8185_v41, %v3782_v11  ;;  %v3998_v15 = vmax.f32 %v3780_v8, 0.0 }
 0x642   : > { %v4001_v14 = vmax.f32 %v3791_v10, 0.0 }
 0x643   : > { %v3999_v16 = vmax.f32 %v3783_v12, 0.0 }
 0x644   : > { %v4068_v17 = vpack.c.bf16 %v4001_v14, %v4000_v13 }
 0x645   : > { %v4067_v18 = vpack.c.bf16 %v3999_v16, %v3998_v15  ;;  %v6855_v19 = vpop.f32.mrb[208].mxu0 }
 0x646   : > { %v3804_v20 = vadd.f32 %v6855_v19, %v8185_v41  ;;  %v3795_v21 = vpop.f32.mrb[209].mxu0 }
 0x647   : > { %v3796_v22 = vadd.f32 %v8185_v41, %v3795_v21  ;;  %v6856_v23 = vpop.f32.mrb[210].mxu0  ;;  %6921 = vmatprep.mubr.msk.bf16.mxu1 %vm470_vm0, %v4067_v18 }
 0x648   : > { %v3807_v24 = vadd.f32 %v6856_v23, %v8185_v41  ;;  %v3798_v25 = vpop.f32.mrb[211].mxu0  ;;  %6922 = vmatmul.mubr.msk.bf16.gmra.mrb[204].mxu1 %vm470_vm0, %v4068_v17  ;;  %v4004_v27 = vmax.f32 %v3804_v20, 0.0 }
 0x649   : > { %v3799_v26 = vadd.f32 %v8185_v41, %v3798_v25  ;;  %v4002_v29 = vmax.f32 %v3796_v22, 0.0 }
 0x64a   : > { %v4005_v28 = vmax.f32 %v3807_v24, 0.0 }
 0x64b   : > { %v4003_v30 = vmax.f32 %v3799_v26, 0.0 }
 0x64c   : > { %v4070_v31 = vpack.c.bf16 %v4005_v28, %v4004_v27 }
 0x64d   : > { %v4069_v32 = vpack.c.bf16 %v4003_v30, %v4002_v29  ;;  %v6859_v33 = vpop.f32.mrb[212].mxu0 }
 0x64e   : > { %v3820_v34 = vadd.f32 %v6859_v33, %v8185_v41  ;;  %v3811_v35 = vpop.f32.mrb[213].mxu0 }
 0x64f   : > { %v3812_v36 = vadd.f32 %v8185_v41, %v3811_v35  ;;  %v6860_v37 = vpop.f32.mrb[214].mxu0  ;;  %6925 = vmatprep.mubr.msk.bf16.mxu1 %vm470_vm0, %v4069_v32 }
 0x650   : > { %v3823_v38 = vadd.f32 %v6860_v37, %v8185_v41  ;;  %v3814_v39 = vpop.f32.mrb[215].mxu0  ;;  %6926 = vmatmul.mubr.msk.bf16.gmra.mrb[208].mxu1 %vm470_vm0, %v4070_v31  ;;  %v4008_v42 = vmax.f32 %v3820_v34, 0.0 }
 0x651   : > { %v3815_v40 = vadd.f32 %v8185_v41, %v3814_v39  ;;  %v4006_v44 = vmax.f32 %v3812_v36, 0.0 }
 0x652   : > { %v4009_v43 = vmax.f32 %v3823_v38, 0.0 }
 0x653   : > { %v4007_v45 = vmax.f32 %v3815_v40, 0.0 }
 0x654   : > { %v4072_v46 = vpack.c.bf16 %v4009_v43, %v4008_v42 }
 0x655   : > { %v4071_v47 = vpack.c.bf16 %v4007_v45, %v4006_v44  ;;  %v6863_v48 = vpop.f32.mrb[216].mxu0 }
 0x656   : > { %v3836_v49 = vadd.f32 %v6863_v48, %v8185_v41  ;;  %v3827_v50 = vpop.f32.mrb[217].mxu0 }
 0x657   : > { %v3828_v51 = vadd.f32 %v8185_v41, %v3827_v50  ;;  %v6864_v52 = vpop.f32.mrb[218].mxu0  ;;  %6929 = vmatprep.mubr.msk.bf16.mxu1 %vm470_vm0, %v4071_v47 }
 0x658   : > { %v3839_v53 = vadd.f32 %v6864_v52, %v8185_v41  ;;  %v3830_v54 = vpop.f32.mrb[219].mxu0  ;;  %6930 = vmatmul.mubr.msk.bf16.gmra.mrb[212].mxu1 %vm470_vm0, %v4072_v46  ;;  %v4012_v56 = vmax.f32 %v3836_v49, 0.0 }
 0x659   : > { %v3831_v55 = vadd.f32 %v8185_v41, %v3830_v54  ;;  %v4010_v58 = vmax.f32 %v3828_v51, 0.0 }
 0x65a   : > { %v4013_v57 = vmax.f32 %v3839_v53, 0.0 }
 0x65b   : > { %v4011_v59 = vmax.f32 %v3831_v55, 0.0 }
 0x65c   : > { %v4074_v60 = vpack.c.bf16 %v4013_v57, %v4012_v56 }
 0x65d   : > { %v4073_v61 = vpack.c.bf16 %v4011_v59, %v4010_v58  ;;  %v6867_v62 = vpop.f32.mrb[220].mxu0 }
 0x65e   : > { %v3852_v63 = vadd.f32 %v6867_v62, %v8185_v41  ;;  %v3843_v0 = vpop.f32.mrb[221].mxu0 }
 0x65f   : > { %v3844_v1 = vadd.f32 %v8185_v41, %v3843_v0  ;;  %v6868_v2 = vpop.f32.mrb[222].mxu0  ;;  %6933 = vmatprep.mubr.msk.bf16.mxu1 %vm470_vm0, %v4073_v61 }
 0x660   : > { %v3855_v3 = vadd.f32 %v6868_v2, %v8185_v41  ;;  %v3846_v4 = vpop.f32.mrb[223].mxu0  ;;  %6934 = vmatmul.mubr.msk.bf16.gmra.mrb[216].mxu1 %vm470_vm0, %v4074_v60  ;;  %v4016_v6 = vmax.f32 %v3852_v63, 0.0 }
 0x661   : > { %v3847_v5 = vadd.f32 %v8185_v41, %v3846_v4  ;;  %v4014_v8 = vmax.f32 %v3844_v1, 0.0 }
 0x662   : > { %v4017_v7 = vmax.f32 %v3855_v3, 0.0 }
 0x663   : > { %v4015_v9 = vmax.f32 %v3847_v5, 0.0 }
 0x664   : > { %v4076_v10 = vpack.c.bf16 %v4017_v7, %v4016_v6 }
 0x665   : > { %v4075_v11 = vpack.c.bf16 %v4015_v9, %v4014_v8  ;;  %v6871_v12 = vpop.f32.mrb[224].mxu0 }
 0x666   : > { %v3868_v13 = vadd.f32 %v6871_v12, %v8185_v41  ;;  %v3859_v14 = vpop.f32.mrb[225].mxu0 }
 0x667   : > { %v3860_v15 = vadd.f32 %v8185_v41, %v3859_v14  ;;  %v6872_v16 = vpop.f32.mrb[226].mxu0  ;;  %6937 = vmatprep.mubr.msk.bf16.mxu1 %vm470_vm0, %v4075_v11 }
 0x668   : > { %v3871_v17 = vadd.f32 %v6872_v16, %v8185_v41  ;;  %v3862_v18 = vpop.f32.mrb[227].mxu0  ;;  %6938 = vmatmul.mubr.msk.bf16.gmra.mrb[220].mxu1 %vm470_vm0, %v4076_v10  ;;  %v4020_v20 = vmax.f32 %v3868_v13, 0.0 }
 0x669   : > { %v3863_v19 = vadd.f32 %v8185_v41, %v3862_v18  ;;  %v4018_v22 = vmax.f32 %v3860_v15, 0.0 }
 0x66a   : > { %v4021_v21 = vmax.f32 %v3871_v17, 0.0 }
 0x66b   : > { %v4019_v23 = vmax.f32 %v3863_v19, 0.0 }
 0x66c   : > { %v4078_v24 = vpack.c.bf16 %v4021_v21, %v4020_v20 }
 0x66d   : > { %v4077_v25 = vpack.c.bf16 %v4019_v23, %v4018_v22  ;;  %v6875_v26 = vpop.f32.mrb[228].mxu0 }
 0x66e   : > { %v3884_v27 = vadd.f32 %v6875_v26, %v8185_v41  ;;  %v3875_v28 = vpop.f32.mrb[229].mxu0 }
 0x66f   : > { %v3876_v29 = vadd.f32 %v8185_v41, %v3875_v28  ;;  %v6876_v30 = vpop.f32.mrb[230].mxu0  ;;  %6941 = vmatprep.mubr.msk.bf16.mxu1 %vm470_vm0, %v4077_v25 }
 0x670   : > { %v3887_v31 = vadd.f32 %v6876_v30, %v8185_v41  ;;  %v3878_v32 = vpop.f32.mrb[231].mxu0  ;;  %6942 = vmatmul.mubr.msk.bf16.gmra.mrb[224].mxu1 %vm470_vm0, %v4078_v24  ;;  %v4024_v34 = vmax.f32 %v3884_v27, 0.0 }
 0x671   : > { %v3879_v33 = vadd.f32 %v8185_v41, %v3878_v32  ;;  %v4022_v36 = vmax.f32 %v3876_v29, 0.0 }
 0x672   : > { %v4025_v35 = vmax.f32 %v3887_v31, 0.0 }
 0x673   : > { %v4023_v37 = vmax.f32 %v3879_v33, 0.0 }
 0x674   : > { %v4080_v38 = vpack.c.bf16 %v4025_v35, %v4024_v34 }
 0x675   : > { %v4079_v39 = vpack.c.bf16 %v4023_v37, %v4022_v36  ;;  %v6879_v40 = vpop.f32.mrb[232].mxu0 }
 0x676   : > { %v3900_v42 = vadd.f32 %v6879_v40, %v8185_v41  ;;  %v3891_v43 = vpop.f32.mrb[233].mxu0 }
 0x677   : > { %v3892_v44 = vadd.f32 %v8185_v41, %v3891_v43  ;;  %v6880_v45 = vpop.f32.mrb[234].mxu0  ;;  %6945 = vmatprep.mubr.msk.bf16.mxu1 %vm470_vm0, %v4079_v39 }
 0x678   : > { %v3903_v46 = vadd.f32 %v6880_v45, %v8185_v41  ;;  %v3894_v47 = vpop.f32.mrb[235].mxu0  ;;  %6946 = vmatmul.mubr.msk.bf16.gmra.mrb[228].mxu1 %vm470_vm0, %v4080_v38  ;;  %v4028_v49 = vmax.f32 %v3900_v42, 0.0 }
 0x679   : > { %v3895_v48 = vadd.f32 %v8185_v41, %v3894_v47  ;;  %v4026_v51 = vmax.f32 %v3892_v44, 0.0 }
 0x67a   : > { %v4029_v50 = vmax.f32 %v3903_v46, 0.0 }
 0x67b   : > { %v4027_v52 = vmax.f32 %v3895_v48, 0.0 }
 0x67c   : > { %v4082_v53 = vpack.c.bf16 %v4029_v50, %v4028_v49 }
 0x67d   : > { %v4081_v54 = vpack.c.bf16 %v4027_v52, %v4026_v51  ;;  %v6883_v55 = vpop.f32.mrb[236].mxu0 }
 0x67e   : > { %v3916_v56 = vadd.f32 %v6883_v55, %v8185_v41  ;;  %v3907_v57 = vpop.f32.mrb[237].mxu0 }
 0x67f   : > { %v3908_v58 = vadd.f32 %v8185_v41, %v3907_v57  ;;  %v6884_v59 = vpop.f32.mrb[238].mxu0  ;;  %6949 = vmatprep.mubr.msk.bf16.mxu1 %vm470_vm0, %v4081_v54 }
 0x680   : > { %v3919_v60 = vadd.f32 %v6884_v59, %v8185_v41  ;;  %v3910_v61 = vpop.f32.mrb[239].mxu0  ;;  %6950 = vmatmul.mubr.msk.bf16.gmra.mrb[232].mxu1 %vm470_vm0, %v4082_v53  ;;  %v4032_v63 = vmax.f32 %v3916_v56, 0.0 }
 0x681   : > { %v3911_v62 = vadd.f32 %v8185_v41, %v3910_v61  ;;  %v4030_v1 = vmax.f32 %v3908_v58, 0.0 }
 0x682   : > { %v4033_v0 = vmax.f32 %v3919_v60, 0.0 }
 0x683   : > { %v4031_v2 = vmax.f32 %v3911_v62, 0.0  ;;  %v7202_v62 = vld [vmem:[%s8683_s7] sm:$0xff]  }
 0x684   : > { %v4084_v3 = vpack.c.bf16 %v4033_v0, %v4032_v63  ;;  %7045 = vmatprep.subr.bf16.mxu1 %v7202_v62  ;;  %v8301_v63 = vld [vmem:[%s8680_s4 + $0x6] ss:$0 sm:$0xff] }
 0x685   : > { %v4083_v4 = vpack.c.bf16 %v4031_v2, %v4030_v1  ;;  %v6887_v5 = vpop.f32.mrb[240].mxu0  ;;  %7046 = vmatpush3.bf16.msra.mxu1 %v7202_v62 }
 0x686   : > { %v3932_v6 = vadd.f32 %v6887_v5, %v8185_v41  ;;  %v3923_v7 = vpop.f32.mrb[241].mxu0 }
 0x687   : > { %v3924_v8 = vadd.f32 %v8185_v41, %v3923_v7  ;;  %v6888_v9 = vpop.f32.mrb[242].mxu0  ;;  %6953 = vmatprep.mubr.msk.bf16.mxu1 %vm470_vm0, %v4083_v4  ;;  %v7204_v7 = vld [vmem:[%s8683_s7 + $0x10] sm:$0xff]  }
 0x688   : > { %v3935_v10 = vadd.f32 %v6888_v9, %v8185_v41  ;;  %v3926_v11 = vpop.f32.mrb[243].mxu0  ;;  %6954 = vmatmul.mubr.msk.bf16.gmra.mrb[236].mxu1 %vm470_vm0, %v4084_v3  ;;  %v4036_v13 = vmax.f32 %v3932_v6, 0.0 }
 0x689   : > { %v3927_v12 = vadd.f32 %v8185_v41, %v3926_v11  ;;  %v4034_v15 = vmax.f32 %v3924_v8, 0.0  ;;  %v7205_v8 = vld [vmem:[%s8683_s7 + $0x18] sm:$0xff]  }
 0x68a   : > { %v4037_v14 = vmax.f32 %v3935_v10, 0.0 }
 0x68b   : > { %v4035_v16 = vmax.f32 %v3927_v12, 0.0 }
 0x68c   : > { %v4086_v17 = vpack.c.bf16 %v4037_v14, %v4036_v13 }
 0x68d   : > { %v4085_v18 = vpack.c.bf16 %v4035_v16, %v4034_v15  ;;  %v6891_v19 = vpop.f32.mrb[244].mxu0  ;;  %v7206_v15 = vld [vmem:[%s8683_s7 + $0x20] sm:$0xff]  }
 0x68e   : > { %v3948_v20 = vadd.f32 %v6891_v19, %v8185_v41  ;;  %v3939_v21 = vpop.f32.mrb[245].mxu0 }
 0x68f   : > { %v3940_v22 = vadd.f32 %v8185_v41, %v3939_v21  ;;  %v6892_v23 = vpop.f32.mrb[246].mxu0  ;;  %6957 = vmatprep.mubr.msk.bf16.mxu1 %vm470_vm0, %v4085_v18 }
 0x690   : > { %v3951_v24 = vadd.f32 %v6892_v23, %v8185_v41  ;;  %v3942_v25 = vpop.f32.mrb[247].mxu0  ;;  %6958 = vmatmul.mubr.msk.bf16.gmra.mrb[240].mxu1 %vm470_vm0, %v4086_v17  ;;  %v4040_v27 = vmax.f32 %v3948_v20, 0.0 }
 0x691   : > { %v3943_v26 = vadd.f32 %v8185_v41, %v3942_v25  ;;  %v4038_v29 = vmax.f32 %v3940_v22, 0.0 }
 0x692   : > { %v4041_v28 = vmax.f32 %v3951_v24, 0.0  ;;  %v7207_v24 = vld [vmem:[%s8683_s7 + $0x28] sm:$0xff]  }
 0x693   : > { %v4039_v30 = vmax.f32 %v3943_v26, 0.0 }
 0x694   : > { %v4088_v31 = vpack.c.bf16 %v4041_v28, %v4040_v27 }
 0x695   : > { %v4087_v32 = vpack.c.bf16 %v4039_v30, %v4038_v29  ;;  %v6895_v33 = vpop.f32.mrb[248].mxu0 }
 0x696   : > { %v3964_v34 = vadd.f32 %v6895_v33, %v8185_v41  ;;  %v3955_v35 = vpop.f32.mrb[249].mxu0 }
 0x697   : > { %v3956_v36 = vadd.f32 %v8185_v41, %v3955_v35  ;;  %v6896_v37 = vpop.f32.mrb[250].mxu0  ;;  %6961 = vmatprep.mubr.msk.bf16.mxu1 %vm470_vm0, %v4087_v32 }
 0x698   : > { %v3967_v38 = vadd.f32 %v6896_v37, %v8185_v41  ;;  %v3958_v39 = vpop.f32.mrb[251].mxu0  ;;  %6962 = vmatmul.mubr.msk.bf16.gmra.mrb[244].mxu1 %vm470_vm0, %v4088_v31  ;;  %v4044_v42 = vmax.f32 %v3964_v34, 0.0  ;;  %v7208_v31 = vld [vmem:[%s8683_s7 + $0x30] sm:$0xff]  }
 0x699   : > { %v3959_v40 = vadd.f32 %v8185_v41, %v3958_v39  ;;  %v4042_v44 = vmax.f32 %v3956_v36, 0.0 }
 0x69a   : > { %v4045_v43 = vmax.f32 %v3967_v38, 0.0 }
 0x69b   : > { %v4043_v45 = vmax.f32 %v3959_v40, 0.0  ;;  %v7209_v40 = vld [vmem:[%s8683_s7 + $0x38] sm:$0xff]  }
 0x69c   : > { %v4090_v46 = vpack.c.bf16 %v4045_v43, %v4044_v42 }
 0x69d   : > { %v4089_v47 = vpack.c.bf16 %v4043_v45, %v4042_v44  ;;  %v6899_v48 = vpop.f32.mrb[252].mxu0 }
 0x69e   : > { %v3980_v49 = vadd.f32 %v6899_v48, %v8185_v41  ;;  %v3971_v50 = vpop.f32.mrb[253].mxu0 }
 0x69f   : > { %v3972_v51 = vadd.f32 %v8185_v41, %v3971_v50  ;;  %v6900_v52 = vpop.f32.mrb[254].mxu0  ;;  %6965 = vmatprep.mubr.msk.bf16.mxu1 %vm470_vm0, %v4089_v47 }
 0x6a0   : > { %v3983_v53 = vadd.f32 %v6900_v52, %v8185_v41  ;;  %v3974_v54 = vpop.f32.mrb[255].mxu0  ;;  %6966 = vmatmul.mubr.msk.bf16.gmra.mrb[248].mxu1 %vm470_vm0, %v4090_v46  ;;  %v4048_v56 = vmax.f32 %v3980_v49, 0.0 }
 0x6a1   : > { %v3975_v55 = vadd.f32 %v8185_v41, %v3974_v54  ;;  %v4046_v58 = vmax.f32 %v3972_v51, 0.0  ;;  %v7203_v41 = vld [vmem:[%s8683_s7 + $0x8] sm:$0xff]  }
 0x6a2   : > { %v4049_v57 = vmax.f32 %v3983_v53, 0.0  ;;  %7047 = vmatprep.subr.bf16.mxu1 %v7203_v41 }
 0x6a3   : > { %v4047_v59 = vmax.f32 %v3975_v55, 0.0  ;;  %7048 = vmatpush3.bf16.msra.mxu1 %v7203_v41 }
 0x6a4   : > { %v4092_v60 = vpack.c.bf16 %v4049_v57, %v4048_v56  ;;  %7049 = vmatprep.subr.bf16.mxu1 %v7204_v7 }
 0x6a5   : > { %v4091_v61 = vpack.c.bf16 %v4047_v59, %v4046_v58 }
 0x6a7   : > { %6969 = vmatprep.mubr.msk.bf16.mxu1 %vm470_vm0, %v4091_v61  ;;  %7050 = vmatpush3.bf16.msra.mxu1 %v7204_v7 }
 0x6a8   : > { %6970 = vmatmul.mubr.msk.bf16.gmra.mrb[252].mxu1 %vm470_vm0, %v4092_v60  ;;  %7051 = vmatprep.subr.bf16.mxu1 %v7205_v8 }
 0x6ab   : > { %7052 = vmatpush3.bf16.msra.mxu1 %v7205_v8 }
 0x6ac   : > { %7053 = vmatprep.subr.bf16.mxu1 %v7206_v15 }
 0x6af   : > { %7054 = vmatpush3.bf16.msra.mxu1 %v7206_v15 }
 0x6b0   : > { %7055 = vmatprep.subr.bf16.mxu1 %v7207_v24 }
 0x6b3   : > { %7056 = vmatpush3.bf16.msra.mxu1 %v7207_v24 }
 0x6b4   : > { %7057 = vmatprep.subr.bf16.mxu1 %v7208_v31 }
 0x6b7   : > { %7058 = vmatpush3.bf16.msra.mxu1 %v7208_v31 }
 0x6b8   : > { %7059 = vmatprep.subr.bf16.mxu1 %v7209_v40 }
 0x6bb   : > { %7060 = vmatpush3.bf16.msra.mxu1 %v7209_v40 }
 0x703   : > { %v6911_v0 = vpop.f32.mrb[192].mxu1 }
 0x704   : > { %v4262_v1 = vadd.f32 %v6911_v0, %v8301_v63  ;;  %v4253_v2 = vpop.f32.mrb[193].mxu1 }
 0x705   : > { %v4254_v3 = vadd.f32 %v8301_v63, %v4253_v2  ;;  %v6912_v4 = vpop.f32.mrb[194].mxu1 }
 0x706   : > { %v4265_v5 = vadd.f32 %v6912_v4, %v8301_v63  ;;  %v4256_v6 = vpop.f32.mrb[195].mxu1  ;;  %v4510_v10 = vmax.f32 %v4262_v1, 0.0 }
 0x707   : > { %v4257_v9 = vadd.f32 %v8301_v63, %v4256_v6  ;;  %v4508_v12 = vmax.f32 %v4254_v3, 0.0 }
 0x708   : > { %v4511_v11 = vmax.f32 %v4265_v5, 0.0 }
 0x709   : > { %v4509_v13 = vmax.f32 %v4257_v9, 0.0 }
 0x70a   : > { %v4582_v14 = vpack.c.bf16 %v4511_v11, %v4510_v10 }
 0x70b   : > { %v4581_v16 = vpack.c.bf16 %v4509_v13, %v4508_v12  ;;  %v6915_v17 = vpop.f32.mrb[196].mxu1 }
 0x70c   : > { %v4278_v18 = vadd.f32 %v6915_v17, %v8301_v63  ;;  %v4269_v19 = vpop.f32.mrb[197].mxu1 }
 0x70d   : > { %v4270_v20 = vadd.f32 %v8301_v63, %v4269_v19  ;;  %v6916_v21 = vpop.f32.mrb[198].mxu1  ;;  %6981 = vmatprep.mubr.msk.bf16.mxu0 %vm470_vm0, %v4581_v16 }
 0x70e   : > { %v4281_v22 = vadd.f32 %v6916_v21, %v8301_v63  ;;  %v4272_v23 = vpop.f32.mrb[199].mxu1  ;;  %6982 = vmatmul.mubr.msk.bf16.vlgmr.msra.gmra.mrb[0].mxu0 %vm470_vm0, %v4582_v14  ;;  %v4514_v26 = vmax.f32 %v4278_v18, 0.0 }
 0x70f   : > { %v4273_v25 = vadd.f32 %v8301_v63, %v4272_v23  ;;  %v4512_v28 = vmax.f32 %v4270_v20, 0.0 }
 0x710   : > { %v4515_v27 = vmax.f32 %v4281_v22, 0.0 }
 0x711   : > { %v4513_v29 = vmax.f32 %v4273_v25, 0.0 }
 0x712   : > { %v4584_v30 = vpack.c.bf16 %v4515_v27, %v4514_v26 }
 0x713   : > { %v4583_v32 = vpack.c.bf16 %v4513_v29, %v4512_v28  ;;  %v6919_v33 = vpop.f32.mrb[200].mxu1 }
 0x714   : > { %v4294_v34 = vadd.f32 %v6919_v33, %v8301_v63  ;;  %v4285_v35 = vpop.f32.mrb[201].mxu1 }
 0x715   : > { %v4286_v36 = vadd.f32 %v8301_v63, %v4285_v35  ;;  %v6920_v37 = vpop.f32.mrb[202].mxu1  ;;  %6985 = vmatprep.mubr.msk.bf16.mxu0 %vm470_vm0, %v4583_v32 }
 0x716   : > { %v4297_v38 = vadd.f32 %v6920_v37, %v8301_v63  ;;  %v4288_v39 = vpop.f32.mrb[203].mxu1  ;;  %6986 = vmatmul.mubr.msk.bf16.gmra.mrb[4].mxu0 %vm470_vm0, %v4584_v30  ;;  %v4518_v43 = vmax.f32 %v4294_v34, 0.0 }
 0x717   : > { %v4289_v42 = vadd.f32 %v8301_v63, %v4288_v39  ;;  %v4516_v45 = vmax.f32 %v4286_v36, 0.0 }
 0x718   : > { %v4519_v44 = vmax.f32 %v4297_v38, 0.0 }
 0x719   : > { %v4517_v46 = vmax.f32 %v4289_v42, 0.0 }
 0x71a   : > { %v4586_v47 = vpack.c.bf16 %v4519_v44, %v4518_v43 }
 0x71b   : > { %v4585_v48 = vpack.c.bf16 %v4517_v46, %v4516_v45  ;;  %v6923_v49 = vpop.f32.mrb[204].mxu1 }
 0x71c   : > { %v4310_v50 = vadd.f32 %v6923_v49, %v8301_v63  ;;  %v4301_v51 = vpop.f32.mrb[205].mxu1 }
 0x71d   : > { %v4302_v52 = vadd.f32 %v8301_v63, %v4301_v51  ;;  %v6924_v53 = vpop.f32.mrb[206].mxu1  ;;  %6989 = vmatprep.mubr.msk.bf16.mxu0 %vm470_vm0, %v4585_v48 }
 0x71e   : > { %v4313_v54 = vadd.f32 %v6924_v53, %v8301_v63  ;;  %v4304_v55 = vpop.f32.mrb[207].mxu1  ;;  %6990 = vmatmul.mubr.msk.bf16.gmra.mrb[8].mxu0 %vm470_vm0, %v4586_v47  ;;  %v4522_v57 = vmax.f32 %v4310_v50, 0.0 }
 0x71f   : > { %v4305_v56 = vadd.f32 %v8301_v63, %v4304_v55  ;;  %v4520_v59 = vmax.f32 %v4302_v52, 0.0 }
 0x720   : > { %v4523_v58 = vmax.f32 %v4313_v54, 0.0 }
 0x721   : > { %v4521_v60 = vmax.f32 %v4305_v56, 0.0 }
 0x722   : > { %v4588_v61 = vpack.c.bf16 %v4523_v58, %v4522_v57 }
 0x723   : > { %v4587_v62 = vpack.c.bf16 %v4521_v60, %v4520_v59  ;;  %v6927_v41 = vpop.f32.mrb[208].mxu1 }
 0x724   : > { %v4326_v0 = vadd.f32 %v6927_v41, %v8301_v63  ;;  %v4317_v1 = vpop.f32.mrb[209].mxu1 }
 0x725   : > { %v4318_v2 = vadd.f32 %v8301_v63, %v4317_v1  ;;  %v6928_v3 = vpop.f32.mrb[210].mxu1  ;;  %6993 = vmatprep.mubr.msk.bf16.mxu0 %vm470_vm0, %v4587_v62 }
 0x726   : > { %v4329_v4 = vadd.f32 %v6928_v3, %v8301_v63  ;;  %v4320_v5 = vpop.f32.mrb[211].mxu1  ;;  %6994 = vmatmul.mubr.msk.bf16.gmra.mrb[12].mxu0 %vm470_vm0, %v4588_v61  ;;  %v4526_v7 = vmax.f32 %v4326_v0, 0.0 }
 0x727   : > { %v4321_v6 = vadd.f32 %v8301_v63, %v4320_v5  ;;  %v4524_v9 = vmax.f32 %v4318_v2, 0.0 }
 0x728   : > { %v4527_v8 = vmax.f32 %v4329_v4, 0.0 }
 0x729   : > { %v4525_v10 = vmax.f32 %v4321_v6, 0.0 }
 0x72a   : > { %v4590_v11 = vpack.c.bf16 %v4527_v8, %v4526_v7 }
 0x72b   : > { %v4589_v12 = vpack.c.bf16 %v4525_v10, %v4524_v9  ;;  %v6931_v13 = vpop.f32.mrb[212].mxu1 }
 0x72c   : > { %v4342_v14 = vadd.f32 %v6931_v13, %v8301_v63  ;;  %v4333_v15 = vpop.f32.mrb[213].mxu1 }
 0x72d   : > { %v4334_v16 = vadd.f32 %v8301_v63, %v4333_v15  ;;  %v6932_v17 = vpop.f32.mrb[214].mxu1  ;;  %6997 = vmatprep.mubr.msk.bf16.mxu0 %vm470_vm0, %v4589_v12 }
 0x72e   : > { %v4345_v18 = vadd.f32 %v6932_v17, %v8301_v63  ;;  %v4336_v19 = vpop.f32.mrb[215].mxu1  ;;  %6998 = vmatmul.mubr.msk.bf16.gmra.mrb[16].mxu0 %vm470_vm0, %v4590_v11  ;;  %v4530_v21 = vmax.f32 %v4342_v14, 0.0 }
 0x72f   : > { %v4337_v20 = vadd.f32 %v8301_v63, %v4336_v19  ;;  %v4528_v23 = vmax.f32 %v4334_v16, 0.0 }
 0x730   : > { %v4531_v22 = vmax.f32 %v4345_v18, 0.0 }
 0x731   : > { %v4529_v24 = vmax.f32 %v4337_v20, 0.0 }
 0x732   : > { %v4592_v25 = vpack.c.bf16 %v4531_v22, %v4530_v21 }
 0x733   : > { %v4591_v26 = vpack.c.bf16 %v4529_v24, %v4528_v23  ;;  %v6935_v27 = vpop.f32.mrb[216].mxu1 }
 0x734   : > { %v4358_v28 = vadd.f32 %v6935_v27, %v8301_v63  ;;  %v4349_v29 = vpop.f32.mrb[217].mxu1 }
 0x735   : > { %v4350_v30 = vadd.f32 %v8301_v63, %v4349_v29  ;;  %v6936_v31 = vpop.f32.mrb[218].mxu1  ;;  %7001 = vmatprep.mubr.msk.bf16.mxu0 %vm470_vm0, %v4591_v26 }
 0x736   : > { %v4361_v32 = vadd.f32 %v6936_v31, %v8301_v63  ;;  %v4352_v33 = vpop.f32.mrb[219].mxu1  ;;  %7002 = vmatmul.mubr.msk.bf16.gmra.mrb[20].mxu0 %vm470_vm0, %v4592_v25  ;;  %v4534_v35 = vmax.f32 %v4358_v28, 0.0 }
 0x737   : > { %v4353_v34 = vadd.f32 %v8301_v63, %v4352_v33  ;;  %v4532_v37 = vmax.f32 %v4350_v30, 0.0 }
 0x738   : > { %v4535_v36 = vmax.f32 %v4361_v32, 0.0 }
 0x739   : > { %v4533_v38 = vmax.f32 %v4353_v34, 0.0 }
 0x73a   : > { %v4594_v39 = vpack.c.bf16 %v4535_v36, %v4534_v35 }
 0x73b   : > { %v4593_v40 = vpack.c.bf16 %v4533_v38, %v4532_v37  ;;  %v6939_v42 = vpop.f32.mrb[220].mxu1 }
 0x73c   : > { %v4374_v43 = vadd.f32 %v6939_v42, %v8301_v63  ;;  %v4365_v44 = vpop.f32.mrb[221].mxu1 }
 0x73d   : > { %v4366_v45 = vadd.f32 %v8301_v63, %v4365_v44  ;;  %v6940_v46 = vpop.f32.mrb[222].mxu1  ;;  %7005 = vmatprep.mubr.msk.bf16.mxu0 %vm470_vm0, %v4593_v40 }
 0x73e   : > { %v4377_v47 = vadd.f32 %v6940_v46, %v8301_v63  ;;  %v4368_v48 = vpop.f32.mrb[223].mxu1  ;;  %7006 = vmatmul.mubr.msk.bf16.gmra.mrb[24].mxu0 %vm470_vm0, %v4594_v39  ;;  %v4538_v50 = vmax.f32 %v4374_v43, 0.0 }
 0x73f   : > { %v4369_v49 = vadd.f32 %v8301_v63, %v4368_v48  ;;  %v4536_v52 = vmax.f32 %v4366_v45, 0.0 }
 0x740   : > { %v4539_v51 = vmax.f32 %v4377_v47, 0.0 }
 0x741   : > { %v4537_v53 = vmax.f32 %v4369_v49, 0.0 }
 0x742   : > { %v4596_v54 = vpack.c.bf16 %v4539_v51, %v4538_v50 }
 0x743   : > { %v4595_v55 = vpack.c.bf16 %v4537_v53, %v4536_v52  ;;  %v6943_v56 = vpop.f32.mrb[224].mxu1 }
 0x744   : > { %v4390_v57 = vadd.f32 %v6943_v56, %v8301_v63  ;;  %v4381_v58 = vpop.f32.mrb[225].mxu1 }
 0x745   : > { %v4382_v59 = vadd.f32 %v8301_v63, %v4381_v58  ;;  %v6944_v60 = vpop.f32.mrb[226].mxu1  ;;  %7009 = vmatprep.mubr.msk.bf16.mxu0 %vm470_vm0, %v4595_v55 }
 0x746   : > { %v4393_v61 = vadd.f32 %v6944_v60, %v8301_v63  ;;  %v4384_v62 = vpop.f32.mrb[227].mxu1  ;;  %7010 = vmatmul.mubr.msk.bf16.gmra.mrb[28].mxu0 %vm470_vm0, %v4596_v54  ;;  %v4542_v0 = vmax.f32 %v4390_v57, 0.0 }
 0x747   : > { %v4385_v41 = vadd.f32 %v8301_v63, %v4384_v62  ;;  %v4540_v2 = vmax.f32 %v4382_v59, 0.0 }
 0x748   : > { %v4543_v1 = vmax.f32 %v4393_v61, 0.0 }
 0x749   : > { %v4541_v3 = vmax.f32 %v4385_v41, 0.0 }
 0x74a   : > { %v4598_v4 = vpack.c.bf16 %v4543_v1, %v4542_v0 }
 0x74b   : > { %v4597_v5 = vpack.c.bf16 %v4541_v3, %v4540_v2  ;;  %v6947_v6 = vpop.f32.mrb[228].mxu1 }
 0x74c   : > { %v4406_v7 = vadd.f32 %v6947_v6, %v8301_v63  ;;  %v4397_v8 = vpop.f32.mrb[229].mxu1 }
 0x74d   : > { %v4398_v9 = vadd.f32 %v8301_v63, %v4397_v8  ;;  %v6948_v10 = vpop.f32.mrb[230].mxu1  ;;  %7013 = vmatprep.mubr.msk.bf16.mxu0 %vm470_vm0, %v4597_v5 }
 0x74e   : > { %v4409_v11 = vadd.f32 %v6948_v10, %v8301_v63  ;;  %v4400_v12 = vpop.f32.mrb[231].mxu1  ;;  %7014 = vmatmul.mubr.msk.bf16.gmra.mrb[32].mxu0 %vm470_vm0, %v4598_v4  ;;  %v4546_v14 = vmax.f32 %v4406_v7, 0.0 }
 0x74f   : > { %v4401_v13 = vadd.f32 %v8301_v63, %v4400_v12  ;;  %v4544_v16 = vmax.f32 %v4398_v9, 0.0 }
 0x750   : > { %v4547_v15 = vmax.f32 %v4409_v11, 0.0 }
 0x751   : > { %v4545_v17 = vmax.f32 %v4401_v13, 0.0 }
 0x752   : > { %v4600_v18 = vpack.c.bf16 %v4547_v15, %v4546_v14 }
 0x753   : > { %v4599_v19 = vpack.c.bf16 %v4545_v17, %v4544_v16  ;;  %v6951_v20 = vpop.f32.mrb[232].mxu1 }
 0x754   : > { %v4422_v21 = vadd.f32 %v6951_v20, %v8301_v63  ;;  %v4413_v22 = vpop.f32.mrb[233].mxu1 }
 0x755   : > { %v4414_v23 = vadd.f32 %v8301_v63, %v4413_v22  ;;  %v6952_v24 = vpop.f32.mrb[234].mxu1  ;;  %7017 = vmatprep.mubr.msk.bf16.mxu0 %vm470_vm0, %v4599_v19 }
 0x756   : > { %v4425_v25 = vadd.f32 %v6952_v24, %v8301_v63  ;;  %v4416_v26 = vpop.f32.mrb[235].mxu1  ;;  %7018 = vmatmul.mubr.msk.bf16.gmra.mrb[36].mxu0 %vm470_vm0, %v4600_v18  ;;  %v4550_v28 = vmax.f32 %v4422_v21, 0.0 }
 0x757   : > { %v4417_v27 = vadd.f32 %v8301_v63, %v4416_v26  ;;  %v4548_v30 = vmax.f32 %v4414_v23, 0.0 }
 0x758   : > { %v4551_v29 = vmax.f32 %v4425_v25, 0.0 }
 0x759   : > { %v4549_v31 = vmax.f32 %v4417_v27, 0.0 }
 0x75a   : > { %v4602_v32 = vpack.c.bf16 %v4551_v29, %v4550_v28 }
 0x75b   : > { %v4601_v33 = vpack.c.bf16 %v4549_v31, %v4548_v30  ;;  %v6955_v34 = vpop.f32.mrb[236].mxu1 }
 0x75c   : > { %v4438_v35 = vadd.f32 %v6955_v34, %v8301_v63  ;;  %v4429_v36 = vpop.f32.mrb[237].mxu1 }
 0x75d   : > { %v4430_v37 = vadd.f32 %v8301_v63, %v4429_v36  ;;  %v6956_v38 = vpop.f32.mrb[238].mxu1  ;;  %7021 = vmatprep.mubr.msk.bf16.mxu0 %vm470_vm0, %v4601_v33 }
 0x75e   : > { %v4441_v39 = vadd.f32 %v6956_v38, %v8301_v63  ;;  %v4432_v40 = vpop.f32.mrb[239].mxu1  ;;  %7022 = vmatmul.mubr.msk.bf16.gmra.mrb[40].mxu0 %vm470_vm0, %v4602_v32  ;;  %v4554_v43 = vmax.f32 %v4438_v35, 0.0 }
 0x75f   : > { %v4433_v42 = vadd.f32 %v8301_v63, %v4432_v40  ;;  %v4552_v45 = vmax.f32 %v4430_v37, 0.0 }
 0x760   : > { %v4555_v44 = vmax.f32 %v4441_v39, 0.0 }
 0x761   : > { %v4553_v46 = vmax.f32 %v4433_v42, 0.0  ;;  %v8420_v42 = vld [vmem:[%s8682_s6] ss:$0 sm:$0xff] }
 0x762   : > { %v4604_v47 = vpack.c.bf16 %v4555_v44, %v4554_v43 }
 0x763   : > { %v4603_v48 = vpack.c.bf16 %v4553_v46, %v4552_v45  ;;  %v6959_v49 = vpop.f32.mrb[240].mxu1 }
 0x764   : > { %v4454_v50 = vadd.f32 %v6959_v49, %v8301_v63  ;;  %v4445_v51 = vpop.f32.mrb[241].mxu1 }
 0x765   : > { %v4446_v52 = vadd.f32 %v8301_v63, %v4445_v51  ;;  %v6960_v53 = vpop.f32.mrb[242].mxu1  ;;  %7025 = vmatprep.mubr.msk.bf16.mxu0 %vm470_vm0, %v4603_v48 }
 0x766   : > { %v4457_v54 = vadd.f32 %v6960_v53, %v8301_v63  ;;  %v4448_v55 = vpop.f32.mrb[243].mxu1  ;;  %7026 = vmatmul.mubr.msk.bf16.gmra.mrb[44].mxu0 %vm470_vm0, %v4604_v47  ;;  %v4558_v57 = vmax.f32 %v4454_v50, 0.0 }
 0x767   : > { %v4449_v56 = vadd.f32 %v8301_v63, %v4448_v55  ;;  %v4556_v59 = vmax.f32 %v4446_v52, 0.0 }
 0x768   : > { %v4559_v58 = vmax.f32 %v4457_v54, 0.0 }
 0x769   : > { %v4557_v60 = vmax.f32 %v4449_v56, 0.0 }
 0x76a   : > { %v4606_v61 = vpack.c.bf16 %v4559_v58, %v4558_v57 }
 0x76b   : > { %v4605_v62 = vpack.c.bf16 %v4557_v60, %v4556_v59  ;;  %v6963_v41 = vpop.f32.mrb[244].mxu1 }
 0x76c   : > { %v4470_v0 = vadd.f32 %v6963_v41, %v8301_v63  ;;  %v4461_v1 = vpop.f32.mrb[245].mxu1 }
 0x76d   : > { %v4462_v2 = vadd.f32 %v8301_v63, %v4461_v1  ;;  %v6964_v3 = vpop.f32.mrb[246].mxu1  ;;  %7029 = vmatprep.mubr.msk.bf16.mxu0 %vm470_vm0, %v4605_v62 }
 0x76e   : > { %v4473_v4 = vadd.f32 %v6964_v3, %v8301_v63  ;;  %v4464_v5 = vpop.f32.mrb[247].mxu1  ;;  %7030 = vmatmul.mubr.msk.bf16.gmra.mrb[48].mxu0 %vm470_vm0, %v4606_v61  ;;  %v4562_v7 = vmax.f32 %v4470_v0, 0.0 }
 0x76f   : > { %v4465_v6 = vadd.f32 %v8301_v63, %v4464_v5  ;;  %v4560_v9 = vmax.f32 %v4462_v2, 0.0 }
 0x770   : > { %v4563_v8 = vmax.f32 %v4473_v4, 0.0 }
 0x771   : > { %v4561_v10 = vmax.f32 %v4465_v6, 0.0 }
 0x772   : > { %v4608_v11 = vpack.c.bf16 %v4563_v8, %v4562_v7 }
 0x773   : > { %v4607_v12 = vpack.c.bf16 %v4561_v10, %v4560_v9  ;;  %v6967_v13 = vpop.f32.mrb[248].mxu1 }
 0x774   : > { %v4486_v14 = vadd.f32 %v6967_v13, %v8301_v63  ;;  %v4477_v15 = vpop.f32.mrb[249].mxu1 }
 0x775   : > { %v4478_v16 = vadd.f32 %v8301_v63, %v4477_v15  ;;  %v6968_v17 = vpop.f32.mrb[250].mxu1  ;;  %7033 = vmatprep.mubr.msk.bf16.mxu0 %vm470_vm0, %v4607_v12 }
 0x776   : > { %v4489_v18 = vadd.f32 %v6968_v17, %v8301_v63  ;;  %v4480_v19 = vpop.f32.mrb[251].mxu1  ;;  %7034 = vmatmul.mubr.msk.bf16.gmra.mrb[52].mxu0 %vm470_vm0, %v4608_v11  ;;  %v4566_v21 = vmax.f32 %v4486_v14, 0.0 }
 0x777   : > { %v4481_v20 = vadd.f32 %v8301_v63, %v4480_v19  ;;  %v4564_v23 = vmax.f32 %v4478_v16, 0.0 }
 0x778   : > { %v4567_v22 = vmax.f32 %v4489_v18, 0.0 }
 0x779   : > { %v4565_v24 = vmax.f32 %v4481_v20, 0.0 }
 0x77a   : > { %v4610_v25 = vpack.c.bf16 %v4567_v22, %v4566_v21 }
 0x77b   : > { %v4609_v26 = vpack.c.bf16 %v4565_v24, %v4564_v23  ;;  %v6971_v27 = vpop.f32.mrb[252].mxu1 }
 0x77c   : > { %v4502_v28 = vadd.f32 %v6971_v27, %v8301_v63  ;;  %v4493_v29 = vpop.f32.mrb[253].mxu1 }
 0x77d   : > { %v4494_v30 = vadd.f32 %v8301_v63, %v4493_v29  ;;  %v6972_v31 = vpop.f32.mrb[254].mxu1  ;;  %7037 = vmatprep.mubr.msk.bf16.mxu0 %vm470_vm0, %v4609_v26 }
 0x77e   : > { %v4505_v32 = vadd.f32 %v6972_v31, %v8301_v63  ;;  %v4496_v33 = vpop.f32.mrb[255].mxu1  ;;  %7038 = vmatmul.mubr.msk.bf16.gmra.mrb[56].mxu0 %vm470_vm0, %v4610_v25  ;;  %v4570_v35 = vmax.f32 %v4502_v28, 0.0 }
 0x77f   : > { %v4497_v34 = vadd.f32 %v8301_v63, %v4496_v33  ;;  %v4568_v37 = vmax.f32 %v4494_v30, 0.0 }
 0x780   : > { %v4571_v36 = vmax.f32 %v4505_v32, 0.0 }
 0x781   : > { %v4569_v38 = vmax.f32 %v4497_v34, 0.0 }
 0x782   : > { %v4612_v39 = vpack.c.bf16 %v4571_v36, %v4570_v35 }
 0x783   : > { %v4611_v40 = vpack.c.bf16 %v4569_v38, %v4568_v37 }
 0x785   : > { %7041 = vmatprep.mubr.msk.bf16.mxu0 %vm470_vm0, %v4611_v40 }
 0x786   : > { %7042 = vmatmul.mubr.msk.bf16.gmra.mrb[60].mxu0 %vm470_vm0, %v4612_v39 }
 0x7e1   : > { %v6983_v43 = vpop.f32.mrb[0].mxu0 }
 0x7e2   : > { %v4782_v44 = vadd.f32 %v6983_v43, %v8420_v42  ;;  %v4773_v45 = vpop.f32.mrb[1].mxu0 }
 0x7e3   : > { %v4774_v63 = vadd.f32 %v8420_v42, %v4773_v45  ;;  %v6984_v46 = vpop.f32.mrb[2].mxu0 }
 0x7e4   : > { %v4785_v47 = vadd.f32 %v6984_v46, %v8420_v42  ;;  %v4776_v48 = vpop.f32.mrb[3].mxu0  ;;  %v5030_v50 = vmax.f32 %v4782_v44, 0.0 }
 0x7e5   : > { %v4777_v49 = vadd.f32 %v8420_v42, %v4776_v48  ;;  %v5028_v52 = vmax.f32 %v4774_v63, 0.0 }
 0x7e6   : > { %v5031_v51 = vmax.f32 %v4785_v47, 0.0 }
 0x7e7   : > { %v5029_v53 = vmax.f32 %v4777_v49, 0.0 }
 0x7e8   : > { %v5110_v54 = vpack.c.bf16 %v5031_v51, %v5030_v50 }
 0x7e9   : > { %v5109_v55 = vpack.c.bf16 %v5029_v53, %v5028_v52  ;;  %v6987_v56 = vpop.f32.mrb[4].mxu0 }
 0x7ea   : > { %v4798_v57 = vadd.f32 %v6987_v56, %v8420_v42  ;;  %v4789_v58 = vpop.f32.mrb[5].mxu0 }
 0x7eb   : > { %v4790_v59 = vadd.f32 %v8420_v42, %v4789_v58  ;;  %v6988_v60 = vpop.f32.mrb[6].mxu0  ;;  %7061 = vmatprep.mubr.bf16.mxu1 %v5109_v55 }
 0x7ec   : > { %v4801_v61 = vadd.f32 %v6988_v60, %v8420_v42  ;;  %v4792_v62 = vpop.f32.mrb[7].mxu0  ;;  %7062 = vmatmul.mubr.bf16.vlgmr.msra.gmra.mrb[0].mxu1 %v5110_v54  ;;  %v5034_v0 = vmax.f32 %v4798_v57, 0.0 }
 0x7ed   : > { %v4793_v41 = vadd.f32 %v8420_v42, %v4792_v62  ;;  %v5032_v2 = vmax.f32 %v4790_v59, 0.0 }
 0x7ee   : > { %v5035_v1 = vmax.f32 %v4801_v61, 0.0 }
 0x7ef   : > { %v5033_v3 = vmax.f32 %v4793_v41, 0.0 }
 0x7f0   : > { %v5112_v4 = vpack.c.bf16 %v5035_v1, %v5034_v0 }
 0x7f1   : > { %v5111_v5 = vpack.c.bf16 %v5033_v3, %v5032_v2  ;;  %v6991_v6 = vpop.f32.mrb[8].mxu0 }
 0x7f2   : > { %v4814_v7 = vadd.f32 %v6991_v6, %v8420_v42  ;;  %v4805_v8 = vpop.f32.mrb[9].mxu0 }
 0x7f3   : > { %v4806_v9 = vadd.f32 %v8420_v42, %v4805_v8  ;;  %v6992_v10 = vpop.f32.mrb[10].mxu0  ;;  %7065 = vmatprep.mubr.bf16.mxu1 %v5111_v5 }
 0x7f4   : > { %v4817_v11 = vadd.f32 %v6992_v10, %v8420_v42  ;;  %v4808_v12 = vpop.f32.mrb[11].mxu0  ;;  %7066 = vmatmul.mubr.bf16.gmra.mrb[4].mxu1 %v5112_v4  ;;  %v5038_v14 = vmax.f32 %v4814_v7, 0.0 }
 0x7f5   : > { %v4809_v13 = vadd.f32 %v8420_v42, %v4808_v12  ;;  %v5036_v16 = vmax.f32 %v4806_v9, 0.0 }
 0x7f6   : > { %v5039_v15 = vmax.f32 %v4817_v11, 0.0 }
 0x7f7   : > { %v5037_v17 = vmax.f32 %v4809_v13, 0.0 }
 0x7f8   : > { %v5114_v18 = vpack.c.bf16 %v5039_v15, %v5038_v14 }
 0x7f9   : > { %v5113_v19 = vpack.c.bf16 %v5037_v17, %v5036_v16  ;;  %v6995_v20 = vpop.f32.mrb[12].mxu0 }
 0x7fa   : > { %v4830_v21 = vadd.f32 %v6995_v20, %v8420_v42  ;;  %v4821_v22 = vpop.f32.mrb[13].mxu0 }
 0x7fb   : > { %v4822_v23 = vadd.f32 %v8420_v42, %v4821_v22  ;;  %v6996_v24 = vpop.f32.mrb[14].mxu0  ;;  %7069 = vmatprep.mubr.bf16.mxu1 %v5113_v19 }
 0x7fc   : > { %v4833_v25 = vadd.f32 %v6996_v24, %v8420_v42  ;;  %v4824_v26 = vpop.f32.mrb[15].mxu0  ;;  %7070 = vmatmul.mubr.bf16.gmra.mrb[8].mxu1 %v5114_v18  ;;  %v5042_v28 = vmax.f32 %v4830_v21, 0.0 }
 0x7fd   : > { %v4825_v27 = vadd.f32 %v8420_v42, %v4824_v26  ;;  %v5040_v30 = vmax.f32 %v4822_v23, 0.0 }
 0x7fe   : > { %v5043_v29 = vmax.f32 %v4833_v25, 0.0 }
 0x7ff   : > { %v5041_v31 = vmax.f32 %v4825_v27, 0.0 }
 0x800   : > { %v5116_v32 = vpack.c.bf16 %v5043_v29, %v5042_v28 }
 0x801   : > { %v5115_v33 = vpack.c.bf16 %v5041_v31, %v5040_v30  ;;  %v6999_v34 = vpop.f32.mrb[16].mxu0 }
 0x802   : > { %v4846_v35 = vadd.f32 %v6999_v34, %v8420_v42  ;;  %v4837_v36 = vpop.f32.mrb[17].mxu0 }
 0x803   : > { %v4838_v37 = vadd.f32 %v8420_v42, %v4837_v36  ;;  %v7000_v38 = vpop.f32.mrb[18].mxu0  ;;  %7073 = vmatprep.mubr.bf16.mxu1 %v5115_v33 }
 0x804   : > { %v4849_v39 = vadd.f32 %v7000_v38, %v8420_v42  ;;  %v4840_v40 = vpop.f32.mrb[19].mxu0  ;;  %7074 = vmatmul.mubr.bf16.gmra.mrb[12].mxu1 %v5116_v32  ;;  %v5046_v44 = vmax.f32 %v4846_v35, 0.0 }
 0x805   : > { %v4841_v43 = vadd.f32 %v8420_v42, %v4840_v40  ;;  %v5044_v63 = vmax.f32 %v4838_v37, 0.0 }
 0x806   : > { %v5047_v45 = vmax.f32 %v4849_v39, 0.0 }
 0x807   : > { %v5045_v46 = vmax.f32 %v4841_v43, 0.0 }
 0x808   : > { %v5118_v47 = vpack.c.bf16 %v5047_v45, %v5046_v44 }
 0x809   : > { %v5117_v48 = vpack.c.bf16 %v5045_v46, %v5044_v63  ;;  %v7003_v49 = vpop.f32.mrb[20].mxu0 }
 0x80a   : > { %v4862_v50 = vadd.f32 %v7003_v49, %v8420_v42  ;;  %v4853_v51 = vpop.f32.mrb[21].mxu0 }
 0x80b   : > { %v4854_v52 = vadd.f32 %v8420_v42, %v4853_v51  ;;  %v7004_v53 = vpop.f32.mrb[22].mxu0  ;;  %7077 = vmatprep.mubr.bf16.mxu1 %v5117_v48 }
 0x80c   : > { %v4865_v54 = vadd.f32 %v7004_v53, %v8420_v42  ;;  %v4856_v55 = vpop.f32.mrb[23].mxu0  ;;  %7078 = vmatmul.mubr.bf16.gmra.mrb[16].mxu1 %v5118_v47  ;;  %v5050_v57 = vmax.f32 %v4862_v50, 0.0 }
 0x80d   : > { %v4857_v56 = vadd.f32 %v8420_v42, %v4856_v55  ;;  %v5048_v59 = vmax.f32 %v4854_v52, 0.0 }
 0x80e   : > { %v5051_v58 = vmax.f32 %v4865_v54, 0.0 }
 0x80f   : > { %v5049_v60 = vmax.f32 %v4857_v56, 0.0 }
 0x810   : > { %v5120_v61 = vpack.c.bf16 %v5051_v58, %v5050_v57 }
 0x811   : > { %v5119_v62 = vpack.c.bf16 %v5049_v60, %v5048_v59  ;;  %v7007_v41 = vpop.f32.mrb[24].mxu0 }
 0x812   : > { %v4878_v0 = vadd.f32 %v7007_v41, %v8420_v42  ;;  %v4869_v1 = vpop.f32.mrb[25].mxu0 }
 0x813   : > { %v4870_v2 = vadd.f32 %v8420_v42, %v4869_v1  ;;  %v7008_v3 = vpop.f32.mrb[26].mxu0  ;;  %7081 = vmatprep.mubr.bf16.mxu1 %v5119_v62 }
 0x814   : > { %v4881_v4 = vadd.f32 %v7008_v3, %v8420_v42  ;;  %v4872_v5 = vpop.f32.mrb[27].mxu0  ;;  %7082 = vmatmul.mubr.bf16.gmra.mrb[20].mxu1 %v5120_v61  ;;  %v5054_v7 = vmax.f32 %v4878_v0, 0.0 }
 0x815   : > { %v4873_v6 = vadd.f32 %v8420_v42, %v4872_v5  ;;  %v5052_v9 = vmax.f32 %v4870_v2, 0.0 }
 0x816   : > { %v5055_v8 = vmax.f32 %v4881_v4, 0.0 }
 0x817   : > { %v5053_v10 = vmax.f32 %v4873_v6, 0.0 }
 0x818   : > { %v5122_v11 = vpack.c.bf16 %v5055_v8, %v5054_v7 }
 0x819   : > { %v5121_v12 = vpack.c.bf16 %v5053_v10, %v5052_v9  ;;  %v7011_v13 = vpop.f32.mrb[28].mxu0 }
 0x81a   : > { %v4894_v14 = vadd.f32 %v7011_v13, %v8420_v42  ;;  %v4885_v15 = vpop.f32.mrb[29].mxu0 }
 0x81b   : > { %v4886_v16 = vadd.f32 %v8420_v42, %v4885_v15  ;;  %v7012_v17 = vpop.f32.mrb[30].mxu0  ;;  %7085 = vmatprep.mubr.bf16.mxu1 %v5121_v12 }
 0x81c   : > { %v4897_v18 = vadd.f32 %v7012_v17, %v8420_v42  ;;  %v4888_v19 = vpop.f32.mrb[31].mxu0  ;;  %7086 = vmatmul.mubr.bf16.gmra.mrb[24].mxu1 %v5122_v11  ;;  %v5058_v21 = vmax.f32 %v4894_v14, 0.0 }
 0x81d   : > { %v4889_v20 = vadd.f32 %v8420_v42, %v4888_v19  ;;  %v5056_v23 = vmax.f32 %v4886_v16, 0.0 }
 0x81e   : > { %v5059_v22 = vmax.f32 %v4897_v18, 0.0 }
 0x81f   : > { %v5057_v24 = vmax.f32 %v4889_v20, 0.0 }
 0x820   : > { %v5124_v25 = vpack.c.bf16 %v5059_v22, %v5058_v21 }
 0x821   : > { %v5123_v26 = vpack.c.bf16 %v5057_v24, %v5056_v23  ;;  %v7015_v27 = vpop.f32.mrb[32].mxu0 }
 0x822   : > { %v4910_v28 = vadd.f32 %v7015_v27, %v8420_v42  ;;  %v4901_v29 = vpop.f32.mrb[33].mxu0 }
 0x823   : > { %v4902_v30 = vadd.f32 %v8420_v42, %v4901_v29  ;;  %v7016_v31 = vpop.f32.mrb[34].mxu0  ;;  %7089 = vmatprep.mubr.bf16.mxu1 %v5123_v26 }
 0x824   : > { %v4913_v32 = vadd.f32 %v7016_v31, %v8420_v42  ;;  %v4904_v33 = vpop.f32.mrb[35].mxu0  ;;  %7090 = vmatmul.mubr.bf16.gmra.mrb[28].mxu1 %v5124_v25  ;;  %v5062_v35 = vmax.f32 %v4910_v28, 0.0 }
 0x825   : > { %v4905_v34 = vadd.f32 %v8420_v42, %v4904_v33  ;;  %v5060_v37 = vmax.f32 %v4902_v30, 0.0 }
 0x826   : > { %v5063_v36 = vmax.f32 %v4913_v32, 0.0 }
 0x827   : > { %v5061_v38 = vmax.f32 %v4905_v34, 0.0 }
 0x828   : > { %v5126_v39 = vpack.c.bf16 %v5063_v36, %v5062_v35 }
 0x829   : > { %v5125_v40 = vpack.c.bf16 %v5061_v38, %v5060_v37  ;;  %v7019_v43 = vpop.f32.mrb[36].mxu0 }
 0x82a   : > { %v4926_v44 = vadd.f32 %v7019_v43, %v8420_v42  ;;  %v4917_v45 = vpop.f32.mrb[37].mxu0 }
 0x82b   : > { %v4918_v63 = vadd.f32 %v8420_v42, %v4917_v45  ;;  %v7020_v46 = vpop.f32.mrb[38].mxu0  ;;  %7093 = vmatprep.mubr.bf16.mxu1 %v5125_v40 }
 0x82c   : > { %v4929_v47 = vadd.f32 %v7020_v46, %v8420_v42  ;;  %v4920_v48 = vpop.f32.mrb[39].mxu0  ;;  %7094 = vmatmul.mubr.bf16.gmra.mrb[32].mxu1 %v5126_v39  ;;  %v5066_v50 = vmax.f32 %v4926_v44, 0.0 }
 0x82d   : > { %v4921_v49 = vadd.f32 %v8420_v42, %v4920_v48  ;;  %v5064_v52 = vmax.f32 %v4918_v63, 0.0 }
 0x82e   : > { %v5067_v51 = vmax.f32 %v4929_v47, 0.0 }
 0x82f   : > { %v5065_v53 = vmax.f32 %v4921_v49, 0.0 }
 0x830   : > { %v5128_v54 = vpack.c.bf16 %v5067_v51, %v5066_v50 }
 0x831   : > { %v5127_v55 = vpack.c.bf16 %v5065_v53, %v5064_v52  ;;  %v7023_v56 = vpop.f32.mrb[40].mxu0 }
 0x832   : > { %v4942_v57 = vadd.f32 %v7023_v56, %v8420_v42  ;;  %v4933_v58 = vpop.f32.mrb[41].mxu0 }
 0x833   : > { %v4934_v59 = vadd.f32 %v8420_v42, %v4933_v58  ;;  %v7024_v60 = vpop.f32.mrb[42].mxu0  ;;  %7097 = vmatprep.mubr.bf16.mxu1 %v5127_v55 }
 0x834   : > { %v4945_v61 = vadd.f32 %v7024_v60, %v8420_v42  ;;  %v4936_v62 = vpop.f32.mrb[43].mxu0  ;;  %7098 = vmatmul.mubr.bf16.gmra.mrb[36].mxu1 %v5128_v54  ;;  %v5070_v0 = vmax.f32 %v4942_v57, 0.0 }
 0x835   : > { %v4937_v41 = vadd.f32 %v8420_v42, %v4936_v62  ;;  %v5068_v2 = vmax.f32 %v4934_v59, 0.0 }
 0x836   : > { %v5071_v1 = vmax.f32 %v4945_v61, 0.0 }
 0x837   : > { %v5069_v3 = vmax.f32 %v4937_v41, 0.0 }
 0x838   : > { %v5130_v4 = vpack.c.bf16 %v5071_v1, %v5070_v0 }
 0x839   : > { %v5129_v5 = vpack.c.bf16 %v5069_v3, %v5068_v2  ;;  %v7027_v6 = vpop.f32.mrb[44].mxu0 }
 0x83a   : > { %v4958_v7 = vadd.f32 %v7027_v6, %v8420_v42  ;;  %v4949_v8 = vpop.f32.mrb[45].mxu0 }
 0x83b   : > { %v4950_v9 = vadd.f32 %v8420_v42, %v4949_v8  ;;  %v7028_v10 = vpop.f32.mrb[46].mxu0  ;;  %7101 = vmatprep.mubr.bf16.mxu1 %v5129_v5 }
 0x83c   : > { %v4961_v11 = vadd.f32 %v7028_v10, %v8420_v42  ;;  %v4952_v12 = vpop.f32.mrb[47].mxu0  ;;  %7102 = vmatmul.mubr.bf16.gmra.mrb[40].mxu1 %v5130_v4  ;;  %v5074_v14 = vmax.f32 %v4958_v7, 0.0 }
 0x83d   : > { %v4953_v13 = vadd.f32 %v8420_v42, %v4952_v12  ;;  %v5072_v16 = vmax.f32 %v4950_v9, 0.0 }
 0x83e   : > { %v5075_v15 = vmax.f32 %v4961_v11, 0.0 }
 0x83f   : > { %v5073_v17 = vmax.f32 %v4953_v13, 0.0  ;;  %v8492_v13 = vld [vmem:[%s8684_s8] ss:$0 sm:$0xff] }
 0x840   : > { %v5132_v18 = vpack.c.bf16 %v5075_v15, %v5074_v14 }
 0x841   : > { %v5131_v19 = vpack.c.bf16 %v5073_v17, %v5072_v16  ;;  %v7031_v20 = vpop.f32.mrb[48].mxu0 }
 0x842   : > { %v4974_v21 = vadd.f32 %v7031_v20, %v8420_v42  ;;  %v4965_v22 = vpop.f32.mrb[49].mxu0 }
 0x843   : > { %v4966_v23 = vadd.f32 %v8420_v42, %v4965_v22  ;;  %v7032_v24 = vpop.f32.mrb[50].mxu0  ;;  %7105 = vmatprep.mubr.bf16.mxu1 %v5131_v19 }
 0x844   : > { %v4977_v25 = vadd.f32 %v7032_v24, %v8420_v42  ;;  %v4968_v26 = vpop.f32.mrb[51].mxu0  ;;  %7106 = vmatmul.mubr.bf16.gmra.mrb[44].mxu1 %v5132_v18  ;;  %v5078_v28 = vmax.f32 %v4974_v21, 0.0 }
 0x845   : > { %v4969_v27 = vadd.f32 %v8420_v42, %v4968_v26  ;;  %v5076_v30 = vmax.f32 %v4966_v23, 0.0 }
 0x846   : > { %v5079_v29 = vmax.f32 %v4977_v25, 0.0 }
 0x847   : > { %v5077_v31 = vmax.f32 %v4969_v27, 0.0 }
 0x848   : > { %v5134_v32 = vpack.c.bf16 %v5079_v29, %v5078_v28 }
 0x849   : > { %v5133_v33 = vpack.c.bf16 %v5077_v31, %v5076_v30  ;;  %v7035_v34 = vpop.f32.mrb[52].mxu0 }
 0x84a   : > { %v4990_v35 = vadd.f32 %v7035_v34, %v8420_v42  ;;  %v4981_v36 = vpop.f32.mrb[53].mxu0 }
 0x84b   : > { %v4982_v37 = vadd.f32 %v8420_v42, %v4981_v36  ;;  %v7036_v38 = vpop.f32.mrb[54].mxu0  ;;  %7109 = vmatprep.mubr.bf16.mxu1 %v5133_v33 }
 0x84c   : > { %v4993_v39 = vadd.f32 %v7036_v38, %v8420_v42  ;;  %v4984_v40 = vpop.f32.mrb[55].mxu0  ;;  %7110 = vmatmul.mubr.bf16.gmra.mrb[48].mxu1 %v5134_v32  ;;  %v5082_v44 = vmax.f32 %v4990_v35, 0.0 }
 0x84d   : > { %v4985_v43 = vadd.f32 %v8420_v42, %v4984_v40  ;;  %v5080_v63 = vmax.f32 %v4982_v37, 0.0 }
 0x84e   : > { %v5083_v45 = vmax.f32 %v4993_v39, 0.0 }
 0x84f   : > { %v5081_v46 = vmax.f32 %v4985_v43, 0.0 }
 0x850   : > { %v5136_v47 = vpack.c.bf16 %v5083_v45, %v5082_v44 }
 0x851   : > { %v5135_v48 = vpack.c.bf16 %v5081_v46, %v5080_v63  ;;  %v7039_v49 = vpop.f32.mrb[56].mxu0 }
 0x852   : > { %v5006_v50 = vadd.f32 %v7039_v49, %v8420_v42  ;;  %v4997_v51 = vpop.f32.mrb[57].mxu0 }
 0x853   : > { %v4998_v52 = vadd.f32 %v8420_v42, %v4997_v51  ;;  %v7040_v53 = vpop.f32.mrb[58].mxu0  ;;  %7113 = vmatprep.mubr.bf16.mxu1 %v5135_v48 }
 0x854   : > { %v5009_v54 = vadd.f32 %v7040_v53, %v8420_v42  ;;  %v5000_v55 = vpop.f32.mrb[59].mxu0  ;;  %7114 = vmatmul.mubr.bf16.gmra.mrb[52].mxu1 %v5136_v47  ;;  %v5086_v57 = vmax.f32 %v5006_v50, 0.0 }
 0x855   : > { %v5001_v56 = vadd.f32 %v8420_v42, %v5000_v55  ;;  %v5084_v59 = vmax.f32 %v4998_v52, 0.0 }
 0x856   : > { %v5087_v58 = vmax.f32 %v5009_v54, 0.0 }
 0x857   : > { %v5085_v60 = vmax.f32 %v5001_v56, 0.0 }
 0x858   : > { %v5138_v61 = vpack.c.bf16 %v5087_v58, %v5086_v57 }
 0x859   : > { %v5137_v62 = vpack.c.bf16 %v5085_v60, %v5084_v59  ;;  %v7043_v41 = vpop.f32.mrb[60].mxu0 }
 0x85a   : > { %v5022_v0 = vadd.f32 %v7043_v41, %v8420_v42  ;;  %v5013_v1 = vpop.f32.mrb[61].mxu0 }
 0x85b   : > { %v5014_v2 = vadd.f32 %v8420_v42, %v5013_v1  ;;  %v7044_v3 = vpop.f32.mrb[62].mxu0  ;;  %7117 = vmatprep.mubr.bf16.mxu1 %v5137_v62 }
 0x85c   : > { %v5025_v4 = vadd.f32 %v7044_v3, %v8420_v42  ;;  %v5016_v5 = vpop.f32.mrb[63].mxu0  ;;  %7118 = vmatmul.mubr.bf16.gmra.mrb[56].mxu1 %v5138_v61  ;;  %v5090_v7 = vmax.f32 %v5022_v0, 0.0 }
 0x85d   : > { %v5017_v6 = vadd.f32 %v8420_v42, %v5016_v5  ;;  %v5088_v9 = vmax.f32 %v5014_v2, 0.0 }
 0x85e   : > { %v5091_v8 = vmax.f32 %v5025_v4, 0.0 }
 0x85f   : > { %v5089_v10 = vmax.f32 %v5017_v6, 0.0 }
 0x860   : > { %v5140_v11 = vpack.c.bf16 %v5091_v8, %v5090_v7 }
 0x861   : > { %v5139_v12 = vpack.c.bf16 %v5089_v10, %v5088_v9 }
 0x863   : > { %7121 = vmatprep.mubr.bf16.mxu1 %v5139_v12 }
 0x864   : > { %7122 = vmatmul.mubr.bf16.gmra.mrb[60].mxu1 %v5140_v11 }
 0x8bf   : > { %v7063_v14 = vpop.f32.mrb[0].mxu1 }
 0x8c0   : > { %v5238_v15 = vadd.f32 %v7063_v14, %v8492_v13  ;;  %v5229_v42 = vpop.f32.mrb[1].mxu1 }
 0x8c1   : > { %v5230_v16 = vadd.f32 %v8492_v13, %v5229_v42  ;;  %v7064_v17 = vpop.f32.mrb[2].mxu1 }
 0x8c2   : > { %5486 = vst [vmem:[%s8496_s28 + $0x10] sm:$0xff] %v5238_v15  ;;  %v5241_v18 = vadd.f32 %v7064_v17, %v8492_v13  ;;  %v5232_v19 = vpop.f32.mrb[3].mxu1 }
 0x8c3   : > { %5484 = vst [vmem:[%s8496_s28] sm:$0xff] %v5230_v16  ;;  %v5233_v20 = vadd.f32 %v8492_v13, %v5232_v19 }
 0x8c4   : > { %5487 = vst [vmem:[%s8496_s28 + $0x18] sm:$0xff] %v5241_v18 }
 0x8c5   : > { %5485 = vst [vmem:[%s8496_s28 + $0x8] sm:$0xff] %v5233_v20 }
 0x8c7   : > { %v7067_v21 = vpop.f32.mrb[4].mxu1 }
 0x8c8   : > { %v5254_v22 = vadd.f32 %v7067_v21, %v8492_v13  ;;  %v5245_v23 = vpop.f32.mrb[5].mxu1 }
 0x8c9   : > { %v5246_v24 = vadd.f32 %v8492_v13, %v5245_v23  ;;  %v7068_v25 = vpop.f32.mrb[6].mxu1 }
 0x8ca   : > { %5490 = vst [vmem:[%s8496_s28 + $0x30] sm:$0xff] %v5254_v22  ;;  %v5257_v26 = vadd.f32 %v7068_v25, %v8492_v13  ;;  %v5248_v27 = vpop.f32.mrb[7].mxu1 }
 0x8cb   : > { %5488 = vst [vmem:[%s8496_s28 + $0x20] sm:$0xff] %v5246_v24  ;;  %v5249_v28 = vadd.f32 %v8492_v13, %v5248_v27 }
 0x8cc   : > { %5491 = vst [vmem:[%s8496_s28 + $0x38] sm:$0xff] %v5257_v26 }
 0x8cd   : > { %5489 = vst [vmem:[%s8496_s28 + $0x28] sm:$0xff] %v5249_v28 }
 0x8cf   : > { %v7071_v29 = vpop.f32.mrb[8].mxu1 }
 0x8d0   : > { %v5270_v30 = vadd.f32 %v7071_v29, %v8492_v13  ;;  %v5261_v31 = vpop.f32.mrb[9].mxu1 }
 0x8d1   : > { %v5262_v32 = vadd.f32 %v8492_v13, %v5261_v31  ;;  %v7072_v33 = vpop.f32.mrb[10].mxu1 }
 0x8d2   : > { %5494 = vst [vmem:[%s8496_s28 + $0x50] sm:$0xff] %v5270_v30  ;;  %v5273_v34 = vadd.f32 %v7072_v33, %v8492_v13  ;;  %v5264_v35 = vpop.f32.mrb[11].mxu1 }
 0x8d3   : > { %5492 = vst [vmem:[%s8496_s28 + $0x40] sm:$0xff] %v5262_v32  ;;  %v5265_v36 = vadd.f32 %v8492_v13, %v5264_v35 }
 0x8d4   : > { %5495 = vst [vmem:[%s8496_s28 + $0x58] sm:$0xff] %v5273_v34 }
 0x8d5   : > { %5493 = vst [vmem:[%s8496_s28 + $0x48] sm:$0xff] %v5265_v36 }
 0x8d7   : > { %v7075_v37 = vpop.f32.mrb[12].mxu1 }
 0x8d8   : > { %v5286_v38 = vadd.f32 %v7075_v37, %v8492_v13  ;;  %v5277_v39 = vpop.f32.mrb[13].mxu1 }
 0x8d9   : > { %v5278_v40 = vadd.f32 %v8492_v13, %v5277_v39  ;;  %v7076_v43 = vpop.f32.mrb[14].mxu1 }
 0x8da   : > { %5498 = vst [vmem:[%s8496_s28 + $0x70] sm:$0xff] %v5286_v38  ;;  %v5289_v44 = vadd.f32 %v7076_v43, %v8492_v13  ;;  %v5280_v45 = vpop.f32.mrb[15].mxu1 }
 0x8db   : > { %5496 = vst [vmem:[%s8496_s28 + $0x60] sm:$0xff] %v5278_v40  ;;  %v5281_v63 = vadd.f32 %v8492_v13, %v5280_v45 }
 0x8dc   : > { %5499 = vst [vmem:[%s8496_s28 + $0x78] sm:$0xff] %v5289_v44 }
 0x8dd   : > { %5497 = vst [vmem:[%s8496_s28 + $0x68] sm:$0xff] %v5281_v63 }
 0x8df   : > { %v7079_v46 = vpop.f32.mrb[16].mxu1 }
 0x8e0   : > { %v5302_v47 = vadd.f32 %v7079_v46, %v8492_v13  ;;  %v5293_v48 = vpop.f32.mrb[17].mxu1 }
 0x8e1   : > { %v5294_v49 = vadd.f32 %v8492_v13, %v5293_v48  ;;  %v7080_v50 = vpop.f32.mrb[18].mxu1 }
 0x8e2   : > { %5502 = vst [vmem:[%s8496_s28 + $0x90] sm:$0xff] %v5302_v47  ;;  %v5305_v51 = vadd.f32 %v7080_v50, %v8492_v13  ;;  %v5296_v52 = vpop.f32.mrb[19].mxu1 }
 0x8e3   : > { %5500 = vst [vmem:[%s8496_s28 + $0x80] sm:$0xff] %v5294_v49  ;;  %v5297_v53 = vadd.f32 %v8492_v13, %v5296_v52 }
 0x8e4   : > { %5503 = vst [vmem:[%s8496_s28 + $0x98] sm:$0xff] %v5305_v51 }
 0x8e5   : > { %5501 = vst [vmem:[%s8496_s28 + $0x88] sm:$0xff] %v5297_v53 }
 0x8e7   : > { %v7083_v54 = vpop.f32.mrb[20].mxu1 }
 0x8e8   : > { %v5318_v55 = vadd.f32 %v7083_v54, %v8492_v13  ;;  %v5309_v56 = vpop.f32.mrb[21].mxu1 }
 0x8e9   : > { %v5310_v57 = vadd.f32 %v8492_v13, %v5309_v56  ;;  %v7084_v58 = vpop.f32.mrb[22].mxu1 }
 0x8ea   : > { %5506 = vst [vmem:[%s8496_s28 + $0xb0] sm:$0xff] %v5318_v55  ;;  %v5321_v59 = vadd.f32 %v7084_v58, %v8492_v13  ;;  %v5312_v60 = vpop.f32.mrb[23].mxu1 }
 0x8eb   : > { %5504 = vst [vmem:[%s8496_s28 + $0xa0] sm:$0xff] %v5310_v57  ;;  %v5313_v61 = vadd.f32 %v8492_v13, %v5312_v60 }
 0x8ec   : > { %5507 = vst [vmem:[%s8496_s28 + $0xb8] sm:$0xff] %v5321_v59 }
 0x8ed   : > { %5505 = vst [vmem:[%s8496_s28 + $0xa8] sm:$0xff] %v5313_v61 }
 0x8ef   : > { %v7087_v62 = vpop.f32.mrb[24].mxu1 }
 0x8f0   : > { %v5334_v41 = vadd.f32 %v7087_v62, %v8492_v13  ;;  %v5325_v0 = vpop.f32.mrb[25].mxu1 }
 0x8f1   : > { %v5326_v1 = vadd.f32 %v8492_v13, %v5325_v0  ;;  %v7088_v2 = vpop.f32.mrb[26].mxu1 }
 0x8f2   : > { %5510 = vst [vmem:[%s8496_s28 + $0xd0] sm:$0xff] %v5334_v41  ;;  %v5337_v3 = vadd.f32 %v7088_v2, %v8492_v13  ;;  %v5328_v4 = vpop.f32.mrb[27].mxu1 }
 0x8f3   : > { %5508 = vst [vmem:[%s8496_s28 + $0xc0] sm:$0xff] %v5326_v1  ;;  %v5329_v5 = vadd.f32 %v8492_v13, %v5328_v4 }
 0x8f4   : > { %5511 = vst [vmem:[%s8496_s28 + $0xd8] sm:$0xff] %v5337_v3 }
 0x8f5   : > { %5509 = vst [vmem:[%s8496_s28 + $0xc8] sm:$0xff] %v5329_v5 }
 0x8f7   : > { %v7091_v6 = vpop.f32.mrb[28].mxu1 }
 0x8f8   : > { %v5350_v7 = vadd.f32 %v7091_v6, %v8492_v13  ;;  %v5341_v8 = vpop.f32.mrb[29].mxu1 }
 0x8f9   : > { %v5342_v9 = vadd.f32 %v8492_v13, %v5341_v8  ;;  %v7092_v10 = vpop.f32.mrb[30].mxu1 }
 0x8fa   : > { %5514 = vst [vmem:[%s8496_s28 + $0xf0] sm:$0xff] %v5350_v7  ;;  %v5353_v11 = vadd.f32 %v7092_v10, %v8492_v13  ;;  %v5344_v12 = vpop.f32.mrb[31].mxu1 }
 0x8fb   : > { %5512 = vst [vmem:[%s8496_s28 + $0xe0] sm:$0xff] %v5342_v9  ;;  %v5345_v14 = vadd.f32 %v8492_v13, %v5344_v12 }
 0x8fc   : > { %5515 = vst [vmem:[%s8496_s28 + $0xf8] sm:$0xff] %v5353_v11 }
 0x8fd   : > { %5513 = vst [vmem:[%s8496_s28 + $0xe8] sm:$0xff] %v5345_v14 }
 0x8ff   : > { %v7095_v15 = vpop.f32.mrb[32].mxu1 }
 0x900   : > { %v5366_v42 = vadd.f32 %v7095_v15, %v8492_v13  ;;  %v5357_v16 = vpop.f32.mrb[33].mxu1 }
 0x901   : > { %v5358_v17 = vadd.f32 %v8492_v13, %v5357_v16  ;;  %v7096_v18 = vpop.f32.mrb[34].mxu1 }
 0x902   : > { %5518 = vst [vmem:[%s8496_s28 + $0x110] sm:$0xff] %v5366_v42  ;;  %v5369_v19 = vadd.f32 %v7096_v18, %v8492_v13  ;;  %v5360_v20 = vpop.f32.mrb[35].mxu1 }
 0x903   : > { %5516 = vst [vmem:[%s8496_s28 + $0x100] sm:$0xff] %v5358_v17  ;;  %v5361_v21 = vadd.f32 %v8492_v13, %v5360_v20 }
 0x904   : > { %5519 = vst [vmem:[%s8496_s28 + $0x118] sm:$0xff] %v5369_v19 }
 0x905   : > { %5517 = vst [vmem:[%s8496_s28 + $0x108] sm:$0xff] %v5361_v21 }
 0x907   : > { %v7099_v22 = vpop.f32.mrb[36].mxu1 }
 0x908   : > { %v5382_v23 = vadd.f32 %v7099_v22, %v8492_v13  ;;  %v5373_v24 = vpop.f32.mrb[37].mxu1 }
 0x909   : > { %v5374_v25 = vadd.f32 %v8492_v13, %v5373_v24  ;;  %v7100_v26 = vpop.f32.mrb[38].mxu1 }
 0x90a   : > { %5522 = vst [vmem:[%s8496_s28 + $0x130] sm:$0xff] %v5382_v23  ;;  %v5385_v27 = vadd.f32 %v7100_v26, %v8492_v13  ;;  %v5376_v28 = vpop.f32.mrb[39].mxu1 }
 0x90b   : > { %5520 = vst [vmem:[%s8496_s28 + $0x120] sm:$0xff] %v5374_v25  ;;  %v5377_v29 = vadd.f32 %v8492_v13, %v5376_v28 }
 0x90c   : > { %5523 = vst [vmem:[%s8496_s28 + $0x138] sm:$0xff] %v5385_v27 }
 0x90d   : > { %5521 = vst [vmem:[%s8496_s28 + $0x128] sm:$0xff] %v5377_v29 }
 0x90f   : > { %v7103_v30 = vpop.f32.mrb[40].mxu1 }
 0x910   : > { %v5398_v31 = vadd.f32 %v7103_v30, %v8492_v13  ;;  %v5389_v32 = vpop.f32.mrb[41].mxu1 }
 0x911   : > { %v5390_v33 = vadd.f32 %v8492_v13, %v5389_v32  ;;  %v7104_v34 = vpop.f32.mrb[42].mxu1 }
 0x912   : > { %5526 = vst [vmem:[%s8496_s28 + $0x150] sm:$0xff] %v5398_v31  ;;  %v5401_v35 = vadd.f32 %v7104_v34, %v8492_v13  ;;  %v5392_v36 = vpop.f32.mrb[43].mxu1 }
 0x913   : > { %5524 = vst [vmem:[%s8496_s28 + $0x140] sm:$0xff] %v5390_v33  ;;  %v5393_v37 = vadd.f32 %v8492_v13, %v5392_v36 }
 0x914   : > { %5527 = vst [vmem:[%s8496_s28 + $0x158] sm:$0xff] %v5401_v35 }
 0x915   : > { %5525 = vst [vmem:[%s8496_s28 + $0x148] sm:$0xff] %v5393_v37 }
 0x917   : > { %v7107_v38 = vpop.f32.mrb[44].mxu1 }
 0x918   : > { %v5414_v39 = vadd.f32 %v7107_v38, %v8492_v13  ;;  %v5405_v40 = vpop.f32.mrb[45].mxu1 }
 0x919   : > { %v5406_v43 = vadd.f32 %v8492_v13, %v5405_v40  ;;  %v7108_v44 = vpop.f32.mrb[46].mxu1 }
 0x91a   : > { %5530 = vst [vmem:[%s8496_s28 + $0x170] sm:$0xff] %v5414_v39  ;;  %v5417_v45 = vadd.f32 %v7108_v44, %v8492_v13  ;;  %v5408_v63 = vpop.f32.mrb[47].mxu1 }
 0x91b   : > { %5528 = vst [vmem:[%s8496_s28 + $0x160] sm:$0xff] %v5406_v43  ;;  %v5409_v46 = vadd.f32 %v8492_v13, %v5408_v63 }
 0x91c   : > { %5531 = vst [vmem:[%s8496_s28 + $0x178] sm:$0xff] %v5417_v45 }
 0x91d   : > { %5529 = vst [vmem:[%s8496_s28 + $0x168] sm:$0xff] %v5409_v46 }
 0x91f   : > { %v7111_v47 = vpop.f32.mrb[48].mxu1 }
 0x920   : > { %v5430_v48 = vadd.f32 %v7111_v47, %v8492_v13  ;;  %v5421_v49 = vpop.f32.mrb[49].mxu1 }
 0x921   : > { %v5422_v50 = vadd.f32 %v8492_v13, %v5421_v49  ;;  %v7112_v51 = vpop.f32.mrb[50].mxu1 }
 0x922   : > { %5534 = vst [vmem:[%s8496_s28 + $0x190] sm:$0xff] %v5430_v48  ;;  %v5433_v52 = vadd.f32 %v7112_v51, %v8492_v13  ;;  %v5424_v53 = vpop.f32.mrb[51].mxu1 }
 0x923   : > { %5532 = vst [vmem:[%s8496_s28 + $0x180] sm:$0xff] %v5422_v50  ;;  %v5425_v54 = vadd.f32 %v8492_v13, %v5424_v53 }
 0x924   : > { %5535 = vst [vmem:[%s8496_s28 + $0x198] sm:$0xff] %v5433_v52 }
 0x925   : > { %5533 = vst [vmem:[%s8496_s28 + $0x188] sm:$0xff] %v5425_v54 }
 0x927   : > { %v7115_v55 = vpop.f32.mrb[52].mxu1 }
 0x928   : > { %v5446_v56 = vadd.f32 %v7115_v55, %v8492_v13  ;;  %v5437_v57 = vpop.f32.mrb[53].mxu1 }
 0x929   : > { %v5438_v58 = vadd.f32 %v8492_v13, %v5437_v57  ;;  %v7116_v59 = vpop.f32.mrb[54].mxu1 }
 0x92a   : > { %5538 = vst [vmem:[%s8496_s28 + $0x1b0] sm:$0xff] %v5446_v56  ;;  %v5449_v60 = vadd.f32 %v7116_v59, %v8492_v13  ;;  %v5440_v61 = vpop.f32.mrb[55].mxu1 }
 0x92b   : > { %5536 = vst [vmem:[%s8496_s28 + $0x1a0] sm:$0xff] %v5438_v58  ;;  %v5441_v62 = vadd.f32 %v8492_v13, %v5440_v61 }
 0x92c   : > { %5539 = vst [vmem:[%s8496_s28 + $0x1b8] sm:$0xff] %v5449_v60 }
 0x92d   : > { %5537 = vst [vmem:[%s8496_s28 + $0x1a8] sm:$0xff] %v5441_v62 }
 0x92f   : > { %v7119_v41 = vpop.f32.mrb[56].mxu1 }
 0x930   : > { %v5462_v0 = vadd.f32 %v7119_v41, %v8492_v13  ;;  %v5453_v1 = vpop.f32.mrb[57].mxu1 }
 0x931   : > { %v5454_v2 = vadd.f32 %v8492_v13, %v5453_v1  ;;  %v7120_v3 = vpop.f32.mrb[58].mxu1 }
 0x932   : > { %5542 = vst [vmem:[%s8496_s28 + $0x1d0] sm:$0xff] %v5462_v0  ;;  %v5465_v4 = vadd.f32 %v7120_v3, %v8492_v13  ;;  %v5456_v5 = vpop.f32.mrb[59].mxu1 }
 0x933   : > { %5540 = vst [vmem:[%s8496_s28 + $0x1c0] sm:$0xff] %v5454_v2  ;;  %v5457_v6 = vadd.f32 %v8492_v13, %v5456_v5 }
 0x934   : > { %5543 = vst [vmem:[%s8496_s28 + $0x1d8] sm:$0xff] %v5465_v4 }
 0x935   : > { %5541 = vst [vmem:[%s8496_s28 + $0x1c8] sm:$0xff] %v5457_v6 }
 0x937   : > { %v7123_v7 = vpop.f32.mrb[60].mxu1 }
 0x938   : > { %v5478_v8 = vadd.f32 %v7123_v7, %v8492_v13  ;;  %v5469_v9 = vpop.f32.mrb[61].mxu1 }
 0x939   : > { %v5470_v10 = vadd.f32 %v8492_v13, %v5469_v9  ;;  %v7124_v11 = vpop.f32.mrb[62].mxu1 }
 0x93a   : > { %5546 = vst [vmem:[%s8496_s28 + $0x1f0] sm:$0xff] %v5478_v8  ;;  %v5481_v12 = vadd.f32 %v7124_v11, %v8492_v13  ;;  %v5472_v14 = vpop.f32.mrb[63].mxu1 }
 0x93b   : > { %5544 = vst [vmem:[%s8496_s28 + $0x1e0] sm:$0xff] %v5470_v10  ;;  %v5473_v15 = vadd.f32 %v8492_v13, %v5472_v14 }
 0x93c   : > { %5547 = vst [vmem:[%s8496_s28 + $0x1f8] sm:$0xff] %v5481_v12 }
 0x93d   : > { %5545 = vst [vmem:[%s8496_s28 + $0x1e8] sm:$0xff] %v5473_v15 }
 0x93e   : > { %7223 = shalt.err (!%p7220_p3)
}
 0x93f   : > { %s7224_s24 = scalar_lea.hbm %s8625_s22, 8192  ;;  %s7228_s29 = scalar_lea.hbm %s8685_s9, 16384 }
 0x940   : > { %p7225_p4 = scmp.ne.s32.totalorder %s8625_s22, %s7224_s24  ;;  %p7229_p9 = scmp.lt.u32.totalorder %s8625_s22, %s8685_s9 }
 0x941   : > { %p7230_p10 = scmp.lt.u32.totalorder %s7228_s29, %s7224_s24  ;;  %p7232_p12 = scmp.lt.u32.totalorder %s7224_s24, %s8625_s22 }
 0x942   : > { %p7226_p7 = pnand %p7225_p4, %p7365_p5 }
 0x943   : > { %p7231_p11 = por %p7230_p10, %p7229_p9 }
 0x944   : > { %p7227_p8 = pneg %p7226_p7 }
 0x945   : > { %p7233_p13 = por %p7232_p12, %p7231_p11 }
 0x947   : > { %p7234_p0 = pnand %p7233_p13, %p7227_p8 }
 0x949   : > { %7237 = shalt.err (!%p7234_p0)
}
 0x94a   : > { %s7275_s16 = smov 128   ;;  %s7276_s23 = smov 8  }
 0x94b   : > { %7125 = dma.vmem_to_hbm [thread:$0]  (%p7365_p5), %s8627_s14, 8192, %s8625_s22, %s8635_s13, %s7275_s16, %s7275_s16, %s7276_s23  }
 0x94c PF: > { %p7131_p1 = scmp.ge.s32.totalorder %s7272_s12, 2  ;;  %s5577_s25 = sand.u32 1, %s7260_s30  }
 0x94d   : > { %s5578_s26 = scalar_lea.sflag [#allocation3], %s5577_s25 }
 0x94e   : > { %p7128_p2 = pnand %p7131_p1, %p7369_p6 }
 0x950   : > { %7255 = dma.done.wait (!%p7128_p2), %s5578_s26, 8192  }
 0x951   : > { %7257 = vsyncadd (!%p7128_p2), %s5578_s26, 4294959104  ;;  %p19_p3 = scmp.ge.s32.totalorder %s7352_s15, 4   ;;  %s8688_s30 = smov %s7264_s10 }
 0x952   : > { %s8689_s10 = smov %s7268_s11  ;;  %s8690_s11 = smov %s7363_s18 }
 0x953   : > { %s8691_s12 = smov %s7352_s15  ;;  %21 = sbr.rel (!%p19_p3) target bundleno = 3 (0x3), region = 103 }
 0x95a   :  { %5583 = vsyncpa [#allocation3], 1 }
 0x95b   :  { %5585 = vsyncpa [#allocation3 + $0x1], 1 }

// kernel: tpu_custom_call.1
= control target key start
LH: loop header
LB: loop body
LE: loop exit
PB: predicated region body
PF: predicated region fallthrough
CT: control target
= control target key end

     0   :  { %14 = vsyncpa [#allocation3], 0  ;;  %s8676_s0 = inlined_call_operand.vmem [shape: f32[1024,64], index: 0, kind: input, shape index: {}]   ;;  %s8677_s1 = inlined_call_operand.vmem [shape: bf16[64,64], index: 1, kind: input, shape index: {}]   ;;  %s8678_s2 = inlined_call_operand.vmem [shape: f32[1,64], index: 2, kind: input, shape index: {}]   ;;  %s8679_s3 = inlined_call_operand.vmem [shape: bf16[7,64,64], index: 3, kind: input, shape index: {}]   ;;  %s8680_s4 = inlined_call_operand.vmem [shape: f32[7,1,64], index: 4, kind: input, shape index: {}]   ;;  %s8681_s5 = inlined_call_operand.vmem [shape: bf16[64,128], index: 5, kind: input, shape index: {}]   ;;  %s8682_s6 = inlined_call_operand.vmem [shape: f32[1,128], index: 6, kind: input, shape index: {}]   ;;  %s8683_s7 = inlined_call_operand.vmem [shape: bf16[128,128], index: 7, kind: input, shape index: {}]   ;;  %s8684_s8 = inlined_call_operand.vmem [shape: f32[1,128], index: 8, kind: input, shape index: {}]   ;;  %s8685_s9 = inlined_call_operand.hbm [shape: f32[1024,128], index: 9, kind: output, shape index: {}]  }
   0x1   :  { %16 = vsyncpa [#allocation3 + $0x1], 0  ;;  %s7327_s30 = smov 0   ;;  %s7329_s10 = smov 0  }
   0x2   :  { %s7331_s11 = smov 0   ;;  %s7333_s12 = smov 0  }
   0x3 LB: > { %s7348_s13 = sadd.s32 4294967295, %s7272_s12   ;;  %s5624_s14 = sadd.s32 4294967294, %s7272_s12   ;;  %s7272_s12 = sphi %s7333_s12, %s8691_s12   ;;  %s7268_s11 = sphi %s7331_s11, %s8690_s11   ;;  %s7264_s10 = sphi %s7329_s10, %s8689_s10   ;;  %s7260_s30 = sphi %s7327_s30, %s8688_s30  }
   0x4   : > { %s7352_s15 = sadd.s32 1, %s7272_s12   ;;  %s223_s16 = sadd.s32 1, %s7268_s11 }
   0x5   : > { %s220_s17 = ssub.s32 %s7272_s12, %s7352_s15  ;;  %p233_p0 = scmp.ne.s32.totalorder %s7268_s11, %s7264_s10 }
   0x6   : > { %p221_p1 = scmp.eq.s32.totalorder %s220_s17, 0  ;;  %p234_p2 = scmp.eq.s32.totalorder %s7348_s13, 1 }
   0x7   : > { %p239_p3 = scmp.ne.s32.totalorder %s7264_s10, %s7260_s30  ;;  %p240_p4 = scmp.eq.s32.totalorder %s5624_s14, 1 }
   0x8   : > { %s7363_s18 = scalar_select %p221_p1, %s7268_s11, %s223_s16  }
   0x9   : > { %p7365_p5 = por %p234_p2, %p233_p0  ;;  %p7369_p6 = por %p240_p4, %p239_p3 }
   0xa   : > { %p5627_p7 = scmp.ge.s32.totalorder %s7272_s12, 1  ;;  %p291_p8 = scmp.lt.s32.totalorder %s7272_s12, 3 }
   0xc   : > { %p292_p9 = pnand %p5627_p7, %p291_p8 }
   0xd   : > { %v7166_v0 = vld [vmem:[%s8677_s1] sm:$0xff] (!%p292_p9)   ;;  %s5629_s23 = sshll.u32 (!%p292_p9), %s7348_s13, 6  ;;  %v7167_v1 = vld [vmem:[%s8677_s1 + $0x8] sm:$0xff] (!%p292_p9)   ;;  %v7168_v2 = vld [vmem:[%s8677_s1 + $0x10] sm:$0xff] (!%p292_p9)   ;;  %vm470_vm0 = vcmask (!%p292_p9), 523264   ;;  %s324_s24 = sand.u32 (!%p292_p9), 1, %s7264_s10  }
   0xe   : > { %295 = sbr.rel (%p292_p9) target bundleno = 2380 (0x94c), region = 56  ;;  %p328_p10 = scmp.lt.s32.totalorder (!%p292_p9), %s5629_s23, 127  ;;  %6397 = vmatprep.subr.bf16.mxu0 (!%p292_p9), %v7166_v0  ;;  %v7169_v5 = vld [vmem:[%s8677_s1 + $0x18] sm:$0xff] (!%p292_p9)   ;;  %v7170_v23 = vld [vmem:[%s8679_s3] sm:$0xff] (!%p292_p9)   ;;  %v7171_v24 = vld [vmem:[%s8679_s3 + $0x8] sm:$0xff] (!%p292_p9)  }
   0xf   : > { %6398 = vmatpush3.bf16.msra.mxu0 (!%p292_p9), %v7166_v0  ;;  %6469 = vmatprep.subr.bf16.mxu1 (!%p292_p9), %v7170_v23  ;;  %s5628_s25 = sshll.u32 (!%p292_p9), %s324_s24, 9  ;;  %s6032_s29 = sshll.u32 (!%p292_p9), %s7348_s13, 13 }
  0x10   : > { %6399 = vmatprep.subr.bf16.mxu0 (!%p292_p9), %v7167_v1  ;;  %6470 = vmatpush3.bf16.msra.mxu1 (!%p292_p9), %v7170_v23  ;;  %s8625_s22 = scalar_lea.hbm (!%p292_p9), %s8685_s9, %s6032_s29  ;;  %s8635_s13 = scalar_lea.sflag (!%p292_p9), [#allocation3], %s324_s24 }
  0x11   : > { %6471 = vmatprep.subr.bf16.mxu1 (!%p292_p9), %v7171_v24 }
  0x13   : > { %6400 = vmatpush3.bf16.msra.mxu0 (!%p292_p9), %v7167_v1 }
  0x14   : > { %6401 = vmatprep.subr.bf16.mxu0 (!%p292_p9), %v7168_v2  ;;  %6472 = vmatpush3.bf16.msra.mxu1 (!%p292_p9), %v7171_v24 }
  0x15   : > { %s8693_s23 = smov (!%p328_p10, %s5629_s23), 127 }
  0x16   : > { %s5630_s28 = sshll.u32 %s8693_s23, 3  ;;  %s7274_s23 = smov [#allocation2]  }
  0x17   : > { %s7388_s16 = scalar_lea.vmem %s8676_s0, %s5630_s28  ;;  %6402 = vmatpush3.bf16.msra.mxu0 %v7168_v2  ;;  %s8496_s28 = scalar_lea.vmem [#allocation2], %s5628_s25 }
  0x18   : > { %v335_v3 = vld [vmem:[%s7388_s16] sm:$0xff]  ;;  %v336_v4 = vld [vmem:[%s7388_s16 + $0x8] sm:$0xff]  ;;  %v337_v7 = vld [vmem:[%s7388_s16 + $0x10] sm:$0xff]  ;;  %6403 = vmatprep.subr.bf16.mxu0 %v7169_v5  ;;  %s5562_s14 = sshll.u32 %s8496_s28, 4  ;;  %s7214_s25 = sshll.u32 %s7274_s23, 4  ;;  %s8627_s14 = int_to_ptr.vmem [resolvable:$true] %s5562_s14  ;;  %s7215_s25 = int_to_ptr.vmem [resolvable:$false] %s7214_s25 }
  0x19   : > { %v408_v6 = vpack.c.bf16 %v336_v4, %v335_v3  ;;  %v338_v8 = vld [vmem:[%s7388_s16 + $0x18] sm:$0xff]  ;;  %v339_v9 = vld [vmem:[%s7388_s16 + $0x20] sm:$0xff]  ;;  %v340_v10 = vld [vmem:[%s7388_s16 + $0x28] sm:$0xff]  ;;  %s7216_s26 = scalar_lea.vmem %s7215_s25, 16384  ;;  %p7217_p0 = scmp.lt.s32.totalorder %s8627_s14, %s7215_s25 }
  0x1a   : > { %v409_v11 = vpack.c.bf16 %v338_v8, %v337_v7  ;;  %v410_v12 = vpack.c.bf16 %v340_v10, %v339_v9  ;;  %v341_v13 = vld [vmem:[%s7388_s16 + $0x30] sm:$0xff]  ;;  %v342_v14 = vld [vmem:[%s7388_s16 + $0x38] sm:$0xff]  ;;  %v343_v15 = vld [vmem:[%s7388_s16 + $0x40] sm:$0xff] }
  0x1b   : > { %6405 = vmatprep.mubr.msk.bf16.mxu0 %vm470_vm0, %v408_v6  ;;  %6404 = vmatpush3.bf16.msra.mxu0 %v7169_v5  ;;  %v344_v16 = vld [vmem:[%s7388_s16 + $0x48] sm:$0xff]  ;;  %v411_v17 = vpack.c.bf16 %v342_v14, %v341_v13  ;;  %v345_v19 = vld [vmem:[%s7388_s16 + $0x50] sm:$0xff]  ;;  %v346_v20 = vld [vmem:[%s7388_s16 + $0x58] sm:$0xff] }
  0x1c   : > { %v412_v18 = vpack.c.bf16 %v344_v16, %v343_v15  ;;  %v347_v21 = vld [vmem:[%s7388_s16 + $0x60] sm:$0xff]  ;;  %v348_v22 = vld [vmem:[%s7388_s16 + $0x68] sm:$0xff]  ;;  %v413_v25 = vpack.c.bf16 %v346_v20, %v345_v19  ;;  %v349_v27 = vld [vmem:[%s7388_s16 + $0x70] sm:$0xff] }
  0x1d   : > { %v414_v26 = vpack.c.bf16 %v348_v22, %v347_v21  ;;  %v350_v28 = vld [vmem:[%s7388_s16 + $0x78] sm:$0xff]  ;;  %v351_v29 = vld [vmem:[%s7388_s16 + $0x80] sm:$0xff]  ;;  %v352_v30 = vld [vmem:[%s7388_s16 + $0x88] sm:$0xff] }
  0x1e   : > { %6406 = vmatmul.mubr.msk.bf16.vlgmr.msra.gmra.mrb[0].mxu0 %vm470_vm0, %v409_v11  ;;  %v415_v31 = vpack.c.bf16 %v350_v28, %v349_v27  ;;  %v416_v32 = vpack.c.bf16 %v352_v30, %v351_v29  ;;  %v353_v33 = vld [vmem:[%s7388_s16 + $0x90] sm:$0xff]  ;;  %v354_v34 = vld [vmem:[%s7388_s16 + $0x98] sm:$0xff]  ;;  %v355_v35 = vld [vmem:[%s7388_s16 + $0xa0] sm:$0xff] }
  0x1f   : > { %6409 = vmatprep.mubr.msk.bf16.mxu0 %vm470_vm0, %v410_v12  ;;  %v356_v36 = vld [vmem:[%s7388_s16 + $0xa8] sm:$0xff]  ;;  %v417_v37 = vpack.c.bf16 %v354_v34, %v353_v33  ;;  %v357_v39 = vld [vmem:[%s7388_s16 + $0xb0] sm:$0xff]  ;;  %v358_v40 = vld [vmem:[%s7388_s16 + $0xb8] sm:$0xff] }
  0x20   : > { %v418_v38 = vpack.c.bf16 %v356_v36, %v355_v35  ;;  %v359_v41 = vld [vmem:[%s7388_s16 + $0xc0] sm:$0xff]  ;;  %v360_v42 = vld [vmem:[%s7388_s16 + $0xc8] sm:$0xff]  ;;  %v419_v43 = vpack.c.bf16 %v358_v40, %v357_v39  ;;  %v361_v45 = vld [vmem:[%s7388_s16 + $0xd0] sm:$0xff] }
  0x21   : > { %v420_v44 = vpack.c.bf16 %v360_v42, %v359_v41  ;;  %v362_v46 = vld [vmem:[%s7388_s16 + $0xd8] sm:$0xff]  ;;  %v363_v47 = vld [vmem:[%s7388_s16 + $0xe0] sm:$0xff]  ;;  %v364_v48 = vld [vmem:[%s7388_s16 + $0xe8] sm:$0xff] }
  0x22   : > { %v421_v49 = vpack.c.bf16 %v362_v46, %v361_v45  ;;  %v422_v50 = vpack.c.bf16 %v364_v48, %v363_v47  ;;  %v365_v51 = vld [vmem:[%s7388_s16 + $0xf0] sm:$0xff]  ;;  %v366_v52 = vld [vmem:[%s7388_s16 + $0xf8] sm:$0xff]  ;;  %v367_v53 = vld [vmem:[%s7388_s16 + $0x100] sm:$0xff] }
  0x23   : > { %v368_v54 = vld [vmem:[%s7388_s16 + $0x108] sm:$0xff]  ;;  %v423_v55 = vpack.c.bf16 %v366_v52, %v365_v51  ;;  %v369_v57 = vld [vmem:[%s7388_s16 + $0x110] sm:$0xff]  ;;  %v370_v58 = vld [vmem:[%s7388_s16 + $0x118] sm:$0xff] }
  0x24   : > { %v424_v56 = vpack.c.bf16 %v368_v54, %v367_v53  ;;  %v371_v59 = vld [vmem:[%s7388_s16 + $0x120] sm:$0xff]  ;;  %v372_v60 = vld [vmem:[%s7388_s16 + $0x128] sm:$0xff]  ;;  %v425_v61 = vpack.c.bf16 %v370_v58, %v369_v57  ;;  %v373_v63 = vld [vmem:[%s7388_s16 + $0x130] sm:$0xff] }
  0x25   : > { %v426_v62 = vpack.c.bf16 %v372_v60, %v371_v59  ;;  %v374_v0 = vld [vmem:[%s7388_s16 + $0x138] sm:$0xff]  ;;  %v375_v1 = vld [vmem:[%s7388_s16 + $0x140] sm:$0xff]  ;;  %v376_v2 = vld [vmem:[%s7388_s16 + $0x148] sm:$0xff] }
  0x26   : > { %6410 = vmatmul.mubr.msk.bf16.gmra.mrb[4].mxu0 %vm470_vm0, %v411_v17  ;;  %v427_v3 = vpack.c.bf16 %v374_v0, %v373_v63  ;;  %v428_v4 = vpack.c.bf16 %v376_v2, %v375_v1  ;;  %v377_v5 = vld [vmem:[%s7388_s16 + $0x150] sm:$0xff]  ;;  %v378_v6 = vld [vmem:[%s7388_s16 + $0x158] sm:$0xff]  ;;  %v379_v7 = vld [vmem:[%s7388_s16 + $0x160] sm:$0xff] }
  0x27   : > { %6413 = vmatprep.mubr.msk.bf16.mxu0 %vm470_vm0, %v412_v18  ;;  %v380_v8 = vld [vmem:[%s7388_s16 + $0x168] sm:$0xff]  ;;  %v429_v9 = vpack.c.bf16 %v378_v6, %v377_v5  ;;  %v381_v11 = vld [vmem:[%s7388_s16 + $0x170] sm:$0xff]  ;;  %v382_v12 = vld [vmem:[%s7388_s16 + $0x178] sm:$0xff] }
  0x28   : > { %v430_v10 = vpack.c.bf16 %v380_v8, %v379_v7  ;;  %v383_v13 = vld [vmem:[%s7388_s16 + $0x180] sm:$0xff]  ;;  %v384_v14 = vld [vmem:[%s7388_s16 + $0x188] sm:$0xff]  ;;  %v431_v15 = vpack.c.bf16 %v382_v12, %v381_v11  ;;  %v7172_v16 = vld [vmem:[%s8679_s3 + $0x10] sm:$0xff]  }
  0x29   : > { %v432_v17 = vpack.c.bf16 %v384_v14, %v383_v13  ;;  %6473 = vmatprep.subr.bf16.mxu1 %v7172_v16  ;;  %v7173_v18 = vld [vmem:[%s8679_s3 + $0x18] sm:$0xff]   ;;  %v385_v19 = vld [vmem:[%s7388_s16 + $0x190] sm:$0xff]  ;;  %v387_v21 = vld [vmem:[%s7388_s16 + $0x1a0] sm:$0xff] }
  0x2a   : > { %6474 = vmatpush3.bf16.msra.mxu1 %v7172_v16  ;;  %v386_v20 = vld [vmem:[%s7388_s16 + $0x198] sm:$0xff]  ;;  %v388_v22 = vld [vmem:[%s7388_s16 + $0x1a8] sm:$0xff]  ;;  %v391_v27 = vld [vmem:[%s7388_s16 + $0x1c0] sm:$0xff] }
  0x2b   : > { %6475 = vmatprep.subr.bf16.mxu1 %v7173_v18  ;;  %v433_v23 = vpack.c.bf16 %v386_v20, %v385_v19  ;;  %v434_v24 = vpack.c.bf16 %v388_v22, %v387_v21  ;;  %v392_v28 = vld [vmem:[%s7388_s16 + $0x1c8] sm:$0xff]  ;;  %v395_v33 = vld [vmem:[%s7388_s16 + $0x1e0] sm:$0xff]  ;;  %v7177_v57 = vld [vmem:[%s8679_s3 + $0x38] sm:$0xff]  }
  0x2c   : > { %v436_v30 = vpack.c.bf16 %v392_v28, %v391_v27  ;;  %v396_v34 = vld [vmem:[%s7388_s16 + $0x1e8] sm:$0xff]  ;;  %v7174_v40 = vld [vmem:[%s8679_s3 + $0x20] sm:$0xff]  }
  0x2d   : > { %v438_v36 = vpack.c.bf16 %v396_v34, %v395_v33  ;;  %6541 = vmatprep.subr.bf16.mxu0 %v7174_v40  ;;  %v7507_v41 = vld [vmem:[%s8678_s2] ss:$0 sm:$0xff] }
  0x2e   : > { %6414 = vmatmul.mubr.msk.bf16.gmra.mrb[8].mxu0 %vm470_vm0, %v413_v25  ;;  %6476 = vmatpush3.bf16.msra.mxu1 %v7173_v18  ;;  %v389_v25 = vld [vmem:[%s7388_s16 + $0x1b0] sm:$0xff] }
  0x2f   : > { %6417 = vmatprep.mubr.msk.bf16.mxu0 %vm470_vm0, %v414_v26  ;;  %v390_v26 = vld [vmem:[%s7388_s16 + $0x1b8] sm:$0xff]  ;;  %6542 = vmatpush3.bf16.msra.mxu0 %v7174_v40 }
  0x30   : > { %v435_v29 = vpack.c.bf16 %v390_v26, %v389_v25 }
  0x36   : > { %6418 = vmatmul.mubr.msk.bf16.gmra.mrb[12].mxu0 %vm470_vm0, %v415_v31  ;;  %v393_v31 = vld [vmem:[%s7388_s16 + $0x1d0] sm:$0xff] }
  0x37   : > { %6421 = vmatprep.mubr.msk.bf16.mxu0 %vm470_vm0, %v416_v32  ;;  %v394_v32 = vld [vmem:[%s7388_s16 + $0x1d8] sm:$0xff] }
  0x38   : > { %v437_v35 = vpack.c.bf16 %v394_v32, %v393_v31 }
  0x3e   : > { %6422 = vmatmul.mubr.msk.bf16.gmra.mrb[16].mxu0 %vm470_vm0, %v417_v37  ;;  %v397_v37 = vld [vmem:[%s7388_s16 + $0x1f0] sm:$0xff] }
  0x3f   : > { %6425 = vmatprep.mubr.msk.bf16.mxu0 %vm470_vm0, %v418_v38  ;;  %v398_v38 = vld [vmem:[%s7388_s16 + $0x1f8] sm:$0xff]  ;;  %s7210_s16 = scalar_lea.vmem %s8627_s14, 8192 }
  0x40   : > { %v439_v39 = vpack.c.bf16 %v398_v38, %v397_v37  ;;  %p7211_p11 = scmp.ne.s32.totalorder %s8627_s14, %s7210_s16  ;;  %p7218_p1 = scmp.lt.s32.totalorder %s7216_s26, %s7210_s16 }
  0x42   : > { %p7212_p12 = pnand %p7211_p11, %p7365_p5  ;;  %p7219_p2 = por %p7218_p1, %p7217_p0 }
  0x44   : > { %p7213_p13 = pneg %p7212_p12 }
  0x46   : > { %6426 = vmatmul.mubr.msk.bf16.gmra.mrb[20].mxu0 %vm470_vm0, %v419_v43  ;;  %p7220_p3 = pnand %p7219_p2, %p7213_p13 }
  0x47   : > { %6429 = vmatprep.mubr.msk.bf16.mxu0 %vm470_vm0, %v420_v44 }
  0x4e   : > { %6430 = vmatmul.mubr.msk.bf16.gmra.mrb[24].mxu0 %vm470_vm0, %v421_v49  ;;  %v7175_v49 = vld [vmem:[%s8679_s3 + $0x28] sm:$0xff]  }
  0x4f   : > { %6433 = vmatprep.mubr.msk.bf16.mxu0 %vm470_vm0, %v422_v50  ;;  %v7176_v50 = vld [vmem:[%s8679_s3 + $0x30] sm:$0xff]   ;;  %6543 = vmatprep.subr.bf16.mxu0 %v7175_v49 }
  0x50   : > { %6544 = vmatpush3.bf16.msra.mxu0 %v7175_v49 }
  0x51   : > { %6545 = vmatprep.subr.bf16.mxu0 %v7176_v50 }
  0x54   : > { %6546 = vmatpush3.bf16.msra.mxu0 %v7176_v50 }
  0x55   : > { %6547 = vmatprep.subr.bf16.mxu0 %v7177_v57 }
  0x56   : > { %6434 = vmatmul.mubr.msk.bf16.gmra.mrb[28].mxu0 %vm470_vm0, %v423_v55 }
  0x57   : > { %6437 = vmatprep.mubr.msk.bf16.mxu0 %vm470_vm0, %v424_v56 }
  0x58   : > { %6548 = vmatpush3.bf16.msra.mxu0 %v7177_v57 }
  0x5e   : > { %6438 = vmatmul.mubr.msk.bf16.gmra.mrb[32].mxu0 %vm470_vm0, %v425_v61 }
  0x5f   : > { %6441 = vmatprep.mubr.msk.bf16.mxu0 %vm470_vm0, %v426_v62 }
  0x66   : > { %6442 = vmatmul.mubr.msk.bf16.gmra.mrb[36].mxu0 %vm470_vm0, %v427_v3 }
  0x67   : > { %6445 = vmatprep.mubr.msk.bf16.mxu0 %vm470_vm0, %v428_v4 }
  0x6e   : > { %6446 = vmatmul.mubr.msk.bf16.gmra.mrb[40].mxu0 %vm470_vm0, %v429_v9 }
  0x6f   : > { %6449 = vmatprep.mubr.msk.bf16.mxu0 %vm470_vm0, %v430_v10 }
  0x76   : > { %6450 = vmatmul.mubr.msk.bf16.gmra.mrb[44].mxu0 %vm470_vm0, %v431_v15 }
  0x77   : > { %6453 = vmatprep.mubr.msk.bf16.mxu0 %vm470_vm0, %v432_v17 }
  0x7e   : > { %6454 = vmatmul.mubr.msk.bf16.gmra.mrb[48].mxu0 %vm470_vm0, %v433_v23 }
  0x7f   : > { %6457 = vmatprep.mubr.msk.bf16.mxu0 %vm470_vm0, %v434_v24 }
  0x86   : > { %6458 = vmatmul.mubr.msk.bf16.gmra.mrb[52].mxu0 %vm470_vm0, %v435_v29 }
  0x87   : > { %6461 = vmatprep.mubr.msk.bf16.mxu0 %vm470_vm0, %v436_v30 }
  0x8e   : > { %6462 = vmatmul.mubr.msk.bf16.gmra.mrb[56].mxu0 %vm470_vm0, %v437_v35 }
  0x8f   : > { %6465 = vmatprep.mubr.msk.bf16.mxu0 %vm470_vm0, %v438_v36 }
  0x96   : > { %6466 = vmatmul.mubr.msk.bf16.gmra.mrb[60].mxu0 %vm470_vm0, %v439_v39 }
  0xf1   : > { %v6407_v42 = vpop.f32.mrb[0].mxu0 }
  0xf2   : > { %v610_v43 = vadd.f32 %v6407_v42, %v7507_v41  ;;  %v601_v44 = vpop.f32.mrb[1].mxu0 }
  0xf3   : > { %v602_v45 = vadd.f32 %v7507_v41, %v601_v44  ;;  %v6408_v46 = vpop.f32.mrb[2].mxu0 }
  0xf4   : > { %v613_v47 = vadd.f32 %v6408_v46, %v7507_v41  ;;  %v604_v48 = vpop.f32.mrb[3].mxu0  ;;  %v858_v52 = vmax.f32 %v610_v43, 0.0 }
  0xf5   : > { %v605_v51 = vadd.f32 %v7507_v41, %v604_v48  ;;  %v856_v54 = vmax.f32 %v602_v45, 0.0 }
  0xf6   : > { %v859_v53 = vmax.f32 %v613_v47, 0.0 }
  0xf7   : > { %v857_v55 = vmax.f32 %v605_v51, 0.0 }
  0xf8   : > { %v930_v56 = vpack.c.bf16 %v859_v53, %v858_v52 }
  0xf9   : > { %v6411_v58 = vpop.f32.mrb[4].mxu0  ;;  %v929_v59 = vpack.c.bf16 %v857_v55, %v856_v54 }
  0xfa   : > { %v626_v60 = vadd.f32 %v6411_v58, %v7507_v41  ;;  %v617_v61 = vpop.f32.mrb[5].mxu0 }
  0xfb   : > { %v618_v62 = vadd.f32 %v7507_v41, %v617_v61  ;;  %v6412_v63 = vpop.f32.mrb[6].mxu0  ;;  %6477 = vmatprep.mubr.msk.bf16.mxu1 %vm470_vm0, %v929_v59 }
  0xfc   : > { %v629_v0 = vadd.f32 %v6412_v63, %v7507_v41  ;;  %v620_v1 = vpop.f32.mrb[7].mxu0  ;;  %6478 = vmatmul.mubr.msk.bf16.vlgmr.msra.gmra.mrb[0].mxu1 %vm470_vm0, %v930_v56  ;;  %v862_v3 = vmax.f32 %v626_v60, 0.0 }
  0xfd   : > { %v621_v2 = vadd.f32 %v7507_v41, %v620_v1  ;;  %v860_v5 = vmax.f32 %v618_v62, 0.0 }
  0xfe   : > { %v863_v4 = vmax.f32 %v629_v0, 0.0 }
  0xff   : > { %v861_v6 = vmax.f32 %v621_v2, 0.0 }
 0x100   : > { %v932_v7 = vpack.c.bf16 %v863_v4, %v862_v3 }
 0x101   : > { %v931_v8 = vpack.c.bf16 %v861_v6, %v860_v5  ;;  %v6415_v9 = vpop.f32.mrb[8].mxu0 }
 0x102   : > { %v642_v10 = vadd.f32 %v6415_v9, %v7507_v41  ;;  %v633_v11 = vpop.f32.mrb[9].mxu0 }
 0x103   : > { %v634_v12 = vadd.f32 %v7507_v41, %v633_v11  ;;  %v6416_v13 = vpop.f32.mrb[10].mxu0  ;;  %6481 = vmatprep.mubr.msk.bf16.mxu1 %vm470_vm0, %v931_v8 }
 0x104   : > { %v645_v14 = vadd.f32 %v6416_v13, %v7507_v41  ;;  %v636_v15 = vpop.f32.mrb[11].mxu0  ;;  %6482 = vmatmul.mubr.msk.bf16.gmra.mrb[4].mxu1 %vm470_vm0, %v932_v7  ;;  %v866_v17 = vmax.f32 %v642_v10, 0.0 }
 0x105   : > { %v637_v16 = vadd.f32 %v7507_v41, %v636_v15  ;;  %v864_v19 = vmax.f32 %v634_v12, 0.0 }
 0x106   : > { %v867_v18 = vmax.f32 %v645_v14, 0.0 }
 0x107   : > { %v865_v20 = vmax.f32 %v637_v16, 0.0 }
 0x108   : > { %v934_v21 = vpack.c.bf16 %v867_v18, %v866_v17 }
 0x109   : > { %v933_v22 = vpack.c.bf16 %v865_v20, %v864_v19  ;;  %v6419_v23 = vpop.f32.mrb[12].mxu0 }
 0x10a   : > { %v658_v24 = vadd.f32 %v6419_v23, %v7507_v41  ;;  %v649_v25 = vpop.f32.mrb[13].mxu0 }
 0x10b   : > { %v650_v26 = vadd.f32 %v7507_v41, %v649_v25  ;;  %v6420_v27 = vpop.f32.mrb[14].mxu0  ;;  %6485 = vmatprep.mubr.msk.bf16.mxu1 %vm470_vm0, %v933_v22 }
 0x10c   : > { %v661_v28 = vadd.f32 %v6420_v27, %v7507_v41  ;;  %v652_v29 = vpop.f32.mrb[15].mxu0  ;;  %6486 = vmatmul.mubr.msk.bf16.gmra.mrb[8].mxu1 %vm470_vm0, %v934_v21  ;;  %v870_v31 = vmax.f32 %v658_v24, 0.0 }
 0x10d   : > { %v653_v30 = vadd.f32 %v7507_v41, %v652_v29  ;;  %v868_v33 = vmax.f32 %v650_v26, 0.0 }
 0x10e   : > { %v871_v32 = vmax.f32 %v661_v28, 0.0 }
 0x10f   : > { %v869_v34 = vmax.f32 %v653_v30, 0.0 }
 0x110   : > { %v936_v35 = vpack.c.bf16 %v871_v32, %v870_v31 }
 0x111   : > { %v935_v36 = vpack.c.bf16 %v869_v34, %v868_v33  ;;  %v6423_v37 = vpop.f32.mrb[16].mxu0 }
 0x112   : > { %v674_v38 = vadd.f32 %v6423_v37, %v7507_v41  ;;  %v665_v39 = vpop.f32.mrb[17].mxu0 }
 0x113   : > { %v666_v40 = vadd.f32 %v7507_v41, %v665_v39  ;;  %v6424_v42 = vpop.f32.mrb[18].mxu0  ;;  %6489 = vmatprep.mubr.msk.bf16.mxu1 %vm470_vm0, %v935_v36 }
 0x114   : > { %v677_v43 = vadd.f32 %v6424_v42, %v7507_v41  ;;  %v668_v44 = vpop.f32.mrb[19].mxu0  ;;  %6490 = vmatmul.mubr.msk.bf16.gmra.mrb[12].mxu1 %vm470_vm0, %v936_v35  ;;  %v874_v46 = vmax.f32 %v674_v38, 0.0 }
 0x115   : > { %v669_v45 = vadd.f32 %v7507_v41, %v668_v44  ;;  %v872_v48 = vmax.f32 %v666_v40, 0.0 }
 0x116   : > { %v875_v47 = vmax.f32 %v677_v43, 0.0 }
 0x117   : > { %v873_v49 = vmax.f32 %v669_v45, 0.0 }
 0x118   : > { %v938_v50 = vpack.c.bf16 %v875_v47, %v874_v46 }
 0x119   : > { %v937_v51 = vpack.c.bf16 %v873_v49, %v872_v48  ;;  %v6427_v52 = vpop.f32.mrb[20].mxu0 }
 0x11a   : > { %v690_v53 = vadd.f32 %v6427_v52, %v7507_v41  ;;  %v681_v54 = vpop.f32.mrb[21].mxu0 }
 0x11b   : > { %v682_v55 = vadd.f32 %v7507_v41, %v681_v54  ;;  %v6428_v56 = vpop.f32.mrb[22].mxu0  ;;  %6493 = vmatprep.mubr.msk.bf16.mxu1 %vm470_vm0, %v937_v51 }
 0x11c   : > { %v693_v57 = vadd.f32 %v6428_v56, %v7507_v41  ;;  %v684_v58 = vpop.f32.mrb[23].mxu0  ;;  %6494 = vmatmul.mubr.msk.bf16.gmra.mrb[16].mxu1 %vm470_vm0, %v938_v50  ;;  %v878_v60 = vmax.f32 %v690_v53, 0.0 }
 0x11d   : > { %v685_v59 = vadd.f32 %v7507_v41, %v684_v58  ;;  %v876_v62 = vmax.f32 %v682_v55, 0.0 }
 0x11e   : > { %v879_v61 = vmax.f32 %v693_v57, 0.0 }
 0x11f   : > { %v877_v63 = vmax.f32 %v685_v59, 0.0 }
 0x120   : > { %v940_v0 = vpack.c.bf16 %v879_v61, %v878_v60 }
 0x121   : > { %v939_v1 = vpack.c.bf16 %v877_v63, %v876_v62  ;;  %v6431_v2 = vpop.f32.mrb[24].mxu0 }
 0x122   : > { %v706_v3 = vadd.f32 %v6431_v2, %v7507_v41  ;;  %v697_v4 = vpop.f32.mrb[25].mxu0 }
 0x123   : > { %v698_v5 = vadd.f32 %v7507_v41, %v697_v4  ;;  %v6432_v6 = vpop.f32.mrb[26].mxu0  ;;  %6497 = vmatprep.mubr.msk.bf16.mxu1 %vm470_vm0, %v939_v1 }
 0x124   : > { %v709_v7 = vadd.f32 %v6432_v6, %v7507_v41  ;;  %v700_v8 = vpop.f32.mrb[27].mxu0  ;;  %6498 = vmatmul.mubr.msk.bf16.gmra.mrb[20].mxu1 %vm470_vm0, %v940_v0  ;;  %v882_v10 = vmax.f32 %v706_v3, 0.0 }
 0x125   : > { %v701_v9 = vadd.f32 %v7507_v41, %v700_v8  ;;  %v880_v12 = vmax.f32 %v698_v5, 0.0 }
 0x126   : > { %v883_v11 = vmax.f32 %v709_v7, 0.0 }
 0x127   : > { %v881_v13 = vmax.f32 %v701_v9, 0.0 }
 0x128   : > { %v942_v14 = vpack.c.bf16 %v883_v11, %v882_v10 }
 0x129   : > { %v941_v15 = vpack.c.bf16 %v881_v13, %v880_v12  ;;  %v6435_v16 = vpop.f32.mrb[28].mxu0 }
 0x12a   : > { %v722_v17 = vadd.f32 %v6435_v16, %v7507_v41  ;;  %v713_v18 = vpop.f32.mrb[29].mxu0 }
 0x12b   : > { %v714_v19 = vadd.f32 %v7507_v41, %v713_v18  ;;  %v6436_v20 = vpop.f32.mrb[30].mxu0  ;;  %6501 = vmatprep.mubr.msk.bf16.mxu1 %vm470_vm0, %v941_v15 }
 0x12c   : > { %v725_v21 = vadd.f32 %v6436_v20, %v7507_v41  ;;  %v716_v22 = vpop.f32.mrb[31].mxu0  ;;  %6502 = vmatmul.mubr.msk.bf16.gmra.mrb[24].mxu1 %vm470_vm0, %v942_v14  ;;  %v886_v24 = vmax.f32 %v722_v17, 0.0 }
 0x12d   : > { %v717_v23 = vadd.f32 %v7507_v41, %v716_v22  ;;  %v884_v26 = vmax.f32 %v714_v19, 0.0 }
 0x12e   : > { %v887_v25 = vmax.f32 %v725_v21, 0.0 }
 0x12f   : > { %v885_v27 = vmax.f32 %v717_v23, 0.0 }
 0x130   : > { %v944_v28 = vpack.c.bf16 %v887_v25, %v886_v24 }
 0x131   : > { %v943_v29 = vpack.c.bf16 %v885_v27, %v884_v26  ;;  %v6439_v30 = vpop.f32.mrb[32].mxu0 }
 0x132   : > { %v738_v31 = vadd.f32 %v6439_v30, %v7507_v41  ;;  %v729_v32 = vpop.f32.mrb[33].mxu0 }
 0x133   : > { %v730_v33 = vadd.f32 %v7507_v41, %v729_v32  ;;  %v6440_v34 = vpop.f32.mrb[34].mxu0  ;;  %6505 = vmatprep.mubr.msk.bf16.mxu1 %vm470_vm0, %v943_v29 }
 0x134   : > { %v741_v35 = vadd.f32 %v6440_v34, %v7507_v41  ;;  %v732_v36 = vpop.f32.mrb[35].mxu0  ;;  %6506 = vmatmul.mubr.msk.bf16.gmra.mrb[28].mxu1 %vm470_vm0, %v944_v28  ;;  %v890_v38 = vmax.f32 %v738_v31, 0.0 }
 0x135   : > { %v733_v37 = vadd.f32 %v7507_v41, %v732_v36  ;;  %v888_v40 = vmax.f32 %v730_v33, 0.0 }
 0x136   : > { %v891_v39 = vmax.f32 %v741_v35, 0.0 }
 0x137   : > { %v889_v42 = vmax.f32 %v733_v37, 0.0 }
 0x138   : > { %v946_v43 = vpack.c.bf16 %v891_v39, %v890_v38 }
 0x139   : > { %v945_v44 = vpack.c.bf16 %v889_v42, %v888_v40  ;;  %v6443_v45 = vpop.f32.mrb[36].mxu0 }
 0x13a   : > { %v754_v46 = vadd.f32 %v6443_v45, %v7507_v41  ;;  %v745_v47 = vpop.f32.mrb[37].mxu0 }
 0x13b   : > { %v746_v48 = vadd.f32 %v7507_v41, %v745_v47  ;;  %v6444_v49 = vpop.f32.mrb[38].mxu0  ;;  %6509 = vmatprep.mubr.msk.bf16.mxu1 %vm470_vm0, %v945_v44 }
 0x13c   : > { %v757_v50 = vadd.f32 %v6444_v49, %v7507_v41  ;;  %v748_v51 = vpop.f32.mrb[39].mxu0  ;;  %6510 = vmatmul.mubr.msk.bf16.gmra.mrb[32].mxu1 %vm470_vm0, %v946_v43  ;;  %v894_v53 = vmax.f32 %v754_v46, 0.0 }
 0x13d   : > { %v749_v52 = vadd.f32 %v7507_v41, %v748_v51  ;;  %v892_v55 = vmax.f32 %v746_v48, 0.0 }
 0x13e   : > { %v895_v54 = vmax.f32 %v757_v50, 0.0 }
 0x13f   : > { %v893_v56 = vmax.f32 %v749_v52, 0.0 }
 0x140   : > { %v948_v57 = vpack.c.bf16 %v895_v54, %v894_v53 }
 0x141   : > { %v947_v58 = vpack.c.bf16 %v893_v56, %v892_v55  ;;  %v6447_v59 = vpop.f32.mrb[40].mxu0 }
 0x142   : > { %v770_v60 = vadd.f32 %v6447_v59, %v7507_v41  ;;  %v761_v61 = vpop.f32.mrb[41].mxu0 }
 0x143   : > { %v762_v62 = vadd.f32 %v7507_v41, %v761_v61  ;;  %v6448_v63 = vpop.f32.mrb[42].mxu0  ;;  %6513 = vmatprep.mubr.msk.bf16.mxu1 %vm470_vm0, %v947_v58 }
 0x144   : > { %v773_v0 = vadd.f32 %v6448_v63, %v7507_v41  ;;  %v764_v1 = vpop.f32.mrb[43].mxu0  ;;  %6514 = vmatmul.mubr.msk.bf16.gmra.mrb[36].mxu1 %vm470_vm0, %v948_v57  ;;  %v898_v3 = vmax.f32 %v770_v60, 0.0 }
 0x145   : > { %v765_v2 = vadd.f32 %v7507_v41, %v764_v1  ;;  %v896_v5 = vmax.f32 %v762_v62, 0.0 }
 0x146   : > { %v899_v4 = vmax.f32 %v773_v0, 0.0 }
 0x147   : > { %v897_v6 = vmax.f32 %v765_v2, 0.0 }
 0x148   : > { %v950_v7 = vpack.c.bf16 %v899_v4, %v898_v3 }
 0x149   : > { %v949_v8 = vpack.c.bf16 %v897_v6, %v896_v5  ;;  %v6451_v9 = vpop.f32.mrb[44].mxu0 }
 0x14a   : > { %v786_v10 = vadd.f32 %v6451_v9, %v7507_v41  ;;  %v777_v11 = vpop.f32.mrb[45].mxu0 }
 0x14b   : > { %v778_v12 = vadd.f32 %v7507_v41, %v777_v11  ;;  %v6452_v13 = vpop.f32.mrb[46].mxu0  ;;  %6517 = vmatprep.mubr.msk.bf16.mxu1 %vm470_vm0, %v949_v8 }
 0x14c   : > { %v789_v14 = vadd.f32 %v6452_v13, %v7507_v41  ;;  %v780_v15 = vpop.f32.mrb[47].mxu0  ;;  %6518 = vmatmul.mubr.msk.bf16.gmra.mrb[40].mxu1 %vm470_vm0, %v950_v7  ;;  %v902_v17 = vmax.f32 %v786_v10, 0.0 }
 0x14d   : > { %v781_v16 = vadd.f32 %v7507_v41, %v780_v15  ;;  %v900_v19 = vmax.f32 %v778_v12, 0.0 }
 0x14e   : > { %v903_v18 = vmax.f32 %v789_v14, 0.0 }
 0x14f   : > { %v901_v20 = vmax.f32 %v781_v16, 0.0  ;;  %v7178_v16 = vld [vmem:[%s8679_s3 + $0x40] sm:$0xff]  }
 0x150   : > { %v952_v21 = vpack.c.bf16 %v903_v18, %v902_v17  ;;  %6613 = vmatprep.subr.bf16.mxu1 %v7178_v16 }
 0x151   : > { %v951_v22 = vpack.c.bf16 %v901_v20, %v900_v19  ;;  %v6455_v23 = vpop.f32.mrb[48].mxu0  ;;  %6614 = vmatpush3.bf16.msra.mxu1 %v7178_v16 }
 0x152   : > { %v802_v24 = vadd.f32 %v6455_v23, %v7507_v41  ;;  %v793_v25 = vpop.f32.mrb[49].mxu0 }
 0x153   : > { %v794_v26 = vadd.f32 %v7507_v41, %v793_v25  ;;  %v6456_v27 = vpop.f32.mrb[50].mxu0  ;;  %6521 = vmatprep.mubr.msk.bf16.mxu1 %vm470_vm0, %v951_v22  ;;  %v7180_v25 = vld [vmem:[%s8679_s3 + $0x50] sm:$0xff]  }
 0x154   : > { %v805_v28 = vadd.f32 %v6456_v27, %v7507_v41  ;;  %v796_v29 = vpop.f32.mrb[51].mxu0  ;;  %6522 = vmatmul.mubr.msk.bf16.gmra.mrb[44].mxu1 %vm470_vm0, %v952_v21  ;;  %v906_v31 = vmax.f32 %v802_v24, 0.0  ;;  %v7179_v24 = vld [vmem:[%s8679_s3 + $0x48] sm:$0xff]  }
 0x155   : > { %v797_v30 = vadd.f32 %v7507_v41, %v796_v29  ;;  %v904_v33 = vmax.f32 %v794_v26, 0.0  ;;  %6615 = vmatprep.subr.bf16.mxu1 %v7179_v24 }
 0x156   : > { %v907_v32 = vmax.f32 %v805_v28, 0.0  ;;  %6616 = vmatpush3.bf16.msra.mxu1 %v7179_v24 }
 0x157   : > { %v905_v34 = vmax.f32 %v797_v30, 0.0  ;;  %6617 = vmatprep.subr.bf16.mxu1 %v7180_v25 }
 0x158   : > { %v954_v35 = vpack.c.bf16 %v907_v32, %v906_v31  ;;  %v7181_v32 = vld [vmem:[%s8679_s3 + $0x58] sm:$0xff]  }
 0x159   : > { %v953_v36 = vpack.c.bf16 %v905_v34, %v904_v33  ;;  %v6459_v37 = vpop.f32.mrb[52].mxu0 }
 0x15a   : > { %v818_v38 = vadd.f32 %v6459_v37, %v7507_v41  ;;  %v809_v39 = vpop.f32.mrb[53].mxu0  ;;  %6618 = vmatpush3.bf16.msra.mxu1 %v7180_v25 }
 0x15b   : > { %v810_v40 = vadd.f32 %v7507_v41, %v809_v39  ;;  %v6460_v42 = vpop.f32.mrb[54].mxu0  ;;  %6525 = vmatprep.mubr.msk.bf16.mxu1 %vm470_vm0, %v953_v36  ;;  %6619 = vmatprep.subr.bf16.mxu1 %v7181_v32 }
 0x15c   : > { %v821_v43 = vadd.f32 %v6460_v42, %v7507_v41  ;;  %v812_v44 = vpop.f32.mrb[55].mxu0  ;;  %6526 = vmatmul.mubr.msk.bf16.gmra.mrb[48].mxu1 %vm470_vm0, %v954_v35  ;;  %v910_v46 = vmax.f32 %v818_v38, 0.0 }
 0x15d   : > { %v813_v45 = vadd.f32 %v7507_v41, %v812_v44  ;;  %v908_v48 = vmax.f32 %v810_v40, 0.0 }
 0x15e   : > { %v911_v47 = vmax.f32 %v821_v43, 0.0  ;;  %6620 = vmatpush3.bf16.msra.mxu1 %v7181_v32 }
 0x15f   : > { %v909_v49 = vmax.f32 %v813_v45, 0.0 }
 0x160   : > { %v956_v50 = vpack.c.bf16 %v911_v47, %v910_v46 }
 0x161   : > { %v955_v51 = vpack.c.bf16 %v909_v49, %v908_v48  ;;  %v6463_v52 = vpop.f32.mrb[56].mxu0 }
 0x162   : > { %v834_v53 = vadd.f32 %v6463_v52, %v7507_v41  ;;  %v825_v54 = vpop.f32.mrb[57].mxu0 }
 0x163   : > { %v826_v55 = vadd.f32 %v7507_v41, %v825_v54  ;;  %v6464_v56 = vpop.f32.mrb[58].mxu0  ;;  %6529 = vmatprep.mubr.msk.bf16.mxu1 %vm470_vm0, %v955_v51 }
 0x164   : > { %v837_v57 = vadd.f32 %v6464_v56, %v7507_v41  ;;  %v828_v58 = vpop.f32.mrb[59].mxu0  ;;  %6530 = vmatmul.mubr.msk.bf16.gmra.mrb[52].mxu1 %vm470_vm0, %v956_v50  ;;  %v914_v60 = vmax.f32 %v834_v53, 0.0 }
 0x165   : > { %v829_v59 = vadd.f32 %v7507_v41, %v828_v58  ;;  %v912_v62 = vmax.f32 %v826_v55, 0.0 }
 0x166   : > { %v915_v61 = vmax.f32 %v837_v57, 0.0 }
 0x167   : > { %v913_v63 = vmax.f32 %v829_v59, 0.0 }
 0x168   : > { %v958_v0 = vpack.c.bf16 %v915_v61, %v914_v60 }
 0x169   : > { %v957_v1 = vpack.c.bf16 %v913_v63, %v912_v62  ;;  %v6467_v2 = vpop.f32.mrb[60].mxu0 }
 0x16a   : > { %v850_v3 = vadd.f32 %v6467_v2, %v7507_v41  ;;  %v841_v4 = vpop.f32.mrb[61].mxu0 }
 0x16b   : > { %v842_v5 = vadd.f32 %v7507_v41, %v841_v4  ;;  %v6468_v6 = vpop.f32.mrb[62].mxu0  ;;  %6533 = vmatprep.mubr.msk.bf16.mxu1 %vm470_vm0, %v957_v1 }
 0x16c   : > { %v853_v7 = vadd.f32 %v6468_v6, %v7507_v41  ;;  %v844_v8 = vpop.f32.mrb[63].mxu0  ;;  %6534 = vmatmul.mubr.msk.bf16.gmra.mrb[56].mxu1 %vm470_vm0, %v958_v0  ;;  %v918_v10 = vmax.f32 %v850_v3, 0.0 }
 0x16d   : > { %v845_v9 = vadd.f32 %v7507_v41, %v844_v8  ;;  %v916_v12 = vmax.f32 %v842_v5, 0.0  ;;  %v7620_v41 = vld [vmem:[%s8680_s4] ss:$0 sm:$0xff] }
 0x16e   : > { %v919_v11 = vmax.f32 %v853_v7, 0.0 }
 0x16f   : > { %v917_v13 = vmax.f32 %v845_v9, 0.0 }
 0x170   : > { %v960_v14 = vpack.c.bf16 %v919_v11, %v918_v10 }
 0x171   : > { %v959_v15 = vpack.c.bf16 %v917_v13, %v916_v12 }
 0x173   : > { %6537 = vmatprep.mubr.msk.bf16.mxu1 %vm470_vm0, %v959_v15 }
 0x174   : > { %6538 = vmatmul.mubr.msk.bf16.gmra.mrb[60].mxu1 %vm470_vm0, %v960_v14 }
 0x1cf   : > { %v6479_v17 = vpop.f32.mrb[0].mxu1 }
 0x1d0   : > { %v1130_v18 = vadd.f32 %v6479_v17, %v7620_v41  ;;  %v1121_v19 = vpop.f32.mrb[1].mxu1 }
 0x1d1   : > { %v1122_v20 = vadd.f32 %v7620_v41, %v1121_v19  ;;  %v6480_v21 = vpop.f32.mrb[2].mxu1 }
 0x1d2   : > { %v1133_v22 = vadd.f32 %v6480_v21, %v7620_v41  ;;  %v1124_v23 = vpop.f32.mrb[3].mxu1  ;;  %v1378_v27 = vmax.f32 %v1130_v18, 0.0 }
 0x1d3   : > { %v1125_v26 = vadd.f32 %v7620_v41, %v1124_v23  ;;  %v1376_v29 = vmax.f32 %v1122_v20, 0.0 }
 0x1d4   : > { %v1379_v28 = vmax.f32 %v1133_v22, 0.0 }
 0x1d5   : > { %v1377_v30 = vmax.f32 %v1125_v26, 0.0 }
 0x1d6   : > { %v1452_v31 = vpack.c.bf16 %v1379_v28, %v1378_v27 }
 0x1d7   : > { %v1451_v33 = vpack.c.bf16 %v1377_v30, %v1376_v29  ;;  %v6483_v34 = vpop.f32.mrb[4].mxu1 }
 0x1d8   : > { %v1146_v35 = vadd.f32 %v6483_v34, %v7620_v41  ;;  %v1137_v36 = vpop.f32.mrb[5].mxu1 }
 0x1d9   : > { %v1138_v37 = vadd.f32 %v7620_v41, %v1137_v36  ;;  %v6484_v38 = vpop.f32.mrb[6].mxu1  ;;  %6549 = vmatprep.mubr.msk.bf16.mxu0 %vm470_vm0, %v1451_v33 }
 0x1da   : > { %v1149_v39 = vadd.f32 %v6484_v38, %v7620_v41  ;;  %v1140_v40 = vpop.f32.mrb[7].mxu1  ;;  %6550 = vmatmul.mubr.msk.bf16.vlgmr.msra.gmra.mrb[64].mxu0 %vm470_vm0, %v1452_v31  ;;  %v1382_v43 = vmax.f32 %v1146_v35, 0.0 }
 0x1db   : > { %v1141_v42 = vadd.f32 %v7620_v41, %v1140_v40  ;;  %v1380_v45 = vmax.f32 %v1138_v37, 0.0 }
 0x1dc   : > { %v1383_v44 = vmax.f32 %v1149_v39, 0.0 }
 0x1dd   : > { %v1381_v46 = vmax.f32 %v1141_v42, 0.0 }
 0x1de   : > { %v1454_v47 = vpack.c.bf16 %v1383_v44, %v1382_v43 }
 0x1df   : > { %v1453_v48 = vpack.c.bf16 %v1381_v46, %v1380_v45  ;;  %v6487_v49 = vpop.f32.mrb[8].mxu1 }
 0x1e0   : > { %v1162_v50 = vadd.f32 %v6487_v49, %v7620_v41  ;;  %v1153_v51 = vpop.f32.mrb[9].mxu1 }
 0x1e1   : > { %v1154_v52 = vadd.f32 %v7620_v41, %v1153_v51  ;;  %v6488_v53 = vpop.f32.mrb[10].mxu1  ;;  %6553 = vmatprep.mubr.msk.bf16.mxu0 %vm470_vm0, %v1453_v48 }
 0x1e2   : > { %v1165_v54 = vadd.f32 %v6488_v53, %v7620_v41  ;;  %v1156_v55 = vpop.f32.mrb[11].mxu1  ;;  %6554 = vmatmul.mubr.msk.bf16.gmra.mrb[68].mxu0 %vm470_vm0, %v1454_v47  ;;  %v1386_v57 = vmax.f32 %v1162_v50, 0.0 }
 0x1e3   : > { %v1157_v56 = vadd.f32 %v7620_v41, %v1156_v55  ;;  %v1384_v59 = vmax.f32 %v1154_v52, 0.0 }
 0x1e4   : > { %v1387_v58 = vmax.f32 %v1165_v54, 0.0 }
 0x1e5   : > { %v1385_v60 = vmax.f32 %v1157_v56, 0.0 }
 0x1e6   : > { %v1456_v61 = vpack.c.bf16 %v1387_v58, %v1386_v57 }
 0x1e7   : > { %v1455_v62 = vpack.c.bf16 %v1385_v60, %v1384_v59  ;;  %v6491_v63 = vpop.f32.mrb[12].mxu1 }
 0x1e8   : > { %v1178_v0 = vadd.f32 %v6491_v63, %v7620_v41  ;;  %v1169_v1 = vpop.f32.mrb[13].mxu1 }
 0x1e9   : > { %v1170_v2 = vadd.f32 %v7620_v41, %v1169_v1  ;;  %v6492_v3 = vpop.f32.mrb[14].mxu1  ;;  %6557 = vmatprep.mubr.msk.bf16.mxu0 %vm470_vm0, %v1455_v62 }
 0x1ea   : > { %v1181_v4 = vadd.f32 %v6492_v3, %v7620_v41  ;;  %v1172_v5 = vpop.f32.mrb[15].mxu1  ;;  %6558 = vmatmul.mubr.msk.bf16.gmra.mrb[72].mxu0 %vm470_vm0, %v1456_v61  ;;  %v1390_v7 = vmax.f32 %v1178_v0, 0.0 }
 0x1eb   : > { %v1173_v6 = vadd.f32 %v7620_v41, %v1172_v5  ;;  %v1388_v9 = vmax.f32 %v1170_v2, 0.0 }
 0x1ec   : > { %v1391_v8 = vmax.f32 %v1181_v4, 0.0 }
 0x1ed   : > { %v1389_v10 = vmax.f32 %v1173_v6, 0.0 }
 0x1ee   : > { %v1458_v11 = vpack.c.bf16 %v1391_v8, %v1390_v7 }
 0x1ef   : > { %v1457_v12 = vpack.c.bf16 %v1389_v10, %v1388_v9  ;;  %v6495_v13 = vpop.f32.mrb[16].mxu1 }
 0x1f0   : > { %v1194_v14 = vadd.f32 %v6495_v13, %v7620_v41  ;;  %v1185_v15 = vpop.f32.mrb[17].mxu1 }
 0x1f1   : > { %v1186_v16 = vadd.f32 %v7620_v41, %v1185_v15  ;;  %v6496_v17 = vpop.f32.mrb[18].mxu1  ;;  %6561 = vmatprep.mubr.msk.bf16.mxu0 %vm470_vm0, %v1457_v12 }
 0x1f2   : > { %v1197_v18 = vadd.f32 %v6496_v17, %v7620_v41  ;;  %v1188_v19 = vpop.f32.mrb[19].mxu1  ;;  %6562 = vmatmul.mubr.msk.bf16.gmra.mrb[76].mxu0 %vm470_vm0, %v1458_v11  ;;  %v1394_v21 = vmax.f32 %v1194_v14, 0.0 }
 0x1f3   : > { %v1189_v20 = vadd.f32 %v7620_v41, %v1188_v19  ;;  %v1392_v23 = vmax.f32 %v1186_v16, 0.0 }
 0x1f4   : > { %v1395_v22 = vmax.f32 %v1197_v18, 0.0 }
 0x1f5   : > { %v1393_v24 = vmax.f32 %v1189_v20, 0.0 }
 0x1f6   : > { %v1460_v25 = vpack.c.bf16 %v1395_v22, %v1394_v21 }
 0x1f7   : > { %v1459_v26 = vpack.c.bf16 %v1393_v24, %v1392_v23  ;;  %v6499_v27 = vpop.f32.mrb[20].mxu1 }
 0x1f8   : > { %v1210_v28 = vadd.f32 %v6499_v27, %v7620_v41  ;;  %v1201_v29 = vpop.f32.mrb[21].mxu1 }
 0x1f9   : > { %v1202_v30 = vadd.f32 %v7620_v41, %v1201_v29  ;;  %v6500_v31 = vpop.f32.mrb[22].mxu1  ;;  %6565 = vmatprep.mubr.msk.bf16.mxu0 %vm470_vm0, %v1459_v26 }
 0x1fa   : > { %v1213_v32 = vadd.f32 %v6500_v31, %v7620_v41  ;;  %v1204_v33 = vpop.f32.mrb[23].mxu1  ;;  %6566 = vmatmul.mubr.msk.bf16.gmra.mrb[80].mxu0 %vm470_vm0, %v1460_v25  ;;  %v1398_v35 = vmax.f32 %v1210_v28, 0.0 }
 0x1fb   : > { %v1205_v34 = vadd.f32 %v7620_v41, %v1204_v33  ;;  %v1396_v37 = vmax.f32 %v1202_v30, 0.0 }
 0x1fc   : > { %v1399_v36 = vmax.f32 %v1213_v32, 0.0 }
 0x1fd   : > { %v1397_v38 = vmax.f32 %v1205_v34, 0.0 }
 0x1fe   : > { %v1462_v39 = vpack.c.bf16 %v1399_v36, %v1398_v35 }
 0x1ff   : > { %v1461_v40 = vpack.c.bf16 %v1397_v38, %v1396_v37  ;;  %v6503_v42 = vpop.f32.mrb[24].mxu1 }
 0x200   : > { %v1226_v43 = vadd.f32 %v6503_v42, %v7620_v41  ;;  %v1217_v44 = vpop.f32.mrb[25].mxu1 }
 0x201   : > { %v1218_v45 = vadd.f32 %v7620_v41, %v1217_v44  ;;  %v6504_v46 = vpop.f32.mrb[26].mxu1  ;;  %6569 = vmatprep.mubr.msk.bf16.mxu0 %vm470_vm0, %v1461_v40 }
 0x202   : > { %v1229_v47 = vadd.f32 %v6504_v46, %v7620_v41  ;;  %v1220_v48 = vpop.f32.mrb[27].mxu1  ;;  %6570 = vmatmul.mubr.msk.bf16.gmra.mrb[84].mxu0 %vm470_vm0, %v1462_v39  ;;  %v1402_v50 = vmax.f32 %v1226_v43, 0.0 }
 0x203   : > { %v1221_v49 = vadd.f32 %v7620_v41, %v1220_v48  ;;  %v1400_v52 = vmax.f32 %v1218_v45, 0.0 }
 0x204   : > { %v1403_v51 = vmax.f32 %v1229_v47, 0.0 }
 0x205   : > { %v1401_v53 = vmax.f32 %v1221_v49, 0.0 }
 0x206   : > { %v1464_v54 = vpack.c.bf16 %v1403_v51, %v1402_v50 }
 0x207   : > { %v1463_v55 = vpack.c.bf16 %v1401_v53, %v1400_v52  ;;  %v6507_v56 = vpop.f32.mrb[28].mxu1 }
 0x208   : > { %v1242_v57 = vadd.f32 %v6507_v56, %v7620_v41  ;;  %v1233_v58 = vpop.f32.mrb[29].mxu1 }
 0x209   : > { %v1234_v59 = vadd.f32 %v7620_v41, %v1233_v58  ;;  %v6508_v60 = vpop.f32.mrb[30].mxu1  ;;  %6573 = vmatprep.mubr.msk.bf16.mxu0 %vm470_vm0, %v1463_v55 }
 0x20a   : > { %v1245_v61 = vadd.f32 %v6508_v60, %v7620_v41  ;;  %v1236_v62 = vpop.f32.mrb[31].mxu1  ;;  %6574 = vmatmul.mubr.msk.bf16.gmra.mrb[88].mxu0 %vm470_vm0, %v1464_v54  ;;  %v1406_v0 = vmax.f32 %v1242_v57, 0.0 }
 0x20b   : > { %v1237_v63 = vadd.f32 %v7620_v41, %v1236_v62  ;;  %v1404_v2 = vmax.f32 %v1234_v59, 0.0 }
 0x20c   : > { %v1407_v1 = vmax.f32 %v1245_v61, 0.0 }
 0x20d   : > { %v1405_v3 = vmax.f32 %v1237_v63, 0.0 }
 0x20e   : > { %v1466_v4 = vpack.c.bf16 %v1407_v1, %v1406_v0 }
 0x20f   : > { %v1465_v5 = vpack.c.bf16 %v1405_v3, %v1404_v2  ;;  %v6511_v6 = vpop.f32.mrb[32].mxu1 }
 0x210   : > { %v1258_v7 = vadd.f32 %v6511_v6, %v7620_v41  ;;  %v1249_v8 = vpop.f32.mrb[33].mxu1 }
 0x211   : > { %v1250_v9 = vadd.f32 %v7620_v41, %v1249_v8  ;;  %v6512_v10 = vpop.f32.mrb[34].mxu1  ;;  %6577 = vmatprep.mubr.msk.bf16.mxu0 %vm470_vm0, %v1465_v5 }
 0x212   : > { %v1261_v11 = vadd.f32 %v6512_v10, %v7620_v41  ;;  %v1252_v12 = vpop.f32.mrb[35].mxu1  ;;  %6578 = vmatmul.mubr.msk.bf16.gmra.mrb[92].mxu0 %vm470_vm0, %v1466_v4  ;;  %v1410_v14 = vmax.f32 %v1258_v7, 0.0 }
 0x213   : > { %v1253_v13 = vadd.f32 %v7620_v41, %v1252_v12  ;;  %v1408_v16 = vmax.f32 %v1250_v9, 0.0 }
 0x214   : > { %v1411_v15 = vmax.f32 %v1261_v11, 0.0 }
 0x215   : > { %v1409_v17 = vmax.f32 %v1253_v13, 0.0 }
 0x216   : > { %v1468_v18 = vpack.c.bf16 %v1411_v15, %v1410_v14 }
 0x217   : > { %v1467_v19 = vpack.c.bf16 %v1409_v17, %v1408_v16  ;;  %v6515_v20 = vpop.f32.mrb[36].mxu1 }
 0x218   : > { %v1274_v21 = vadd.f32 %v6515_v20, %v7620_v41  ;;  %v1265_v22 = vpop.f32.mrb[37].mxu1 }
 0x219   : > { %v1266_v23 = vadd.f32 %v7620_v41, %v1265_v22  ;;  %v6516_v24 = vpop.f32.mrb[38].mxu1  ;;  %6581 = vmatprep.mubr.msk.bf16.mxu0 %vm470_vm0, %v1467_v19 }
 0x21a   : > { %v1277_v25 = vadd.f32 %v6516_v24, %v7620_v41  ;;  %v1268_v26 = vpop.f32.mrb[39].mxu1  ;;  %6582 = vmatmul.mubr.msk.bf16.gmra.mrb[96].mxu0 %vm470_vm0, %v1468_v18  ;;  %v1414_v28 = vmax.f32 %v1274_v21, 0.0 }
 0x21b   : > { %v1269_v27 = vadd.f32 %v7620_v41, %v1268_v26  ;;  %v1412_v30 = vmax.f32 %v1266_v23, 0.0 }
 0x21c   : > { %v1415_v29 = vmax.f32 %v1277_v25, 0.0 }
 0x21d   : > { %v1413_v31 = vmax.f32 %v1269_v27, 0.0 }
 0x21e   : > { %v1470_v32 = vpack.c.bf16 %v1415_v29, %v1414_v28 }
 0x21f   : > { %v1469_v33 = vpack.c.bf16 %v1413_v31, %v1412_v30  ;;  %v6519_v34 = vpop.f32.mrb[40].mxu1 }
 0x220   : > { %v1290_v35 = vadd.f32 %v6519_v34, %v7620_v41  ;;  %v1281_v36 = vpop.f32.mrb[41].mxu1 }
 0x221   : > { %v1282_v37 = vadd.f32 %v7620_v41, %v1281_v36  ;;  %v6520_v38 = vpop.f32.mrb[42].mxu1  ;;  %6585 = vmatprep.mubr.msk.bf16.mxu0 %vm470_vm0, %v1469_v33 }
 0x222   : > { %v1293_v39 = vadd.f32 %v6520_v38, %v7620_v41  ;;  %v1284_v40 = vpop.f32.mrb[43].mxu1  ;;  %6586 = vmatmul.mubr.msk.bf16.gmra.mrb[100].mxu0 %vm470_vm0, %v1470_v32  ;;  %v1418_v43 = vmax.f32 %v1290_v35, 0.0 }
 0x223   : > { %v1285_v42 = vadd.f32 %v7620_v41, %v1284_v40  ;;  %v1416_v45 = vmax.f32 %v1282_v37, 0.0 }
 0x224   : > { %v1419_v44 = vmax.f32 %v1293_v39, 0.0 }
 0x225   : > { %v1417_v46 = vmax.f32 %v1285_v42, 0.0 }
 0x226   : > { %v1472_v47 = vpack.c.bf16 %v1419_v44, %v1418_v43 }
 0x227   : > { %v1471_v48 = vpack.c.bf16 %v1417_v46, %v1416_v45  ;;  %v6523_v49 = vpop.f32.mrb[44].mxu1 }
 0x228   : > { %v1306_v50 = vadd.f32 %v6523_v49, %v7620_v41  ;;  %v1297_v51 = vpop.f32.mrb[45].mxu1 }
 0x229   : > { %v1298_v52 = vadd.f32 %v7620_v41, %v1297_v51  ;;  %v6524_v53 = vpop.f32.mrb[46].mxu1  ;;  %6589 = vmatprep.mubr.msk.bf16.mxu0 %vm470_vm0, %v1471_v48 }
 0x22a   : > { %v1309_v54 = vadd.f32 %v6524_v53, %v7620_v41  ;;  %v1300_v55 = vpop.f32.mrb[47].mxu1  ;;  %6590 = vmatmul.mubr.msk.bf16.gmra.mrb[104].mxu0 %vm470_vm0, %v1472_v47  ;;  %v1422_v57 = vmax.f32 %v1306_v50, 0.0 }
 0x22b   : > { %v1301_v56 = vadd.f32 %v7620_v41, %v1300_v55  ;;  %v1420_v59 = vmax.f32 %v1298_v52, 0.0 }
 0x22c   : > { %v1423_v58 = vmax.f32 %v1309_v54, 0.0 }
 0x22d   : > { %v1421_v60 = vmax.f32 %v1301_v56, 0.0  ;;  %v7182_v56 = vld [vmem:[%s8679_s3 + $0x60] sm:$0xff]  }
 0x22e   : > { %v1474_v61 = vpack.c.bf16 %v1423_v58, %v1422_v57  ;;  %6685 = vmatprep.subr.bf16.mxu0 %v7182_v56 }
 0x22f   : > { %v1473_v62 = vpack.c.bf16 %v1421_v60, %v1420_v59  ;;  %v6527_v63 = vpop.f32.mrb[48].mxu1  ;;  %6686 = vmatpush3.bf16.msra.mxu0 %v7182_v56 }
 0x230   : > { %v1322_v0 = vadd.f32 %v6527_v63, %v7620_v41  ;;  %v1313_v1 = vpop.f32.mrb[49].mxu1 }
 0x231   : > { %v1314_v2 = vadd.f32 %v7620_v41, %v1313_v1  ;;  %v6528_v3 = vpop.f32.mrb[50].mxu1  ;;  %6593 = vmatprep.mubr.msk.bf16.mxu0 %vm470_vm0, %v1473_v62  ;;  %v7184_v1 = vld [vmem:[%s8679_s3 + $0x70] sm:$0xff]  }
 0x232   : > { %v1325_v4 = vadd.f32 %v6528_v3, %v7620_v41  ;;  %v1316_v5 = vpop.f32.mrb[51].mxu1  ;;  %6594 = vmatmul.mubr.msk.bf16.gmra.mrb[108].mxu0 %vm470_vm0, %v1474_v61  ;;  %v1426_v7 = vmax.f32 %v1322_v0, 0.0  ;;  %v7183_v0 = vld [vmem:[%s8679_s3 + $0x68] sm:$0xff]  }
 0x233   : > { %v1317_v6 = vadd.f32 %v7620_v41, %v1316_v5  ;;  %v1424_v9 = vmax.f32 %v1314_v2, 0.0  ;;  %6687 = vmatprep.subr.bf16.mxu0 %v7183_v0 }
 0x234   : > { %v1427_v8 = vmax.f32 %v1325_v4, 0.0  ;;  %6688 = vmatpush3.bf16.msra.mxu0 %v7183_v0 }
 0x235   : > { %v1425_v10 = vmax.f32 %v1317_v6, 0.0  ;;  %6689 = vmatprep.subr.bf16.mxu0 %v7184_v1 }
 0x236   : > { %v1476_v11 = vpack.c.bf16 %v1427_v8, %v1426_v7  ;;  %v7185_v8 = vld [vmem:[%s8679_s3 + $0x78] sm:$0xff]  }
 0x237   : > { %v1475_v12 = vpack.c.bf16 %v1425_v10, %v1424_v9  ;;  %v6531_v13 = vpop.f32.mrb[52].mxu1 }
 0x238   : > { %v1338_v14 = vadd.f32 %v6531_v13, %v7620_v41  ;;  %v1329_v15 = vpop.f32.mrb[53].mxu1  ;;  %6690 = vmatpush3.bf16.msra.mxu0 %v7184_v1 }
 0x239   : > { %v1330_v16 = vadd.f32 %v7620_v41, %v1329_v15  ;;  %v6532_v17 = vpop.f32.mrb[54].mxu1  ;;  %6597 = vmatprep.mubr.msk.bf16.mxu0 %vm470_vm0, %v1475_v12  ;;  %6691 = vmatprep.subr.bf16.mxu0 %v7185_v8 }
 0x23a   : > { %v1341_v18 = vadd.f32 %v6532_v17, %v7620_v41  ;;  %v1332_v19 = vpop.f32.mrb[55].mxu1  ;;  %6598 = vmatmul.mubr.msk.bf16.gmra.mrb[112].mxu0 %vm470_vm0, %v1476_v11  ;;  %v1430_v21 = vmax.f32 %v1338_v14, 0.0 }
 0x23b   : > { %v1333_v20 = vadd.f32 %v7620_v41, %v1332_v19  ;;  %v1428_v23 = vmax.f32 %v1330_v16, 0.0 }
 0x23c   : > { %v1431_v22 = vmax.f32 %v1341_v18, 0.0  ;;  %6692 = vmatpush3.bf16.msra.mxu0 %v7185_v8 }
 0x23d   : > { %v1429_v24 = vmax.f32 %v1333_v20, 0.0 }
 0x23e   : > { %v1478_v25 = vpack.c.bf16 %v1431_v22, %v1430_v21 }
 0x23f   : > { %v1477_v26 = vpack.c.bf16 %v1429_v24, %v1428_v23  ;;  %v6535_v27 = vpop.f32.mrb[56].mxu1 }
 0x240   : > { %v1354_v28 = vadd.f32 %v6535_v27, %v7620_v41  ;;  %v1345_v29 = vpop.f32.mrb[57].mxu1 }
 0x241   : > { %v1346_v30 = vadd.f32 %v7620_v41, %v1345_v29  ;;  %v6536_v31 = vpop.f32.mrb[58].mxu1  ;;  %6601 = vmatprep.mubr.msk.bf16.mxu0 %vm470_vm0, %v1477_v26 }
 0x242   : > { %v1357_v32 = vadd.f32 %v6536_v31, %v7620_v41  ;;  %v1348_v33 = vpop.f32.mrb[59].mxu1  ;;  %6602 = vmatmul.mubr.msk.bf16.gmra.mrb[116].mxu0 %vm470_vm0, %v1478_v25  ;;  %v1434_v35 = vmax.f32 %v1354_v28, 0.0 }
 0x243   : > { %v1349_v34 = vadd.f32 %v7620_v41, %v1348_v33  ;;  %v1432_v37 = vmax.f32 %v1346_v30, 0.0 }
 0x244   : > { %v1435_v36 = vmax.f32 %v1357_v32, 0.0 }
 0x245   : > { %v1433_v38 = vmax.f32 %v1349_v34, 0.0 }
 0x246   : > { %v1480_v39 = vpack.c.bf16 %v1435_v36, %v1434_v35 }
 0x247   : > { %v1479_v40 = vpack.c.bf16 %v1433_v38, %v1432_v37  ;;  %v6539_v42 = vpop.f32.mrb[60].mxu1 }
 0x248   : > { %v1370_v43 = vadd.f32 %v6539_v42, %v7620_v41  ;;  %v1361_v44 = vpop.f32.mrb[61].mxu1 }
 0x249   : > { %v1362_v45 = vadd.f32 %v7620_v41, %v1361_v44  ;;  %v6540_v46 = vpop.f32.mrb[62].mxu1  ;;  %6605 = vmatprep.mubr.msk.bf16.mxu0 %vm470_vm0, %v1479_v40 }
 0x24a   : > { %v1373_v47 = vadd.f32 %v6540_v46, %v7620_v41  ;;  %v1364_v48 = vpop.f32.mrb[63].mxu1  ;;  %6606 = vmatmul.mubr.msk.bf16.gmra.mrb[120].mxu0 %vm470_vm0, %v1480_v39  ;;  %v1438_v50 = vmax.f32 %v1370_v43, 0.0 }
 0x24b   : > { %v1365_v49 = vadd.f32 %v7620_v41, %v1364_v48  ;;  %v1436_v52 = vmax.f32 %v1362_v45, 0.0  ;;  %v7733_v41 = vld [vmem:[%s8680_s4 + $0x1] ss:$0 sm:$0xff] }
 0x24c   : > { %v1439_v51 = vmax.f32 %v1373_v47, 0.0 }
 0x24d   : > { %v1437_v53 = vmax.f32 %v1365_v49, 0.0 }
 0x24e   : > { %v1482_v54 = vpack.c.bf16 %v1439_v51, %v1438_v50 }
 0x24f   : > { %v1481_v55 = vpack.c.bf16 %v1437_v53, %v1436_v52 }
 0x251   : > { %6609 = vmatprep.mubr.msk.bf16.mxu0 %vm470_vm0, %v1481_v55 }
 0x252   : > { %6610 = vmatmul.mubr.msk.bf16.gmra.mrb[124].mxu0 %vm470_vm0, %v1482_v54 }
 0x2ad   : > { %v6551_v57 = vpop.f32.mrb[64].mxu0 }
 0x2ae   : > { %v1652_v58 = vadd.f32 %v6551_v57, %v7733_v41  ;;  %v1643_v59 = vpop.f32.mrb[65].mxu0 }
 0x2af   : > { %v1644_v60 = vadd.f32 %v7733_v41, %v1643_v59  ;;  %v6552_v61 = vpop.f32.mrb[66].mxu0 }
 0x2b0   : > { %v1655_v62 = vadd.f32 %v6552_v61, %v7733_v41  ;;  %v1646_v63 = vpop.f32.mrb[67].mxu0  ;;  %v1900_v3 = vmax.f32 %v1652_v58, 0.0 }
 0x2b1   : > { %v1647_v2 = vadd.f32 %v7733_v41, %v1646_v63  ;;  %v1898_v5 = vmax.f32 %v1644_v60, 0.0 }
 0x2b2   : > { %v1901_v4 = vmax.f32 %v1655_v62, 0.0 }
 0x2b3   : > { %v1899_v6 = vmax.f32 %v1647_v2, 0.0 }
 0x2b4   : > { %v1974_v7 = vpack.c.bf16 %v1901_v4, %v1900_v3 }
 0x2b5   : > { %v1973_v9 = vpack.c.bf16 %v1899_v6, %v1898_v5  ;;  %v6555_v10 = vpop.f32.mrb[68].mxu0 }
 0x2b6   : > { %v1668_v11 = vadd.f32 %v6555_v10, %v7733_v41  ;;  %v1659_v12 = vpop.f32.mrb[69].mxu0 }
 0x2b7   : > { %v1660_v13 = vadd.f32 %v7733_v41, %v1659_v12  ;;  %v6556_v14 = vpop.f32.mrb[70].mxu0  ;;  %6621 = vmatprep.mubr.msk.bf16.mxu1 %vm470_vm0, %v1973_v9 }
 0x2b8   : > { %v1671_v15 = vadd.f32 %v6556_v14, %v7733_v41  ;;  %v1662_v16 = vpop.f32.mrb[71].mxu0  ;;  %6622 = vmatmul.mubr.msk.bf16.vlgmr.msra.gmra.mrb[64].mxu1 %vm470_vm0, %v1974_v7  ;;  %v1904_v18 = vmax.f32 %v1668_v11, 0.0 }
 0x2b9   : > { %v1663_v17 = vadd.f32 %v7733_v41, %v1662_v16  ;;  %v1902_v20 = vmax.f32 %v1660_v13, 0.0 }
 0x2ba   : > { %v1905_v19 = vmax.f32 %v1671_v15, 0.0 }
 0x2bb   : > { %v1903_v21 = vmax.f32 %v1663_v17, 0.0 }
 0x2bc   : > { %v1976_v22 = vpack.c.bf16 %v1905_v19, %v1904_v18 }
 0x2bd   : > { %v1975_v23 = vpack.c.bf16 %v1903_v21, %v1902_v20  ;;  %v6559_v24 = vpop.f32.mrb[72].mxu0 }
 0x2be   : > { %v1684_v25 = vadd.f32 %v6559_v24, %v7733_v41  ;;  %v1675_v26 = vpop.f32.mrb[73].mxu0 }
 0x2bf   : > { %v1676_v27 = vadd.f32 %v7733_v41, %v1675_v26  ;;  %v6560_v28 = vpop.f32.mrb[74].mxu0  ;;  %6625 = vmatprep.mubr.msk.bf16.mxu1 %vm470_vm0, %v1975_v23 }
 0x2c0   : > { %v1687_v29 = vadd.f32 %v6560_v28, %v7733_v41  ;;  %v1678_v30 = vpop.f32.mrb[75].mxu0  ;;  %6626 = vmatmul.mubr.msk.bf16.gmra.mrb[68].mxu1 %vm470_vm0, %v1976_v22  ;;  %v1908_v32 = vmax.f32 %v1684_v25, 0.0 }
 0x2c1   : > { %v1679_v31 = vadd.f32 %v7733_v41, %v1678_v30  ;;  %v1906_v34 = vmax.f32 %v1676_v27, 0.0 }
 0x2c2   : > { %v1909_v33 = vmax.f32 %v1687_v29, 0.0 }
 0x2c3   : > { %v1907_v35 = vmax.f32 %v1679_v31, 0.0 }
 0x2c4   : > { %v1978_v36 = vpack.c.bf16 %v1909_v33, %v1908_v32 }
 0x2c5   : > { %v1977_v37 = vpack.c.bf16 %v1907_v35, %v1906_v34  ;;  %v6563_v38 = vpop.f32.mrb[76].mxu0 }
 0x2c6   : > { %v1700_v39 = vadd.f32 %v6563_v38, %v7733_v41  ;;  %v1691_v40 = vpop.f32.mrb[77].mxu0 }
 0x2c7   : > { %v1692_v42 = vadd.f32 %v7733_v41, %v1691_v40  ;;  %v6564_v43 = vpop.f32.mrb[78].mxu0  ;;  %6629 = vmatprep.mubr.msk.bf16.mxu1 %vm470_vm0, %v1977_v37 }
 0x2c8   : > { %v1703_v44 = vadd.f32 %v6564_v43, %v7733_v41  ;;  %v1694_v45 = vpop.f32.mrb[79].mxu0  ;;  %6630 = vmatmul.mubr.msk.bf16.gmra.mrb[72].mxu1 %vm470_vm0, %v1978_v36  ;;  %v1912_v47 = vmax.f32 %v1700_v39, 0.0 }
 0x2c9   : > { %v1695_v46 = vadd.f32 %v7733_v41, %v1694_v45  ;;  %v1910_v49 = vmax.f32 %v1692_v42, 0.0 }
 0x2ca   : > { %v1913_v48 = vmax.f32 %v1703_v44, 0.0 }
 0x2cb   : > { %v1911_v50 = vmax.f32 %v1695_v46, 0.0 }
 0x2cc   : > { %v1980_v51 = vpack.c.bf16 %v1913_v48, %v1912_v47 }
 0x2cd   : > { %v1979_v52 = vpack.c.bf16 %v1911_v50, %v1910_v49  ;;  %v6567_v53 = vpop.f32.mrb[80].mxu0 }
 0x2ce   : > { %v1716_v54 = vadd.f32 %v6567_v53, %v7733_v41  ;;  %v1707_v55 = vpop.f32.mrb[81].mxu0 }
 0x2cf   : > { %v1708_v56 = vadd.f32 %v7733_v41, %v1707_v55  ;;  %v6568_v57 = vpop.f32.mrb[82].mxu0  ;;  %6633 = vmatprep.mubr.msk.bf16.mxu1 %vm470_vm0, %v1979_v52 }
 0x2d0   : > { %v1719_v58 = vadd.f32 %v6568_v57, %v7733_v41  ;;  %v1710_v59 = vpop.f32.mrb[83].mxu0  ;;  %6634 = vmatmul.mubr.msk.bf16.gmra.mrb[76].mxu1 %vm470_vm0, %v1980_v51  ;;  %v1916_v61 = vmax.f32 %v1716_v54, 0.0 }
 0x2d1   : > { %v1711_v60 = vadd.f32 %v7733_v41, %v1710_v59  ;;  %v1914_v63 = vmax.f32 %v1708_v56, 0.0 }
 0x2d2   : > { %v1917_v62 = vmax.f32 %v1719_v58, 0.0 }
 0x2d3   : > { %v1915_v0 = vmax.f32 %v1711_v60, 0.0 }
 0x2d4   : > { %v1982_v1 = vpack.c.bf16 %v1917_v62, %v1916_v61 }
 0x2d5   : > { %v1981_v2 = vpack.c.bf16 %v1915_v0, %v1914_v63  ;;  %v6571_v3 = vpop.f32.mrb[84].mxu0 }
 0x2d6   : > { %v1732_v4 = vadd.f32 %v6571_v3, %v7733_v41  ;;  %v1723_v5 = vpop.f32.mrb[85].mxu0 }
 0x2d7   : > { %v1724_v6 = vadd.f32 %v7733_v41, %v1723_v5  ;;  %v6572_v7 = vpop.f32.mrb[86].mxu0  ;;  %6637 = vmatprep.mubr.msk.bf16.mxu1 %vm470_vm0, %v1981_v2 }
 0x2d8   : > { %v1735_v8 = vadd.f32 %v6572_v7, %v7733_v41  ;;  %v1726_v9 = vpop.f32.mrb[87].mxu0  ;;  %6638 = vmatmul.mubr.msk.bf16.gmra.mrb[80].mxu1 %vm470_vm0, %v1982_v1  ;;  %v1920_v11 = vmax.f32 %v1732_v4, 0.0 }
 0x2d9   : > { %v1727_v10 = vadd.f32 %v7733_v41, %v1726_v9  ;;  %v1918_v13 = vmax.f32 %v1724_v6, 0.0 }
 0x2da   : > { %v1921_v12 = vmax.f32 %v1735_v8, 0.0 }
 0x2db   : > { %v1919_v14 = vmax.f32 %v1727_v10, 0.0 }
 0x2dc   : > { %v1984_v15 = vpack.c.bf16 %v1921_v12, %v1920_v11 }
 0x2dd   : > { %v1983_v16 = vpack.c.bf16 %v1919_v14, %v1918_v13  ;;  %v6575_v17 = vpop.f32.mrb[88].mxu0 }
 0x2de   : > { %v1748_v18 = vadd.f32 %v6575_v17, %v7733_v41  ;;  %v1739_v19 = vpop.f32.mrb[89].mxu0 }
 0x2df   : > { %v1740_v20 = vadd.f32 %v7733_v41, %v1739_v19  ;;  %v6576_v21 = vpop.f32.mrb[90].mxu0  ;;  %6641 = vmatprep.mubr.msk.bf16.mxu1 %vm470_vm0, %v1983_v16 }
 0x2e0   : > { %v1751_v22 = vadd.f32 %v6576_v21, %v7733_v41  ;;  %v1742_v23 = vpop.f32.mrb[91].mxu0  ;;  %6642 = vmatmul.mubr.msk.bf16.gmra.mrb[84].mxu1 %vm470_vm0, %v1984_v15  ;;  %v1924_v25 = vmax.f32 %v1748_v18, 0.0 }
 0x2e1   : > { %v1743_v24 = vadd.f32 %v7733_v41, %v1742_v23  ;;  %v1922_v27 = vmax.f32 %v1740_v20, 0.0 }
 0x2e2   : > { %v1925_v26 = vmax.f32 %v1751_v22, 0.0 }
 0x2e3   : > { %v1923_v28 = vmax.f32 %v1743_v24, 0.0 }
 0x2e4   : > { %v1986_v29 = vpack.c.bf16 %v1925_v26, %v1924_v25 }
 0x2e5   : > { %v1985_v30 = vpack.c.bf16 %v1923_v28, %v1922_v27  ;;  %v6579_v31 = vpop.f32.mrb[92].mxu0 }
 0x2e6   : > { %v1764_v32 = vadd.f32 %v6579_v31, %v7733_v41  ;;  %v1755_v33 = vpop.f32.mrb[93].mxu0 }
 0x2e7   : > { %v1756_v34 = vadd.f32 %v7733_v41, %v1755_v33  ;;  %v6580_v35 = vpop.f32.mrb[94].mxu0  ;;  %6645 = vmatprep.mubr.msk.bf16.mxu1 %vm470_vm0, %v1985_v30 }
 0x2e8   : > { %v1767_v36 = vadd.f32 %v6580_v35, %v7733_v41  ;;  %v1758_v37 = vpop.f32.mrb[95].mxu0  ;;  %6646 = vmatmul.mubr.msk.bf16.gmra.mrb[88].mxu1 %vm470_vm0, %v1986_v29  ;;  %v1928_v39 = vmax.f32 %v1764_v32, 0.0 }
 0x2e9   : > { %v1759_v38 = vadd.f32 %v7733_v41, %v1758_v37  ;;  %v1926_v42 = vmax.f32 %v1756_v34, 0.0 }
 0x2ea   : > { %v1929_v40 = vmax.f32 %v1767_v36, 0.0 }
 0x2eb   : > { %v1927_v43 = vmax.f32 %v1759_v38, 0.0 }
 0x2ec   : > { %v1988_v44 = vpack.c.bf16 %v1929_v40, %v1928_v39 }
 0x2ed   : > { %v1987_v45 = vpack.c.bf16 %v1927_v43, %v1926_v42  ;;  %v6583_v46 = vpop.f32.mrb[96].mxu0 }
 0x2ee   : > { %v1780_v47 = vadd.f32 %v6583_v46, %v7733_v41  ;;  %v1771_v48 = vpop.f32.mrb[97].mxu0 }
 0x2ef   : > { %v1772_v49 = vadd.f32 %v7733_v41, %v1771_v48  ;;  %v6584_v50 = vpop.f32.mrb[98].mxu0  ;;  %6649 = vmatprep.mubr.msk.bf16.mxu1 %vm470_vm0, %v1987_v45 }
 0x2f0   : > { %v1783_v51 = vadd.f32 %v6584_v50, %v7733_v41  ;;  %v1774_v52 = vpop.f32.mrb[99].mxu0  ;;  %6650 = vmatmul.mubr.msk.bf16.gmra.mrb[92].mxu1 %vm470_vm0, %v1988_v44  ;;  %v1932_v54 = vmax.f32 %v1780_v47, 0.0 }
 0x2f1   : > { %v1775_v53 = vadd.f32 %v7733_v41, %v1774_v52  ;;  %v1930_v56 = vmax.f32 %v1772_v49, 0.0 }
 0x2f2   : > { %v1933_v55 = vmax.f32 %v1783_v51, 0.0 }
 0x2f3   : > { %v1931_v57 = vmax.f32 %v1775_v53, 0.0 }
 0x2f4   : > { %v1990_v58 = vpack.c.bf16 %v1933_v55, %v1932_v54 }
 0x2f5   : > { %v1989_v59 = vpack.c.bf16 %v1931_v57, %v1930_v56  ;;  %v6587_v60 = vpop.f32.mrb[100].mxu0 }
 0x2f6   : > { %v1796_v61 = vadd.f32 %v6587_v60, %v7733_v41  ;;  %v1787_v62 = vpop.f32.mrb[101].mxu0 }
 0x2f7   : > { %v1788_v63 = vadd.f32 %v7733_v41, %v1787_v62  ;;  %v6588_v0 = vpop.f32.mrb[102].mxu0  ;;  %6653 = vmatprep.mubr.msk.bf16.mxu1 %vm470_vm0, %v1989_v59 }
 0x2f8   : > { %v1799_v1 = vadd.f32 %v6588_v0, %v7733_v41  ;;  %v1790_v2 = vpop.f32.mrb[103].mxu0  ;;  %6654 = vmatmul.mubr.msk.bf16.gmra.mrb[96].mxu1 %vm470_vm0, %v1990_v58  ;;  %v1936_v4 = vmax.f32 %v1796_v61, 0.0 }
 0x2f9   : > { %v1791_v3 = vadd.f32 %v7733_v41, %v1790_v2  ;;  %v1934_v6 = vmax.f32 %v1788_v63, 0.0 }
 0x2fa   : > { %v1937_v5 = vmax.f32 %v1799_v1, 0.0 }
 0x2fb   : > { %v1935_v7 = vmax.f32 %v1791_v3, 0.0 }
 0x2fc   : > { %v1992_v8 = vpack.c.bf16 %v1937_v5, %v1936_v4 }
 0x2fd   : > { %v1991_v9 = vpack.c.bf16 %v1935_v7, %v1934_v6  ;;  %v6591_v10 = vpop.f32.mrb[104].mxu0 }
 0x2fe   : > { %v1812_v11 = vadd.f32 %v6591_v10, %v7733_v41  ;;  %v1803_v12 = vpop.f32.mrb[105].mxu0 }
 0x2ff   : > { %v1804_v13 = vadd.f32 %v7733_v41, %v1803_v12  ;;  %v6592_v14 = vpop.f32.mrb[106].mxu0  ;;  %6657 = vmatprep.mubr.msk.bf16.mxu1 %vm470_vm0, %v1991_v9 }
 0x300   : > { %v1815_v15 = vadd.f32 %v6592_v14, %v7733_v41  ;;  %v1806_v16 = vpop.f32.mrb[107].mxu0  ;;  %6658 = vmatmul.mubr.msk.bf16.gmra.mrb[100].mxu1 %vm470_vm0, %v1992_v8  ;;  %v1940_v18 = vmax.f32 %v1812_v11, 0.0 }
 0x301   : > { %v1807_v17 = vadd.f32 %v7733_v41, %v1806_v16  ;;  %v1938_v20 = vmax.f32 %v1804_v13, 0.0 }
 0x302   : > { %v1941_v19 = vmax.f32 %v1815_v15, 0.0 }
 0x303   : > { %v1939_v21 = vmax.f32 %v1807_v17, 0.0 }
 0x304   : > { %v1994_v22 = vpack.c.bf16 %v1941_v19, %v1940_v18 }
 0x305   : > { %v1993_v23 = vpack.c.bf16 %v1939_v21, %v1938_v20  ;;  %v6595_v24 = vpop.f32.mrb[108].mxu0 }
 0x306   : > { %v1828_v25 = vadd.f32 %v6595_v24, %v7733_v41  ;;  %v1819_v26 = vpop.f32.mrb[109].mxu0 }
 0x307   : > { %v1820_v27 = vadd.f32 %v7733_v41, %v1819_v26  ;;  %v6596_v28 = vpop.f32.mrb[110].mxu0  ;;  %6661 = vmatprep.mubr.msk.bf16.mxu1 %vm470_vm0, %v1993_v23 }
 0x308   : > { %v1831_v29 = vadd.f32 %v6596_v28, %v7733_v41  ;;  %v1822_v30 = vpop.f32.mrb[111].mxu0  ;;  %6662 = vmatmul.mubr.msk.bf16.gmra.mrb[104].mxu1 %vm470_vm0, %v1994_v22  ;;  %v1944_v32 = vmax.f32 %v1828_v25, 0.0 }
 0x309   : > { %v1823_v31 = vadd.f32 %v7733_v41, %v1822_v30  ;;  %v1942_v34 = vmax.f32 %v1820_v27, 0.0 }
 0x30a   : > { %v1945_v33 = vmax.f32 %v1831_v29, 0.0 }
 0x30b   : > { %v1943_v35 = vmax.f32 %v1823_v31, 0.0  ;;  %v7186_v31 = vld [vmem:[%s8679_s3 + $0x80] sm:$0xff]  }
 0x30c   : > { %v1996_v36 = vpack.c.bf16 %v1945_v33, %v1944_v32  ;;  %6757 = vmatprep.subr.bf16.mxu1 %v7186_v31 }
 0x30d   : > { %v1995_v37 = vpack.c.bf16 %v1943_v35, %v1942_v34  ;;  %v6599_v38 = vpop.f32.mrb[112].mxu0  ;;  %6758 = vmatpush3.bf16.msra.mxu1 %v7186_v31 }
 0x30e   : > { %v1844_v39 = vadd.f32 %v6599_v38, %v7733_v41  ;;  %v1835_v40 = vpop.f32.mrb[113].mxu0 }
 0x30f   : > { %v1836_v42 = vadd.f32 %v7733_v41, %v1835_v40  ;;  %v6600_v43 = vpop.f32.mrb[114].mxu0  ;;  %6665 = vmatprep.mubr.msk.bf16.mxu1 %vm470_vm0, %v1995_v37  ;;  %v7188_v40 = vld [vmem:[%s8679_s3 + $0x90] sm:$0xff]  }
 0x310   : > { %v1847_v44 = vadd.f32 %v6600_v43, %v7733_v41  ;;  %v1838_v45 = vpop.f32.mrb[115].mxu0  ;;  %6666 = vmatmul.mubr.msk.bf16.gmra.mrb[108].mxu1 %vm470_vm0, %v1996_v36  ;;  %v1948_v47 = vmax.f32 %v1844_v39, 0.0  ;;  %v7187_v39 = vld [vmem:[%s8679_s3 + $0x88] sm:$0xff]  }
 0x311   : > { %v1839_v46 = vadd.f32 %v7733_v41, %v1838_v45  ;;  %v1946_v49 = vmax.f32 %v1836_v42, 0.0  ;;  %6759 = vmatprep.subr.bf16.mxu1 %v7187_v39 }
 0x312   : > { %v1949_v48 = vmax.f32 %v1847_v44, 0.0  ;;  %6760 = vmatpush3.bf16.msra.mxu1 %v7187_v39 }
 0x313   : > { %v1947_v50 = vmax.f32 %v1839_v46, 0.0  ;;  %6761 = vmatprep.subr.bf16.mxu1 %v7188_v40 }
 0x314   : > { %v1998_v51 = vpack.c.bf16 %v1949_v48, %v1948_v47  ;;  %v7189_v48 = vld [vmem:[%s8679_s3 + $0x98] sm:$0xff]  }
 0x315   : > { %v1997_v52 = vpack.c.bf16 %v1947_v50, %v1946_v49  ;;  %v6603_v53 = vpop.f32.mrb[116].mxu0 }
 0x316   : > { %v1860_v54 = vadd.f32 %v6603_v53, %v7733_v41  ;;  %v1851_v55 = vpop.f32.mrb[117].mxu0  ;;  %6762 = vmatpush3.bf16.msra.mxu1 %v7188_v40 }
 0x317   : > { %v1852_v56 = vadd.f32 %v7733_v41, %v1851_v55  ;;  %v6604_v57 = vpop.f32.mrb[118].mxu0  ;;  %6669 = vmatprep.mubr.msk.bf16.mxu1 %vm470_vm0, %v1997_v52  ;;  %6763 = vmatprep.subr.bf16.mxu1 %v7189_v48 }
 0x318   : > { %v1863_v58 = vadd.f32 %v6604_v57, %v7733_v41  ;;  %v1854_v59 = vpop.f32.mrb[119].mxu0  ;;  %6670 = vmatmul.mubr.msk.bf16.gmra.mrb[112].mxu1 %vm470_vm0, %v1998_v51  ;;  %v1952_v61 = vmax.f32 %v1860_v54, 0.0 }
 0x319   : > { %v1855_v60 = vadd.f32 %v7733_v41, %v1854_v59  ;;  %v1950_v63 = vmax.f32 %v1852_v56, 0.0 }
 0x31a   : > { %v1953_v62 = vmax.f32 %v1863_v58, 0.0  ;;  %6764 = vmatpush3.bf16.msra.mxu1 %v7189_v48 }
 0x31b   : > { %v1951_v0 = vmax.f32 %v1855_v60, 0.0 }
 0x31c   : > { %v2000_v1 = vpack.c.bf16 %v1953_v62, %v1952_v61 }
 0x31d   : > { %v1999_v2 = vpack.c.bf16 %v1951_v0, %v1950_v63  ;;  %v6607_v3 = vpop.f32.mrb[120].mxu0 }
 0x31e   : > { %v1876_v4 = vadd.f32 %v6607_v3, %v7733_v41  ;;  %v1867_v5 = vpop.f32.mrb[121].mxu0 }
 0x31f   : > { %v1868_v6 = vadd.f32 %v7733_v41, %v1867_v5  ;;  %v6608_v7 = vpop.f32.mrb[122].mxu0  ;;  %6673 = vmatprep.mubr.msk.bf16.mxu1 %vm470_vm0, %v1999_v2 }
 0x320   : > { %v1879_v8 = vadd.f32 %v6608_v7, %v7733_v41  ;;  %v1870_v9 = vpop.f32.mrb[123].mxu0  ;;  %6674 = vmatmul.mubr.msk.bf16.gmra.mrb[116].mxu1 %vm470_vm0, %v2000_v1  ;;  %v1956_v11 = vmax.f32 %v1876_v4, 0.0 }
 0x321   : > { %v1871_v10 = vadd.f32 %v7733_v41, %v1870_v9  ;;  %v1954_v13 = vmax.f32 %v1868_v6, 0.0 }
 0x322   : > { %v1957_v12 = vmax.f32 %v1879_v8, 0.0 }
 0x323   : > { %v1955_v14 = vmax.f32 %v1871_v10, 0.0 }
 0x324   : > { %v2002_v15 = vpack.c.bf16 %v1957_v12, %v1956_v11 }
 0x325   : > { %v2001_v16 = vpack.c.bf16 %v1955_v14, %v1954_v13  ;;  %v6611_v17 = vpop.f32.mrb[124].mxu0 }
 0x326   : > { %v1892_v18 = vadd.f32 %v6611_v17, %v7733_v41  ;;  %v1883_v19 = vpop.f32.mrb[125].mxu0 }
 0x327   : > { %v1884_v20 = vadd.f32 %v7733_v41, %v1883_v19  ;;  %v6612_v21 = vpop.f32.mrb[126].mxu0  ;;  %6677 = vmatprep.mubr.msk.bf16.mxu1 %vm470_vm0, %v2001_v16 }
 0x328   : > { %v1895_v22 = vadd.f32 %v6612_v21, %v7733_v41  ;;  %v1886_v23 = vpop.f32.mrb[127].mxu0  ;;  %6678 = vmatmul.mubr.msk.bf16.gmra.mrb[120].mxu1 %vm470_vm0, %v2002_v15  ;;  %v1960_v25 = vmax.f32 %v1892_v18, 0.0 }
 0x329   : > { %v1887_v24 = vadd.f32 %v7733_v41, %v1886_v23  ;;  %v1958_v27 = vmax.f32 %v1884_v20, 0.0  ;;  %v7846_v41 = vld [vmem:[%s8680_s4 + $0x2] ss:$0 sm:$0xff] }
 0x32a   : > { %v1961_v26 = vmax.f32 %v1895_v22, 0.0 }
 0x32b   : > { %v1959_v28 = vmax.f32 %v1887_v24, 0.0 }
 0x32c   : > { %v2004_v29 = vpack.c.bf16 %v1961_v26, %v1960_v25 }
 0x32d   : > { %v2003_v30 = vpack.c.bf16 %v1959_v28, %v1958_v27 }
 0x32f   : > { %6681 = vmatprep.mubr.msk.bf16.mxu1 %vm470_vm0, %v2003_v30 }
 0x330   : > { %6682 = vmatmul.mubr.msk.bf16.gmra.mrb[124].mxu1 %vm470_vm0, %v2004_v29 }
 0x38b   : > { %v6623_v32 = vpop.f32.mrb[64].mxu1 }
 0x38c   : > { %v2174_v33 = vadd.f32 %v6623_v32, %v7846_v41  ;;  %v2165_v34 = vpop.f32.mrb[65].mxu1 }
 0x38d   : > { %v2166_v35 = vadd.f32 %v7846_v41, %v2165_v34  ;;  %v6624_v36 = vpop.f32.mrb[66].mxu1 }
 0x38e   : > { %v2177_v37 = vadd.f32 %v6624_v36, %v7846_v41  ;;  %v2168_v38 = vpop.f32.mrb[67].mxu1  ;;  %v2422_v43 = vmax.f32 %v2174_v33, 0.0 }
 0x38f   : > { %v2169_v42 = vadd.f32 %v7846_v41, %v2168_v38  ;;  %v2420_v45 = vmax.f32 %v2166_v35, 0.0 }
 0x390   : > { %v2423_v44 = vmax.f32 %v2177_v37, 0.0 }
 0x391   : > { %v2421_v46 = vmax.f32 %v2169_v42, 0.0 }
 0x392   : > { %v2496_v47 = vpack.c.bf16 %v2423_v44, %v2422_v43 }
 0x393   : > { %v2495_v49 = vpack.c.bf16 %v2421_v46, %v2420_v45  ;;  %v6627_v50 = vpop.f32.mrb[68].mxu1 }
 0x394   : > { %v2190_v51 = vadd.f32 %v6627_v50, %v7846_v41  ;;  %v2181_v52 = vpop.f32.mrb[69].mxu1 }
 0x395   : > { %v2182_v53 = vadd.f32 %v7846_v41, %v2181_v52  ;;  %v6628_v54 = vpop.f32.mrb[70].mxu1  ;;  %6693 = vmatprep.mubr.msk.bf16.mxu0 %vm470_vm0, %v2495_v49 }
 0x396   : > { %v2193_v55 = vadd.f32 %v6628_v54, %v7846_v41  ;;  %v2184_v56 = vpop.f32.mrb[71].mxu1  ;;  %6694 = vmatmul.mubr.msk.bf16.vlgmr.msra.gmra.mrb[128].mxu0 %vm470_vm0, %v2496_v47  ;;  %v2426_v58 = vmax.f32 %v2190_v51, 0.0 }
 0x397   : > { %v2185_v57 = vadd.f32 %v7846_v41, %v2184_v56  ;;  %v2424_v60 = vmax.f32 %v2182_v53, 0.0 }
 0x398   : > { %v2427_v59 = vmax.f32 %v2193_v55, 0.0 }
 0x399   : > { %v2425_v61 = vmax.f32 %v2185_v57, 0.0 }
 0x39a   : > { %v2498_v62 = vpack.c.bf16 %v2427_v59, %v2426_v58 }
 0x39b   : > { %v2497_v63 = vpack.c.bf16 %v2425_v61, %v2424_v60  ;;  %v6631_v0 = vpop.f32.mrb[72].mxu1 }
 0x39c   : > { %v2206_v1 = vadd.f32 %v6631_v0, %v7846_v41  ;;  %v2197_v2 = vpop.f32.mrb[73].mxu1 }
 0x39d   : > { %v2198_v3 = vadd.f32 %v7846_v41, %v2197_v2  ;;  %v6632_v4 = vpop.f32.mrb[74].mxu1  ;;  %6697 = vmatprep.mubr.msk.bf16.mxu0 %vm470_vm0, %v2497_v63 }
 0x39e   : > { %v2209_v5 = vadd.f32 %v6632_v4, %v7846_v41  ;;  %v2200_v6 = vpop.f32.mrb[75].mxu1  ;;  %6698 = vmatmul.mubr.msk.bf16.gmra.mrb[132].mxu0 %vm470_vm0, %v2498_v62  ;;  %v2430_v8 = vmax.f32 %v2206_v1, 0.0 }
 0x39f   : > { %v2201_v7 = vadd.f32 %v7846_v41, %v2200_v6  ;;  %v2428_v10 = vmax.f32 %v2198_v3, 0.0 }
 0x3a0   : > { %v2431_v9 = vmax.f32 %v2209_v5, 0.0 }
 0x3a1   : > { %v2429_v11 = vmax.f32 %v2201_v7, 0.0 }
 0x3a2   : > { %v2500_v12 = vpack.c.bf16 %v2431_v9, %v2430_v8 }
 0x3a3   : > { %v2499_v13 = vpack.c.bf16 %v2429_v11, %v2428_v10  ;;  %v6635_v14 = vpop.f32.mrb[76].mxu1 }
 0x3a4   : > { %v2222_v15 = vadd.f32 %v6635_v14, %v7846_v41  ;;  %v2213_v16 = vpop.f32.mrb[77].mxu1 }
 0x3a5   : > { %v2214_v17 = vadd.f32 %v7846_v41, %v2213_v16  ;;  %v6636_v18 = vpop.f32.mrb[78].mxu1  ;;  %6701 = vmatprep.mubr.msk.bf16.mxu0 %vm470_vm0, %v2499_v13 }
 0x3a6   : > { %v2225_v19 = vadd.f32 %v6636_v18, %v7846_v41  ;;  %v2216_v20 = vpop.f32.mrb[79].mxu1  ;;  %6702 = vmatmul.mubr.msk.bf16.gmra.mrb[136].mxu0 %vm470_vm0, %v2500_v12  ;;  %v2434_v22 = vmax.f32 %v2222_v15, 0.0 }
 0x3a7   : > { %v2217_v21 = vadd.f32 %v7846_v41, %v2216_v20  ;;  %v2432_v24 = vmax.f32 %v2214_v17, 0.0 }
 0x3a8   : > { %v2435_v23 = vmax.f32 %v2225_v19, 0.0 }
 0x3a9   : > { %v2433_v25 = vmax.f32 %v2217_v21, 0.0 }
 0x3aa   : > { %v2502_v26 = vpack.c.bf16 %v2435_v23, %v2434_v22 }
 0x3ab   : > { %v2501_v27 = vpack.c.bf16 %v2433_v25, %v2432_v24  ;;  %v6639_v28 = vpop.f32.mrb[80].mxu1 }
 0x3ac   : > { %v2238_v29 = vadd.f32 %v6639_v28, %v7846_v41  ;;  %v2229_v30 = vpop.f32.mrb[81].mxu1 }
 0x3ad   : > { %v2230_v31 = vadd.f32 %v7846_v41, %v2229_v30  ;;  %v6640_v32 = vpop.f32.mrb[82].mxu1  ;;  %6705 = vmatprep.mubr.msk.bf16.mxu0 %vm470_vm0, %v2501_v27 }
 0x3ae   : > { %v2241_v33 = vadd.f32 %v6640_v32, %v7846_v41  ;;  %v2232_v34 = vpop.f32.mrb[83].mxu1  ;;  %6706 = vmatmul.mubr.msk.bf16.gmra.mrb[140].mxu0 %vm470_vm0, %v2502_v26  ;;  %v2438_v36 = vmax.f32 %v2238_v29, 0.0 }
 0x3af   : > { %v2233_v35 = vadd.f32 %v7846_v41, %v2232_v34  ;;  %v2436_v38 = vmax.f32 %v2230_v31, 0.0 }
 0x3b0   : > { %v2439_v37 = vmax.f32 %v2241_v33, 0.0 }
 0x3b1   : > { %v2437_v39 = vmax.f32 %v2233_v35, 0.0 }
 0x3b2   : > { %v2504_v40 = vpack.c.bf16 %v2439_v37, %v2438_v36 }
 0x3b3   : > { %v2503_v42 = vpack.c.bf16 %v2437_v39, %v2436_v38  ;;  %v6643_v43 = vpop.f32.mrb[84].mxu1 }
 0x3b4   : > { %v2254_v44 = vadd.f32 %v6643_v43, %v7846_v41  ;;  %v2245_v45 = vpop.f32.mrb[85].mxu1 }
 0x3b5   : > { %v2246_v46 = vadd.f32 %v7846_v41, %v2245_v45  ;;  %v6644_v47 = vpop.f32.mrb[86].mxu1  ;;  %6709 = vmatprep.mubr.msk.bf16.mxu0 %vm470_vm0, %v2503_v42 }
 0x3b6   : > { %v2257_v48 = vadd.f32 %v6644_v47, %v7846_v41  ;;  %v2248_v49 = vpop.f32.mrb[87].mxu1  ;;  %6710 = vmatmul.mubr.msk.bf16.gmra.mrb[144].mxu0 %vm470_vm0, %v2504_v40  ;;  %v2442_v51 = vmax.f32 %v2254_v44, 0.0 }
 0x3b7   : > { %v2249_v50 = vadd.f32 %v7846_v41, %v2248_v49  ;;  %v2440_v53 = vmax.f32 %v2246_v46, 0.0 }
 0x3b8   : > { %v2443_v52 = vmax.f32 %v2257_v48, 0.0 }
 0x3b9   : > { %v2441_v54 = vmax.f32 %v2249_v50, 0.0 }
 0x3ba   : > { %v2506_v55 = vpack.c.bf16 %v2443_v52, %v2442_v51 }
 0x3bb   : > { %v2505_v56 = vpack.c.bf16 %v2441_v54, %v2440_v53  ;;  %v6647_v57 = vpop.f32.mrb[88].mxu1 }
 0x3bc   : > { %v2270_v58 = vadd.f32 %v6647_v57, %v7846_v41  ;;  %v2261_v59 = vpop.f32.mrb[89].mxu1 }
 0x3bd   : > { %v2262_v60 = vadd.f32 %v7846_v41, %v2261_v59  ;;  %v6648_v61 = vpop.f32.mrb[90].mxu1  ;;  %6713 = vmatprep.mubr.msk.bf16.mxu0 %vm470_vm0, %v2505_v56 }
 0x3be   : > { %v2273_v62 = vadd.f32 %v6648_v61, %v7846_v41  ;;  %v2264_v63 = vpop.f32.mrb[91].mxu1  ;;  %6714 = vmatmul.mubr.msk.bf16.gmra.mrb[148].mxu0 %vm470_vm0, %v2506_v55  ;;  %v2446_v1 = vmax.f32 %v2270_v58, 0.0 }
 0x3bf   : > { %v2265_v0 = vadd.f32 %v7846_v41, %v2264_v63  ;;  %v2444_v3 = vmax.f32 %v2262_v60, 0.0 }
 0x3c0   : > { %v2447_v2 = vmax.f32 %v2273_v62, 0.0 }
 0x3c1   : > { %v2445_v4 = vmax.f32 %v2265_v0, 0.0 }
 0x3c2   : > { %v2508_v5 = vpack.c.bf16 %v2447_v2, %v2446_v1 }
 0x3c3   : > { %v2507_v6 = vpack.c.bf16 %v2445_v4, %v2444_v3  ;;  %v6651_v7 = vpop.f32.mrb[92].mxu1 }
 0x3c4   : > { %v2286_v8 = vadd.f32 %v6651_v7, %v7846_v41  ;;  %v2277_v9 = vpop.f32.mrb[93].mxu1 }
 0x3c5   : > { %v2278_v10 = vadd.f32 %v7846_v41, %v2277_v9  ;;  %v6652_v11 = vpop.f32.mrb[94].mxu1  ;;  %6717 = vmatprep.mubr.msk.bf16.mxu0 %vm470_vm0, %v2507_v6 }
 0x3c6   : > { %v2289_v12 = vadd.f32 %v6652_v11, %v7846_v41  ;;  %v2280_v13 = vpop.f32.mrb[95].mxu1  ;;  %6718 = vmatmul.mubr.msk.bf16.gmra.mrb[152].mxu0 %vm470_vm0, %v2508_v5  ;;  %v2450_v15 = vmax.f32 %v2286_v8, 0.0 }
 0x3c7   : > { %v2281_v14 = vadd.f32 %v7846_v41, %v2280_v13  ;;  %v2448_v17 = vmax.f32 %v2278_v10, 0.0 }
 0x3c8   : > { %v2451_v16 = vmax.f32 %v2289_v12, 0.0 }
 0x3c9   : > { %v2449_v18 = vmax.f32 %v2281_v14, 0.0 }
 0x3ca   : > { %v2510_v19 = vpack.c.bf16 %v2451_v16, %v2450_v15 }
 0x3cb   : > { %v2509_v20 = vpack.c.bf16 %v2449_v18, %v2448_v17  ;;  %v6655_v21 = vpop.f32.mrb[96].mxu1 }
 0x3cc   : > { %v2302_v22 = vadd.f32 %v6655_v21, %v7846_v41  ;;  %v2293_v23 = vpop.f32.mrb[97].mxu1 }
 0x3cd   : > { %v2294_v24 = vadd.f32 %v7846_v41, %v2293_v23  ;;  %v6656_v25 = vpop.f32.mrb[98].mxu1  ;;  %6721 = vmatprep.mubr.msk.bf16.mxu0 %vm470_vm0, %v2509_v20 }
 0x3ce   : > { %v2305_v26 = vadd.f32 %v6656_v25, %v7846_v41  ;;  %v2296_v27 = vpop.f32.mrb[99].mxu1  ;;  %6722 = vmatmul.mubr.msk.bf16.gmra.mrb[156].mxu0 %vm470_vm0, %v2510_v19  ;;  %v2454_v29 = vmax.f32 %v2302_v22, 0.0 }
 0x3cf   : > { %v2297_v28 = vadd.f32 %v7846_v41, %v2296_v27  ;;  %v2452_v31 = vmax.f32 %v2294_v24, 0.0 }
 0x3d0   : > { %v2455_v30 = vmax.f32 %v2305_v26, 0.0 }
 0x3d1   : > { %v2453_v32 = vmax.f32 %v2297_v28, 0.0 }
 0x3d2   : > { %v2512_v33 = vpack.c.bf16 %v2455_v30, %v2454_v29 }
 0x3d3   : > { %v2511_v34 = vpack.c.bf16 %v2453_v32, %v2452_v31  ;;  %v6659_v35 = vpop.f32.mrb[100].mxu1 }
 0x3d4   : > { %v2318_v36 = vadd.f32 %v6659_v35, %v7846_v41  ;;  %v2309_v37 = vpop.f32.mrb[101].mxu1 }
 0x3d5   : > { %v2310_v38 = vadd.f32 %v7846_v41, %v2309_v37  ;;  %v6660_v39 = vpop.f32.mrb[102].mxu1  ;;  %6725 = vmatprep.mubr.msk.bf16.mxu0 %vm470_vm0, %v2511_v34 }
 0x3d6   : > { %v2321_v40 = vadd.f32 %v6660_v39, %v7846_v41  ;;  %v2312_v42 = vpop.f32.mrb[103].mxu1  ;;  %6726 = vmatmul.mubr.msk.bf16.gmra.mrb[160].mxu0 %vm470_vm0, %v2512_v33  ;;  %v2458_v44 = vmax.f32 %v2318_v36, 0.0 }
 0x3d7   : > { %v2313_v43 = vadd.f32 %v7846_v41, %v2312_v42  ;;  %v2456_v46 = vmax.f32 %v2310_v38, 0.0 }
 0x3d8   : > { %v2459_v45 = vmax.f32 %v2321_v40, 0.0 }
 0x3d9   : > { %v2457_v47 = vmax.f32 %v2313_v43, 0.0 }
 0x3da   : > { %v2514_v48 = vpack.c.bf16 %v2459_v45, %v2458_v44 }
 0x3db   : > { %v2513_v49 = vpack.c.bf16 %v2457_v47, %v2456_v46  ;;  %v6663_v50 = vpop.f32.mrb[104].mxu1 }
 0x3dc   : > { %v2334_v51 = vadd.f32 %v6663_v50, %v7846_v41  ;;  %v2325_v52 = vpop.f32.mrb[105].mxu1 }
 0x3dd   : > { %v2326_v53 = vadd.f32 %v7846_v41, %v2325_v52  ;;  %v6664_v54 = vpop.f32.mrb[106].mxu1  ;;  %6729 = vmatprep.mubr.msk.bf16.mxu0 %vm470_vm0, %v2513_v49 }
 0x3de   : > { %v2337_v55 = vadd.f32 %v6664_v54, %v7846_v41  ;;  %v2328_v56 = vpop.f32.mrb[107].mxu1  ;;  %6730 = vmatmul.mubr.msk.bf16.gmra.mrb[164].mxu0 %vm470_vm0, %v2514_v48  ;;  %v2462_v58 = vmax.f32 %v2334_v51, 0.0 }
 0x3df   : > { %v2329_v57 = vadd.f32 %v7846_v41, %v2328_v56  ;;  %v2460_v60 = vmax.f32 %v2326_v53, 0.0 }
 0x3e0   : > { %v2463_v59 = vmax.f32 %v2337_v55, 0.0 }
 0x3e1   : > { %v2461_v61 = vmax.f32 %v2329_v57, 0.0 }
 0x3e2   : > { %v2516_v62 = vpack.c.bf16 %v2463_v59, %v2462_v58 }
 0x3e3   : > { %v2515_v63 = vpack.c.bf16 %v2461_v61, %v2460_v60  ;;  %v6667_v0 = vpop.f32.mrb[108].mxu1 }
 0x3e4   : > { %v2350_v1 = vadd.f32 %v6667_v0, %v7846_v41  ;;  %v2341_v2 = vpop.f32.mrb[109].mxu1 }
 0x3e5   : > { %v2342_v3 = vadd.f32 %v7846_v41, %v2341_v2  ;;  %v6668_v4 = vpop.f32.mrb[110].mxu1  ;;  %6733 = vmatprep.mubr.msk.bf16.mxu0 %vm470_vm0, %v2515_v63 }
 0x3e6   : > { %v2353_v5 = vadd.f32 %v6668_v4, %v7846_v41  ;;  %v2344_v6 = vpop.f32.mrb[111].mxu1  ;;  %6734 = vmatmul.mubr.msk.bf16.gmra.mrb[168].mxu0 %vm470_vm0, %v2516_v62  ;;  %v2466_v8 = vmax.f32 %v2350_v1, 0.0 }
 0x3e7   : > { %v2345_v7 = vadd.f32 %v7846_v41, %v2344_v6  ;;  %v2464_v10 = vmax.f32 %v2342_v3, 0.0 }
 0x3e8   : > { %v2467_v9 = vmax.f32 %v2353_v5, 0.0 }
 0x3e9   : > { %v2465_v11 = vmax.f32 %v2345_v7, 0.0  ;;  %v7190_v7 = vld [vmem:[%s8679_s3 + $0xa0] sm:$0xff]  }
 0x3ea   : > { %v2518_v12 = vpack.c.bf16 %v2467_v9, %v2466_v8  ;;  %6829 = vmatprep.subr.bf16.mxu0 %v7190_v7 }
 0x3eb   : > { %v2517_v13 = vpack.c.bf16 %v2465_v11, %v2464_v10  ;;  %v6671_v14 = vpop.f32.mrb[112].mxu1  ;;  %6830 = vmatpush3.bf16.msra.mxu0 %v7190_v7 }
 0x3ec   : > { %v2366_v15 = vadd.f32 %v6671_v14, %v7846_v41  ;;  %v2357_v16 = vpop.f32.mrb[113].mxu1 }
 0x3ed   : > { %v2358_v17 = vadd.f32 %v7846_v41, %v2357_v16  ;;  %v6672_v18 = vpop.f32.mrb[114].mxu1  ;;  %6737 = vmatprep.mubr.msk.bf16.mxu0 %vm470_vm0, %v2517_v13  ;;  %v7192_v16 = vld [vmem:[%s8679_s3 + $0xb0] sm:$0xff]  }
 0x3ee   : > { %v2369_v19 = vadd.f32 %v6672_v18, %v7846_v41  ;;  %v2360_v20 = vpop.f32.mrb[115].mxu1  ;;  %6738 = vmatmul.mubr.msk.bf16.gmra.mrb[172].mxu0 %vm470_vm0, %v2518_v12  ;;  %v2470_v22 = vmax.f32 %v2366_v15, 0.0  ;;  %v7191_v15 = vld [vmem:[%s8679_s3 + $0xa8] sm:$0xff]  }
 0x3ef   : > { %v2361_v21 = vadd.f32 %v7846_v41, %v2360_v20  ;;  %v2468_v24 = vmax.f32 %v2358_v17, 0.0  ;;  %6831 = vmatprep.subr.bf16.mxu0 %v7191_v15 }
 0x3f0   : > { %v2471_v23 = vmax.f32 %v2369_v19, 0.0  ;;  %6832 = vmatpush3.bf16.msra.mxu0 %v7191_v15 }
 0x3f1   : > { %v2469_v25 = vmax.f32 %v2361_v21, 0.0  ;;  %6833 = vmatprep.subr.bf16.mxu0 %v7192_v16 }
 0x3f2   : > { %v2520_v26 = vpack.c.bf16 %v2471_v23, %v2470_v22  ;;  %v7193_v23 = vld [vmem:[%s8679_s3 + $0xb8] sm:$0xff]  }
 0x3f3   : > { %v2519_v27 = vpack.c.bf16 %v2469_v25, %v2468_v24  ;;  %v6675_v28 = vpop.f32.mrb[116].mxu1 }
 0x3f4   : > { %v2382_v29 = vadd.f32 %v6675_v28, %v7846_v41  ;;  %v2373_v30 = vpop.f32.mrb[117].mxu1  ;;  %6834 = vmatpush3.bf16.msra.mxu0 %v7192_v16 }
 0x3f5   : > { %v2374_v31 = vadd.f32 %v7846_v41, %v2373_v30  ;;  %v6676_v32 = vpop.f32.mrb[118].mxu1  ;;  %6741 = vmatprep.mubr.msk.bf16.mxu0 %vm470_vm0, %v2519_v27  ;;  %6835 = vmatprep.subr.bf16.mxu0 %v7193_v23 }
 0x3f6   : > { %v2385_v33 = vadd.f32 %v6676_v32, %v7846_v41  ;;  %v2376_v34 = vpop.f32.mrb[119].mxu1  ;;  %6742 = vmatmul.mubr.msk.bf16.gmra.mrb[176].mxu0 %vm470_vm0, %v2520_v26  ;;  %v2474_v36 = vmax.f32 %v2382_v29, 0.0 }
 0x3f7   : > { %v2377_v35 = vadd.f32 %v7846_v41, %v2376_v34  ;;  %v2472_v38 = vmax.f32 %v2374_v31, 0.0 }
 0x3f8   : > { %v2475_v37 = vmax.f32 %v2385_v33, 0.0  ;;  %6836 = vmatpush3.bf16.msra.mxu0 %v7193_v23 }
 0x3f9   : > { %v2473_v39 = vmax.f32 %v2377_v35, 0.0 }
 0x3fa   : > { %v2522_v40 = vpack.c.bf16 %v2475_v37, %v2474_v36 }
 0x3fb   : > { %v2521_v42 = vpack.c.bf16 %v2473_v39, %v2472_v38  ;;  %v6679_v43 = vpop.f32.mrb[120].mxu1 }
 0x3fc   : > { %v2398_v44 = vadd.f32 %v6679_v43, %v7846_v41  ;;  %v2389_v45 = vpop.f32.mrb[121].mxu1 }
 0x3fd   : > { %v2390_v46 = vadd.f32 %v7846_v41, %v2389_v45  ;;  %v6680_v47 = vpop.f32.mrb[122].mxu1  ;;  %6745 = vmatprep.mubr.msk.bf16.mxu0 %vm470_vm0, %v2521_v42 }
 0x3fe   : > { %v2401_v48 = vadd.f32 %v6680_v47, %v7846_v41  ;;  %v2392_v49 = vpop.f32.mrb[123].mxu1  ;;  %6746 = vmatmul.mubr.msk.bf16.gmra.mrb[180].mxu0 %vm470_vm0, %v2522_v40  ;;  %v2478_v51 = vmax.f32 %v2398_v44, 0.0 }
 0x3ff   : > { %v2393_v50 = vadd.f32 %v7846_v41, %v2392_v49  ;;  %v2476_v53 = vmax.f32 %v2390_v46, 0.0 }
 0x400   : > { %v2479_v52 = vmax.f32 %v2401_v48, 0.0 }
 0x401   : > { %v2477_v54 = vmax.f32 %v2393_v50, 0.0 }
 0x402   : > { %v2524_v55 = vpack.c.bf16 %v2479_v52, %v2478_v51 }
 0x403   : > { %v2523_v56 = vpack.c.bf16 %v2477_v54, %v2476_v53  ;;  %v6683_v57 = vpop.f32.mrb[124].mxu1 }
 0x404   : > { %v2414_v58 = vadd.f32 %v6683_v57, %v7846_v41  ;;  %v2405_v59 = vpop.f32.mrb[125].mxu1 }
 0x405   : > { %v2406_v60 = vadd.f32 %v7846_v41, %v2405_v59  ;;  %v6684_v61 = vpop.f32.mrb[126].mxu1  ;;  %6749 = vmatprep.mubr.msk.bf16.mxu0 %vm470_vm0, %v2523_v56 }
 0x406   : > { %v2417_v62 = vadd.f32 %v6684_v61, %v7846_v41  ;;  %v2408_v63 = vpop.f32.mrb[127].mxu1  ;;  %6750 = vmatmul.mubr.msk.bf16.gmra.mrb[184].mxu0 %vm470_vm0, %v2524_v55  ;;  %v2482_v1 = vmax.f32 %v2414_v58, 0.0 }
 0x407   : > { %v2409_v0 = vadd.f32 %v7846_v41, %v2408_v63  ;;  %v2480_v3 = vmax.f32 %v2406_v60, 0.0  ;;  %v7959_v41 = vld [vmem:[%s8680_s4 + $0x3] ss:$0 sm:$0xff] }
 0x408   : > { %v2483_v2 = vmax.f32 %v2417_v62, 0.0 }
 0x409   : > { %v2481_v4 = vmax.f32 %v2409_v0, 0.0 }
 0x40a   : > { %v2526_v5 = vpack.c.bf16 %v2483_v2, %v2482_v1 }
 0x40b   : > { %v2525_v6 = vpack.c.bf16 %v2481_v4, %v2480_v3 }
 0x40d   : > { %6753 = vmatprep.mubr.msk.bf16.mxu0 %vm470_vm0, %v2525_v6 }
 0x40e   : > { %6754 = vmatmul.mubr.msk.bf16.gmra.mrb[188].mxu0 %vm470_vm0, %v2526_v5 }
 0x469   : > { %v6695_v8 = vpop.f32.mrb[128].mxu0 }
 0x46a   : > { %v2696_v9 = vadd.f32 %v6695_v8, %v7959_v41  ;;  %v2687_v10 = vpop.f32.mrb[129].mxu0 }
 0x46b   : > { %v2688_v11 = vadd.f32 %v7959_v41, %v2687_v10  ;;  %v6696_v12 = vpop.f32.mrb[130].mxu0 }
 0x46c   : > { %v2699_v13 = vadd.f32 %v6696_v12, %v7959_v41  ;;  %v2690_v14 = vpop.f32.mrb[131].mxu0  ;;  %v2944_v18 = vmax.f32 %v2696_v9, 0.0 }
 0x46d   : > { %v2691_v17 = vadd.f32 %v7959_v41, %v2690_v14  ;;  %v2942_v20 = vmax.f32 %v2688_v11, 0.0 }
 0x46e   : > { %v2945_v19 = vmax.f32 %v2699_v13, 0.0 }
 0x46f   : > { %v2943_v21 = vmax.f32 %v2691_v17, 0.0 }
 0x470   : > { %v3018_v22 = vpack.c.bf16 %v2945_v19, %v2944_v18 }
 0x471   : > { %v3017_v24 = vpack.c.bf16 %v2943_v21, %v2942_v20  ;;  %v6699_v25 = vpop.f32.mrb[132].mxu0 }
 0x472   : > { %v2712_v26 = vadd.f32 %v6699_v25, %v7959_v41  ;;  %v2703_v27 = vpop.f32.mrb[133].mxu0 }
 0x473   : > { %v2704_v28 = vadd.f32 %v7959_v41, %v2703_v27  ;;  %v6700_v29 = vpop.f32.mrb[134].mxu0  ;;  %6765 = vmatprep.mubr.msk.bf16.mxu1 %vm470_vm0, %v3017_v24 }
 0x474   : > { %v2715_v30 = vadd.f32 %v6700_v29, %v7959_v41  ;;  %v2706_v31 = vpop.f32.mrb[135].mxu0  ;;  %6766 = vmatmul.mubr.msk.bf16.vlgmr.msra.gmra.mrb[128].mxu1 %vm470_vm0, %v3018_v22  ;;  %v2948_v33 = vmax.f32 %v2712_v26, 0.0 }
 0x475   : > { %v2707_v32 = vadd.f32 %v7959_v41, %v2706_v31  ;;  %v2946_v35 = vmax.f32 %v2704_v28, 0.0 }
 0x476   : > { %v2949_v34 = vmax.f32 %v2715_v30, 0.0 }
 0x477   : > { %v2947_v36 = vmax.f32 %v2707_v32, 0.0 }
 0x478   : > { %v3020_v37 = vpack.c.bf16 %v2949_v34, %v2948_v33 }
 0x479   : > { %v3019_v38 = vpack.c.bf16 %v2947_v36, %v2946_v35  ;;  %v6703_v39 = vpop.f32.mrb[136].mxu0 }
 0x47a   : > { %v2728_v40 = vadd.f32 %v6703_v39, %v7959_v41  ;;  %v2719_v42 = vpop.f32.mrb[137].mxu0 }
 0x47b   : > { %v2720_v43 = vadd.f32 %v7959_v41, %v2719_v42  ;;  %v6704_v44 = vpop.f32.mrb[138].mxu0  ;;  %6769 = vmatprep.mubr.msk.bf16.mxu1 %vm470_vm0, %v3019_v38 }
 0x47c   : > { %v2731_v45 = vadd.f32 %v6704_v44, %v7959_v41  ;;  %v2722_v46 = vpop.f32.mrb[139].mxu0  ;;  %6770 = vmatmul.mubr.msk.bf16.gmra.mrb[132].mxu1 %vm470_vm0, %v3020_v37  ;;  %v2952_v48 = vmax.f32 %v2728_v40, 0.0 }
 0x47d   : > { %v2723_v47 = vadd.f32 %v7959_v41, %v2722_v46  ;;  %v2950_v50 = vmax.f32 %v2720_v43, 0.0 }
 0x47e   : > { %v2953_v49 = vmax.f32 %v2731_v45, 0.0 }
 0x47f   : > { %v2951_v51 = vmax.f32 %v2723_v47, 0.0 }
 0x480   : > { %v3022_v52 = vpack.c.bf16 %v2953_v49, %v2952_v48 }
 0x481   : > { %v3021_v53 = vpack.c.bf16 %v2951_v51, %v2950_v50  ;;  %v6707_v54 = vpop.f32.mrb[140].mxu0 }
 0x482   : > { %v2744_v55 = vadd.f32 %v6707_v54, %v7959_v41  ;;  %v2735_v56 = vpop.f32.mrb[141].mxu0 }
 0x483   : > { %v2736_v57 = vadd.f32 %v7959_v41, %v2735_v56  ;;  %v6708_v58 = vpop.f32.mrb[142].mxu0  ;;  %6773 = vmatprep.mubr.msk.bf16.mxu1 %vm470_vm0, %v3021_v53 }
 0x484   : > { %v2747_v59 = vadd.f32 %v6708_v58, %v7959_v41  ;;  %v2738_v60 = vpop.f32.mrb[143].mxu0  ;;  %6774 = vmatmul.mubr.msk.bf16.gmra.mrb[136].mxu1 %vm470_vm0, %v3022_v52  ;;  %v2956_v62 = vmax.f32 %v2744_v55, 0.0 }
 0x485   : > { %v2739_v61 = vadd.f32 %v7959_v41, %v2738_v60  ;;  %v2954_v0 = vmax.f32 %v2736_v57, 0.0 }
 0x486   : > { %v2957_v63 = vmax.f32 %v2747_v59, 0.0 }
 0x487   : > { %v2955_v1 = vmax.f32 %v2739_v61, 0.0 }
 0x488   : > { %v3024_v2 = vpack.c.bf16 %v2957_v63, %v2956_v62 }
 0x489   : > { %v3023_v3 = vpack.c.bf16 %v2955_v1, %v2954_v0  ;;  %v6711_v4 = vpop.f32.mrb[144].mxu0 }
 0x48a   : > { %v2760_v5 = vadd.f32 %v6711_v4, %v7959_v41  ;;  %v2751_v6 = vpop.f32.mrb[145].mxu0 }
 0x48b   : > { %v2752_v7 = vadd.f32 %v7959_v41, %v2751_v6  ;;  %v6712_v8 = vpop.f32.mrb[146].mxu0  ;;  %6777 = vmatprep.mubr.msk.bf16.mxu1 %vm470_vm0, %v3023_v3 }
 0x48c   : > { %v2763_v9 = vadd.f32 %v6712_v8, %v7959_v41  ;;  %v2754_v10 = vpop.f32.mrb[147].mxu0  ;;  %6778 = vmatmul.mubr.msk.bf16.gmra.mrb[140].mxu1 %vm470_vm0, %v3024_v2  ;;  %v2960_v12 = vmax.f32 %v2760_v5, 0.0 }
 0x48d   : > { %v2755_v11 = vadd.f32 %v7959_v41, %v2754_v10  ;;  %v2958_v14 = vmax.f32 %v2752_v7, 0.0 }
 0x48e   : > { %v2961_v13 = vmax.f32 %v2763_v9, 0.0 }
 0x48f   : > { %v2959_v15 = vmax.f32 %v2755_v11, 0.0 }
 0x490   : > { %v3026_v16 = vpack.c.bf16 %v2961_v13, %v2960_v12 }
 0x491   : > { %v3025_v17 = vpack.c.bf16 %v2959_v15, %v2958_v14  ;;  %v6715_v18 = vpop.f32.mrb[148].mxu0 }
 0x492   : > { %v2776_v19 = vadd.f32 %v6715_v18, %v7959_v41  ;;  %v2767_v20 = vpop.f32.mrb[149].mxu0 }
 0x493   : > { %v2768_v21 = vadd.f32 %v7959_v41, %v2767_v20  ;;  %v6716_v22 = vpop.f32.mrb[150].mxu0  ;;  %6781 = vmatprep.mubr.msk.bf16.mxu1 %vm470_vm0, %v3025_v17 }
 0x494   : > { %v2779_v23 = vadd.f32 %v6716_v22, %v7959_v41  ;;  %v2770_v24 = vpop.f32.mrb[151].mxu0  ;;  %6782 = vmatmul.mubr.msk.bf16.gmra.mrb[144].mxu1 %vm470_vm0, %v3026_v16  ;;  %v2964_v26 = vmax.f32 %v2776_v19, 0.0 }
 0x495   : > { %v2771_v25 = vadd.f32 %v7959_v41, %v2770_v24  ;;  %v2962_v28 = vmax.f32 %v2768_v21, 0.0 }
 0x496   : > { %v2965_v27 = vmax.f32 %v2779_v23, 0.0 }
 0x497   : > { %v2963_v29 = vmax.f32 %v2771_v25, 0.0 }
 0x498   : > { %v3028_v30 = vpack.c.bf16 %v2965_v27, %v2964_v26 }
 0x499   : > { %v3027_v31 = vpack.c.bf16 %v2963_v29, %v2962_v28  ;;  %v6719_v32 = vpop.f32.mrb[152].mxu0 }
 0x49a   : > { %v2792_v33 = vadd.f32 %v6719_v32, %v7959_v41  ;;  %v2783_v34 = vpop.f32.mrb[153].mxu0 }
 0x49b   : > { %v2784_v35 = vadd.f32 %v7959_v41, %v2783_v34  ;;  %v6720_v36 = vpop.f32.mrb[154].mxu0  ;;  %6785 = vmatprep.mubr.msk.bf16.mxu1 %vm470_vm0, %v3027_v31 }
 0x49c   : > { %v2795_v37 = vadd.f32 %v6720_v36, %v7959_v41  ;;  %v2786_v38 = vpop.f32.mrb[155].mxu0  ;;  %6786 = vmatmul.mubr.msk.bf16.gmra.mrb[148].mxu1 %vm470_vm0, %v3028_v30  ;;  %v2968_v40 = vmax.f32 %v2792_v33, 0.0 }
 0x49d   : > { %v2787_v39 = vadd.f32 %v7959_v41, %v2786_v38  ;;  %v2966_v43 = vmax.f32 %v2784_v35, 0.0 }
 0x49e   : > { %v2969_v42 = vmax.f32 %v2795_v37, 0.0 }
 0x49f   : > { %v2967_v44 = vmax.f32 %v2787_v39, 0.0 }
 0x4a0   : > { %v3030_v45 = vpack.c.bf16 %v2969_v42, %v2968_v40 }
 0x4a1   : > { %v3029_v46 = vpack.c.bf16 %v2967_v44, %v2966_v43  ;;  %v6723_v47 = vpop.f32.mrb[156].mxu0 }
 0x4a2   : > { %v2808_v48 = vadd.f32 %v6723_v47, %v7959_v41  ;;  %v2799_v49 = vpop.f32.mrb[157].mxu0 }
 0x4a3   : > { %v2800_v50 = vadd.f32 %v7959_v41, %v2799_v49  ;;  %v6724_v51 = vpop.f32.mrb[158].mxu0  ;;  %6789 = vmatprep.mubr.msk.bf16.mxu1 %vm470_vm0, %v3029_v46 }
 0x4a4   : > { %v2811_v52 = vadd.f32 %v6724_v51, %v7959_v41  ;;  %v2802_v53 = vpop.f32.mrb[159].mxu0  ;;  %6790 = vmatmul.mubr.msk.bf16.gmra.mrb[152].mxu1 %vm470_vm0, %v3030_v45  ;;  %v2972_v55 = vmax.f32 %v2808_v48, 0.0 }
 0x4a5   : > { %v2803_v54 = vadd.f32 %v7959_v41, %v2802_v53  ;;  %v2970_v57 = vmax.f32 %v2800_v50, 0.0 }
 0x4a6   : > { %v2973_v56 = vmax.f32 %v2811_v52, 0.0 }
 0x4a7   : > { %v2971_v58 = vmax.f32 %v2803_v54, 0.0 }
 0x4a8   : > { %v3032_v59 = vpack.c.bf16 %v2973_v56, %v2972_v55 }
 0x4a9   : > { %v3031_v60 = vpack.c.bf16 %v2971_v58, %v2970_v57  ;;  %v6727_v61 = vpop.f32.mrb[160].mxu0 }
 0x4aa   : > { %v2824_v62 = vadd.f32 %v6727_v61, %v7959_v41  ;;  %v2815_v63 = vpop.f32.mrb[161].mxu0 }
 0x4ab   : > { %v2816_v0 = vadd.f32 %v7959_v41, %v2815_v63  ;;  %v6728_v1 = vpop.f32.mrb[162].mxu0  ;;  %6793 = vmatprep.mubr.msk.bf16.mxu1 %vm470_vm0, %v3031_v60 }
 0x4ac   : > { %v2827_v2 = vadd.f32 %v6728_v1, %v7959_v41  ;;  %v2818_v3 = vpop.f32.mrb[163].mxu0  ;;  %6794 = vmatmul.mubr.msk.bf16.gmra.mrb[156].mxu1 %vm470_vm0, %v3032_v59  ;;  %v2976_v5 = vmax.f32 %v2824_v62, 0.0 }
 0x4ad   : > { %v2819_v4 = vadd.f32 %v7959_v41, %v2818_v3  ;;  %v2974_v7 = vmax.f32 %v2816_v0, 0.0 }
 0x4ae   : > { %v2977_v6 = vmax.f32 %v2827_v2, 0.0 }
 0x4af   : > { %v2975_v8 = vmax.f32 %v2819_v4, 0.0 }
 0x4b0   : > { %v3034_v9 = vpack.c.bf16 %v2977_v6, %v2976_v5 }
 0x4b1   : > { %v3033_v10 = vpack.c.bf16 %v2975_v8, %v2974_v7  ;;  %v6731_v11 = vpop.f32.mrb[164].mxu0 }
 0x4b2   : > { %v2840_v12 = vadd.f32 %v6731_v11, %v7959_v41  ;;  %v2831_v13 = vpop.f32.mrb[165].mxu0 }
 0x4b3   : > { %v2832_v14 = vadd.f32 %v7959_v41, %v2831_v13  ;;  %v6732_v15 = vpop.f32.mrb[166].mxu0  ;;  %6797 = vmatprep.mubr.msk.bf16.mxu1 %vm470_vm0, %v3033_v10 }
 0x4b4   : > { %v2843_v16 = vadd.f32 %v6732_v15, %v7959_v41  ;;  %v2834_v17 = vpop.f32.mrb[167].mxu0  ;;  %6798 = vmatmul.mubr.msk.bf16.gmra.mrb[160].mxu1 %vm470_vm0, %v3034_v9  ;;  %v2980_v19 = vmax.f32 %v2840_v12, 0.0 }
 0x4b5   : > { %v2835_v18 = vadd.f32 %v7959_v41, %v2834_v17  ;;  %v2978_v21 = vmax.f32 %v2832_v14, 0.0 }
 0x4b6   : > { %v2981_v20 = vmax.f32 %v2843_v16, 0.0 }
 0x4b7   : > { %v2979_v22 = vmax.f32 %v2835_v18, 0.0 }
 0x4b8   : > { %v3036_v23 = vpack.c.bf16 %v2981_v20, %v2980_v19 }
 0x4b9   : > { %v3035_v24 = vpack.c.bf16 %v2979_v22, %v2978_v21  ;;  %v6735_v25 = vpop.f32.mrb[168].mxu0 }
 0x4ba   : > { %v2856_v26 = vadd.f32 %v6735_v25, %v7959_v41  ;;  %v2847_v27 = vpop.f32.mrb[169].mxu0 }
 0x4bb   : > { %v2848_v28 = vadd.f32 %v7959_v41, %v2847_v27  ;;  %v6736_v29 = vpop.f32.mrb[170].mxu0  ;;  %6801 = vmatprep.mubr.msk.bf16.mxu1 %vm470_vm0, %v3035_v24 }
 0x4bc   : > { %v2859_v30 = vadd.f32 %v6736_v29, %v7959_v41  ;;  %v2850_v31 = vpop.f32.mrb[171].mxu0  ;;  %6802 = vmatmul.mubr.msk.bf16.gmra.mrb[164].mxu1 %vm470_vm0, %v3036_v23  ;;  %v2984_v33 = vmax.f32 %v2856_v26, 0.0 }
 0x4bd   : > { %v2851_v32 = vadd.f32 %v7959_v41, %v2850_v31  ;;  %v2982_v35 = vmax.f32 %v2848_v28, 0.0 }
 0x4be   : > { %v2985_v34 = vmax.f32 %v2859_v30, 0.0 }
 0x4bf   : > { %v2983_v36 = vmax.f32 %v2851_v32, 0.0 }
 0x4c0   : > { %v3038_v37 = vpack.c.bf16 %v2985_v34, %v2984_v33 }
 0x4c1   : > { %v3037_v38 = vpack.c.bf16 %v2983_v36, %v2982_v35  ;;  %v6739_v39 = vpop.f32.mrb[172].mxu0 }
 0x4c2   : > { %v2872_v40 = vadd.f32 %v6739_v39, %v7959_v41  ;;  %v2863_v42 = vpop.f32.mrb[173].mxu0 }
 0x4c3   : > { %v2864_v43 = vadd.f32 %v7959_v41, %v2863_v42  ;;  %v6740_v44 = vpop.f32.mrb[174].mxu0  ;;  %6805 = vmatprep.mubr.msk.bf16.mxu1 %vm470_vm0, %v3037_v38 }
 0x4c4   : > { %v2875_v45 = vadd.f32 %v6740_v44, %v7959_v41  ;;  %v2866_v46 = vpop.f32.mrb[175].mxu0  ;;  %6806 = vmatmul.mubr.msk.bf16.gmra.mrb[168].mxu1 %vm470_vm0, %v3038_v37  ;;  %v2988_v48 = vmax.f32 %v2872_v40, 0.0 }
 0x4c5   : > { %v2867_v47 = vadd.f32 %v7959_v41, %v2866_v46  ;;  %v2986_v50 = vmax.f32 %v2864_v43, 0.0 }
 0x4c6   : > { %v2989_v49 = vmax.f32 %v2875_v45, 0.0 }
 0x4c7   : > { %v2987_v51 = vmax.f32 %v2867_v47, 0.0  ;;  %v7194_v47 = vld [vmem:[%s8679_s3 + $0xc0] sm:$0xff]  }
 0x4c8   : > { %v3040_v52 = vpack.c.bf16 %v2989_v49, %v2988_v48  ;;  %6901 = vmatprep.subr.bf16.mxu1 %v7194_v47 }
 0x4c9   : > { %v3039_v53 = vpack.c.bf16 %v2987_v51, %v2986_v50  ;;  %v6743_v54 = vpop.f32.mrb[176].mxu0  ;;  %6902 = vmatpush3.bf16.msra.mxu1 %v7194_v47 }
 0x4ca   : > { %v2888_v55 = vadd.f32 %v6743_v54, %v7959_v41  ;;  %v2879_v56 = vpop.f32.mrb[177].mxu0 }
 0x4cb   : > { %v2880_v57 = vadd.f32 %v7959_v41, %v2879_v56  ;;  %v6744_v58 = vpop.f32.mrb[178].mxu0  ;;  %6809 = vmatprep.mubr.msk.bf16.mxu1 %vm470_vm0, %v3039_v53  ;;  %v7196_v56 = vld [vmem:[%s8679_s3 + $0xd0] sm:$0xff]  }
 0x4cc   : > { %v2891_v59 = vadd.f32 %v6744_v58, %v7959_v41  ;;  %v2882_v60 = vpop.f32.mrb[179].mxu0  ;;  %6810 = vmatmul.mubr.msk.bf16.gmra.mrb[172].mxu1 %vm470_vm0, %v3040_v52  ;;  %v2992_v62 = vmax.f32 %v2888_v55, 0.0  ;;  %v7195_v55 = vld [vmem:[%s8679_s3 + $0xc8] sm:$0xff]  }
 0x4cd   : > { %v2883_v61 = vadd.f32 %v7959_v41, %v2882_v60  ;;  %v2990_v0 = vmax.f32 %v2880_v57, 0.0  ;;  %6903 = vmatprep.subr.bf16.mxu1 %v7195_v55 }
 0x4ce   : > { %v2993_v63 = vmax.f32 %v2891_v59, 0.0  ;;  %6904 = vmatpush3.bf16.msra.mxu1 %v7195_v55 }
 0x4cf   : > { %v2991_v1 = vmax.f32 %v2883_v61, 0.0  ;;  %6905 = vmatprep.subr.bf16.mxu1 %v7196_v56 }
 0x4d0   : > { %v3042_v2 = vpack.c.bf16 %v2993_v63, %v2992_v62  ;;  %v7197_v63 = vld [vmem:[%s8679_s3 + $0xd8] sm:$0xff]  }
 0x4d1   : > { %v3041_v3 = vpack.c.bf16 %v2991_v1, %v2990_v0  ;;  %v6747_v4 = vpop.f32.mrb[180].mxu0 }
 0x4d2   : > { %v2904_v5 = vadd.f32 %v6747_v4, %v7959_v41  ;;  %v2895_v6 = vpop.f32.mrb[181].mxu0  ;;  %6906 = vmatpush3.bf16.msra.mxu1 %v7196_v56 }
 0x4d3   : > { %v2896_v7 = vadd.f32 %v7959_v41, %v2895_v6  ;;  %v6748_v8 = vpop.f32.mrb[182].mxu0  ;;  %6813 = vmatprep.mubr.msk.bf16.mxu1 %vm470_vm0, %v3041_v3  ;;  %6907 = vmatprep.subr.bf16.mxu1 %v7197_v63 }
 0x4d4   : > { %v2907_v9 = vadd.f32 %v6748_v8, %v7959_v41  ;;  %v2898_v10 = vpop.f32.mrb[183].mxu0  ;;  %6814 = vmatmul.mubr.msk.bf16.gmra.mrb[176].mxu1 %vm470_vm0, %v3042_v2  ;;  %v2996_v12 = vmax.f32 %v2904_v5, 0.0 }
 0x4d5   : > { %v2899_v11 = vadd.f32 %v7959_v41, %v2898_v10  ;;  %v2994_v14 = vmax.f32 %v2896_v7, 0.0 }
 0x4d6   : > { %v2997_v13 = vmax.f32 %v2907_v9, 0.0  ;;  %6908 = vmatpush3.bf16.msra.mxu1 %v7197_v63 }
 0x4d7   : > { %v2995_v15 = vmax.f32 %v2899_v11, 0.0 }
 0x4d8   : > { %v3044_v16 = vpack.c.bf16 %v2997_v13, %v2996_v12 }
 0x4d9   : > { %v3043_v17 = vpack.c.bf16 %v2995_v15, %v2994_v14  ;;  %v6751_v18 = vpop.f32.mrb[184].mxu0 }
 0x4da   : > { %v2920_v19 = vadd.f32 %v6751_v18, %v7959_v41  ;;  %v2911_v20 = vpop.f32.mrb[185].mxu0 }
 0x4db   : > { %v2912_v21 = vadd.f32 %v7959_v41, %v2911_v20  ;;  %v6752_v22 = vpop.f32.mrb[186].mxu0  ;;  %6817 = vmatprep.mubr.msk.bf16.mxu1 %vm470_vm0, %v3043_v17 }
 0x4dc   : > { %v2923_v23 = vadd.f32 %v6752_v22, %v7959_v41  ;;  %v2914_v24 = vpop.f32.mrb[187].mxu0  ;;  %6818 = vmatmul.mubr.msk.bf16.gmra.mrb[180].mxu1 %vm470_vm0, %v3044_v16  ;;  %v3000_v26 = vmax.f32 %v2920_v19, 0.0 }
 0x4dd   : > { %v2915_v25 = vadd.f32 %v7959_v41, %v2914_v24  ;;  %v2998_v28 = vmax.f32 %v2912_v21, 0.0 }
 0x4de   : > { %v3001_v27 = vmax.f32 %v2923_v23, 0.0 }
 0x4df   : > { %v2999_v29 = vmax.f32 %v2915_v25, 0.0 }
 0x4e0   : > { %v3046_v30 = vpack.c.bf16 %v3001_v27, %v3000_v26 }
 0x4e1   : > { %v3045_v31 = vpack.c.bf16 %v2999_v29, %v2998_v28  ;;  %v6755_v32 = vpop.f32.mrb[188].mxu0 }
 0x4e2   : > { %v2936_v33 = vadd.f32 %v6755_v32, %v7959_v41  ;;  %v2927_v34 = vpop.f32.mrb[189].mxu0 }
 0x4e3   : > { %v2928_v35 = vadd.f32 %v7959_v41, %v2927_v34  ;;  %v6756_v36 = vpop.f32.mrb[190].mxu0  ;;  %6821 = vmatprep.mubr.msk.bf16.mxu1 %vm470_vm0, %v3045_v31 }
 0x4e4   : > { %v2939_v37 = vadd.f32 %v6756_v36, %v7959_v41  ;;  %v2930_v38 = vpop.f32.mrb[191].mxu0  ;;  %6822 = vmatmul.mubr.msk.bf16.gmra.mrb[184].mxu1 %vm470_vm0, %v3046_v30  ;;  %v3004_v40 = vmax.f32 %v2936_v33, 0.0 }
 0x4e5   : > { %v2931_v39 = vadd.f32 %v7959_v41, %v2930_v38  ;;  %v3002_v43 = vmax.f32 %v2928_v35, 0.0  ;;  %v8072_v41 = vld [vmem:[%s8680_s4 + $0x4] ss:$0 sm:$0xff] }
 0x4e6   : > { %v3005_v42 = vmax.f32 %v2939_v37, 0.0 }
 0x4e7   : > { %v3003_v44 = vmax.f32 %v2931_v39, 0.0 }
 0x4e8   : > { %v3048_v45 = vpack.c.bf16 %v3005_v42, %v3004_v40 }
 0x4e9   : > { %v3047_v46 = vpack.c.bf16 %v3003_v44, %v3002_v43 }
 0x4eb   : > { %6825 = vmatprep.mubr.msk.bf16.mxu1 %vm470_vm0, %v3047_v46 }
 0x4ec   : > { %6826 = vmatmul.mubr.msk.bf16.gmra.mrb[188].mxu1 %vm470_vm0, %v3048_v45 }
 0x547   : > { %v6767_v48 = vpop.f32.mrb[128].mxu1 }
 0x548   : > { %v3218_v49 = vadd.f32 %v6767_v48, %v8072_v41  ;;  %v3209_v50 = vpop.f32.mrb[129].mxu1 }
 0x549   : > { %v3210_v51 = vadd.f32 %v8072_v41, %v3209_v50  ;;  %v6768_v52 = vpop.f32.mrb[130].mxu1 }
 0x54a   : > { %v3221_v53 = vadd.f32 %v6768_v52, %v8072_v41  ;;  %v3212_v54 = vpop.f32.mrb[131].mxu1  ;;  %v3466_v58 = vmax.f32 %v3218_v49, 0.0 }
 0x54b   : > { %v3213_v57 = vadd.f32 %v8072_v41, %v3212_v54  ;;  %v3464_v60 = vmax.f32 %v3210_v51, 0.0 }
 0x54c   : > { %v3467_v59 = vmax.f32 %v3221_v53, 0.0 }
 0x54d   : > { %v3465_v61 = vmax.f32 %v3213_v57, 0.0 }
 0x54e   : > { %v3540_v62 = vpack.c.bf16 %v3467_v59, %v3466_v58 }
 0x54f   : > { %v3539_v0 = vpack.c.bf16 %v3465_v61, %v3464_v60  ;;  %v6771_v1 = vpop.f32.mrb[132].mxu1 }
 0x550   : > { %v3234_v2 = vadd.f32 %v6771_v1, %v8072_v41  ;;  %v3225_v3 = vpop.f32.mrb[133].mxu1 }
 0x551   : > { %v3226_v4 = vadd.f32 %v8072_v41, %v3225_v3  ;;  %v6772_v5 = vpop.f32.mrb[134].mxu1  ;;  %6837 = vmatprep.mubr.msk.bf16.mxu0 %vm470_vm0, %v3539_v0 }
 0x552   : > { %v3237_v6 = vadd.f32 %v6772_v5, %v8072_v41  ;;  %v3228_v7 = vpop.f32.mrb[135].mxu1  ;;  %6838 = vmatmul.mubr.msk.bf16.vlgmr.msra.gmra.mrb[192].mxu0 %vm470_vm0, %v3540_v62  ;;  %v3470_v9 = vmax.f32 %v3234_v2, 0.0 }
 0x553   : > { %v3229_v8 = vadd.f32 %v8072_v41, %v3228_v7  ;;  %v3468_v11 = vmax.f32 %v3226_v4, 0.0 }
 0x554   : > { %v3471_v10 = vmax.f32 %v3237_v6, 0.0 }
 0x555   : > { %v3469_v12 = vmax.f32 %v3229_v8, 0.0 }
 0x556   : > { %v3542_v13 = vpack.c.bf16 %v3471_v10, %v3470_v9 }
 0x557   : > { %v3541_v14 = vpack.c.bf16 %v3469_v12, %v3468_v11  ;;  %v6775_v15 = vpop.f32.mrb[136].mxu1 }
 0x558   : > { %v3250_v16 = vadd.f32 %v6775_v15, %v8072_v41  ;;  %v3241_v17 = vpop.f32.mrb[137].mxu1 }
 0x559   : > { %v3242_v18 = vadd.f32 %v8072_v41, %v3241_v17  ;;  %v6776_v19 = vpop.f32.mrb[138].mxu1  ;;  %6841 = vmatprep.mubr.msk.bf16.mxu0 %vm470_vm0, %v3541_v14 }
 0x55a   : > { %v3253_v20 = vadd.f32 %v6776_v19, %v8072_v41  ;;  %v3244_v21 = vpop.f32.mrb[139].mxu1  ;;  %6842 = vmatmul.mubr.msk.bf16.gmra.mrb[196].mxu0 %vm470_vm0, %v3542_v13  ;;  %v3474_v23 = vmax.f32 %v3250_v16, 0.0 }
 0x55b   : > { %v3245_v22 = vadd.f32 %v8072_v41, %v3244_v21  ;;  %v3472_v25 = vmax.f32 %v3242_v18, 0.0 }
 0x55c   : > { %v3475_v24 = vmax.f32 %v3253_v20, 0.0 }
 0x55d   : > { %v3473_v26 = vmax.f32 %v3245_v22, 0.0 }
 0x55e   : > { %v3544_v27 = vpack.c.bf16 %v3475_v24, %v3474_v23 }
 0x55f   : > { %v3543_v28 = vpack.c.bf16 %v3473_v26, %v3472_v25  ;;  %v6779_v29 = vpop.f32.mrb[140].mxu1 }
 0x560   : > { %v3266_v30 = vadd.f32 %v6779_v29, %v8072_v41  ;;  %v3257_v31 = vpop.f32.mrb[141].mxu1 }
 0x561   : > { %v3258_v32 = vadd.f32 %v8072_v41, %v3257_v31  ;;  %v6780_v33 = vpop.f32.mrb[142].mxu1  ;;  %6845 = vmatprep.mubr.msk.bf16.mxu0 %vm470_vm0, %v3543_v28 }
 0x562   : > { %v3269_v34 = vadd.f32 %v6780_v33, %v8072_v41  ;;  %v3260_v35 = vpop.f32.mrb[143].mxu1  ;;  %6846 = vmatmul.mubr.msk.bf16.gmra.mrb[200].mxu0 %vm470_vm0, %v3544_v27  ;;  %v3478_v37 = vmax.f32 %v3266_v30, 0.0 }
 0x563   : > { %v3261_v36 = vadd.f32 %v8072_v41, %v3260_v35  ;;  %v3476_v39 = vmax.f32 %v3258_v32, 0.0 }
 0x564   : > { %v3479_v38 = vmax.f32 %v3269_v34, 0.0 }
 0x565   : > { %v3477_v40 = vmax.f32 %v3261_v36, 0.0 }
 0x566   : > { %v3546_v42 = vpack.c.bf16 %v3479_v38, %v3478_v37 }
 0x567   : > { %v3545_v43 = vpack.c.bf16 %v3477_v40, %v3476_v39  ;;  %v6783_v44 = vpop.f32.mrb[144].mxu1 }
 0x568   : > { %v3282_v45 = vadd.f32 %v6783_v44, %v8072_v41  ;;  %v3273_v46 = vpop.f32.mrb[145].mxu1 }
 0x569   : > { %v3274_v47 = vadd.f32 %v8072_v41, %v3273_v46  ;;  %v6784_v48 = vpop.f32.mrb[146].mxu1  ;;  %6849 = vmatprep.mubr.msk.bf16.mxu0 %vm470_vm0, %v3545_v43 }
 0x56a   : > { %v3285_v49 = vadd.f32 %v6784_v48, %v8072_v41  ;;  %v3276_v50 = vpop.f32.mrb[147].mxu1  ;;  %6850 = vmatmul.mubr.msk.bf16.gmra.mrb[204].mxu0 %vm470_vm0, %v3546_v42  ;;  %v3482_v52 = vmax.f32 %v3282_v45, 0.0 }
 0x56b   : > { %v3277_v51 = vadd.f32 %v8072_v41, %v3276_v50  ;;  %v3480_v54 = vmax.f32 %v3274_v47, 0.0 }
 0x56c   : > { %v3483_v53 = vmax.f32 %v3285_v49, 0.0 }
 0x56d   : > { %v3481_v55 = vmax.f32 %v3277_v51, 0.0 }
 0x56e   : > { %v3548_v56 = vpack.c.bf16 %v3483_v53, %v3482_v52 }
 0x56f   : > { %v3547_v57 = vpack.c.bf16 %v3481_v55, %v3480_v54  ;;  %v6787_v58 = vpop.f32.mrb[148].mxu1 }
 0x570   : > { %v3298_v59 = vadd.f32 %v6787_v58, %v8072_v41  ;;  %v3289_v60 = vpop.f32.mrb[149].mxu1 }
 0x571   : > { %v3290_v61 = vadd.f32 %v8072_v41, %v3289_v60  ;;  %v6788_v62 = vpop.f32.mrb[150].mxu1  ;;  %6853 = vmatprep.mubr.msk.bf16.mxu0 %vm470_vm0, %v3547_v57 }
 0x572   : > { %v3301_v63 = vadd.f32 %v6788_v62, %v8072_v41  ;;  %v3292_v0 = vpop.f32.mrb[151].mxu1  ;;  %6854 = vmatmul.mubr.msk.bf16.gmra.mrb[208].mxu0 %vm470_vm0, %v3548_v56  ;;  %v3486_v2 = vmax.f32 %v3298_v59, 0.0 }
 0x573   : > { %v3293_v1 = vadd.f32 %v8072_v41, %v3292_v0  ;;  %v3484_v4 = vmax.f32 %v3290_v61, 0.0 }
 0x574   : > { %v3487_v3 = vmax.f32 %v3301_v63, 0.0 }
 0x575   : > { %v3485_v5 = vmax.f32 %v3293_v1, 0.0 }
 0x576   : > { %v3550_v6 = vpack.c.bf16 %v3487_v3, %v3486_v2 }
 0x577   : > { %v3549_v7 = vpack.c.bf16 %v3485_v5, %v3484_v4  ;;  %v6791_v8 = vpop.f32.mrb[152].mxu1 }
 0x578   : > { %v3314_v9 = vadd.f32 %v6791_v8, %v8072_v41  ;;  %v3305_v10 = vpop.f32.mrb[153].mxu1 }
 0x579   : > { %v3306_v11 = vadd.f32 %v8072_v41, %v3305_v10  ;;  %v6792_v12 = vpop.f32.mrb[154].mxu1  ;;  %6857 = vmatprep.mubr.msk.bf16.mxu0 %vm470_vm0, %v3549_v7 }
 0x57a   : > { %v3317_v13 = vadd.f32 %v6792_v12, %v8072_v41  ;;  %v3308_v14 = vpop.f32.mrb[155].mxu1  ;;  %6858 = vmatmul.mubr.msk.bf16.gmra.mrb[212].mxu0 %vm470_vm0, %v3550_v6  ;;  %v3490_v16 = vmax.f32 %v3314_v9, 0.0 }
 0x57b   : > { %v3309_v15 = vadd.f32 %v8072_v41, %v3308_v14  ;;  %v3488_v18 = vmax.f32 %v3306_v11, 0.0 }
 0x57c   : > { %v3491_v17 = vmax.f32 %v3317_v13, 0.0 }
 0x57d   : > { %v3489_v19 = vmax.f32 %v3309_v15, 0.0 }
 0x57e   : > { %v3552_v20 = vpack.c.bf16 %v3491_v17, %v3490_v16 }
 0x57f   : > { %v3551_v21 = vpack.c.bf16 %v3489_v19, %v3488_v18  ;;  %v6795_v22 = vpop.f32.mrb[156].mxu1 }
 0x580   : > { %v3330_v23 = vadd.f32 %v6795_v22, %v8072_v41  ;;  %v3321_v24 = vpop.f32.mrb[157].mxu1 }
 0x581   : > { %v3322_v25 = vadd.f32 %v8072_v41, %v3321_v24  ;;  %v6796_v26 = vpop.f32.mrb[158].mxu1  ;;  %6861 = vmatprep.mubr.msk.bf16.mxu0 %vm470_vm0, %v3551_v21 }
 0x582   : > { %v3333_v27 = vadd.f32 %v6796_v26, %v8072_v41  ;;  %v3324_v28 = vpop.f32.mrb[159].mxu1  ;;  %6862 = vmatmul.mubr.msk.bf16.gmra.mrb[216].mxu0 %vm470_vm0, %v3552_v20  ;;  %v3494_v30 = vmax.f32 %v3330_v23, 0.0 }
 0x583   : > { %v3325_v29 = vadd.f32 %v8072_v41, %v3324_v28  ;;  %v3492_v32 = vmax.f32 %v3322_v25, 0.0 }
 0x584   : > { %v3495_v31 = vmax.f32 %v3333_v27, 0.0 }
 0x585   : > { %v3493_v33 = vmax.f32 %v3325_v29, 0.0 }
 0x586   : > { %v3554_v34 = vpack.c.bf16 %v3495_v31, %v3494_v30 }
 0x587   : > { %v3553_v35 = vpack.c.bf16 %v3493_v33, %v3492_v32  ;;  %v6799_v36 = vpop.f32.mrb[160].mxu1 }
 0x588   : > { %v3346_v37 = vadd.f32 %v6799_v36, %v8072_v41  ;;  %v3337_v38 = vpop.f32.mrb[161].mxu1 }
 0x589   : > { %v3338_v39 = vadd.f32 %v8072_v41, %v3337_v38  ;;  %v6800_v40 = vpop.f32.mrb[162].mxu1  ;;  %6865 = vmatprep.mubr.msk.bf16.mxu0 %vm470_vm0, %v3553_v35 }
 0x58a   : > { %v3349_v42 = vadd.f32 %v6800_v40, %v8072_v41  ;;  %v3340_v43 = vpop.f32.mrb[163].mxu1  ;;  %6866 = vmatmul.mubr.msk.bf16.gmra.mrb[220].mxu0 %vm470_vm0, %v3554_v34  ;;  %v3498_v45 = vmax.f32 %v3346_v37, 0.0 }
 0x58b   : > { %v3341_v44 = vadd.f32 %v8072_v41, %v3340_v43  ;;  %v3496_v47 = vmax.f32 %v3338_v39, 0.0 }
 0x58c   : > { %v3499_v46 = vmax.f32 %v3349_v42, 0.0 }
 0x58d   : > { %v3497_v48 = vmax.f32 %v3341_v44, 0.0 }
 0x58e   : > { %v3556_v49 = vpack.c.bf16 %v3499_v46, %v3498_v45 }
 0x58f   : > { %v3555_v50 = vpack.c.bf16 %v3497_v48, %v3496_v47  ;;  %v6803_v51 = vpop.f32.mrb[164].mxu1 }
 0x590   : > { %v3362_v52 = vadd.f32 %v6803_v51, %v8072_v41  ;;  %v3353_v53 = vpop.f32.mrb[165].mxu1 }
 0x591   : > { %v3354_v54 = vadd.f32 %v8072_v41, %v3353_v53  ;;  %v6804_v55 = vpop.f32.mrb[166].mxu1  ;;  %6869 = vmatprep.mubr.msk.bf16.mxu0 %vm470_vm0, %v3555_v50 }
 0x592   : > { %v3365_v56 = vadd.f32 %v6804_v55, %v8072_v41  ;;  %v3356_v57 = vpop.f32.mrb[167].mxu1  ;;  %6870 = vmatmul.mubr.msk.bf16.gmra.mrb[224].mxu0 %vm470_vm0, %v3556_v49  ;;  %v3502_v59 = vmax.f32 %v3362_v52, 0.0 }
 0x593   : > { %v3357_v58 = vadd.f32 %v8072_v41, %v3356_v57  ;;  %v3500_v61 = vmax.f32 %v3354_v54, 0.0 }
 0x594   : > { %v3503_v60 = vmax.f32 %v3365_v56, 0.0 }
 0x595   : > { %v3501_v62 = vmax.f32 %v3357_v58, 0.0 }
 0x596   : > { %v3558_v63 = vpack.c.bf16 %v3503_v60, %v3502_v59 }
 0x597   : > { %v3557_v0 = vpack.c.bf16 %v3501_v62, %v3500_v61  ;;  %v6807_v1 = vpop.f32.mrb[168].mxu1 }
 0x598   : > { %v3378_v2 = vadd.f32 %v6807_v1, %v8072_v41  ;;  %v3369_v3 = vpop.f32.mrb[169].mxu1 }
 0x599   : > { %v3370_v4 = vadd.f32 %v8072_v41, %v3369_v3  ;;  %v6808_v5 = vpop.f32.mrb[170].mxu1  ;;  %6873 = vmatprep.mubr.msk.bf16.mxu0 %vm470_vm0, %v3557_v0 }
 0x59a   : > { %v3381_v6 = vadd.f32 %v6808_v5, %v8072_v41  ;;  %v3372_v7 = vpop.f32.mrb[171].mxu1  ;;  %6874 = vmatmul.mubr.msk.bf16.gmra.mrb[228].mxu0 %vm470_vm0, %v3558_v63  ;;  %v3506_v9 = vmax.f32 %v3378_v2, 0.0 }
 0x59b   : > { %v3373_v8 = vadd.f32 %v8072_v41, %v3372_v7  ;;  %v3504_v11 = vmax.f32 %v3370_v4, 0.0 }
 0x59c   : > { %v3507_v10 = vmax.f32 %v3381_v6, 0.0 }
 0x59d   : > { %v3505_v12 = vmax.f32 %v3373_v8, 0.0 }
 0x59e   : > { %v3560_v13 = vpack.c.bf16 %v3507_v10, %v3506_v9 }
 0x59f   : > { %v3559_v14 = vpack.c.bf16 %v3505_v12, %v3504_v11  ;;  %v6811_v15 = vpop.f32.mrb[172].mxu1 }
 0x5a0   : > { %v3394_v16 = vadd.f32 %v6811_v15, %v8072_v41  ;;  %v3385_v17 = vpop.f32.mrb[173].mxu1 }
 0x5a1   : > { %v3386_v18 = vadd.f32 %v8072_v41, %v3385_v17  ;;  %v6812_v19 = vpop.f32.mrb[174].mxu1  ;;  %6877 = vmatprep.mubr.msk.bf16.mxu0 %vm470_vm0, %v3559_v14 }
 0x5a2   : > { %v3397_v20 = vadd.f32 %v6812_v19, %v8072_v41  ;;  %v3388_v21 = vpop.f32.mrb[175].mxu1  ;;  %6878 = vmatmul.mubr.msk.bf16.gmra.mrb[232].mxu0 %vm470_vm0, %v3560_v13  ;;  %v3510_v23 = vmax.f32 %v3394_v16, 0.0 }
 0x5a3   : > { %v3389_v22 = vadd.f32 %v8072_v41, %v3388_v21  ;;  %v3508_v25 = vmax.f32 %v3386_v18, 0.0 }
 0x5a4   : > { %v3511_v24 = vmax.f32 %v3397_v20, 0.0 }
 0x5a5   : > { %v3509_v26 = vmax.f32 %v3389_v22, 0.0  ;;  %v7198_v22 = vld [vmem:[%s8681_s5] sm:$0xff]  }
 0x5a6   : > { %v3562_v27 = vpack.c.bf16 %v3511_v24, %v3510_v23  ;;  %6973 = vmatprep.subr.bf16.mxu0 %v7198_v22 }
 0x5a7   : > { %v3561_v28 = vpack.c.bf16 %v3509_v26, %v3508_v25  ;;  %v6815_v29 = vpop.f32.mrb[176].mxu1  ;;  %6974 = vmatpush3.bf16.msra.mxu0 %v7198_v22 }
 0x5a8   : > { %v3410_v30 = vadd.f32 %v6815_v29, %v8072_v41  ;;  %v3401_v31 = vpop.f32.mrb[177].mxu1 }
 0x5a9   : > { %v3402_v32 = vadd.f32 %v8072_v41, %v3401_v31  ;;  %v6816_v33 = vpop.f32.mrb[178].mxu1  ;;  %6881 = vmatprep.mubr.msk.bf16.mxu0 %vm470_vm0, %v3561_v28  ;;  %v7200_v31 = vld [vmem:[%s8681_s5 + $0x10] sm:$0xff]  }
 0x5aa   : > { %v3413_v34 = vadd.f32 %v6816_v33, %v8072_v41  ;;  %v3404_v35 = vpop.f32.mrb[179].mxu1  ;;  %6882 = vmatmul.mubr.msk.bf16.gmra.mrb[236].mxu0 %vm470_vm0, %v3562_v27  ;;  %v3514_v37 = vmax.f32 %v3410_v30, 0.0  ;;  %v7199_v30 = vld [vmem:[%s8681_s5 + $0x8] sm:$0xff]  }
 0x5ab   : > { %v3405_v36 = vadd.f32 %v8072_v41, %v3404_v35  ;;  %v3512_v39 = vmax.f32 %v3402_v32, 0.0  ;;  %6975 = vmatprep.subr.bf16.mxu0 %v7199_v30 }
 0x5ac   : > { %v3515_v38 = vmax.f32 %v3413_v34, 0.0  ;;  %6976 = vmatpush3.bf16.msra.mxu0 %v7199_v30 }
 0x5ad   : > { %v3513_v40 = vmax.f32 %v3405_v36, 0.0  ;;  %6977 = vmatprep.subr.bf16.mxu0 %v7200_v31 }
 0x5ae   : > { %v3564_v42 = vpack.c.bf16 %v3515_v38, %v3514_v37  ;;  %v7201_v38 = vld [vmem:[%s8681_s5 + $0x18] sm:$0xff]  }
 0x5af   : > { %v3563_v43 = vpack.c.bf16 %v3513_v40, %v3512_v39  ;;  %v6819_v44 = vpop.f32.mrb[180].mxu1 }
 0x5b0   : > { %v3426_v45 = vadd.f32 %v6819_v44, %v8072_v41  ;;  %v3417_v46 = vpop.f32.mrb[181].mxu1  ;;  %6978 = vmatpush3.bf16.msra.mxu0 %v7200_v31 }
 0x5b1   : > { %v3418_v47 = vadd.f32 %v8072_v41, %v3417_v46  ;;  %v6820_v48 = vpop.f32.mrb[182].mxu1  ;;  %6885 = vmatprep.mubr.msk.bf16.mxu0 %vm470_vm0, %v3563_v43  ;;  %6979 = vmatprep.subr.bf16.mxu0 %v7201_v38 }
 0x5b2   : > { %v3429_v49 = vadd.f32 %v6820_v48, %v8072_v41  ;;  %v3420_v50 = vpop.f32.mrb[183].mxu1  ;;  %6886 = vmatmul.mubr.msk.bf16.gmra.mrb[240].mxu0 %vm470_vm0, %v3564_v42  ;;  %v3518_v52 = vmax.f32 %v3426_v45, 0.0 }
 0x5b3   : > { %v3421_v51 = vadd.f32 %v8072_v41, %v3420_v50  ;;  %v3516_v54 = vmax.f32 %v3418_v47, 0.0 }
 0x5b4   : > { %v3519_v53 = vmax.f32 %v3429_v49, 0.0  ;;  %6980 = vmatpush3.bf16.msra.mxu0 %v7201_v38 }
 0x5b5   : > { %v3517_v55 = vmax.f32 %v3421_v51, 0.0 }
 0x5b6   : > { %v3566_v56 = vpack.c.bf16 %v3519_v53, %v3518_v52 }
 0x5b7   : > { %v3565_v57 = vpack.c.bf16 %v3517_v55, %v3516_v54  ;;  %v6823_v58 = vpop.f32.mrb[184].mxu1 }
 0x5b8   : > { %v3442_v59 = vadd.f32 %v6823_v58, %v8072_v41  ;;  %v3433_v60 = vpop.f32.mrb[185].mxu1 }
 0x5b9   : > { %v3434_v61 = vadd.f32 %v8072_v41, %v3433_v60  ;;  %v6824_v62 = vpop.f32.mrb[186].mxu1  ;;  %6889 = vmatprep.mubr.msk.bf16.mxu0 %vm470_vm0, %v3565_v57 }
 0x5ba   : > { %v3445_v63 = vadd.f32 %v6824_v62, %v8072_v41  ;;  %v3436_v0 = vpop.f32.mrb[187].mxu1  ;;  %6890 = vmatmul.mubr.msk.bf16.gmra.mrb[244].mxu0 %vm470_vm0, %v3566_v56  ;;  %v3522_v2 = vmax.f32 %v3442_v59, 0.0 }
 0x5bb   : > { %v3437_v1 = vadd.f32 %v8072_v41, %v3436_v0  ;;  %v3520_v4 = vmax.f32 %v3434_v61, 0.0 }
 0x5bc   : > { %v3523_v3 = vmax.f32 %v3445_v63, 0.0 }
 0x5bd   : > { %v3521_v5 = vmax.f32 %v3437_v1, 0.0 }
 0x5be   : > { %v3568_v6 = vpack.c.bf16 %v3523_v3, %v3522_v2 }
 0x5bf   : > { %v3567_v7 = vpack.c.bf16 %v3521_v5, %v3520_v4  ;;  %v6827_v8 = vpop.f32.mrb[188].mxu1 }
 0x5c0   : > { %v3458_v9 = vadd.f32 %v6827_v8, %v8072_v41  ;;  %v3449_v10 = vpop.f32.mrb[189].mxu1 }
 0x5c1   : > { %v3450_v11 = vadd.f32 %v8072_v41, %v3449_v10  ;;  %v6828_v12 = vpop.f32.mrb[190].mxu1  ;;  %6893 = vmatprep.mubr.msk.bf16.mxu0 %vm470_vm0, %v3567_v7 }
 0x5c2   : > { %v3461_v13 = vadd.f32 %v6828_v12, %v8072_v41  ;;  %v3452_v14 = vpop.f32.mrb[191].mxu1  ;;  %6894 = vmatmul.mubr.msk.bf16.gmra.mrb[248].mxu0 %vm470_vm0, %v3568_v6  ;;  %v3526_v16 = vmax.f32 %v3458_v9, 0.0 }
 0x5c3   : > { %v3453_v15 = vadd.f32 %v8072_v41, %v3452_v14  ;;  %v3524_v18 = vmax.f32 %v3450_v11, 0.0  ;;  %v8185_v41 = vld [vmem:[%s8680_s4 + $0x5] ss:$0 sm:$0xff] }
 0x5c4   : > { %v3527_v17 = vmax.f32 %v3461_v13, 0.0 }
 0x5c5   : > { %v3525_v19 = vmax.f32 %v3453_v15, 0.0 }
 0x5c6   : > { %v3570_v20 = vpack.c.bf16 %v3527_v17, %v3526_v16 }
 0x5c7   : > { %v3569_v21 = vpack.c.bf16 %v3525_v19, %v3524_v18 }
 0x5c9   : > { %6897 = vmatprep.mubr.msk.bf16.mxu0 %vm470_vm0, %v3569_v21 }
 0x5ca   : > { %6898 = vmatmul.mubr.msk.bf16.gmra.mrb[252].mxu0 %vm470_vm0, %v3570_v20 }
 0x625   : > { %v6839_v23 = vpop.f32.mrb[192].mxu0 }
 0x626   : > { %v3740_v24 = vadd.f32 %v6839_v23, %v8185_v41  ;;  %v3731_v25 = vpop.f32.mrb[193].mxu0 }
 0x627   : > { %v3732_v26 = vadd.f32 %v8185_v41, %v3731_v25  ;;  %v6840_v27 = vpop.f32.mrb[194].mxu0 }
 0x628   : > { %v3743_v28 = vadd.f32 %v6840_v27, %v8185_v41  ;;  %v3734_v29 = vpop.f32.mrb[195].mxu0  ;;  %v3988_v33 = vmax.f32 %v3740_v24, 0.0 }
 0x629   : > { %v3735_v32 = vadd.f32 %v8185_v41, %v3734_v29  ;;  %v3986_v35 = vmax.f32 %v3732_v26, 0.0 }
 0x62a   : > { %v3989_v34 = vmax.f32 %v3743_v28, 0.0 }
 0x62b   : > { %v3987_v36 = vmax.f32 %v3735_v32, 0.0 }
 0x62c   : > { %v4062_v37 = vpack.c.bf16 %v3989_v34, %v3988_v33 }
 0x62d   : > { %v4061_v39 = vpack.c.bf16 %v3987_v36, %v3986_v35  ;;  %v6843_v40 = vpop.f32.mrb[196].mxu0 }
 0x62e   : > { %v3756_v42 = vadd.f32 %v6843_v40, %v8185_v41  ;;  %v3747_v43 = vpop.f32.mrb[197].mxu0 }
 0x62f   : > { %v3748_v44 = vadd.f32 %v8185_v41, %v3747_v43  ;;  %v6844_v45 = vpop.f32.mrb[198].mxu0  ;;  %6909 = vmatprep.mubr.msk.bf16.mxu1 %vm470_vm0, %v4061_v39 }
 0x630   : > { %v3759_v46 = vadd.f32 %v6844_v45, %v8185_v41  ;;  %v3750_v47 = vpop.f32.mrb[199].mxu0  ;;  %6910 = vmatmul.mubr.msk.bf16.vlgmr.msra.gmra.mrb[192].mxu1 %vm470_vm0, %v4062_v37  ;;  %v3992_v49 = vmax.f32 %v3756_v42, 0.0 }
 0x631   : > { %v3751_v48 = vadd.f32 %v8185_v41, %v3750_v47  ;;  %v3990_v51 = vmax.f32 %v3748_v44, 0.0 }
 0x632   : > { %v3993_v50 = vmax.f32 %v3759_v46, 0.0 }
 0x633   : > { %v3991_v52 = vmax.f32 %v3751_v48, 0.0 }
 0x634   : > { %v4064_v53 = vpack.c.bf16 %v3993_v50, %v3992_v49 }
 0x635   : > { %v4063_v54 = vpack.c.bf16 %v3991_v52, %v3990_v51  ;;  %v6847_v55 = vpop.f32.mrb[200].mxu0 }
 0x636   : > { %v3772_v56 = vadd.f32 %v6847_v55, %v8185_v41  ;;  %v3763_v57 = vpop.f32.mrb[201].mxu0 }
 0x637   : > { %v3764_v58 = vadd.f32 %v8185_v41, %v3763_v57  ;;  %v6848_v59 = vpop.f32.mrb[202].mxu0  ;;  %6913 = vmatprep.mubr.msk.bf16.mxu1 %vm470_vm0, %v4063_v54 }
 0x638   : > { %v3775_v60 = vadd.f32 %v6848_v59, %v8185_v41  ;;  %v3766_v61 = vpop.f32.mrb[203].mxu0  ;;  %6914 = vmatmul.mubr.msk.bf16.gmra.mrb[196].mxu1 %vm470_vm0, %v4064_v53  ;;  %v3996_v63 = vmax.f32 %v3772_v56, 0.0 }
 0x639   : > { %v3767_v62 = vadd.f32 %v8185_v41, %v3766_v61  ;;  %v3994_v1 = vmax.f32 %v3764_v58, 0.0 }
 0x63a   : > { %v3997_v0 = vmax.f32 %v3775_v60, 0.0 }
 0x63b   : > { %v3995_v2 = vmax.f32 %v3767_v62, 0.0 }
 0x63c   : > { %v4066_v3 = vpack.c.bf16 %v3997_v0, %v3996_v63 }
 0x63d   : > { %v4065_v4 = vpack.c.bf16 %v3995_v2, %v3994_v1  ;;  %v6851_v5 = vpop.f32.mrb[204].mxu0 }
 0x63e   : > { %v3788_v6 = vadd.f32 %v6851_v5, %v8185_v41  ;;  %v3779_v7 = vpop.f32.mrb[205].mxu0 }
 0x63f   : > { %v3780_v8 = vadd.f32 %v8185_v41, %v3779_v7  ;;  %v6852_v9 = vpop.f32.mrb[206].mxu0  ;;  %6917 = vmatprep.mubr.msk.bf16.mxu1 %vm470_vm0, %v4065_v4 }
 0x640   : > { %v3791_v10 = vadd.f32 %v6852_v9, %v8185_v41  ;;  %v3782_v11 = vpop.f32.mrb[207].mxu0  ;;  %6918 = vmatmul.mubr.msk.bf16.gmra.mrb[200].mxu1 %vm470_vm0, %v4066_v3  ;;  %v4000_v13 = vmax.f32 %v3788_v6, 0.0 }
 0x641   : > { %v3783_v12 = vadd.f32 %v8185_v41, %v3782_v11  ;;  %v3998_v15 = vmax.f32 %v3780_v8, 0.0 }
 0x642   : > { %v4001_v14 = vmax.f32 %v3791_v10, 0.0 }
 0x643   : > { %v3999_v16 = vmax.f32 %v3783_v12, 0.0 }
 0x644   : > { %v4068_v17 = vpack.c.bf16 %v4001_v14, %v4000_v13 }
 0x645   : > { %v4067_v18 = vpack.c.bf16 %v3999_v16, %v3998_v15  ;;  %v6855_v19 = vpop.f32.mrb[208].mxu0 }
 0x646   : > { %v3804_v20 = vadd.f32 %v6855_v19, %v8185_v41  ;;  %v3795_v21 = vpop.f32.mrb[209].mxu0 }
 0x647   : > { %v3796_v22 = vadd.f32 %v8185_v41, %v3795_v21  ;;  %v6856_v23 = vpop.f32.mrb[210].mxu0  ;;  %6921 = vmatprep.mubr.msk.bf16.mxu1 %vm470_vm0, %v4067_v18 }
 0x648   : > { %v3807_v24 = vadd.f32 %v6856_v23, %v8185_v41  ;;  %v3798_v25 = vpop.f32.mrb[211].mxu0  ;;  %6922 = vmatmul.mubr.msk.bf16.gmra.mrb[204].mxu1 %vm470_vm0, %v4068_v17  ;;  %v4004_v27 = vmax.f32 %v3804_v20, 0.0 }
 0x649   : > { %v3799_v26 = vadd.f32 %v8185_v41, %v3798_v25  ;;  %v4002_v29 = vmax.f32 %v3796_v22, 0.0 }
 0x64a   : > { %v4005_v28 = vmax.f32 %v3807_v24, 0.0 }
 0x64b   : > { %v4003_v30 = vmax.f32 %v3799_v26, 0.0 }
 0x64c   : > { %v4070_v31 = vpack.c.bf16 %v4005_v28, %v4004_v27 }
 0x64d   : > { %v4069_v32 = vpack.c.bf16 %v4003_v30, %v4002_v29  ;;  %v6859_v33 = vpop.f32.mrb[212].mxu0 }
 0x64e   : > { %v3820_v34 = vadd.f32 %v6859_v33, %v8185_v41  ;;  %v3811_v35 = vpop.f32.mrb[213].mxu0 }
 0x64f   : > { %v3812_v36 = vadd.f32 %v8185_v41, %v3811_v35  ;;  %v6860_v37 = vpop.f32.mrb[214].mxu0  ;;  %6925 = vmatprep.mubr.msk.bf16.mxu1 %vm470_vm0, %v4069_v32 }
 0x650   : > { %v3823_v38 = vadd.f32 %v6860_v37, %v8185_v41  ;;  %v3814_v39 = vpop.f32.mrb[215].mxu0  ;;  %6926 = vmatmul.mubr.msk.bf16.gmra.mrb[208].mxu1 %vm470_vm0, %v4070_v31  ;;  %v4008_v42 = vmax.f32 %v3820_v34, 0.0 }
 0x651   : > { %v3815_v40 = vadd.f32 %v8185_v41, %v3814_v39  ;;  %v4006_v44 = vmax.f32 %v3812_v36, 0.0 }
 0x652   : > { %v4009_v43 = vmax.f32 %v3823_v38, 0.0 }
 0x653   : > { %v4007_v45 = vmax.f32 %v3815_v40, 0.0 }
 0x654   : > { %v4072_v46 = vpack.c.bf16 %v4009_v43, %v4008_v42 }
 0x655   : > { %v4071_v47 = vpack.c.bf16 %v4007_v45, %v4006_v44  ;;  %v6863_v48 = vpop.f32.mrb[216].mxu0 }
 0x656   : > { %v3836_v49 = vadd.f32 %v6863_v48, %v8185_v41  ;;  %v3827_v50 = vpop.f32.mrb[217].mxu0 }
 0x657   : > { %v3828_v51 = vadd.f32 %v8185_v41, %v3827_v50  ;;  %v6864_v52 = vpop.f32.mrb[218].mxu0  ;;  %6929 = vmatprep.mubr.msk.bf16.mxu1 %vm470_vm0, %v4071_v47 }
 0x658   : > { %v3839_v53 = vadd.f32 %v6864_v52, %v8185_v41  ;;  %v3830_v54 = vpop.f32.mrb[219].mxu0  ;;  %6930 = vmatmul.mubr.msk.bf16.gmra.mrb[212].mxu1 %vm470_vm0, %v4072_v46  ;;  %v4012_v56 = vmax.f32 %v3836_v49, 0.0 }
 0x659   : > { %v3831_v55 = vadd.f32 %v8185_v41, %v3830_v54  ;;  %v4010_v58 = vmax.f32 %v3828_v51, 0.0 }
 0x65a   : > { %v4013_v57 = vmax.f32 %v3839_v53, 0.0 }
 0x65b   : > { %v4011_v59 = vmax.f32 %v3831_v55, 0.0 }
 0x65c   : > { %v4074_v60 = vpack.c.bf16 %v4013_v57, %v4012_v56 }
 0x65d   : > { %v4073_v61 = vpack.c.bf16 %v4011_v59, %v4010_v58  ;;  %v6867_v62 = vpop.f32.mrb[220].mxu0 }
 0x65e   : > { %v3852_v63 = vadd.f32 %v6867_v62, %v8185_v41  ;;  %v3843_v0 = vpop.f32.mrb[221].mxu0 }
 0x65f   : > { %v3844_v1 = vadd.f32 %v8185_v41, %v3843_v0  ;;  %v6868_v2 = vpop.f32.mrb[222].mxu0  ;;  %6933 = vmatprep.mubr.msk.bf16.mxu1 %vm470_vm0, %v4073_v61 }
 0x660   : > { %v3855_v3 = vadd.f32 %v6868_v2, %v8185_v41  ;;  %v3846_v4 = vpop.f32.mrb[223].mxu0  ;;  %6934 = vmatmul.mubr.msk.bf16.gmra.mrb[216].mxu1 %vm470_vm0, %v4074_v60  ;;  %v4016_v6 = vmax.f32 %v3852_v63, 0.0 }
 0x661   : > { %v3847_v5 = vadd.f32 %v8185_v41, %v3846_v4  ;;  %v4014_v8 = vmax.f32 %v3844_v1, 0.0 }
 0x662   : > { %v4017_v7 = vmax.f32 %v3855_v3, 0.0 }
 0x663   : > { %v4015_v9 = vmax.f32 %v3847_v5, 0.0 }
 0x664   : > { %v4076_v10 = vpack.c.bf16 %v4017_v7, %v4016_v6 }
 0x665   : > { %v4075_v11 = vpack.c.bf16 %v4015_v9, %v4014_v8  ;;  %v6871_v12 = vpop.f32.mrb[224].mxu0 }
 0x666   : > { %v3868_v13 = vadd.f32 %v6871_v12, %v8185_v41  ;;  %v3859_v14 = vpop.f32.mrb[225].mxu0 }
 0x667   : > { %v3860_v15 = vadd.f32 %v8185_v41, %v3859_v14  ;;  %v6872_v16 = vpop.f32.mrb[226].mxu0  ;;  %6937 = vmatprep.mubr.msk.bf16.mxu1 %vm470_vm0, %v4075_v11 }
 0x668   : > { %v3871_v17 = vadd.f32 %v6872_v16, %v8185_v41  ;;  %v3862_v18 = vpop.f32.mrb[227].mxu0  ;;  %6938 = vmatmul.mubr.msk.bf16.gmra.mrb[220].mxu1 %vm470_vm0, %v4076_v10  ;;  %v4020_v20 = vmax.f32 %v3868_v13, 0.0 }
 0x669   : > { %v3863_v19 = vadd.f32 %v8185_v41, %v3862_v18  ;;  %v4018_v22 = vmax.f32 %v3860_v15, 0.0 }
 0x66a   : > { %v4021_v21 = vmax.f32 %v3871_v17, 0.0 }
 0x66b   : > { %v4019_v23 = vmax.f32 %v3863_v19, 0.0 }
 0x66c   : > { %v4078_v24 = vpack.c.bf16 %v4021_v21, %v4020_v20 }
 0x66d   : > { %v4077_v25 = vpack.c.bf16 %v4019_v23, %v4018_v22  ;;  %v6875_v26 = vpop.f32.mrb[228].mxu0 }
 0x66e   : > { %v3884_v27 = vadd.f32 %v6875_v26, %v8185_v41  ;;  %v3875_v28 = vpop.f32.mrb[229].mxu0 }
 0x66f   : > { %v3876_v29 = vadd.f32 %v8185_v41, %v3875_v28  ;;  %v6876_v30 = vpop.f32.mrb[230].mxu0  ;;  %6941 = vmatprep.mubr.msk.bf16.mxu1 %vm470_vm0, %v4077_v25 }
 0x670   : > { %v3887_v31 = vadd.f32 %v6876_v30, %v8185_v41  ;;  %v3878_v32 = vpop.f32.mrb[231].mxu0  ;;  %6942 = vmatmul.mubr.msk.bf16.gmra.mrb[224].mxu1 %vm470_vm0, %v4078_v24  ;;  %v4024_v34 = vmax.f32 %v3884_v27, 0.0 }
 0x671   : > { %v3879_v33 = vadd.f32 %v8185_v41, %v3878_v32  ;;  %v4022_v36 = vmax.f32 %v3876_v29, 0.0 }
 0x672   : > { %v4025_v35 = vmax.f32 %v3887_v31, 0.0 }
 0x673   : > { %v4023_v37 = vmax.f32 %v3879_v33, 0.0 }
 0x674   : > { %v4080_v38 = vpack.c.bf16 %v4025_v35, %v4024_v34 }
 0x675   : > { %v4079_v39 = vpack.c.bf16 %v4023_v37, %v4022_v36  ;;  %v6879_v40 = vpop.f32.mrb[232].mxu0 }
 0x676   : > { %v3900_v42 = vadd.f32 %v6879_v40, %v8185_v41  ;;  %v3891_v43 = vpop.f32.mrb[233].mxu0 }
 0x677   : > { %v3892_v44 = vadd.f32 %v8185_v41, %v3891_v43  ;;  %v6880_v45 = vpop.f32.mrb[234].mxu0  ;;  %6945 = vmatprep.mubr.msk.bf16.mxu1 %vm470_vm0, %v4079_v39 }
 0x678   : > { %v3903_v46 = vadd.f32 %v6880_v45, %v8185_v41  ;;  %v3894_v47 = vpop.f32.mrb[235].mxu0  ;;  %6946 = vmatmul.mubr.msk.bf16.gmra.mrb[228].mxu1 %vm470_vm0, %v4080_v38  ;;  %v4028_v49 = vmax.f32 %v3900_v42, 0.0 }
 0x679   : > { %v3895_v48 = vadd.f32 %v8185_v41, %v3894_v47  ;;  %v4026_v51 = vmax.f32 %v3892_v44, 0.0 }
 0x67a   : > { %v4029_v50 = vmax.f32 %v3903_v46, 0.0 }
 0x67b   : > { %v4027_v52 = vmax.f32 %v3895_v48, 0.0 }
 0x67c   : > { %v4082_v53 = vpack.c.bf16 %v4029_v50, %v4028_v49 }
 0x67d   : > { %v4081_v54 = vpack.c.bf16 %v4027_v52, %v4026_v51  ;;  %v6883_v55 = vpop.f32.mrb[236].mxu0 }
 0x67e   : > { %v3916_v56 = vadd.f32 %v6883_v55, %v8185_v41  ;;  %v3907_v57 = vpop.f32.mrb[237].mxu0 }
 0x67f   : > { %v3908_v58 = vadd.f32 %v8185_v41, %v3907_v57  ;;  %v6884_v59 = vpop.f32.mrb[238].mxu0  ;;  %6949 = vmatprep.mubr.msk.bf16.mxu1 %vm470_vm0, %v4081_v54 }
 0x680   : > { %v3919_v60 = vadd.f32 %v6884_v59, %v8185_v41  ;;  %v3910_v61 = vpop.f32.mrb[239].mxu0  ;;  %6950 = vmatmul.mubr.msk.bf16.gmra.mrb[232].mxu1 %vm470_vm0, %v4082_v53  ;;  %v4032_v63 = vmax.f32 %v3916_v56, 0.0 }
 0x681   : > { %v3911_v62 = vadd.f32 %v8185_v41, %v3910_v61  ;;  %v4030_v1 = vmax.f32 %v3908_v58, 0.0 }
 0x682   : > { %v4033_v0 = vmax.f32 %v3919_v60, 0.0 }
 0x683   : > { %v4031_v2 = vmax.f32 %v3911_v62, 0.0  ;;  %v7202_v62 = vld [vmem:[%s8683_s7] sm:$0xff]  }
 0x684   : > { %v4084_v3 = vpack.c.bf16 %v4033_v0, %v4032_v63  ;;  %7045 = vmatprep.subr.bf16.mxu1 %v7202_v62  ;;  %v8301_v63 = vld [vmem:[%s8680_s4 + $0x6] ss:$0 sm:$0xff] }
 0x685   : > { %v4083_v4 = vpack.c.bf16 %v4031_v2, %v4030_v1  ;;  %v6887_v5 = vpop.f32.mrb[240].mxu0  ;;  %7046 = vmatpush3.bf16.msra.mxu1 %v7202_v62 }
 0x686   : > { %v3932_v6 = vadd.f32 %v6887_v5, %v8185_v41  ;;  %v3923_v7 = vpop.f32.mrb[241].mxu0 }
 0x687   : > { %v3924_v8 = vadd.f32 %v8185_v41, %v3923_v7  ;;  %v6888_v9 = vpop.f32.mrb[242].mxu0  ;;  %6953 = vmatprep.mubr.msk.bf16.mxu1 %vm470_vm0, %v4083_v4  ;;  %v7204_v7 = vld [vmem:[%s8683_s7 + $0x10] sm:$0xff]  }
 0x688   : > { %v3935_v10 = vadd.f32 %v6888_v9, %v8185_v41  ;;  %v3926_v11 = vpop.f32.mrb[243].mxu0  ;;  %6954 = vmatmul.mubr.msk.bf16.gmra.mrb[236].mxu1 %vm470_vm0, %v4084_v3  ;;  %v4036_v13 = vmax.f32 %v3932_v6, 0.0 }
 0x689   : > { %v3927_v12 = vadd.f32 %v8185_v41, %v3926_v11  ;;  %v4034_v15 = vmax.f32 %v3924_v8, 0.0  ;;  %v7205_v8 = vld [vmem:[%s8683_s7 + $0x18] sm:$0xff]  }
 0x68a   : > { %v4037_v14 = vmax.f32 %v3935_v10, 0.0 }
 0x68b   : > { %v4035_v16 = vmax.f32 %v3927_v12, 0.0 }
 0x68c   : > { %v4086_v17 = vpack.c.bf16 %v4037_v14, %v4036_v13 }
 0x68d   : > { %v4085_v18 = vpack.c.bf16 %v4035_v16, %v4034_v15  ;;  %v6891_v19 = vpop.f32.mrb[244].mxu0  ;;  %v7206_v15 = vld [vmem:[%s8683_s7 + $0x20] sm:$0xff]  }
 0x68e   : > { %v3948_v20 = vadd.f32 %v6891_v19, %v8185_v41  ;;  %v3939_v21 = vpop.f32.mrb[245].mxu0 }
 0x68f   : > { %v3940_v22 = vadd.f32 %v8185_v41, %v3939_v21  ;;  %v6892_v23 = vpop.f32.mrb[246].mxu0  ;;  %6957 = vmatprep.mubr.msk.bf16.mxu1 %vm470_vm0, %v4085_v18 }
 0x690   : > { %v3951_v24 = vadd.f32 %v6892_v23, %v8185_v41  ;;  %v3942_v25 = vpop.f32.mrb[247].mxu0  ;;  %6958 = vmatmul.mubr.msk.bf16.gmra.mrb[240].mxu1 %vm470_vm0, %v4086_v17  ;;  %v4040_v27 = vmax.f32 %v3948_v20, 0.0 }
 0x691   : > { %v3943_v26 = vadd.f32 %v8185_v41, %v3942_v25  ;;  %v4038_v29 = vmax.f32 %v3940_v22, 0.0 }
 0x692   : > { %v4041_v28 = vmax.f32 %v3951_v24, 0.0  ;;  %v7207_v24 = vld [vmem:[%s8683_s7 + $0x28] sm:$0xff]  }
 0x693   : > { %v4039_v30 = vmax.f32 %v3943_v26, 0.0 }
 0x694   : > { %v4088_v31 = vpack.c.bf16 %v4041_v28, %v4040_v27 }
 0x695   : > { %v4087_v32 = vpack.c.bf16 %v4039_v30, %v4038_v29  ;;  %v6895_v33 = vpop.f32.mrb[248].mxu0 }
 0x696   : > { %v3964_v34 = vadd.f32 %v6895_v33, %v8185_v41  ;;  %v3955_v35 = vpop.f32.mrb[249].mxu0 }
 0x697   : > { %v3956_v36 = vadd.f32 %v8185_v41, %v3955_v35  ;;  %v6896_v37 = vpop.f32.mrb[250].mxu0  ;;  %6961 = vmatprep.mubr.msk.bf16.mxu1 %vm470_vm0, %v4087_v32 }
 0x698   : > { %v3967_v38 = vadd.f32 %v6896_v37, %v8185_v41  ;;  %v3958_v39 = vpop.f32.mrb[251].mxu0  ;;  %6962 = vmatmul.mubr.msk.bf16.gmra.mrb[244].mxu1 %vm470_vm0, %v4088_v31  ;;  %v4044_v42 = vmax.f32 %v3964_v34, 0.0  ;;  %v7208_v31 = vld [vmem:[%s8683_s7 + $0x30] sm:$0xff]  }
 0x699   : > { %v3959_v40 = vadd.f32 %v8185_v41, %v3958_v39  ;;  %v4042_v44 = vmax.f32 %v3956_v36, 0.0 }
 0x69a   : > { %v4045_v43 = vmax.f32 %v3967_v38, 0.0 }
 0x69b   : > { %v4043_v45 = vmax.f32 %v3959_v40, 0.0  ;;  %v7209_v40 = vld [vmem:[%s8683_s7 + $0x38] sm:$0xff]  }
 0x69c   : > { %v4090_v46 = vpack.c.bf16 %v4045_v43, %v4044_v42 }
 0x69d   : > { %v4089_v47 = vpack.c.bf16 %v4043_v45, %v4042_v44  ;;  %v6899_v48 = vpop.f32.mrb[252].mxu0 }
 0x69e   : > { %v3980_v49 = vadd.f32 %v6899_v48, %v8185_v41  ;;  %v3971_v50 = vpop.f32.mrb[253].mxu0 }
 0x69f   : > { %v3972_v51 = vadd.f32 %v8185_v41, %v3971_v50  ;;  %v6900_v52 = vpop.f32.mrb[254].mxu0  ;;  %6965 = vmatprep.mubr.msk.bf16.mxu1 %vm470_vm0, %v4089_v47 }
 0x6a0   : > { %v3983_v53 = vadd.f32 %v6900_v52, %v8185_v41  ;;  %v3974_v54 = vpop.f32.mrb[255].mxu0  ;;  %6966 = vmatmul.mubr.msk.bf16.gmra.mrb[248].mxu1 %vm470_vm0, %v4090_v46  ;;  %v4048_v56 = vmax.f32 %v3980_v49, 0.0 }
 0x6a1   : > { %v3975_v55 = vadd.f32 %v8185_v41, %v3974_v54  ;;  %v4046_v58 = vmax.f32 %v3972_v51, 0.0  ;;  %v7203_v41 = vld [vmem:[%s8683_s7 + $0x8] sm:$0xff]  }
 0x6a2   : > { %v4049_v57 = vmax.f32 %v3983_v53, 0.0  ;;  %7047 = vmatprep.subr.bf16.mxu1 %v7203_v41 }
 0x6a3   : > { %v4047_v59 = vmax.f32 %v3975_v55, 0.0  ;;  %7048 = vmatpush3.bf16.msra.mxu1 %v7203_v41 }
 0x6a4   : > { %v4092_v60 = vpack.c.bf16 %v4049_v57, %v4048_v56  ;;  %7049 = vmatprep.subr.bf16.mxu1 %v7204_v7 }
 0x6a5   : > { %v4091_v61 = vpack.c.bf16 %v4047_v59, %v4046_v58 }
 0x6a7   : > { %6969 = vmatprep.mubr.msk.bf16.mxu1 %vm470_vm0, %v4091_v61  ;;  %7050 = vmatpush3.bf16.msra.mxu1 %v7204_v7 }
 0x6a8   : > { %6970 = vmatmul.mubr.msk.bf16.gmra.mrb[252].mxu1 %vm470_vm0, %v4092_v60  ;;  %7051 = vmatprep.subr.bf16.mxu1 %v7205_v8 }
 0x6ab   : > { %7052 = vmatpush3.bf16.msra.mxu1 %v7205_v8 }
 0x6ac   : > { %7053 = vmatprep.subr.bf16.mxu1 %v7206_v15 }
 0x6af   : > { %7054 = vmatpush3.bf16.msra.mxu1 %v7206_v15 }
 0x6b0   : > { %7055 = vmatprep.subr.bf16.mxu1 %v7207_v24 }
 0x6b3   : > { %7056 = vmatpush3.bf16.msra.mxu1 %v7207_v24 }
 0x6b4   : > { %7057 = vmatprep.subr.bf16.mxu1 %v7208_v31 }
 0x6b7   : > { %7058 = vmatpush3.bf16.msra.mxu1 %v7208_v31 }
 0x6b8   : > { %7059 = vmatprep.subr.bf16.mxu1 %v7209_v40 }
 0x6bb   : > { %7060 = vmatpush3.bf16.msra.mxu1 %v7209_v40 }
 0x703   : > { %v6911_v0 = vpop.f32.mrb[192].mxu1 }
 0x704   : > { %v4262_v1 = vadd.f32 %v6911_v0, %v8301_v63  ;;  %v4253_v2 = vpop.f32.mrb[193].mxu1 }
 0x705   : > { %v4254_v3 = vadd.f32 %v8301_v63, %v4253_v2  ;;  %v6912_v4 = vpop.f32.mrb[194].mxu1 }
 0x706   : > { %v4265_v5 = vadd.f32 %v6912_v4, %v8301_v63  ;;  %v4256_v6 = vpop.f32.mrb[195].mxu1  ;;  %v4510_v10 = vmax.f32 %v4262_v1, 0.0 }
 0x707   : > { %v4257_v9 = vadd.f32 %v8301_v63, %v4256_v6  ;;  %v4508_v12 = vmax.f32 %v4254_v3, 0.0 }
 0x708   : > { %v4511_v11 = vmax.f32 %v4265_v5, 0.0 }
 0x709   : > { %v4509_v13 = vmax.f32 %v4257_v9, 0.0 }
 0x70a   : > { %v4582_v14 = vpack.c.bf16 %v4511_v11, %v4510_v10 }
 0x70b   : > { %v4581_v16 = vpack.c.bf16 %v4509_v13, %v4508_v12  ;;  %v6915_v17 = vpop.f32.mrb[196].mxu1 }
 0x70c   : > { %v4278_v18 = vadd.f32 %v6915_v17, %v8301_v63  ;;  %v4269_v19 = vpop.f32.mrb[197].mxu1 }
 0x70d   : > { %v4270_v20 = vadd.f32 %v8301_v63, %v4269_v19  ;;  %v6916_v21 = vpop.f32.mrb[198].mxu1  ;;  %6981 = vmatprep.mubr.msk.bf16.mxu0 %vm470_vm0, %v4581_v16 }
 0x70e   : > { %v4281_v22 = vadd.f32 %v6916_v21, %v8301_v63  ;;  %v4272_v23 = vpop.f32.mrb[199].mxu1  ;;  %6982 = vmatmul.mubr.msk.bf16.vlgmr.msra.gmra.mrb[0].mxu0 %vm470_vm0, %v4582_v14  ;;  %v4514_v26 = vmax.f32 %v4278_v18, 0.0 }
 0x70f   : > { %v4273_v25 = vadd.f32 %v8301_v63, %v4272_v23  ;;  %v4512_v28 = vmax.f32 %v4270_v20, 0.0 }
 0x710   : > { %v4515_v27 = vmax.f32 %v4281_v22, 0.0 }
 0x711   : > { %v4513_v29 = vmax.f32 %v4273_v25, 0.0 }
 0x712   : > { %v4584_v30 = vpack.c.bf16 %v4515_v27, %v4514_v26 }
 0x713   : > { %v4583_v32 = vpack.c.bf16 %v4513_v29, %v4512_v28  ;;  %v6919_v33 = vpop.f32.mrb[200].mxu1 }
 0x714   : > { %v4294_v34 = vadd.f32 %v6919_v33, %v8301_v63  ;;  %v4285_v35 = vpop.f32.mrb[201].mxu1 }
 0x715   : > { %v4286_v36 = vadd.f32 %v8301_v63, %v4285_v35  ;;  %v6920_v37 = vpop.f32.mrb[202].mxu1  ;;  %6985 = vmatprep.mubr.msk.bf16.mxu0 %vm470_vm0, %v4583_v32 }
 0x716   : > { %v4297_v38 = vadd.f32 %v6920_v37, %v8301_v63  ;;  %v4288_v39 = vpop.f32.mrb[203].mxu1  ;;  %6986 = vmatmul.mubr.msk.bf16.gmra.mrb[4].mxu0 %vm470_vm0, %v4584_v30  ;;  %v4518_v43 = vmax.f32 %v4294_v34, 0.0 }
 0x717   : > { %v4289_v42 = vadd.f32 %v8301_v63, %v4288_v39  ;;  %v4516_v45 = vmax.f32 %v4286_v36, 0.0 }
 0x718   : > { %v4519_v44 = vmax.f32 %v4297_v38, 0.0 }
 0x719   : > { %v4517_v46 = vmax.f32 %v4289_v42, 0.0 }
 0x71a   : > { %v4586_v47 = vpack.c.bf16 %v4519_v44, %v4518_v43 }
 0x71b   : > { %v4585_v48 = vpack.c.bf16 %v4517_v46, %v4516_v45  ;;  %v6923_v49 = vpop.f32.mrb[204].mxu1 }
 0x71c   : > { %v4310_v50 = vadd.f32 %v6923_v49, %v8301_v63  ;;  %v4301_v51 = vpop.f32.mrb[205].mxu1 }
 0x71d   : > { %v4302_v52 = vadd.f32 %v8301_v63, %v4301_v51  ;;  %v6924_v53 = vpop.f32.mrb[206].mxu1  ;;  %6989 = vmatprep.mubr.msk.bf16.mxu0 %vm470_vm0, %v4585_v48 }
 0x71e   : > { %v4313_v54 = vadd.f32 %v6924_v53, %v8301_v63  ;;  %v4304_v55 = vpop.f32.mrb[207].mxu1  ;;  %6990 = vmatmul.mubr.msk.bf16.gmra.mrb[8].mxu0 %vm470_vm0, %v4586_v47  ;;  %v4522_v57 = vmax.f32 %v4310_v50, 0.0 }
 0x71f   : > { %v4305_v56 = vadd.f32 %v8301_v63, %v4304_v55  ;;  %v4520_v59 = vmax.f32 %v4302_v52, 0.0 }
 0x720   : > { %v4523_v58 = vmax.f32 %v4313_v54, 0.0 }
 0x721   : > { %v4521_v60 = vmax.f32 %v4305_v56, 0.0 }
 0x722   : > { %v4588_v61 = vpack.c.bf16 %v4523_v58, %v4522_v57 }
 0x723   : > { %v4587_v62 = vpack.c.bf16 %v4521_v60, %v4520_v59  ;;  %v6927_v41 = vpop.f32.mrb[208].mxu1 }
 0x724   : > { %v4326_v0 = vadd.f32 %v6927_v41, %v8301_v63  ;;  %v4317_v1 = vpop.f32.mrb[209].mxu1 }
 0x725   : > { %v4318_v2 = vadd.f32 %v8301_v63, %v4317_v1  ;;  %v6928_v3 = vpop.f32.mrb[210].mxu1  ;;  %6993 = vmatprep.mubr.msk.bf16.mxu0 %vm470_vm0, %v4587_v62 }
 0x726   : > { %v4329_v4 = vadd.f32 %v6928_v3, %v8301_v63  ;;  %v4320_v5 = vpop.f32.mrb[211].mxu1  ;;  %6994 = vmatmul.mubr.msk.bf16.gmra.mrb[12].mxu0 %vm470_vm0, %v4588_v61  ;;  %v4526_v7 = vmax.f32 %v4326_v0, 0.0 }
 0x727   : > { %v4321_v6 = vadd.f32 %v8301_v63, %v4320_v5  ;;  %v4524_v9 = vmax.f32 %v4318_v2, 0.0 }
 0x728   : > { %v4527_v8 = vmax.f32 %v4329_v4, 0.0 }
 0x729   : > { %v4525_v10 = vmax.f32 %v4321_v6, 0.0 }
 0x72a   : > { %v4590_v11 = vpack.c.bf16 %v4527_v8, %v4526_v7 }
 0x72b   : > { %v4589_v12 = vpack.c.bf16 %v4525_v10, %v4524_v9  ;;  %v6931_v13 = vpop.f32.mrb[212].mxu1 }
 0x72c   : > { %v4342_v14 = vadd.f32 %v6931_v13, %v8301_v63  ;;  %v4333_v15 = vpop.f32.mrb[213].mxu1 }
 0x72d   : > { %v4334_v16 = vadd.f32 %v8301_v63, %v4333_v15  ;;  %v6932_v17 = vpop.f32.mrb[214].mxu1  ;;  %6997 = vmatprep.mubr.msk.bf16.mxu0 %vm470_vm0, %v4589_v12 }
 0x72e   : > { %v4345_v18 = vadd.f32 %v6932_v17, %v8301_v63  ;;  %v4336_v19 = vpop.f32.mrb[215].mxu1  ;;  %6998 = vmatmul.mubr.msk.bf16.gmra.mrb[16].mxu0 %vm470_vm0, %v4590_v11  ;;  %v4530_v21 = vmax.f32 %v4342_v14, 0.0 }
 0x72f   : > { %v4337_v20 = vadd.f32 %v8301_v63, %v4336_v19  ;;  %v4528_v23 = vmax.f32 %v4334_v16, 0.0 }
 0x730   : > { %v4531_v22 = vmax.f32 %v4345_v18, 0.0 }
 0x731   : > { %v4529_v24 = vmax.f32 %v4337_v20, 0.0 }
 0x732   : > { %v4592_v25 = vpack.c.bf16 %v4531_v22, %v4530_v21 }
 0x733   : > { %v4591_v26 = vpack.c.bf16 %v4529_v24, %v4528_v23  ;;  %v6935_v27 = vpop.f32.mrb[216].mxu1 }
 0x734   : > { %v4358_v28 = vadd.f32 %v6935_v27, %v8301_v63  ;;  %v4349_v29 = vpop.f32.mrb[217].mxu1 }
 0x735   : > { %v4350_v30 = vadd.f32 %v8301_v63, %v4349_v29  ;;  %v6936_v31 = vpop.f32.mrb[218].mxu1  ;;  %7001 = vmatprep.mubr.msk.bf16.mxu0 %vm470_vm0, %v4591_v26 }
 0x736   : > { %v4361_v32 = vadd.f32 %v6936_v31, %v8301_v63  ;;  %v4352_v33 = vpop.f32.mrb[219].mxu1  ;;  %7002 = vmatmul.mubr.msk.bf16.gmra.mrb[20].mxu0 %vm470_vm0, %v4592_v25  ;;  %v4534_v35 = vmax.f32 %v4358_v28, 0.0 }
 0x737   : > { %v4353_v34 = vadd.f32 %v8301_v63, %v4352_v33  ;;  %v4532_v37 = vmax.f32 %v4350_v30, 0.0 }
 0x738   : > { %v4535_v36 = vmax.f32 %v4361_v32, 0.0 }
 0x739   : > { %v4533_v38 = vmax.f32 %v4353_v34, 0.0 }
 0x73a   : > { %v4594_v39 = vpack.c.bf16 %v4535_v36, %v4534_v35 }
 0x73b   : > { %v4593_v40 = vpack.c.bf16 %v4533_v38, %v4532_v37  ;;  %v6939_v42 = vpop.f32.mrb[220].mxu1 }
 0x73c   : > { %v4374_v43 = vadd.f32 %v6939_v42, %v8301_v63  ;;  %v4365_v44 = vpop.f32.mrb[221].mxu1 }
 0x73d   : > { %v4366_v45 = vadd.f32 %v8301_v63, %v4365_v44  ;;  %v6940_v46 = vpop.f32.mrb[222].mxu1  ;;  %7005 = vmatprep.mubr.msk.bf16.mxu0 %vm470_vm0, %v4593_v40 }
 0x73e   : > { %v4377_v47 = vadd.f32 %v6940_v46, %v8301_v63  ;;  %v4368_v48 = vpop.f32.mrb[223].mxu1  ;;  %7006 = vmatmul.mubr.msk.bf16.gmra.mrb[24].mxu0 %vm470_vm0, %v4594_v39  ;;  %v4538_v50 = vmax.f32 %v4374_v43, 0.0 }
 0x73f   : > { %v4369_v49 = vadd.f32 %v8301_v63, %v4368_v48  ;;  %v4536_v52 = vmax.f32 %v4366_v45, 0.0 }
 0x740   : > { %v4539_v51 = vmax.f32 %v4377_v47, 0.0 }
 0x741   : > { %v4537_v53 = vmax.f32 %v4369_v49, 0.0 }
 0x742   : > { %v4596_v54 = vpack.c.bf16 %v4539_v51, %v4538_v50 }
 0x743   : > { %v4595_v55 = vpack.c.bf16 %v4537_v53, %v4536_v52  ;;  %v6943_v56 = vpop.f32.mrb[224].mxu1 }
 0x744   : > { %v4390_v57 = vadd.f32 %v6943_v56, %v8301_v63  ;;  %v4381_v58 = vpop.f32.mrb[225].mxu1 }
 0x745   : > { %v4382_v59 = vadd.f32 %v8301_v63, %v4381_v58  ;;  %v6944_v60 = vpop.f32.mrb[226].mxu1  ;;  %7009 = vmatprep.mubr.msk.bf16.mxu0 %vm470_vm0, %v4595_v55 }
 0x746   : > { %v4393_v61 = vadd.f32 %v6944_v60, %v8301_v63  ;;  %v4384_v62 = vpop.f32.mrb[227].mxu1  ;;  %7010 = vmatmul.mubr.msk.bf16.gmra.mrb[28].mxu0 %vm470_vm0, %v4596_v54  ;;  %v4542_v0 = vmax.f32 %v4390_v57, 0.0 }
 0x747   : > { %v4385_v41 = vadd.f32 %v8301_v63, %v4384_v62  ;;  %v4540_v2 = vmax.f32 %v4382_v59, 0.0 }
 0x748   : > { %v4543_v1 = vmax.f32 %v4393_v61, 0.0 }
 0x749   : > { %v4541_v3 = vmax.f32 %v4385_v41, 0.0 }
 0x74a   : > { %v4598_v4 = vpack.c.bf16 %v4543_v1, %v4542_v0 }
 0x74b   : > { %v4597_v5 = vpack.c.bf16 %v4541_v3, %v4540_v2  ;;  %v6947_v6 = vpop.f32.mrb[228].mxu1 }
 0x74c   : > { %v4406_v7 = vadd.f32 %v6947_v6, %v8301_v63  ;;  %v4397_v8 = vpop.f32.mrb[229].mxu1 }
 0x74d   : > { %v4398_v9 = vadd.f32 %v8301_v63, %v4397_v8  ;;  %v6948_v10 = vpop.f32.mrb[230].mxu1  ;;  %7013 = vmatprep.mubr.msk.bf16.mxu0 %vm470_vm0, %v4597_v5 }
 0x74e   : > { %v4409_v11 = vadd.f32 %v6948_v10, %v8301_v63  ;;  %v4400_v12 = vpop.f32.mrb[231].mxu1  ;;  %7014 = vmatmul.mubr.msk.bf16.gmra.mrb[32].mxu0 %vm470_vm0, %v4598_v4  ;;  %v4546_v14 = vmax.f32 %v4406_v7, 0.0 }
 0x74f   : > { %v4401_v13 = vadd.f32 %v8301_v63, %v4400_v12  ;;  %v4544_v16 = vmax.f32 %v4398_v9, 0.0 }
 0x750   : > { %v4547_v15 = vmax.f32 %v4409_v11, 0.0 }
 0x751   : > { %v4545_v17 = vmax.f32 %v4401_v13, 0.0 }
 0x752   : > { %v4600_v18 = vpack.c.bf16 %v4547_v15, %v4546_v14 }
 0x753   : > { %v4599_v19 = vpack.c.bf16 %v4545_v17, %v4544_v16  ;;  %v6951_v20 = vpop.f32.mrb[232].mxu1 }
 0x754   : > { %v4422_v21 = vadd.f32 %v6951_v20, %v8301_v63  ;;  %v4413_v22 = vpop.f32.mrb[233].mxu1 }
 0x755   : > { %v4414_v23 = vadd.f32 %v8301_v63, %v4413_v22  ;;  %v6952_v24 = vpop.f32.mrb[234].mxu1  ;;  %7017 = vmatprep.mubr.msk.bf16.mxu0 %vm470_vm0, %v4599_v19 }
 0x756   : > { %v4425_v25 = vadd.f32 %v6952_v24, %v8301_v63  ;;  %v4416_v26 = vpop.f32.mrb[235].mxu1  ;;  %7018 = vmatmul.mubr.msk.bf16.gmra.mrb[36].mxu0 %vm470_vm0, %v4600_v18  ;;  %v4550_v28 = vmax.f32 %v4422_v21, 0.0 }
 0x757   : > { %v4417_v27 = vadd.f32 %v8301_v63, %v4416_v26  ;;  %v4548_v30 = vmax.f32 %v4414_v23, 0.0 }
 0x758   : > { %v4551_v29 = vmax.f32 %v4425_v25, 0.0 }
 0x759   : > { %v4549_v31 = vmax.f32 %v4417_v27, 0.0 }
 0x75a   : > { %v4602_v32 = vpack.c.bf16 %v4551_v29, %v4550_v28 }
 0x75b   : > { %v4601_v33 = vpack.c.bf16 %v4549_v31, %v4548_v30  ;;  %v6955_v34 = vpop.f32.mrb[236].mxu1 }
 0x75c   : > { %v4438_v35 = vadd.f32 %v6955_v34, %v8301_v63  ;;  %v4429_v36 = vpop.f32.mrb[237].mxu1 }
 0x75d   : > { %v4430_v37 = vadd.f32 %v8301_v63, %v4429_v36  ;;  %v6956_v38 = vpop.f32.mrb[238].mxu1  ;;  %7021 = vmatprep.mubr.msk.bf16.mxu0 %vm470_vm0, %v4601_v33 }
 0x75e   : > { %v4441_v39 = vadd.f32 %v6956_v38, %v8301_v63  ;;  %v4432_v40 = vpop.f32.mrb[239].mxu1  ;;  %7022 = vmatmul.mubr.msk.bf16.gmra.mrb[40].mxu0 %vm470_vm0, %v4602_v32  ;;  %v4554_v43 = vmax.f32 %v4438_v35, 0.0 }
 0x75f   : > { %v4433_v42 = vadd.f32 %v8301_v63, %v4432_v40  ;;  %v4552_v45 = vmax.f32 %v4430_v37, 0.0 }
 0x760   : > { %v4555_v44 = vmax.f32 %v4441_v39, 0.0 }
 0x761   : > { %v4553_v46 = vmax.f32 %v4433_v42, 0.0  ;;  %v8420_v42 = vld [vmem:[%s8682_s6] ss:$0 sm:$0xff] }
 0x762   : > { %v4604_v47 = vpack.c.bf16 %v4555_v44, %v4554_v43 }
 0x763   : > { %v4603_v48 = vpack.c.bf16 %v4553_v46, %v4552_v45  ;;  %v6959_v49 = vpop.f32.mrb[240].mxu1 }
 0x764   : > { %v4454_v50 = vadd.f32 %v6959_v49, %v8301_v63  ;;  %v4445_v51 = vpop.f32.mrb[241].mxu1 }
 0x765   : > { %v4446_v52 = vadd.f32 %v8301_v63, %v4445_v51  ;;  %v6960_v53 = vpop.f32.mrb[242].mxu1  ;;  %7025 = vmatprep.mubr.msk.bf16.mxu0 %vm470_vm0, %v4603_v48 }
 0x766   : > { %v4457_v54 = vadd.f32 %v6960_v53, %v8301_v63  ;;  %v4448_v55 = vpop.f32.mrb[243].mxu1  ;;  %7026 = vmatmul.mubr.msk.bf16.gmra.mrb[44].mxu0 %vm470_vm0, %v4604_v47  ;;  %v4558_v57 = vmax.f32 %v4454_v50, 0.0 }
 0x767   : > { %v4449_v56 = vadd.f32 %v8301_v63, %v4448_v55  ;;  %v4556_v59 = vmax.f32 %v4446_v52, 0.0 }
 0x768   : > { %v4559_v58 = vmax.f32 %v4457_v54, 0.0 }
 0x769   : > { %v4557_v60 = vmax.f32 %v4449_v56, 0.0 }
 0x76a   : > { %v4606_v61 = vpack.c.bf16 %v4559_v58, %v4558_v57 }
 0x76b   : > { %v4605_v62 = vpack.c.bf16 %v4557_v60, %v4556_v59  ;;  %v6963_v41 = vpop.f32.mrb[244].mxu1 }
 0x76c   : > { %v4470_v0 = vadd.f32 %v6963_v41, %v8301_v63  ;;  %v4461_v1 = vpop.f32.mrb[245].mxu1 }
 0x76d   : > { %v4462_v2 = vadd.f32 %v8301_v63, %v4461_v1  ;;  %v6964_v3 = vpop.f32.mrb[246].mxu1  ;;  %7029 = vmatprep.mubr.msk.bf16.mxu0 %vm470_vm0, %v4605_v62 }
 0x76e   : > { %v4473_v4 = vadd.f32 %v6964_v3, %v8301_v63  ;;  %v4464_v5 = vpop.f32.mrb[247].mxu1  ;;  %7030 = vmatmul.mubr.msk.bf16.gmra.mrb[48].mxu0 %vm470_vm0, %v4606_v61  ;;  %v4562_v7 = vmax.f32 %v4470_v0, 0.0 }
 0x76f   : > { %v4465_v6 = vadd.f32 %v8301_v63, %v4464_v5  ;;  %v4560_v9 = vmax.f32 %v4462_v2, 0.0 }
 0x770   : > { %v4563_v8 = vmax.f32 %v4473_v4, 0.0 }
 0x771   : > { %v4561_v10 = vmax.f32 %v4465_v6, 0.0 }
 0x772   : > { %v4608_v11 = vpack.c.bf16 %v4563_v8, %v4562_v7 }
 0x773   : > { %v4607_v12 = vpack.c.bf16 %v4561_v10, %v4560_v9  ;;  %v6967_v13 = vpop.f32.mrb[248].mxu1 }
 0x774   : > { %v4486_v14 = vadd.f32 %v6967_v13, %v8301_v63  ;;  %v4477_v15 = vpop.f32.mrb[249].mxu1 }
 0x775   : > { %v4478_v16 = vadd.f32 %v8301_v63, %v4477_v15  ;;  %v6968_v17 = vpop.f32.mrb[250].mxu1  ;;  %7033 = vmatprep.mubr.msk.bf16.mxu0 %vm470_vm0, %v4607_v12 }
 0x776   : > { %v4489_v18 = vadd.f32 %v6968_v17, %v8301_v63  ;;  %v4480_v19 = vpop.f32.mrb[251].mxu1  ;;  %7034 = vmatmul.mubr.msk.bf16.gmra.mrb[52].mxu0 %vm470_vm0, %v4608_v11  ;;  %v4566_v21 = vmax.f32 %v4486_v14, 0.0 }
 0x777   : > { %v4481_v20 = vadd.f32 %v8301_v63, %v4480_v19  ;;  %v4564_v23 = vmax.f32 %v4478_v16, 0.0 }
 0x778   : > { %v4567_v22 = vmax.f32 %v4489_v18, 0.0 }
 0x779   : > { %v4565_v24 = vmax.f32 %v4481_v20, 0.0 }
 0x77a   : > { %v4610_v25 = vpack.c.bf16 %v4567_v22, %v4566_v21 }
 0x77b   : > { %v4609_v26 = vpack.c.bf16 %v4565_v24, %v4564_v23  ;;  %v6971_v27 = vpop.f32.mrb[252].mxu1 }
 0x77c   : > { %v4502_v28 = vadd.f32 %v6971_v27, %v8301_v63  ;;  %v4493_v29 = vpop.f32.mrb[253].mxu1 }
 0x77d   : > { %v4494_v30 = vadd.f32 %v8301_v63, %v4493_v29  ;;  %v6972_v31 = vpop.f32.mrb[254].mxu1  ;;  %7037 = vmatprep.mubr.msk.bf16.mxu0 %vm470_vm0, %v4609_v26 }
 0x77e   : > { %v4505_v32 = vadd.f32 %v6972_v31, %v8301_v63  ;;  %v4496_v33 = vpop.f32.mrb[255].mxu1  ;;  %7038 = vmatmul.mubr.msk.bf16.gmra.mrb[56].mxu0 %vm470_vm0, %v4610_v25  ;;  %v4570_v35 = vmax.f32 %v4502_v28, 0.0 }
 0x77f   : > { %v4497_v34 = vadd.f32 %v8301_v63, %v4496_v33  ;;  %v4568_v37 = vmax.f32 %v4494_v30, 0.0 }
 0x780   : > { %v4571_v36 = vmax.f32 %v4505_v32, 0.0 }
 0x781   : > { %v4569_v38 = vmax.f32 %v4497_v34, 0.0 }
 0x782   : > { %v4612_v39 = vpack.c.bf16 %v4571_v36, %v4570_v35 }
 0x783   : > { %v4611_v40 = vpack.c.bf16 %v4569_v38, %v4568_v37 }
 0x785   : > { %7041 = vmatprep.mubr.msk.bf16.mxu0 %vm470_vm0, %v4611_v40 }
 0x786   : > { %7042 = vmatmul.mubr.msk.bf16.gmra.mrb[60].mxu0 %vm470_vm0, %v4612_v39 }
 0x7e1   : > { %v6983_v43 = vpop.f32.mrb[0].mxu0 }
 0x7e2   : > { %v4782_v44 = vadd.f32 %v6983_v43, %v8420_v42  ;;  %v4773_v45 = vpop.f32.mrb[1].mxu0 }
 0x7e3   : > { %v4774_v63 = vadd.f32 %v8420_v42, %v4773_v45  ;;  %v6984_v46 = vpop.f32.mrb[2].mxu0 }
 0x7e4   : > { %v4785_v47 = vadd.f32 %v6984_v46, %v8420_v42  ;;  %v4776_v48 = vpop.f32.mrb[3].mxu0  ;;  %v5030_v50 = vmax.f32 %v4782_v44, 0.0 }
 0x7e5   : > { %v4777_v49 = vadd.f32 %v8420_v42, %v4776_v48  ;;  %v5028_v52 = vmax.f32 %v4774_v63, 0.0 }
 0x7e6   : > { %v5031_v51 = vmax.f32 %v4785_v47, 0.0 }
 0x7e7   : > { %v5029_v53 = vmax.f32 %v4777_v49, 0.0 }
 0x7e8   : > { %v5110_v54 = vpack.c.bf16 %v5031_v51, %v5030_v50 }
 0x7e9   : > { %v5109_v55 = vpack.c.bf16 %v5029_v53, %v5028_v52  ;;  %v6987_v56 = vpop.f32.mrb[4].mxu0 }
 0x7ea   : > { %v4798_v57 = vadd.f32 %v6987_v56, %v8420_v42  ;;  %v4789_v58 = vpop.f32.mrb[5].mxu0 }
 0x7eb   : > { %v4790_v59 = vadd.f32 %v8420_v42, %v4789_v58  ;;  %v6988_v60 = vpop.f32.mrb[6].mxu0  ;;  %7061 = vmatprep.mubr.bf16.mxu1 %v5109_v55 }
 0x7ec   : > { %v4801_v61 = vadd.f32 %v6988_v60, %v8420_v42  ;;  %v4792_v62 = vpop.f32.mrb[7].mxu0  ;;  %7062 = vmatmul.mubr.bf16.vlgmr.msra.gmra.mrb[0].mxu1 %v5110_v54  ;;  %v5034_v0 = vmax.f32 %v4798_v57, 0.0 }
 0x7ed   : > { %v4793_v41 = vadd.f32 %v8420_v42, %v4792_v62  ;;  %v5032_v2 = vmax.f32 %v4790_v59, 0.0 }
 0x7ee   : > { %v5035_v1 = vmax.f32 %v4801_v61, 0.0 }
 0x7ef   : > { %v5033_v3 = vmax.f32 %v4793_v41, 0.0 }
 0x7f0   : > { %v5112_v4 = vpack.c.bf16 %v5035_v1, %v5034_v0 }
 0x7f1   : > { %v5111_v5 = vpack.c.bf16 %v5033_v3, %v5032_v2  ;;  %v6991_v6 = vpop.f32.mrb[8].mxu0 }
 0x7f2   : > { %v4814_v7 = vadd.f32 %v6991_v6, %v8420_v42  ;;  %v4805_v8 = vpop.f32.mrb[9].mxu0 }
 0x7f3   : > { %v4806_v9 = vadd.f32 %v8420_v42, %v4805_v8  ;;  %v6992_v10 = vpop.f32.mrb[10].mxu0  ;;  %7065 = vmatprep.mubr.bf16.mxu1 %v5111_v5 }
 0x7f4   : > { %v4817_v11 = vadd.f32 %v6992_v10, %v8420_v42  ;;  %v4808_v12 = vpop.f32.mrb[11].mxu0  ;;  %7066 = vmatmul.mubr.bf16.gmra.mrb[4].mxu1 %v5112_v4  ;;  %v5038_v14 = vmax.f32 %v4814_v7, 0.0 }
 0x7f5   : > { %v4809_v13 = vadd.f32 %v8420_v42, %v4808_v12  ;;  %v5036_v16 = vmax.f32 %v4806_v9, 0.0 }
 0x7f6   : > { %v5039_v15 = vmax.f32 %v4817_v11, 0.0 }
 0x7f7   : > { %v5037_v17 = vmax.f32 %v4809_v13, 0.0 }
 0x7f8   : > { %v5114_v18 = vpack.c.bf16 %v5039_v15, %v5038_v14 }
 0x7f9   : > { %v5113_v19 = vpack.c.bf16 %v5037_v17, %v5036_v16  ;;  %v6995_v20 = vpop.f32.mrb[12].mxu0 }
 0x7fa   : > { %v4830_v21 = vadd.f32 %v6995_v20, %v8420_v42  ;;  %v4821_v22 = vpop.f32.mrb[13].mxu0 }
 0x7fb   : > { %v4822_v23 = vadd.f32 %v8420_v42, %v4821_v22  ;;  %v6996_v24 = vpop.f32.mrb[14].mxu0  ;;  %7069 = vmatprep.mubr.bf16.mxu1 %v5113_v19 }
 0x7fc   : > { %v4833_v25 = vadd.f32 %v6996_v24, %v8420_v42  ;;  %v4824_v26 = vpop.f32.mrb[15].mxu0  ;;  %7070 = vmatmul.mubr.bf16.gmra.mrb[8].mxu1 %v5114_v18  ;;  %v5042_v28 = vmax.f32 %v4830_v21, 0.0 }
 0x7fd   : > { %v4825_v27 = vadd.f32 %v8420_v42, %v4824_v26  ;;  %v5040_v30 = vmax.f32 %v4822_v23, 0.0 }
 0x7fe   : > { %v5043_v29 = vmax.f32 %v4833_v25, 0.0 }
 0x7ff   : > { %v5041_v31 = vmax.f32 %v4825_v27, 0.0 }
 0x800   : > { %v5116_v32 = vpack.c.bf16 %v5043_v29, %v5042_v28 }
 0x801   : > { %v5115_v33 = vpack.c.bf16 %v5041_v31, %v5040_v30  ;;  %v6999_v34 = vpop.f32.mrb[16].mxu0 }
 0x802   : > { %v4846_v35 = vadd.f32 %v6999_v34, %v8420_v42  ;;  %v4837_v36 = vpop.f32.mrb[17].mxu0 }
 0x803   : > { %v4838_v37 = vadd.f32 %v8420_v42, %v4837_v36  ;;  %v7000_v38 = vpop.f32.mrb[18].mxu0  ;;  %7073 = vmatprep.mubr.bf16.mxu1 %v5115_v33 }
 0x804   : > { %v4849_v39 = vadd.f32 %v7000_v38, %v8420_v42  ;;  %v4840_v40 = vpop.f32.mrb[19].mxu0  ;;  %7074 = vmatmul.mubr.bf16.gmra.mrb[12].mxu1 %v5116_v32  ;;  %v5046_v44 = vmax.f32 %v4846_v35, 0.0 }
 0x805   : > { %v4841_v43 = vadd.f32 %v8420_v42, %v4840_v40  ;;  %v5044_v63 = vmax.f32 %v4838_v37, 0.0 }
 0x806   : > { %v5047_v45 = vmax.f32 %v4849_v39, 0.0 }
 0x807   : > { %v5045_v46 = vmax.f32 %v4841_v43, 0.0 }
 0x808   : > { %v5118_v47 = vpack.c.bf16 %v5047_v45, %v5046_v44 }
 0x809   : > { %v5117_v48 = vpack.c.bf16 %v5045_v46, %v5044_v63  ;;  %v7003_v49 = vpop.f32.mrb[20].mxu0 }
 0x80a   : > { %v4862_v50 = vadd.f32 %v7003_v49, %v8420_v42  ;;  %v4853_v51 = vpop.f32.mrb[21].mxu0 }
 0x80b   : > { %v4854_v52 = vadd.f32 %v8420_v42, %v4853_v51  ;;  %v7004_v53 = vpop.f32.mrb[22].mxu0  ;;  %7077 = vmatprep.mubr.bf16.mxu1 %v5117_v48 }
 0x80c   : > { %v4865_v54 = vadd.f32 %v7004_v53, %v8420_v42  ;;  %v4856_v55 = vpop.f32.mrb[23].mxu0  ;;  %7078 = vmatmul.mubr.bf16.gmra.mrb[16].mxu1 %v5118_v47  ;;  %v5050_v57 = vmax.f32 %v4862_v50, 0.0 }
 0x80d   : > { %v4857_v56 = vadd.f32 %v8420_v42, %v4856_v55  ;;  %v5048_v59 = vmax.f32 %v4854_v52, 0.0 }
 0x80e   : > { %v5051_v58 = vmax.f32 %v4865_v54, 0.0 }
 0x80f   : > { %v5049_v60 = vmax.f32 %v4857_v56, 0.0 }
 0x810   : > { %v5120_v61 = vpack.c.bf16 %v5051_v58, %v5050_v57 }
 0x811   : > { %v5119_v62 = vpack.c.bf16 %v5049_v60, %v5048_v59  ;;  %v7007_v41 = vpop.f32.mrb[24].mxu0 }
 0x812   : > { %v4878_v0 = vadd.f32 %v7007_v41, %v8420_v42  ;;  %v4869_v1 = vpop.f32.mrb[25].mxu0 }
 0x813   : > { %v4870_v2 = vadd.f32 %v8420_v42, %v4869_v1  ;;  %v7008_v3 = vpop.f32.mrb[26].mxu0  ;;  %7081 = vmatprep.mubr.bf16.mxu1 %v5119_v62 }
 0x814   : > { %v4881_v4 = vadd.f32 %v7008_v3, %v8420_v42  ;;  %v4872_v5 = vpop.f32.mrb[27].mxu0  ;;  %7082 = vmatmul.mubr.bf16.gmra.mrb[20].mxu1 %v5120_v61  ;;  %v5054_v7 = vmax.f32 %v4878_v0, 0.0 }
 0x815   : > { %v4873_v6 = vadd.f32 %v8420_v42, %v4872_v5  ;;  %v5052_v9 = vmax.f32 %v4870_v2, 0.0 }
 0x816   : > { %v5055_v8 = vmax.f32 %v4881_v4, 0.0 }
 0x817   : > { %v5053_v10 = vmax.f32 %v4873_v6, 0.0 }
 0x818   : > { %v5122_v11 = vpack.c.bf16 %v5055_v8, %v5054_v7 }
 0x819   : > { %v5121_v12 = vpack.c.bf16 %v5053_v10, %v5052_v9  ;;  %v7011_v13 = vpop.f32.mrb[28].mxu0 }
 0x81a   : > { %v4894_v14 = vadd.f32 %v7011_v13, %v8420_v42  ;;  %v4885_v15 = vpop.f32.mrb[29].mxu0 }
 0x81b   : > { %v4886_v16 = vadd.f32 %v8420_v42, %v4885_v15  ;;  %v7012_v17 = vpop.f32.mrb[30].mxu0  ;;  %7085 = vmatprep.mubr.bf16.mxu1 %v5121_v12 }
 0x81c   : > { %v4897_v18 = vadd.f32 %v7012_v17, %v8420_v42  ;;  %v4888_v19 = vpop.f32.mrb[31].mxu0  ;;  %7086 = vmatmul.mubr.bf16.gmra.mrb[24].mxu1 %v5122_v11  ;;  %v5058_v21 = vmax.f32 %v4894_v14, 0.0 }
 0x81d   : > { %v4889_v20 = vadd.f32 %v8420_v42, %v4888_v19  ;;  %v5056_v23 = vmax.f32 %v4886_v16, 0.0 }
 0x81e   : > { %v5059_v22 = vmax.f32 %v4897_v18, 0.0 }
 0x81f   : > { %v5057_v24 = vmax.f32 %v4889_v20, 0.0 }
 0x820   : > { %v5124_v25 = vpack.c.bf16 %v5059_v22, %v5058_v21 }
 0x821   : > { %v5123_v26 = vpack.c.bf16 %v5057_v24, %v5056_v23  ;;  %v7015_v27 = vpop.f32.mrb[32].mxu0 }
 0x822   : > { %v4910_v28 = vadd.f32 %v7015_v27, %v8420_v42  ;;  %v4901_v29 = vpop.f32.mrb[33].mxu0 }
 0x823   : > { %v4902_v30 = vadd.f32 %v8420_v42, %v4901_v29  ;;  %v7016_v31 = vpop.f32.mrb[34].mxu0  ;;  %7089 = vmatprep.mubr.bf16.mxu1 %v5123_v26 }
 0x824   : > { %v4913_v32 = vadd.f32 %v7016_v31, %v8420_v42  ;;  %v4904_v33 = vpop.f32.mrb[35].mxu0  ;;  %7090 = vmatmul.mubr.bf16.gmra.mrb[28].mxu1 %v5124_v25  ;;  %v5062_v35 = vmax.f32 %v4910_v28, 0.0 }
 0x825   : > { %v4905_v34 = vadd.f32 %v8420_v42, %v4904_v33  ;;  %v5060_v37 = vmax.f32 %v4902_v30, 0.0 }
 0x826   : > { %v5063_v36 = vmax.f32 %v4913_v32, 0.0 }
 0x827   : > { %v5061_v38 = vmax.f32 %v4905_v34, 0.0 }
 0x828   : > { %v5126_v39 = vpack.c.bf16 %v5063_v36, %v5062_v35 }
 0x829   : > { %v5125_v40 = vpack.c.bf16 %v5061_v38, %v5060_v37  ;;  %v7019_v43 = vpop.f32.mrb[36].mxu0 }
 0x82a   : > { %v4926_v44 = vadd.f32 %v7019_v43, %v8420_v42  ;;  %v4917_v45 = vpop.f32.mrb[37].mxu0 }
 0x82b   : > { %v4918_v63 = vadd.f32 %v8420_v42, %v4917_v45  ;;  %v7020_v46 = vpop.f32.mrb[38].mxu0  ;;  %7093 = vmatprep.mubr.bf16.mxu1 %v5125_v40 }
 0x82c   : > { %v4929_v47 = vadd.f32 %v7020_v46, %v8420_v42  ;;  %v4920_v48 = vpop.f32.mrb[39].mxu0  ;;  %7094 = vmatmul.mubr.bf16.gmra.mrb[32].mxu1 %v5126_v39  ;;  %v5066_v50 = vmax.f32 %v4926_v44, 0.0 }
 0x82d   : > { %v4921_v49 = vadd.f32 %v8420_v42, %v4920_v48  ;;  %v5064_v52 = vmax.f32 %v4918_v63, 0.0 }
 0x82e   : > { %v5067_v51 = vmax.f32 %v4929_v47, 0.0 }
 0x82f   : > { %v5065_v53 = vmax.f32 %v4921_v49, 0.0 }
 0x830   : > { %v5128_v54 = vpack.c.bf16 %v5067_v51, %v5066_v50 }
 0x831   : > { %v5127_v55 = vpack.c.bf16 %v5065_v53, %v5064_v52  ;;  %v7023_v56 = vpop.f32.mrb[40].mxu0 }
 0x832   : > { %v4942_v57 = vadd.f32 %v7023_v56, %v8420_v42  ;;  %v4933_v58 = vpop.f32.mrb[41].mxu0 }
 0x833   : > { %v4934_v59 = vadd.f32 %v8420_v42, %v4933_v58  ;;  %v7024_v60 = vpop.f32.mrb[42].mxu0  ;;  %7097 = vmatprep.mubr.bf16.mxu1 %v5127_v55 }
 0x834   : > { %v4945_v61 = vadd.f32 %v7024_v60, %v8420_v42  ;;  %v4936_v62 = vpop.f32.mrb[43].mxu0  ;;  %7098 = vmatmul.mubr.bf16.gmra.mrb[36].mxu1 %v5128_v54  ;;  %v5070_v0 = vmax.f32 %v4942_v57, 0.0 }
 0x835   : > { %v4937_v41 = vadd.f32 %v8420_v42, %v4936_v62  ;;  %v5068_v2 = vmax.f32 %v4934_v59, 0.0 }
 0x836   : > { %v5071_v1 = vmax.f32 %v4945_v61, 0.0 }
 0x837   : > { %v5069_v3 = vmax.f32 %v4937_v41, 0.0 }
 0x838   : > { %v5130_v4 = vpack.c.bf16 %v5071_v1, %v5070_v0 }
 0x839   : > { %v5129_v5 = vpack.c.bf16 %v5069_v3, %v5068_v2  ;;  %v7027_v6 = vpop.f32.mrb[44].mxu0 }
 0x83a   : > { %v4958_v7 = vadd.f32 %v7027_v6, %v8420_v42  ;;  %v4949_v8 = vpop.f32.mrb[45].mxu0 }
 0x83b   : > { %v4950_v9 = vadd.f32 %v8420_v42, %v4949_v8  ;;  %v7028_v10 = vpop.f32.mrb[46].mxu0  ;;  %7101 = vmatprep.mubr.bf16.mxu1 %v5129_v5 }
 0x83c   : > { %v4961_v11 = vadd.f32 %v7028_v10, %v8420_v42  ;;  %v4952_v12 = vpop.f32.mrb[47].mxu0  ;;  %7102 = vmatmul.mubr.bf16.gmra.mrb[40].mxu1 %v5130_v4  ;;  %v5074_v14 = vmax.f32 %v4958_v7, 0.0 }
 0x83d   : > { %v4953_v13 = vadd.f32 %v8420_v42, %v4952_v12  ;;  %v5072_v16 = vmax.f32 %v4950_v9, 0.0 }
 0x83e   : > { %v5075_v15 = vmax.f32 %v4961_v11, 0.0 }
 0x83f   : > { %v5073_v17 = vmax.f32 %v4953_v13, 0.0  ;;  %v8492_v13 = vld [vmem:[%s8684_s8] ss:$0 sm:$0xff] }
 0x840   : > { %v5132_v18 = vpack.c.bf16 %v5075_v15, %v5074_v14 }
 0x841   : > { %v5131_v19 = vpack.c.bf16 %v5073_v17, %v5072_v16  ;;  %v7031_v20 = vpop.f32.mrb[48].mxu0 }
 0x842   : > { %v4974_v21 = vadd.f32 %v7031_v20, %v8420_v42  ;;  %v4965_v22 = vpop.f32.mrb[49].mxu0 }
 0x843   : > { %v4966_v23 = vadd.f32 %v8420_v42, %v4965_v22  ;;  %v7032_v24 = vpop.f32.mrb[50].mxu0  ;;  %7105 = vmatprep.mubr.bf16.mxu1 %v5131_v19 }
 0x844   : > { %v4977_v25 = vadd.f32 %v7032_v24, %v8420_v42  ;;  %v4968_v26 = vpop.f32.mrb[51].mxu0  ;;  %7106 = vmatmul.mubr.bf16.gmra.mrb[44].mxu1 %v5132_v18  ;;  %v5078_v28 = vmax.f32 %v4974_v21, 0.0 }
 0x845   : > { %v4969_v27 = vadd.f32 %v8420_v42, %v4968_v26  ;;  %v5076_v30 = vmax.f32 %v4966_v23, 0.0 }
 0x846   : > { %v5079_v29 = vmax.f32 %v4977_v25, 0.0 }
 0x847   : > { %v5077_v31 = vmax.f32 %v4969_v27, 0.0 }
 0x848   : > { %v5134_v32 = vpack.c.bf16 %v5079_v29, %v5078_v28 }
 0x849   : > { %v5133_v33 = vpack.c.bf16 %v5077_v31, %v5076_v30  ;;  %v7035_v34 = vpop.f32.mrb[52].mxu0 }
 0x84a   : > { %v4990_v35 = vadd.f32 %v7035_v34, %v8420_v42  ;;  %v4981_v36 = vpop.f32.mrb[53].mxu0 }
 0x84b   : > { %v4982_v37 = vadd.f32 %v8420_v42, %v4981_v36  ;;  %v7036_v38 = vpop.f32.mrb[54].mxu0  ;;  %7109 = vmatprep.mubr.bf16.mxu1 %v5133_v33 }
 0x84c   : > { %v4993_v39 = vadd.f32 %v7036_v38, %v8420_v42  ;;  %v4984_v40 = vpop.f32.mrb[55].mxu0  ;;  %7110 = vmatmul.mubr.bf16.gmra.mrb[48].mxu1 %v5134_v32  ;;  %v5082_v44 = vmax.f32 %v4990_v35, 0.0 }
 0x84d   : > { %v4985_v43 = vadd.f32 %v8420_v42, %v4984_v40  ;;  %v5080_v63 = vmax.f32 %v4982_v37, 0.0 }
 0x84e   : > { %v5083_v45 = vmax.f32 %v4993_v39, 0.0 }
 0x84f   : > { %v5081_v46 = vmax.f32 %v4985_v43, 0.0 }
 0x850   : > { %v5136_v47 = vpack.c.bf16 %v5083_v45, %v5082_v44 }
 0x851   : > { %v5135_v48 = vpack.c.bf16 %v5081_v46, %v5080_v63  ;;  %v7039_v49 = vpop.f32.mrb[56].mxu0 }
 0x852   : > { %v5006_v50 = vadd.f32 %v7039_v49, %v8420_v42  ;;  %v4997_v51 = vpop.f32.mrb[57].mxu0 }
 0x853   : > { %v4998_v52 = vadd.f32 %v8420_v42, %v4997_v51  ;;  %v7040_v53 = vpop.f32.mrb[58].mxu0  ;;  %7113 = vmatprep.mubr.bf16.mxu1 %v5135_v48 }
 0x854   : > { %v5009_v54 = vadd.f32 %v7040_v53, %v8420_v42  ;;  %v5000_v55 = vpop.f32.mrb[59].mxu0  ;;  %7114 = vmatmul.mubr.bf16.gmra.mrb[52].mxu1 %v5136_v47  ;;  %v5086_v57 = vmax.f32 %v5006_v50, 0.0 }
 0x855   : > { %v5001_v56 = vadd.f32 %v8420_v42, %v5000_v55  ;;  %v5084_v59 = vmax.f32 %v4998_v52, 0.0 }
 0x856   : > { %v5087_v58 = vmax.f32 %v5009_v54, 0.0 }
 0x857   : > { %v5085_v60 = vmax.f32 %v5001_v56, 0.0 }
 0x858   : > { %v5138_v61 = vpack.c.bf16 %v5087_v58, %v5086_v57 }
 0x859   : > { %v5137_v62 = vpack.c.bf16 %v5085_v60, %v5084_v59  ;;  %v7043_v41 = vpop.f32.mrb[60].mxu0 }
 0x85a   : > { %v5022_v0 = vadd.f32 %v7043_v41, %v8420_v42  ;;  %v5013_v1 = vpop.f32.mrb[61].mxu0 }
 0x85b   : > { %v5014_v2 = vadd.f32 %v8420_v42, %v5013_v1  ;;  %v7044_v3 = vpop.f32.mrb[62].mxu0  ;;  %7117 = vmatprep.mubr.bf16.mxu1 %v5137_v62 }
 0x85c   : > { %v5025_v4 = vadd.f32 %v7044_v3, %v8420_v42  ;;  %v5016_v5 = vpop.f32.mrb[63].mxu0  ;;  %7118 = vmatmul.mubr.bf16.gmra.mrb[56].mxu1 %v5138_v61  ;;  %v5090_v7 = vmax.f32 %v5022_v0, 0.0 }
 0x85d   : > { %v5017_v6 = vadd.f32 %v8420_v42, %v5016_v5  ;;  %v5088_v9 = vmax.f32 %v5014_v2, 0.0 }
 0x85e   : > { %v5091_v8 = vmax.f32 %v5025_v4, 0.0 }
 0x85f   : > { %v5089_v10 = vmax.f32 %v5017_v6, 0.0 }
 0x860   : > { %v5140_v11 = vpack.c.bf16 %v5091_v8, %v5090_v7 }
 0x861   : > { %v5139_v12 = vpack.c.bf16 %v5089_v10, %v5088_v9 }
 0x863   : > { %7121 = vmatprep.mubr.bf16.mxu1 %v5139_v12 }
 0x864   : > { %7122 = vmatmul.mubr.bf16.gmra.mrb[60].mxu1 %v5140_v11 }
 0x8bf   : > { %v7063_v14 = vpop.f32.mrb[0].mxu1 }
 0x8c0   : > { %v5238_v15 = vadd.f32 %v7063_v14, %v8492_v13  ;;  %v5229_v42 = vpop.f32.mrb[1].mxu1 }
 0x8c1   : > { %v5230_v16 = vadd.f32 %v8492_v13, %v5229_v42  ;;  %v7064_v17 = vpop.f32.mrb[2].mxu1 }
 0x8c2   : > { %5486 = vst [vmem:[%s8496_s28 + $0x10] sm:$0xff] %v5238_v15  ;;  %v5241_v18 = vadd.f32 %v7064_v17, %v8492_v13  ;;  %v5232_v19 = vpop.f32.mrb[3].mxu1 }
 0x8c3   : > { %5484 = vst [vmem:[%s8496_s28] sm:$0xff] %v5230_v16  ;;  %v5233_v20 = vadd.f32 %v8492_v13, %v5232_v19 }
 0x8c4   : > { %5487 = vst [vmem:[%s8496_s28 + $0x18] sm:$0xff] %v5241_v18 }
 0x8c5   : > { %5485 = vst [vmem:[%s8496_s28 + $0x8] sm:$0xff] %v5233_v20 }
 0x8c7   : > { %v7067_v21 = vpop.f32.mrb[4].mxu1 }
 0x8c8   : > { %v5254_v22 = vadd.f32 %v7067_v21, %v8492_v13  ;;  %v5245_v23 = vpop.f32.mrb[5].mxu1 }
 0x8c9   : > { %v5246_v24 = vadd.f32 %v8492_v13, %v5245_v23  ;;  %v7068_v25 = vpop.f32.mrb[6].mxu1 }
 0x8ca   : > { %5490 = vst [vmem:[%s8496_s28 + $0x30] sm:$0xff] %v5254_v22  ;;  %v5257_v26 = vadd.f32 %v7068_v25, %v8492_v13  ;;  %v5248_v27 = vpop.f32.mrb[7].mxu1 }
 0x8cb   : > { %5488 = vst [vmem:[%s8496_s28 + $0x20] sm:$0xff] %v5246_v24  ;;  %v5249_v28 = vadd.f32 %v8492_v13, %v5248_v27 }
 0x8cc   : > { %5491 = vst [vmem:[%s8496_s28 + $0x38] sm:$0xff] %v5257_v26 }
 0x8cd   : > { %5489 = vst [vmem:[%s8496_s28 + $0x28] sm:$0xff] %v5249_v28 }
 0x8cf   : > { %v7071_v29 = vpop.f32.mrb[8].mxu1 }
 0x8d0   : > { %v5270_v30 = vadd.f32 %v7071_v29, %v8492_v13  ;;  %v5261_v31 = vpop.f32.mrb[9].mxu1 }
 0x8d1   : > { %v5262_v32 = vadd.f32 %v8492_v13, %v5261_v31  ;;  %v7072_v33 = vpop.f32.mrb[10].mxu1 }
 0x8d2   : > { %5494 = vst [vmem:[%s8496_s28 + $0x50] sm:$0xff] %v5270_v30  ;;  %v5273_v34 = vadd.f32 %v7072_v33, %v8492_v13  ;;  %v5264_v35 = vpop.f32.mrb[11].mxu1 }
 0x8d3   : > { %5492 = vst [vmem:[%s8496_s28 + $0x40] sm:$0xff] %v5262_v32  ;;  %v5265_v36 = vadd.f32 %v8492_v13, %v5264_v35 }
 0x8d4   : > { %5495 = vst [vmem:[%s8496_s28 + $0x58] sm:$0xff] %v5273_v34 }
 0x8d5   : > { %5493 = vst [vmem:[%s8496_s28 + $0x48] sm:$0xff] %v5265_v36 }
 0x8d7   : > { %v7075_v37 = vpop.f32.mrb[12].mxu1 }
 0x8d8   : > { %v5286_v38 = vadd.f32 %v7075_v37, %v8492_v13  ;;  %v5277_v39 = vpop.f32.mrb[13].mxu1 }
 0x8d9   : > { %v5278_v40 = vadd.f32 %v8492_v13, %v5277_v39  ;;  %v7076_v43 = vpop.f32.mrb[14].mxu1 }
 0x8da   : > { %5498 = vst [vmem:[%s8496_s28 + $0x70] sm:$0xff] %v5286_v38  ;;  %v5289_v44 = vadd.f32 %v7076_v43, %v8492_v13  ;;  %v5280_v45 = vpop.f32.mrb[15].mxu1 }
 0x8db   : > { %5496 = vst [vmem:[%s8496_s28 + $0x60] sm:$0xff] %v5278_v40  ;;  %v5281_v63 = vadd.f32 %v8492_v13, %v5280_v45 }
 0x8dc   : > { %5499 = vst [vmem:[%s8496_s28 + $0x78] sm:$0xff] %v5289_v44 }
 0x8dd   : > { %5497 = vst [vmem:[%s8496_s28 + $0x68] sm:$0xff] %v5281_v63 }
 0x8df   : > { %v7079_v46 = vpop.f32.mrb[16].mxu1 }
 0x8e0   : > { %v5302_v47 = vadd.f32 %v7079_v46, %v8492_v13  ;;  %v5293_v48 = vpop.f32.mrb[17].mxu1 }
 0x8e1   : > { %v5294_v49 = vadd.f32 %v8492_v13, %v5293_v48  ;;  %v7080_v50 = vpop.f32.mrb[18].mxu1 }
 0x8e2   : > { %5502 = vst [vmem:[%s8496_s28 + $0x90] sm:$0xff] %v5302_v47  ;;  %v5305_v51 = vadd.f32 %v7080_v50, %v8492_v13  ;;  %v5296_v52 = vpop.f32.mrb[19].mxu1 }
 0x8e3   : > { %5500 = vst [vmem:[%s8496_s28 + $0x80] sm:$0xff] %v5294_v49  ;;  %v5297_v53 = vadd.f32 %v8492_v13, %v5296_v52 }
 0x8e4   : > { %5503 = vst [vmem:[%s8496_s28 + $0x98] sm:$0xff] %v5305_v51 }
 0x8e5   : > { %5501 = vst [vmem:[%s8496_s28 + $0x88] sm:$0xff] %v5297_v53 }
 0x8e7   : > { %v7083_v54 = vpop.f32.mrb[20].mxu1 }
 0x8e8   : > { %v5318_v55 = vadd.f32 %v7083_v54, %v8492_v13  ;;  %v5309_v56 = vpop.f32.mrb[21].mxu1 }
 0x8e9   : > { %v5310_v57 = vadd.f32 %v8492_v13, %v5309_v56  ;;  %v7084_v58 = vpop.f32.mrb[22].mxu1 }
 0x8ea   : > { %5506 = vst [vmem:[%s8496_s28 + $0xb0] sm:$0xff] %v5318_v55  ;;  %v5321_v59 = vadd.f32 %v7084_v58, %v8492_v13  ;;  %v5312_v60 = vpop.f32.mrb[23].mxu1 }
 0x8eb   : > { %5504 = vst [vmem:[%s8496_s28 + $0xa0] sm:$0xff] %v5310_v57  ;;  %v5313_v61 = vadd.f32 %v8492_v13, %v5312_v60 }
 0x8ec   : > { %5507 = vst [vmem:[%s8496_s28 + $0xb8] sm:$0xff] %v5321_v59 }
 0x8ed   : > { %5505 = vst [vmem:[%s8496_s28 + $0xa8] sm:$0xff] %v5313_v61 }
 0x8ef   : > { %v7087_v62 = vpop.f32.mrb[24].mxu1 }
 0x8f0   : > { %v5334_v41 = vadd.f32 %v7087_v62, %v8492_v13  ;;  %v5325_v0 = vpop.f32.mrb[25].mxu1 }
 0x8f1   : > { %v5326_v1 = vadd.f32 %v8492_v13, %v5325_v0  ;;  %v7088_v2 = vpop.f32.mrb[26].mxu1 }
 0x8f2   : > { %5510 = vst [vmem:[%s8496_s28 + $0xd0] sm:$0xff] %v5334_v41  ;;  %v5337_v3 = vadd.f32 %v7088_v2, %v8492_v13  ;;  %v5328_v4 = vpop.f32.mrb[27].mxu1 }
 0x8f3   : > { %5508 = vst [vmem:[%s8496_s28 + $0xc0] sm:$0xff] %v5326_v1  ;;  %v5329_v5 = vadd.f32 %v8492_v13, %v5328_v4 }
 0x8f4   : > { %5511 = vst [vmem:[%s8496_s28 + $0xd8] sm:$0xff] %v5337_v3 }
 0x8f5   : > { %5509 = vst [vmem:[%s8496_s28 + $0xc8] sm:$0xff] %v5329_v5 }
 0x8f7   : > { %v7091_v6 = vpop.f32.mrb[28].mxu1 }
 0x8f8   : > { %v5350_v7 = vadd.f32 %v7091_v6, %v8492_v13  ;;  %v5341_v8 = vpop.f32.mrb[29].mxu1 }
 0x8f9   : > { %v5342_v9 = vadd.f32 %v8492_v13, %v5341_v8  ;;  %v7092_v10 = vpop.f32.mrb[30].mxu1 }
 0x8fa   : > { %5514 = vst [vmem:[%s8496_s28 + $0xf0] sm:$0xff] %v5350_v7  ;;  %v5353_v11 = vadd.f32 %v7092_v10, %v8492_v13  ;;  %v5344_v12 = vpop.f32.mrb[31].mxu1 }
 0x8fb   : > { %5512 = vst [vmem:[%s8496_s28 + $0xe0] sm:$0xff] %v5342_v9  ;;  %v5345_v14 = vadd.f32 %v8492_v13, %v5344_v12 }
 0x8fc   : > { %5515 = vst [vmem:[%s8496_s28 + $0xf8] sm:$0xff] %v5353_v11 }
 0x8fd   : > { %5513 = vst [vmem:[%s8496_s28 + $0xe8] sm:$0xff] %v5345_v14 }
 0x8ff   : > { %v7095_v15 = vpop.f32.mrb[32].mxu1 }
 0x900   : > { %v5366_v42 = vadd.f32 %v7095_v15, %v8492_v13  ;;  %v5357_v16 = vpop.f32.mrb[33].mxu1 }
 0x901   : > { %v5358_v17 = vadd.f32 %v8492_v13, %v5357_v16  ;;  %v7096_v18 = vpop.f32.mrb[34].mxu1 }
 0x902   : > { %5518 = vst [vmem:[%s8496_s28 + $0x110] sm:$0xff] %v5366_v42  ;;  %v5369_v19 = vadd.f32 %v7096_v18, %v8492_v13  ;;  %v5360_v20 = vpop.f32.mrb[35].mxu1 }
 0x903   : > { %5516 = vst [vmem:[%s8496_s28 + $0x100] sm:$0xff] %v5358_v17  ;;  %v5361_v21 = vadd.f32 %v8492_v13, %v5360_v20 }
 0x904   : > { %5519 = vst [vmem:[%s8496_s28 + $0x118] sm:$0xff] %v5369_v19 }
 0x905   : > { %5517 = vst [vmem:[%s8496_s28 + $0x108] sm:$0xff] %v5361_v21 }
 0x907   : > { %v7099_v22 = vpop.f32.mrb[36].mxu1 }
 0x908   : > { %v5382_v23 = vadd.f32 %v7099_v22, %v8492_v13  ;;  %v5373_v24 = vpop.f32.mrb[37].mxu1 }
 0x909   : > { %v5374_v25 = vadd.f32 %v8492_v13, %v5373_v24  ;;  %v7100_v26 = vpop.f32.mrb[38].mxu1 }
 0x90a   : > { %5522 = vst [vmem:[%s8496_s28 + $0x130] sm:$0xff] %v5382_v23  ;;  %v5385_v27 = vadd.f32 %v7100_v26, %v8492_v13  ;;  %v5376_v28 = vpop.f32.mrb[39].mxu1 }
 0x90b   : > { %5520 = vst [vmem:[%s8496_s28 + $0x120] sm:$0xff] %v5374_v25  ;;  %v5377_v29 = vadd.f32 %v8492_v13, %v5376_v28 }
 0x90c   : > { %5523 = vst [vmem:[%s8496_s28 + $0x138] sm:$0xff] %v5385_v27 }
 0x90d   : > { %5521 = vst [vmem:[%s8496_s28 + $0x128] sm:$0xff] %v5377_v29 }
 0x90f   : > { %v7103_v30 = vpop.f32.mrb[40].mxu1 }
 0x910   : > { %v5398_v31 = vadd.f32 %v7103_v30, %v8492_v13  ;;  %v5389_v32 = vpop.f32.mrb[41].mxu1 }
 0x911   : > { %v5390_v33 = vadd.f32 %v8492_v13, %v5389_v32  ;;  %v7104_v34 = vpop.f32.mrb[42].mxu1 }
 0x912   : > { %5526 = vst [vmem:[%s8496_s28 + $0x150] sm:$0xff] %v5398_v31  ;;  %v5401_v35 = vadd.f32 %v7104_v34, %v8492_v13  ;;  %v5392_v36 = vpop.f32.mrb[43].mxu1 }
 0x913   : > { %5524 = vst [vmem:[%s8496_s28 + $0x140] sm:$0xff] %v5390_v33  ;;  %v5393_v37 = vadd.f32 %v8492_v13, %v5392_v36 }
 0x914   : > { %5527 = vst [vmem:[%s8496_s28 + $0x158] sm:$0xff] %v5401_v35 }
 0x915   : > { %5525 = vst [vmem:[%s8496_s28 + $0x148] sm:$0xff] %v5393_v37 }
 0x917   : > { %v7107_v38 = vpop.f32.mrb[44].mxu1 }
 0x918   : > { %v5414_v39 = vadd.f32 %v7107_v38, %v8492_v13  ;;  %v5405_v40 = vpop.f32.mrb[45].mxu1 }
 0x919   : > { %v5406_v43 = vadd.f32 %v8492_v13, %v5405_v40  ;;  %v7108_v44 = vpop.f32.mrb[46].mxu1 }
 0x91a   : > { %5530 = vst [vmem:[%s8496_s28 + $0x170] sm:$0xff] %v5414_v39  ;;  %v5417_v45 = vadd.f32 %v7108_v44, %v8492_v13  ;;  %v5408_v63 = vpop.f32.mrb[47].mxu1 }
 0x91b   : > { %5528 = vst [vmem:[%s8496_s28 + $0x160] sm:$0xff] %v5406_v43  ;;  %v5409_v46 = vadd.f32 %v8492_v13, %v5408_v63 }
 0x91c   : > { %5531 = vst [vmem:[%s8496_s28 + $0x178] sm:$0xff] %v5417_v45 }
 0x91d   : > { %5529 = vst [vmem:[%s8496_s28 + $0x168] sm:$0xff] %v5409_v46 }
 0x91f   : > { %v7111_v47 = vpop.f32.mrb[48].mxu1 }
 0x920   : > { %v5430_v48 = vadd.f32 %v7111_v47, %v8492_v13  ;;  %v5421_v49 = vpop.f32.mrb[49].mxu1 }
 0x921   : > { %v5422_v50 = vadd.f32 %v8492_v13, %v5421_v49  ;;  %v7112_v51 = vpop.f32.mrb[50].mxu1 }
 0x922   : > { %5534 = vst [vmem:[%s8496_s28 + $0x190] sm:$0xff] %v5430_v48  ;;  %v5433_v52 = vadd.f32 %v7112_v51, %v8492_v13  ;;  %v5424_v53 = vpop.f32.mrb[51].mxu1 }
 0x923   : > { %5532 = vst [vmem:[%s8496_s28 + $0x180] sm:$0xff] %v5422_v50  ;;  %v5425_v54 = vadd.f32 %v8492_v13, %v5424_v53 }
 0x924   : > { %5535 = vst [vmem:[%s8496_s28 + $0x198] sm:$0xff] %v5433_v52 }
 0x925   : > { %5533 = vst [vmem:[%s8496_s28 + $0x188] sm:$0xff] %v5425_v54 }
 0x927   : > { %v7115_v55 = vpop.f32.mrb[52].mxu1 }
 0x928   : > { %v5446_v56 = vadd.f32 %v7115_v55, %v8492_v13  ;;  %v5437_v57 = vpop.f32.mrb[53].mxu1 }
 0x929   : > { %v5438_v58 = vadd.f32 %v8492_v13, %v5437_v57  ;;  %v7116_v59 = vpop.f32.mrb[54].mxu1 }
 0x92a   : > { %5538 = vst [vmem:[%s8496_s28 + $0x1b0] sm:$0xff] %v5446_v56  ;;  %v5449_v60 = vadd.f32 %v7116_v59, %v8492_v13  ;;  %v5440_v61 = vpop.f32.mrb[55].mxu1 }
 0x92b   : > { %5536 = vst [vmem:[%s8496_s28 + $0x1a0] sm:$0xff] %v5438_v58  ;;  %v5441_v62 = vadd.f32 %v8492_v13, %v5440_v61 }
 0x92c   : > { %5539 = vst [vmem:[%s8496_s28 + $0x1b8] sm:$0xff] %v5449_v60 }
 0x92d   : > { %5537 = vst [vmem:[%s8496_s28 + $0x1a8] sm:$0xff] %v5441_v62 }
 0x92f   : > { %v7119_v41 = vpop.f32.mrb[56].mxu1 }
 0x930   : > { %v5462_v0 = vadd.f32 %v7119_v41, %v8492_v13  ;;  %v5453_v1 = vpop.f32.mrb[57].mxu1 }
 0x931   : > { %v5454_v2 = vadd.f32 %v8492_v13, %v5453_v1  ;;  %v7120_v3 = vpop.f32.mrb[58].mxu1 }
 0x932   : > { %5542 = vst [vmem:[%s8496_s28 + $0x1d0] sm:$0xff] %v5462_v0  ;;  %v5465_v4 = vadd.f32 %v7120_v3, %v8492_v13  ;;  %v5456_v5 = vpop.f32.mrb[59].mxu1 }
 0x933   : > { %5540 = vst [vmem:[%s8496_s28 + $0x1c0] sm:$0xff] %v5454_v2  ;;  %v5457_v6 = vadd.f32 %v8492_v13, %v5456_v5 }
 0x934   : > { %5543 = vst [vmem:[%s8496_s28 + $0x1d8] sm:$0xff] %v5465_v4 }
 0x935   : > { %5541 = vst [vmem:[%s8496_s28 + $0x1c8] sm:$0xff] %v5457_v6 }
 0x937   : > { %v7123_v7 = vpop.f32.mrb[60].mxu1 }
 0x938   : > { %v5478_v8 = vadd.f32 %v7123_v7, %v8492_v13  ;;  %v5469_v9 = vpop.f32.mrb[61].mxu1 }
 0x939   : > { %v5470_v10 = vadd.f32 %v8492_v13, %v5469_v9  ;;  %v7124_v11 = vpop.f32.mrb[62].mxu1 }
 0x93a   : > { %5546 = vst [vmem:[%s8496_s28 + $0x1f0] sm:$0xff] %v5478_v8  ;;  %v5481_v12 = vadd.f32 %v7124_v11, %v8492_v13  ;;  %v5472_v14 = vpop.f32.mrb[63].mxu1 }
 0x93b   : > { %5544 = vst [vmem:[%s8496_s28 + $0x1e0] sm:$0xff] %v5470_v10  ;;  %v5473_v15 = vadd.f32 %v8492_v13, %v5472_v14 }
 0x93c   : > { %5547 = vst [vmem:[%s8496_s28 + $0x1f8] sm:$0xff] %v5481_v12 }
 0x93d   : > { %5545 = vst [vmem:[%s8496_s28 + $0x1e8] sm:$0xff] %v5473_v15 }
 0x93e   : > { %7223 = shalt.err (!%p7220_p3)
}
 0x93f   : > { %s7224_s24 = scalar_lea.hbm %s8625_s22, 8192  ;;  %s7228_s29 = scalar_lea.hbm %s8685_s9, 16384 }
 0x940   : > { %p7225_p4 = scmp.ne.s32.totalorder %s8625_s22, %s7224_s24  ;;  %p7229_p9 = scmp.lt.u32.totalorder %s8625_s22, %s8685_s9 }
 0x941   : > { %p7230_p10 = scmp.lt.u32.totalorder %s7228_s29, %s7224_s24  ;;  %p7232_p12 = scmp.lt.u32.totalorder %s7224_s24, %s8625_s22 }
 0x942   : > { %p7226_p7 = pnand %p7225_p4, %p7365_p5 }
 0x943   : > { %p7231_p11 = por %p7230_p10, %p7229_p9 }
 0x944   : > { %p7227_p8 = pneg %p7226_p7 }
 0x945   : > { %p7233_p13 = por %p7232_p12, %p7231_p11 }
 0x947   : > { %p7234_p0 = pnand %p7233_p13, %p7227_p8 }
 0x949   : > { %7237 = shalt.err (!%p7234_p0)
}
 0x94a   : > { %s7275_s16 = smov 128   ;;  %s7276_s23 = smov 8  }
 0x94b   : > { %7125 = dma.vmem_to_hbm [thread:$0]  (%p7365_p5), %s8627_s14, 8192, %s8625_s22, %s8635_s13, %s7275_s16, %s7275_s16, %s7276_s23  }
 0x94c PF: > { %p7131_p1 = scmp.ge.s32.totalorder %s7272_s12, 2  ;;  %s5577_s25 = sand.u32 1, %s7260_s30  }
 0x94d   : > { %s5578_s26 = scalar_lea.sflag [#allocation3], %s5577_s25 }
 0x94e   : > { %p7128_p2 = pnand %p7131_p1, %p7369_p6 }
 0x950   : > { %7255 = dma.done.wait (!%p7128_p2), %s5578_s26, 8192  }
 0x951   : > { %7257 = vsyncadd (!%p7128_p2), %s5578_s26, 4294959104  ;;  %p19_p3 = scmp.ge.s32.totalorder %s7352_s15, 4   ;;  %s8688_s30 = smov %s7264_s10 }
 0x952   : > { %s8689_s10 = smov %s7268_s11  ;;  %s8690_s11 = smov %s7363_s18 }
 0x953   : > { %s8691_s12 = smov %s7352_s15  ;;  %21 = sbr.rel (!%p19_p3) target bundleno = 3 (0x3), region = 103 }
 0x95a   :  { %5583 = vsyncpa [#allocation3], 1 }
 0x95b   :  { %5585 = vsyncpa [#allocation3 + $0x1], 1 }

</bundles_post_ra>
